<compile_context>
chip_gen: v5e
topology: v5e:2x2
jax: 0.10.0
libtpu: 0.0.40
codegen_flags: <defaults>
</compile_context>

<pallas_src>
import functools

import jax
import jax.numpy as jnp
from jax.experimental import pallas as pl
from jax.experimental.pallas import tpu as pltpu


# ----------------------------------------------------------------------------
# Fused CoFusion kernel (one grid step = one batch element)
# ----------------------------------------------------------------------------
def _cofusion_kernel(xs_ref, xf_ref, mask_ref,
                     w1_ref, b1_ref, g1_ref, be1_ref,
                     w2_ref, b2_ref, g2_ref, be2_ref,
                     w3_ref, b3_ref,
                     o_ref,
                     h_scr, y_scr, stage_scr,
                     *, offsets, M, Lpe, Tn, HW, groups, hidden, eps):
    num_tiles = Lpe // Tn
    Lbuf = Lpe + 2 * M
    gsize = hidden // groups
    inv_cnt = 1.0 / float(gsize * HW)

    # Zero ONLY the halo margins of the hidden-activation scratch (the
    # interior [M, M+Lpe) is fully rewritten by every GroupNorm stage).
    # Done unconditionally every step: under "parallel" megacore sharding
    # each core owns its own scratch and its own "first" iteration.
    zmargin = jnp.zeros((hidden, M), dtype=h_scr.dtype)
    h_scr[:, 0:M] = zmargin
    h_scr[:, M + Lpe:Lbuf] = zmargin

    mask = mask_ref[...]                      # (1, Lpe) f32; 1.0 at valid px

    def gn_relu_to_h(g_ref, be_ref):
        # Masked GroupNorm (centered two-pass) + affine + ReLU over y_scr;
        # result stored bf16 into h_scr[:, M:M+Lpe] with padding re-zeroed so
        # the next conv's shifted taps see correct zero padding.
        for g in range(groups):
            lo = g * gsize
            sl = y_scr[lo:lo + gsize, :]                        # (gsize, Lpe)
            s = jnp.sum(jnp.sum(sl * mask, axis=1, keepdims=True),
                        axis=0, keepdims=True)                  # (1, 1)
            mean = s * inv_cnt
            d = (sl - mean) * mask
            ss = jnp.sum(jnp.sum(d * d, axis=1, keepdims=True),
                         axis=0, keepdims=True)                 # (1, 1)
            inv = jax.lax.rsqrt(ss * inv_cnt + eps)
            z = jnp.maximum(d * inv * g_ref[lo:lo + gsize, :]
                            + be_ref[lo:lo + gsize, :], 0.0) * mask
            h_scr[lo:lo + gsize, M:M + Lpe] = z.astype(h_scr.dtype)

    def stage_taps(jt):
        # Stack the 9 shifted (hidden, Tn) slabs of the hidden activation
        # along the contraction axis -> (9*hidden, Tn) bf16, so each conv is
        # a single MXU dot with K = 9*hidden = 576.  Stores are lane-aligned
        # and sublane-aligned (row offsets are multiples of 64).
        base = M + jt * Tn
        for t, d in enumerate(offsets):
            src = h_scr[:, base + d:base + d + Tn]
            stage_scr[t * hidden:(t + 1) * hidden, :] = src

    # ---- conv1 (folded K = 9*in_ch; im2col stack built in the wrapper) ----
    for jt in range(num_tiles):
        lo = jt * Tn
        y_scr[:, lo:lo + Tn] = (
            jnp.dot(w1_ref[...], xs_ref[0, :, lo:lo + Tn],
                    preferred_element_type=jnp.float32) + b1_ref[...])
    gn_relu_to_h(g1_ref, be1_ref)

    # ---- conv2 (staged tap fold, K = 576) ----------------------------------
    for jt in range(num_tiles):
        stage_taps(jt)
        lo = jt * Tn
        y_scr[:, lo:lo + Tn] = (
            jnp.dot(w2_ref[...], stage_scr[...],
                    preferred_element_type=jnp.float32) + b2_ref[...])
    gn_relu_to_h(g2_ref, be2_ref)

    # ---- conv3 -> softmax over channels -> weighted sum with x, per tile ---
    for jt in range(num_tiles):
        stage_taps(jt)
        lo = jt * Tn
        logits = (jnp.dot(w3_ref[...], stage_scr[...],
                          preferred_element_type=jnp.float32)
                  + b3_ref[...])                         # (out_ch, Tn) f32
        m = jnp.max(logits, axis=0, keepdims=True)
        e = jnp.exp(logits - m)
        inv = pl.reciprocal(jnp.sum(e, axis=0, keepdims=True), approx=True)
        attn = e * inv
        x_t = xf_ref[0, :, lo:lo + Tn]                   # (in_ch, Tn) f32
        o_ref[0, :, lo:lo + Tn] = jnp.sum(
            x_t * attn, axis=0, keepdims=True).astype(o_ref.dtype)


# ----------------------------------------------------------------------------
# Wrapper
# ----------------------------------------------------------------------------
def _round_up(a, b):
    return ((a + b - 1) // b) * b


def cofusion_forward(x, params):
    """CoFusion forward.  x: (N, C, H, W); requires in_ch == out_ch."""
    (w1, b1, g1, be1, w2, b2, g2, be2, w3, b3) = params
    N, Cin, H, W = x.shape
    hidden = w1.shape[0]                   # 64
    out_ch = w3.shape[0]
    groups = 4
    assert Cin == out_ch, "CoFusion requires in_ch == out_ch"
    assert hidden % groups == 0 and (hidden // groups) % 16 == 0

    Hp, Wp = H + 2, W + 2
    Lp = Hp * Wp
    Tn = min(2048, _round_up(Lp, 128))     # lane-aligned spatial column tile
    Lpe = _round_up(Lp, Tn)                # flattened length (multiple of Tn)
    M = _round_up(Wp + 1, 128)             # lane-aligned halo margin
    Lbuf = Lpe + 2 * M
    offsets = tuple((kh - 1) * Wp + (kw - 1)
                    for kh in range(3) for kw in range(3))

    # Zero-pad spatially (conv padding=1) and flatten.
    xpad = jnp.pad(x, ((0, 0), (0, 0), (1, 1), (1, 1))).reshape(N, Cin, Lp)

    # conv1 operand: 9-tap im2col stack (tap-major, channel-minor), bf16.
    halo = Wp + 1
    xsh = jnp.pad(xpad, ((0, 0), (0, 0), (halo, halo + (Lpe - Lp))))
    xs = jnp.concatenate(
        [xsh[:, :, halo + d:halo + d + Lpe] for d in offsets],
        axis=1).astype(jnp.bfloat16)                       # (N, 9*Cin, Lpe)

    # Unshifted f32 copy of x for the final attention-weighted sum.
    xf = jnp.pad(xpad, ((0, 0), (0, 0), (0, Lpe - Lp))).astype(jnp.float32)

    # Validity mask over the flattened padded image (rows 1..H, cols 1..W).
    pos = jnp.arange(Lpe)
    rows, cols = pos // Wp, pos % Wp
    mask = ((rows >= 1) & (rows <= H) & (cols >= 1) & (cols <= W) &
            (pos < Lp)).astype(jnp.float32)[None, :]

    def flat_w(w):   # (Cout, Cin, 3, 3) -> (Cout, 9*Cin); col = t*Cin + ci
        return jnp.transpose(w, (0, 2, 3, 1)).reshape(
            w.shape[0], -1).astype(jnp.bfloat16)

    def col(v):      # (C,) -> (C, 1) f32 column for in-kernel broadcasting
        return v.reshape(-1, 1).astype(jnp.float32)

    kern = functools.partial(
        _cofusion_kernel, offsets=offsets, M=M, Lpe=Lpe, Tn=Tn, HW=H * W,
        groups=groups, hidden=hidden, eps=1e-5)

    # Explicit VMEM budget: double-buffered blocks + scratch, padded to
    # (sublane, 128-lane) tiles, with 2x headroom (capped at 100 MiB).
    def _pad(r, c, item, sub):
        return _round_up(r, sub) * _round_up(c, 128) * item
    est = (2 * _pad(9 * Cin, Lpe, 2, 16)            # xs (bf16, dbl-buffered)
           + 2 * _pad(Cin, Lpe, 4, 8)               # xf
           + 2 * _pad(1, Lpe, 4, 8)                 # mask
           + 2 * _pad(1, Lpe, 4, 8)                 # out
           + 2 * (_pad(hidden, 9 * Cin, 2, 16)      # weights / affine params
                  + _pad(hidden, 9 * hidden, 2, 16)
                  + _pad(out_ch, 9 * hidden, 2, 16)
                  + 8 * _pad(hidden, 1, 4, 8))
           + _pad(hidden, Lbuf, 2, 16)              # h_scr
           + _pad(hidden, Lpe, 4, 8)                # y_scr
           + _pad(9 * hidden, Tn, 2, 16))           # stage_scr
    vmem_limit = int(min(100 * 2**20, max(32 * 2**20, 2 * est)))

    out = pl.pallas_call(
        kern,
        out_shape=jax.ShapeDtypeStruct((N, 1, Lpe), jnp.float32),
        grid_spec=pltpu.PrefetchScalarGridSpec(
            num_scalar_prefetch=0,
            grid=(N,),
            in_specs=[
                pl.BlockSpec((1, 9 * Cin, Lpe), lambda n: (n, 0, 0)),   # xs
                pl.BlockSpec((1, Cin, Lpe), lambda n: (n, 0, 0)),       # xf
                pl.BlockSpec((1, Lpe), lambda n: (0, 0)),               # mask
                pl.BlockSpec((hidden, 9 * Cin), lambda n: (0, 0)),      # w1
                pl.BlockSpec((hidden, 1), lambda n: (0, 0)),            # b1
                pl.BlockSpec((hidden, 1), lambda n: (0, 0)),            # g1
                pl.BlockSpec((hidden, 1), lambda n: (0, 0)),            # be1
                pl.BlockSpec((hidden, 9 * hidden), lambda n: (0, 0)),   # w2
                pl.BlockSpec((hidden, 1), lambda n: (0, 0)),            # b2
                pl.BlockSpec((hidden, 1), lambda n: (0, 0)),            # g2
                pl.BlockSpec((hidden, 1), lambda n: (0, 0)),            # be2
                pl.BlockSpec((out_ch, 9 * hidden), lambda n: (0, 0)),   # w3
                pl.BlockSpec((out_ch, 1), lambda n: (0, 0)),            # b3
            ],
            out_specs=pl.BlockSpec((1, 1, Lpe), lambda n: (n, 0, 0)),
            scratch_shapes=[
                pltpu.VMEM((hidden, Lbuf), jnp.bfloat16),    # h_scr
                pltpu.VMEM((hidden, Lpe), jnp.float32),      # y_scr (pre-GN)
                pltpu.VMEM((9 * hidden, Tn), jnp.bfloat16),  # stage (K-fold)
            ],
        ),
        compiler_params=pltpu.CompilerParams(
            dimension_semantics=("parallel",),
            vmem_limit_bytes=vmem_limit),
    )(xs, xf, mask,
      flat_w(w1), col(b1), col(g1), col(be1),
      flat_w(w2), col(b2), col(g2), col(be2),
      flat_w(w3), col(b3))

    y = out[:, 0, :Lp].reshape(N, Hp, Wp)[:, 1:H + 1, 1:W + 1]
    return y[:, None, :, :]                       # (N, 1, H, W)


# ----------------------------------------------------------------------------
# Parameters + pure-JAX references (XLA) for verification
# ----------------------------------------------------------------------------
def make_cofusion_params(key, in_ch, out_ch, hidden=64):
    ks = jax.random.split(key, 11)
    w1 = 0.2 * jax.random.normal(ks[0], (hidden, in_ch, 3, 3), jnp.float32)
    b1 = 0.1 * jax.random.normal(ks[1], (hidden,), jnp.float32)
    g1 = 1.0 + 0.1 * jax.random.normal(ks[2], (hidden,), jnp.float32)
    be1 = 0.1 * jax.random.normal(ks[3], (hidden,), jnp.float32)
    w2 = 0.05 * jax.random.normal(ks[4], (hidden, hidden, 3, 3), jnp.float32)
    b2 = 0.1 * jax.random.normal(ks[5], (hidden,), jnp.float32)
    g2 = 1.0 + 0.1 * jax.random.normal(ks[6], (hidden,), jnp.float32)
    be2 = 0.1 * jax.random.normal(ks[7], (hidden,), jnp.float32)
    w3 = 0.05 * jax.random.normal(ks[8], (out_ch, hidden, 3, 3), jnp.float32)
    b3 = 0.1 * jax.random.normal(ks[9], (out_ch,), jnp.float32)
    return (w1, b1, g1, be1, w2, b2, g2, be2, w3, b3)


def _ref_cofusion_f32(x, params):
    (w1, b1, g1, be1, w2, b2, g2, be2, w3, b3) = params

    def conv(a, w, b):
        y = jax.lax.conv_general_dilated(
            a, w, (1, 1), ((1, 1), (1, 1)),
            dimension_numbers=('NCHW', 'OIHW', 'NCHW'),
            precision=jax.lax.Precision.HIGHEST)
        return y + b[None, :, None, None]

    def gn(a, gamma, beta, groups=4, eps=1e-5):
        N, C, H, W = a.shape
        ag = a.reshape(N, groups, C // groups, H, W)
        mean = ag.mean(axis=(2, 3, 4), keepdims=True)
        var = ag.var(axis=(2, 3, 4), keepdims=True)
        an = ((ag - mean) / jnp.sqrt(var + eps)).reshape(N, C, H, W)
        return an * gamma[None, :, None, None] + beta[None, :, None, None]

    a = jax.nn.relu(gn(conv(x, w1, b1), g1, be1))
    a = jax.nn.relu(gn(conv(a, w2, b2), g2, be2))
    a = jax.nn.softmax(conv(a, w3, b3), axis=1)
    return (x * a).sum(axis=1, keepdims=True)


def _ref_cofusion_bf16(x, params):
    # Same dtype policy as the kernel: bf16 matmul operands / f32 accumulate,
    # GroupNorm stats + softmax + weighted sum in f32, bf16-rounded hidden
    # activations between layers.
    (w1, b1, g1, be1, w2, b2, g2, be2, w3, b3) = params
    bf = jnp.bfloat16

    def conv(a, w, b):
        y = jax.lax.conv_general_dilated(
            a.astype(bf), w.astype(bf), (1, 1), ((1, 1), (1, 1)),
            dimension_numbers=('NCHW', 'OIHW', 'NCHW'),
            preferred_element_type=jnp.float32)
        return y + b[None, :, None, None]

    def gn(a, gamma, beta, groups=4, eps=1e-5):
        N, C, H, W = a.shape
        ag = a.reshape(N, groups, C // groups, H, W)
        mean = ag.mean(axis=(2, 3, 4), keepdims=True)
        var = ((ag - mean) ** 2).mean(axis=(2, 3, 4), keepdims=True)
        an = ((ag - mean) * jax.lax.rsqrt(var + eps)).reshape(N, C, H, W)
        return an * gamma[None, :, None, None] + beta[None, :, None, None]

    a = jax.nn.relu(gn(conv(x, w1, b1), g1, be1)).astype(bf)
    a = jax.nn.relu(gn(conv(a, w2, b2), g2, be2)).astype(bf)
    attn = jax.nn.softmax(conv(a, w3, b3), axis=1)
    return (x * attn).sum(axis=1, keepdims=True)


if __name__ == "__main__":
    key = jax.random.PRNGKey(0)
    N, C, H, W = 2, 4, 16, 16          # in_ch == out_ch == 4 (DexiNed usage)

    key, kx, kp = jax.random.split(key, 3)
    x = jax.random.normal(kx, (N, C, H, W), jnp.float32)
    params = make_cofusion_params(kp, in_ch=C, out_ch=C)

    fwd = jax.jit(cofusion_forward)
    y = jax.block_until_ready(fwd(x, params))
    assert y.shape == (N, 1, H, W), y.shape

    # Primary correctness check: precision-matched (bf16-matmul) reference.
    y_bf = _ref_cofusion_bf16(x, params)
    # Sanity check: full-f32 reference (loose tolerance reflects bf16 MXU
    # operands; kernel-level bugs would show up orders of magnitude larger).
    y_f32 = _ref_cofusion_f32(x, params)

    err_bf = float(jnp.max(jnp.abs(y - y_bf)))
    err_f32 = float(jnp.max(jnp.abs(y - y_f32)))
    assert jnp.allclose(y, y_bf, rtol=5e-3, atol=5e-3), (err_bf, err_f32)
    assert jnp.allclose(y, y_f32, rtol=1e-1, atol=1e-1), (err_bf, err_f32)

    print("KERNEL_OK")
</pallas_src>

<mosaic_0001>
module attributes {stable_mosaic.version = 11 : i64} {
  func.func @_cofusion_kernel(%arg0: i32, %arg1: memref<1x36x384xbf16, #tpu.memory_space<vmem>>, %arg2: memref<1x4x384xf32, #tpu.memory_space<vmem>>, %arg3: memref<1x384xf32, #tpu.memory_space<vmem>>, %arg4: memref<64x36xbf16, #tpu.memory_space<vmem>>, %arg5: memref<64x1xf32, #tpu.memory_space<vmem>>, %arg6: memref<64x1xf32, #tpu.memory_space<vmem>>, %arg7: memref<64x1xf32, #tpu.memory_space<vmem>>, %arg8: memref<64x576xbf16, #tpu.memory_space<vmem>>, %arg9: memref<64x1xf32, #tpu.memory_space<vmem>>, %arg10: memref<64x1xf32, #tpu.memory_space<vmem>>, %arg11: memref<64x1xf32, #tpu.memory_space<vmem>>, %arg12: memref<4x576xbf16, #tpu.memory_space<vmem>>, %arg13: memref<4x1xf32, #tpu.memory_space<vmem>>, %arg14: memref<1x1x384xf32, #tpu.memory_space<vmem>>, %arg15: memref<64x640xbf16, #tpu.memory_space<vmem>>, %arg16: memref<64x384xf32, #tpu.memory_space<vmem>>, %arg17: memref<576x384xbf16, #tpu.memory_space<vmem>>) attributes {dimension_semantics = [#tpu.dimension_semantics<parallel>], iteration_bounds = array<i64: 2>, scalar_prefetch = 0 : i64, scratch_operands = 3 : i64, tpu.core_type = #tpu.core_type<tc>, window_params = [{transform_indices = @transform_0, window_bounds = array<i64: 1, 36, 384>}, {transform_indices = @transform_1, window_bounds = array<i64: 1, 4, 384>}, {pipeline_mode = #tpu.pipeline_mode<synchronous>, transform_indices = @transform_2, window_bounds = array<i64: 1, 384>}, {pipeline_mode = #tpu.pipeline_mode<synchronous>, transform_indices = @transform_3, window_bounds = array<i64: 64, 36>}, {pipeline_mode = #tpu.pipeline_mode<synchronous>, transform_indices = @transform_4, window_bounds = array<i64: 64, 1>}, {pipeline_mode = #tpu.pipeline_mode<synchronous>, transform_indices = @transform_5, window_bounds = array<i64: 64, 1>}, {pipeline_mode = #tpu.pipeline_mode<synchronous>, transform_indices = @transform_6, window_bounds = array<i64: 64, 1>}, {pipeline_mode = #tpu.pipeline_mode<synchronous>, transform_indices = @transform_7, window_bounds = array<i64: 64, 576>}, {pipeline_mode = #tpu.pipeline_mode<synchronous>, transform_indices = @transform_8, window_bounds = array<i64: 64, 1>}, {pipeline_mode = #tpu.pipeline_mode<synchronous>, transform_indices = @transform_9, window_bounds = array<i64: 64, 1>}, {pipeline_mode = #tpu.pipeline_mode<synchronous>, transform_indices = @transform_10, window_bounds = array<i64: 64, 1>}, {pipeline_mode = #tpu.pipeline_mode<synchronous>, transform_indices = @transform_11, window_bounds = array<i64: 4, 576>}, {pipeline_mode = #tpu.pipeline_mode<synchronous>, transform_indices = @transform_12, window_bounds = array<i64: 4, 1>}, {transform_indices = @transform_13, window_bounds = array<i64: 1, 1, 384>}]} {
    %cst = arith.constant 0.000000e+00 : bf16
    %0 = vector.broadcast %cst : bf16 to vector<64x128xbf16>
    %c0 = arith.constant 0 : index
    %c0_0 = arith.constant 0 : index
    %1 = vector.load %arg15[%c0, %c0_0] : memref<64x640xbf16, #tpu.memory_space<vmem>>, vector<64x128xbf16>
    tpu.vector_store %arg15[%c0, %c0_0], %0 {strides = array<i32>} : memref<64x640xbf16, #tpu.memory_space<vmem>>, vector<64x128xbf16>,
    %c0_1 = arith.constant 0 : index
    %c512 = arith.constant 512 : index
    %2 = vector.load %arg15[%c0_1, %c512] : memref<64x640xbf16, #tpu.memory_space<vmem>>, vector<64x128xbf16>
    tpu.vector_store %arg15[%c0_1, %c512], %0 {strides = array<i32>} : memref<64x640xbf16, #tpu.memory_space<vmem>>, vector<64x128xbf16>,
    %c0_2 = arith.constant 0 : index
    %c0_3 = arith.constant 0 : index
    %3 = vector.load %arg3[%c0_2, %c0_3] : memref<1x384xf32, #tpu.memory_space<vmem>>, vector<1x384xf32>
    %c0_4 = arith.constant 0 : index
    %c0_5 = arith.constant 0 : index
    %4 = vector.load %arg4[%c0_4, %c0_5] : memref<64x36xbf16, #tpu.memory_space<vmem>>, vector<64x36xbf16>
    %c0_6 = arith.constant 0 : index
    %c0_7 = arith.constant 0 : index
    %c0_8 = arith.constant 0 : index
    %5 = vector.load %arg1[%c0_6, %c0_7, %c0_8] : memref<1x36x384xbf16, #tpu.memory_space<vmem>>, vector<1x36x384xbf16>
    %6 = vector.shape_cast %5 : vector<1x36x384xbf16> to vector<36x384xbf16>
    %cst_9 = arith.constant dense<0.000000e+00> : vector<64x384xf32>
    %7 = tpu.matmul %4, %6, %cst_9 {dimension_numbers = #tpu.dot_dimension_numbers<[1], [0], [0], [1], [0, 0, 1, 1], [], []>} : vector<64x36xbf16>, vector<36x384xbf16>, vector<64x384xf32> -> vector<64x384xf32>
    %c0_10 = arith.constant 0 : index
    %c0_11 = arith.constant 0 : index
    %8 = vector.load %arg5[%c0_10, %c0_11] : memref<64x1xf32, #tpu.memory_space<vmem>>, vector<64x1xf32>
    %9 = vector.broadcast %8 : vector<64x1xf32> to vector<64x384xf32>
    %10 = arith.addf %7, %9 : vector<64x384xf32>
    %c0_12 = arith.constant 0 : index
    %c0_13 = arith.constant 0 : index
    %11 = vector.load %arg16[%c0_12, %c0_13] : memref<64x384xf32, #tpu.memory_space<vmem>>, vector<64x384xf32>
    tpu.vector_store %arg16[%c0_12, %c0_13], %10 {strides = array<i32>} : memref<64x384xf32, #tpu.memory_space<vmem>>, vector<64x384xf32>,
    %c0_14 = arith.constant 0 : index
    %c0_15 = arith.constant 0 : index
    %12 = vector.load %arg16[%c0_14, %c0_15] : memref<64x384xf32, #tpu.memory_space<vmem>>, vector<16x384xf32>
    %13 = vector.broadcast %3 : vector<1x384xf32> to vector<16x384xf32>
    %14 = arith.mulf %12, %13 : vector<16x384xf32>
    %cst_16 = arith.constant dense<0.000000e+00> : vector<16xf32>
    %15 = vector.multi_reduction <add>, %14, %cst_16 [1] : vector<16x384xf32> to vector<16xf32>
    %16 = vector.shape_cast %15 : vector<16xf32> to vector<16x1xf32>
    %cst_17 = arith.constant dense<0.000000e+00> : vector<1xf32>
    %17 = vector.multi_reduction <add>, %16, %cst_17 [0] : vector<16x1xf32> to vector<1xf32>
    %18 = vector.shape_cast %17 : vector<1xf32> to vector<1x1xf32>
    %cst_18 = arith.constant 2.44140625E-4 : f32
    %19 = vector.broadcast %cst_18 : f32 to vector<1x1xf32>
    %20 = arith.mulf %18, %19 : vector<1x1xf32>
    %21 = vector.broadcast %20 : vector<1x1xf32> to vector<16x384xf32>
    %22 = arith.subf %12, %21 : vector<16x384xf32>
    %23 = vector.broadcast %3 : vector<1x384xf32> to vector<16x384xf32>
    %24 = arith.mulf %22, %23 : vector<16x384xf32>
    %25 = arith.mulf %24, %24 : vector<16x384xf32>
    %cst_19 = arith.constant dense<0.000000e+00> : vector<16xf32>
    %26 = vector.multi_reduction <add>, %25, %cst_19 [1] : vector<16x384xf32> to vector<16xf32>
    %27 = vector.shape_cast %26 : vector<16xf32> to vector<16x1xf32>
    %cst_20 = arith.constant dense<0.000000e+00> : vector<1xf32>
    %28 = vector.multi_reduction <add>, %27, %cst_20 [0] : vector<16x1xf32> to vector<1xf32>
    %29 = vector.shape_cast %28 : vector<1xf32> to vector<1x1xf32>
    %cst_21 = arith.constant 2.44140625E-4 : f32
    %30 = vector.broadcast %cst_21 : f32 to vector<1x1xf32>
    %31 = arith.mulf %29, %30 : vector<1x1xf32>
    %cst_22 = arith.constant 9.99999974E-6 : f32
    %32 = vector.broadcast %cst_22 : f32 to vector<1x1xf32>
    %33 = arith.addf %31, %32 : vector<1x1xf32>
    %34 = math.rsqrt %33 : vector<1x1xf32>
    %35 = vector.broadcast %34 : vector<1x1xf32> to vector<16x384xf32>
    %36 = arith.mulf %24, %35 : vector<16x384xf32>
    %c0_23 = arith.constant 0 : index
    %c0_24 = arith.constant 0 : index
    %37 = vector.load %arg6[%c0_23, %c0_24] : memref<64x1xf32, #tpu.memory_space<vmem>>, vector<16x1xf32>
    %38 = vector.broadcast %37 : vector<16x1xf32> to vector<16x384xf32>
    %39 = arith.mulf %36, %38 : vector<16x384xf32>
    %c0_25 = arith.constant 0 : index
    %c0_26 = arith.constant 0 : index
    %40 = vector.load %arg7[%c0_25, %c0_26] : memref<64x1xf32, #tpu.memory_space<vmem>>, vector<16x1xf32>
    %41 = vector.broadcast %40 : vector<16x1xf32> to vector<16x384xf32>
    %42 = arith.addf %39, %41 : vector<16x384xf32>
    %cst_27 = arith.constant 0.000000e+00 : f32
    %43 = vector.broadcast %cst_27 : f32 to vector<16x384xf32>
    %44 = arith.maximumf %42, %43 : vector<16x384xf32>
    %45 = vector.broadcast %3 : vector<1x384xf32> to vector<16x384xf32>
    %46 = arith.mulf %44, %45 : vector<16x384xf32>
    %47 = arith.truncf %46 : vector<16x384xf32> to vector<16x384xbf16>
    %c0_28 = arith.constant 0 : index
    %c128 = arith.constant 128 : index
    %48 = vector.load %arg15[%c0_28, %c128] : memref<64x640xbf16, #tpu.memory_space<vmem>>, vector<16x384xbf16>
    tpu.vector_store %arg15[%c0_28, %c128], %47 {strides = array<i32>} : memref<64x640xbf16, #tpu.memory_space<vmem>>, vector<16x384xbf16>,
    %c16 = arith.constant 16 : index
    %c0_29 = arith.constant 0 : index
    %49 = vector.load %arg16[%c16, %c0_29] : memref<64x384xf32, #tpu.memory_space<vmem>>, vector<16x384xf32>
    %50 = vector.broadcast %3 : vector<1x384xf32> to vector<16x384xf32>
    %51 = arith.mulf %49, %50 : vector<16x384xf32>
    %cst_30 = arith.constant dense<0.000000e+00> : vector<16xf32>
    %52 = vector.multi_reduction <add>, %51, %cst_30 [1] : vector<16x384xf32> to vector<16xf32>
    %53 = vector.shape_cast %52 : vector<16xf32> to vector<16x1xf32>
    %cst_31 = arith.constant dense<0.000000e+00> : vector<1xf32>
    %54 = vector.multi_reduction <add>, %53, %cst_31 [0] : vector<16x1xf32> to vector<1xf32>
    %55 = vector.shape_cast %54 : vector<1xf32> to vector<1x1xf32>
    %cst_32 = arith.constant 2.44140625E-4 : f32
    %56 = vector.broadcast %cst_32 : f32 to vector<1x1xf32>
    %57 = arith.mulf %55, %56 : vector<1x1xf32>
    %58 = vector.broadcast %57 : vector<1x1xf32> to vector<16x384xf32>
    %59 = arith.subf %49, %58 : vector<16x384xf32>
    %60 = vector.broadcast %3 : vector<1x384xf32> to vector<16x384xf32>
    %61 = arith.mulf %59, %60 : vector<16x384xf32>
    %62 = arith.mulf %61, %61 : vector<16x384xf32>
    %cst_33 = arith.constant dense<0.000000e+00> : vector<16xf32>
    %63 = vector.multi_reduction <add>, %62, %cst_33 [1] : vector<16x384xf32> to vector<16xf32>
    %64 = vector.shape_cast %63 : vector<16xf32> to vector<16x1xf32>
    %cst_34 = arith.constant dense<0.000000e+00> : vector<1xf32>
    %65 = vector.multi_reduction <add>, %64, %cst_34 [0] : vector<16x1xf32> to vector<1xf32>
    %66 = vector.shape_cast %65 : vector<1xf32> to vector<1x1xf32>
    %cst_35 = arith.constant 2.44140625E-4 : f32
    %67 = vector.broadcast %cst_35 : f32 to vector<1x1xf32>
    %68 = arith.mulf %66, %67 : vector<1x1xf32>
    %cst_36 = arith.constant 9.99999974E-6 : f32
    %69 = vector.broadcast %cst_36 : f32 to vector<1x1xf32>
    %70 = arith.addf %68, %69 : vector<1x1xf32>
    %71 = math.rsqrt %70 : vector<1x1xf32>
    %72 = vector.broadcast %71 : vector<1x1xf32> to vector<16x384xf32>
    %73 = arith.mulf %61, %72 : vector<16x384xf32>
    %c16_37 = arith.constant 16 : index
    %c0_38 = arith.constant 0 : index
    %74 = vector.load %arg6[%c16_37, %c0_38] : memref<64x1xf32, #tpu.memory_space<vmem>>, vector<16x1xf32>
    %75 = vector.broadcast %74 : vector<16x1xf32> to vector<16x384xf32>
    %76 = arith.mulf %73, %75 : vector<16x384xf32>
    %c16_39 = arith.constant 16 : index
    %c0_40 = arith.constant 0 : index
    %77 = vector.load %arg7[%c16_39, %c0_40] : memref<64x1xf32, #tpu.memory_space<vmem>>, vector<16x1xf32>
    %78 = vector.broadcast %77 : vector<16x1xf32> to vector<16x384xf32>
    %79 = arith.addf %76, %78 : vector<16x384xf32>
    %cst_41 = arith.constant 0.000000e+00 : f32
    %80 = vector.broadcast %cst_41 : f32 to vector<16x384xf32>
    %81 = arith.maximumf %79, %80 : vector<16x384xf32>
    %82 = vector.broadcast %3 : vector<1x384xf32> to vector<16x384xf32>
    %83 = arith.mulf %81, %82 : vector<16x384xf32>
    %84 = arith.truncf %83 : vector<16x384xf32> to vector<16x384xbf16>
    %c16_42 = arith.constant 16 : index
    %c128_43 = arith.constant 128 : index
    %85 = vector.load %arg15[%c16_42, %c128_43] : memref<64x640xbf16, #tpu.memory_space<vmem>>, vector<16x384xbf16>
    tpu.vector_store %arg15[%c16_42, %c128_43], %84 {strides = array<i32>} : memref<64x640xbf16, #tpu.memory_space<vmem>>, vector<16x384xbf16>,
    %c32 = arith.constant 32 : index
    %c0_44 = arith.constant 0 : index
    %86 = vector.load %arg16[%c32, %c0_44] : memref<64x384xf32, #tpu.memory_space<vmem>>, vector<16x384xf32>
    %87 = vector.broadcast %3 : vector<1x384xf32> to vector<16x384xf32>
    %88 = arith.mulf %86, %87 : vector<16x384xf32>
    %cst_45 = arith.constant dense<0.000000e+00> : vector<16xf32>
    %89 = vector.multi_reduction <add>, %88, %cst_45 [1] : vector<16x384xf32> to vector<16xf32>
    %90 = vector.shape_cast %89 : vector<16xf32> to vector<16x1xf32>
    %cst_46 = arith.constant dense<0.000000e+00> : vector<1xf32>
    %91 = vector.multi_reduction <add>, %90, %cst_46 [0] : vector<16x1xf32> to vector<1xf32>
    %92 = vector.shape_cast %91 : vector<1xf32> to vector<1x1xf32>
    %cst_47 = arith.constant 2.44140625E-4 : f32
    %93 = vector.broadcast %cst_47 : f32 to vector<1x1xf32>
    %94 = arith.mulf %92, %93 : vector<1x1xf32>
    %95 = vector.broadcast %94 : vector<1x1xf32> to vector<16x384xf32>
    %96 = arith.subf %86, %95 : vector<16x384xf32>
    %97 = vector.broadcast %3 : vector<1x384xf32> to vector<16x384xf32>
    %98 = arith.mulf %96, %97 : vector<16x384xf32>
    %99 = arith.mulf %98, %98 : vector<16x384xf32>
    %cst_48 = arith.constant dense<0.000000e+00> : vector<16xf32>
    %100 = vector.multi_reduction <add>, %99, %cst_48 [1] : vector<16x384xf32> to vector<16xf32>
    %101 = vector.shape_cast %100 : vector<16xf32> to vector<16x1xf32>
    %cst_49 = arith.constant dense<0.000000e+00> : vector<1xf32>
    %102 = vector.multi_reduction <add>, %101, %cst_49 [0] : vector<16x1xf32> to vector<1xf32>
    %103 = vector.shape_cast %102 : vector<1xf32> to vector<1x1xf32>
    %cst_50 = arith.constant 2.44140625E-4 : f32
    %104 = vector.broadcast %cst_50 : f32 to vector<1x1xf32>
    %105 = arith.mulf %103, %104 : vector<1x1xf32>
    %cst_51 = arith.constant 9.99999974E-6 : f32
    %106 = vector.broadcast %cst_51 : f32 to vector<1x1xf32>
    %107 = arith.addf %105, %106 : vector<1x1xf32>
    %108 = math.rsqrt %107 : vector<1x1xf32>
    %109 = vector.broadcast %108 : vector<1x1xf32> to vector<16x384xf32>
    %110 = arith.mulf %98, %109 : vector<16x384xf32>
    %c32_52 = arith.constant 32 : index
    %c0_53 = arith.constant 0 : index
    %111 = vector.load %arg6[%c32_52, %c0_53] : memref<64x1xf32, #tpu.memory_space<vmem>>, vector<16x1xf32>
    %112 = vector.broadcast %111 : vector<16x1xf32> to vector<16x384xf32>
    %113 = arith.mulf %110, %112 : vector<16x384xf32>
    %c32_54 = arith.constant 32 : index
    %c0_55 = arith.constant 0 : index
    %114 = vector.load %arg7[%c32_54, %c0_55] : memref<64x1xf32, #tpu.memory_space<vmem>>, vector<16x1xf32>
    %115 = vector.broadcast %114 : vector<16x1xf32> to vector<16x384xf32>
    %116 = arith.addf %113, %115 : vector<16x384xf32>
    %cst_56 = arith.constant 0.000000e+00 : f32
    %117 = vector.broadcast %cst_56 : f32 to vector<16x384xf32>
    %118 = arith.maximumf %116, %117 : vector<16x384xf32>
    %119 = vector.broadcast %3 : vector<1x384xf32> to vector<16x384xf32>
    %120 = arith.mulf %118, %119 : vector<16x384xf32>
    %121 = arith.truncf %120 : vector<16x384xf32> to vector<16x384xbf16>
    %c32_57 = arith.constant 32 : index
    %c128_58 = arith.constant 128 : index
    %122 = vector.load %arg15[%c32_57, %c128_58] : memref<64x640xbf16, #tpu.memory_space<vmem>>, vector<16x384xbf16>
    tpu.vector_store %arg15[%c32_57, %c128_58], %121 {strides = array<i32>} : memref<64x640xbf16, #tpu.memory_space<vmem>>, vector<16x384xbf16>,
    %c48 = arith.constant 48 : index
    %c0_59 = arith.constant 0 : index
    %123 = vector.load %arg16[%c48, %c0_59] : memref<64x384xf32, #tpu.memory_space<vmem>>, vector<16x384xf32>
    %124 = vector.broadcast %3 : vector<1x384xf32> to vector<16x384xf32>
    %125 = arith.mulf %123, %124 : vector<16x384xf32>
    %cst_60 = arith.constant dense<0.000000e+00> : vector<16xf32>
    %126 = vector.multi_reduction <add>, %125, %cst_60 [1] : vector<16x384xf32> to vector<16xf32>
    %127 = vector.shape_cast %126 : vector<16xf32> to vector<16x1xf32>
    %cst_61 = arith.constant dense<0.000000e+00> : vector<1xf32>
    %128 = vector.multi_reduction <add>, %127, %cst_61 [0] : vector<16x1xf32> to vector<1xf32>
    %129 = vector.shape_cast %128 : vector<1xf32> to vector<1x1xf32>
    %cst_62 = arith.constant 2.44140625E-4 : f32
    %130 = vector.broadcast %cst_62 : f32 to vector<1x1xf32>
    %131 = arith.mulf %129, %130 : vector<1x1xf32>
    %132 = vector.broadcast %131 : vector<1x1xf32> to vector<16x384xf32>
    %133 = arith.subf %123, %132 : vector<16x384xf32>
    %134 = vector.broadcast %3 : vector<1x384xf32> to vector<16x384xf32>
    %135 = arith.mulf %133, %134 : vector<16x384xf32>
    %136 = arith.mulf %135, %135 : vector<16x384xf32>
    %cst_63 = arith.constant dense<0.000000e+00> : vector<16xf32>
    %137 = vector.multi_reduction <add>, %136, %cst_63 [1] : vector<16x384xf32> to vector<16xf32>
    %138 = vector.shape_cast %137 : vector<16xf32> to vector<16x1xf32>
    %cst_64 = arith.constant dense<0.000000e+00> : vector<1xf32>
    %139 = vector.multi_reduction <add>, %138, %cst_64 [0] : vector<16x1xf32> to vector<1xf32>
    %140 = vector.shape_cast %139 : vector<1xf32> to vector<1x1xf32>
    %cst_65 = arith.constant 2.44140625E-4 : f32
    %141 = vector.broadcast %cst_65 : f32 to vector<1x1xf32>
    %142 = arith.mulf %140, %141 : vector<1x1xf32>
    %cst_66 = arith.constant 9.99999974E-6 : f32
    %143 = vector.broadcast %cst_66 : f32 to vector<1x1xf32>
    %144 = arith.addf %142, %143 : vector<1x1xf32>
    %145 = math.rsqrt %144 : vector<1x1xf32>
    %146 = vector.broadcast %145 : vector<1x1xf32> to vector<16x384xf32>
    %147 = arith.mulf %135, %146 : vector<16x384xf32>
    %c48_67 = arith.constant 48 : index
    %c0_68 = arith.constant 0 : index
    %148 = vector.load %arg6[%c48_67, %c0_68] : memref<64x1xf32, #tpu.memory_space<vmem>>, vector<16x1xf32>
    %149 = vector.broadcast %148 : vector<16x1xf32> to vector<16x384xf32>
    %150 = arith.mulf %147, %149 : vector<16x384xf32>
    %c48_69 = arith.constant 48 : index
    %c0_70 = arith.constant 0 : index
    %151 = vector.load %arg7[%c48_69, %c0_70] : memref<64x1xf32, #tpu.memory_space<vmem>>, vector<16x1xf32>
    %152 = vector.broadcast %151 : vector<16x1xf32> to vector<16x384xf32>
    %153 = arith.addf %150, %152 : vector<16x384xf32>
    %cst_71 = arith.constant 0.000000e+00 : f32
    %154 = vector.broadcast %cst_71 : f32 to vector<16x384xf32>
    %155 = arith.maximumf %153, %154 : vector<16x384xf32>
    %156 = vector.broadcast %3 : vector<1x384xf32> to vector<16x384xf32>
    %157 = arith.mulf %155, %156 : vector<16x384xf32>
    %158 = arith.truncf %157 : vector<16x384xf32> to vector<16x384xbf16>
    %c48_72 = arith.constant 48 : index
    %c128_73 = arith.constant 128 : index
    %159 = vector.load %arg15[%c48_72, %c128_73] : memref<64x640xbf16, #tpu.memory_space<vmem>>, vector<16x384xbf16>
    tpu.vector_store %arg15[%c48_72, %c128_73], %158 {strides = array<i32>} : memref<64x640xbf16, #tpu.memory_space<vmem>>, vector<16x384xbf16>,
    %c0_74 = arith.constant 0 : index
    %c109 = arith.constant 109 : index
    %160 = vector.load %arg15[%c0_74, %c109] : memref<64x640xbf16, #tpu.memory_space<vmem>>, vector<64x384xbf16>
    %c0_75 = arith.constant 0 : index
    %c0_76 = arith.constant 0 : index
    %161 = vector.load %arg17[%c0_75, %c0_76] : memref<576x384xbf16, #tpu.memory_space<vmem>>, vector<64x384xbf16>
    tpu.vector_store %arg17[%c0_75, %c0_76], %160 {strides = array<i32>} : memref<576x384xbf16, #tpu.memory_space<vmem>>, vector<64x384xbf16>,
    %c0_77 = arith.constant 0 : index
    %c110 = arith.constant 110 : index
    %162 = vector.load %arg15[%c0_77, %c110] : memref<64x640xbf16, #tpu.memory_space<vmem>>, vector<64x384xbf16>
    %c64 = arith.constant 64 : index
    %c0_78 = arith.constant 0 : index
    %163 = vector.load %arg17[%c64, %c0_78] : memref<576x384xbf16, #tpu.memory_space<vmem>>, vector<64x384xbf16>
    tpu.vector_store %arg17[%c64, %c0_78], %162 {strides = array<i32>} : memref<576x384xbf16, #tpu.memory_space<vmem>>, vector<64x384xbf16>,
    %c0_79 = arith.constant 0 : index
    %c111 = arith.constant 111 : index
    %164 = vector.load %arg15[%c0_79, %c111] : memref<64x640xbf16, #tpu.memory_space<vmem>>, vector<64x384xbf16>
    %c128_80 = arith.constant 128 : index
    %c0_81 = arith.constant 0 : index
    %165 = vector.load %arg17[%c128_80, %c0_81] : memref<576x384xbf16, #tpu.memory_space<vmem>>, vector<64x384xbf16>
    tpu.vector_store %arg17[%c128_80, %c0_81], %164 {strides = array<i32>} : memref<576x384xbf16, #tpu.memory_space<vmem>>, vector<64x384xbf16>,
    %c0_82 = arith.constant 0 : index
    %c127 = arith.constant 127 : index
    %166 = vector.load %arg15[%c0_82, %c127] : memref<64x640xbf16, #tpu.memory_space<vmem>>, vector<64x384xbf16>
    %c192 = arith.constant 192 : index
    %c0_83 = arith.constant 0 : index
    %167 = vector.load %arg17[%c192, %c0_83] : memref<576x384xbf16, #tpu.memory_space<vmem>>, vector<64x384xbf16>
    tpu.vector_store %arg17[%c192, %c0_83], %166 {strides = array<i32>} : memref<576x384xbf16, #tpu.memory_space<vmem>>, vector<64x384xbf16>,
    %c0_84 = arith.constant 0 : index
    %c128_85 = arith.constant 128 : index
    %168 = vector.load %arg15[%c0_84, %c128_85] : memref<64x640xbf16, #tpu.memory_space<vmem>>, vector<64x384xbf16>
    %c256 = arith.constant 256 : index
    %c0_86 = arith.constant 0 : index
    %169 = vector.load %arg17[%c256, %c0_86] : memref<576x384xbf16, #tpu.memory_space<vmem>>, vector<64x384xbf16>
    tpu.vector_store %arg17[%c256, %c0_86], %168 {strides = array<i32>} : memref<576x384xbf16, #tpu.memory_space<vmem>>, vector<64x384xbf16>,
    %c0_87 = arith.constant 0 : index
    %c129 = arith.constant 129 : index
    %170 = vector.load %arg15[%c0_87, %c129] : memref<64x640xbf16, #tpu.memory_space<vmem>>, vector<64x384xbf16>
    %c320 = arith.constant 320 : index
    %c0_88 = arith.constant 0 : index
    %171 = vector.load %arg17[%c320, %c0_88] : memref<576x384xbf16, #tpu.memory_space<vmem>>, vector<64x384xbf16>
    tpu.vector_store %arg17[%c320, %c0_88], %170 {strides = array<i32>} : memref<576x384xbf16, #tpu.memory_space<vmem>>, vector<64x384xbf16>,
    %c0_89 = arith.constant 0 : index
    %c145 = arith.constant 145 : index
    %172 = vector.load %arg15[%c0_89, %c145] : memref<64x640xbf16, #tpu.memory_space<vmem>>, vector<64x384xbf16>
    %c384 = arith.constant 384 : index
    %c0_90 = arith.constant 0 : index
    %173 = vector.load %arg17[%c384, %c0_90] : memref<576x384xbf16, #tpu.memory_space<vmem>>, vector<64x384xbf16>
    tpu.vector_store %arg17[%c384, %c0_90], %172 {strides = array<i32>} : memref<576x384xbf16, #tpu.memory_space<vmem>>, vector<64x384xbf16>,
    %c0_91 = arith.constant 0 : index
    %c146 = arith.constant 146 : index
    %174 = vector.load %arg15[%c0_91, %c146] : memref<64x640xbf16, #tpu.memory_space<vmem>>, vector<64x384xbf16>
    %c448 = arith.constant 448 : index
    %c0_92 = arith.constant 0 : index
    %175 = vector.load %arg17[%c448, %c0_92] : memref<576x384xbf16, #tpu.memory_space<vmem>>, vector<64x384xbf16>
    tpu.vector_store %arg17[%c448, %c0_92], %174 {strides = array<i32>} : memref<576x384xbf16, #tpu.memory_space<vmem>>, vector<64x384xbf16>,
    %c0_93 = arith.constant 0 : index
    %c147 = arith.constant 147 : index
    %176 = vector.load %arg15[%c0_93, %c147] : memref<64x640xbf16, #tpu.memory_space<vmem>>, vector<64x384xbf16>
    %c512_94 = arith.constant 512 : index
    %c0_95 = arith.constant 0 : index
    %177 = vector.load %arg17[%c512_94, %c0_95] : memref<576x384xbf16, #tpu.memory_space<vmem>>, vector<64x384xbf16>
    tpu.vector_store %arg17[%c512_94, %c0_95], %176 {strides = array<i32>} : memref<576x384xbf16, #tpu.memory_space<vmem>>, vector<64x384xbf16>,
    %c0_96 = arith.constant 0 : index
    %c0_97 = arith.constant 0 : index
    %178 = vector.load %arg8[%c0_96, %c0_97] : memref<64x576xbf16, #tpu.memory_space<vmem>>, vector<64x576xbf16>
    %c0_98 = arith.constant 0 : index
    %c0_99 = arith.constant 0 : index
    %179 = vector.load %arg17[%c0_98, %c0_99] : memref<576x384xbf16, #tpu.memory_space<vmem>>, vector<576x384xbf16>
    %cst_100 = arith.constant dense<0.000000e+00> : vector<64x384xf32>
    %180 = tpu.matmul %178, %179, %cst_100 {dimension_numbers = #tpu.dot_dimension_numbers<[1], [0], [0], [1], [0, 0, 1, 1], [], []>} : vector<64x576xbf16>, vector<576x384xbf16>, vector<64x384xf32> -> vector<64x384xf32>
    %c0_101 = arith.constant 0 : index
    %c0_102 = arith.constant 0 : index
    %181 = vector.load %arg9[%c0_101, %c0_102] : memref<64x1xf32, #tpu.memory_space<vmem>>, vector<64x1xf32>
    %182 = vector.broadcast %181 : vector<64x1xf32> to vector<64x384xf32>
    %183 = arith.addf %180, %182 : vector<64x384xf32>
    %c0_103 = arith.constant 0 : index
    %c0_104 = arith.constant 0 : index
    %184 = vector.load %arg16[%c0_103, %c0_104] : memref<64x384xf32, #tpu.memory_space<vmem>>, vector<64x384xf32>
    tpu.vector_store %arg16[%c0_103, %c0_104], %183 {strides = array<i32>} : memref<64x384xf32, #tpu.memory_space<vmem>>, vector<64x384xf32>,
    %c0_105 = arith.constant 0 : index
    %c0_106 = arith.constant 0 : index
    %185 = vector.load %arg16[%c0_105, %c0_106] : memref<64x384xf32, #tpu.memory_space<vmem>>, vector<16x384xf32>
    %186 = vector.broadcast %3 : vector<1x384xf32> to vector<16x384xf32>
    %187 = arith.mulf %185, %186 : vector<16x384xf32>
    %cst_107 = arith.constant dense<0.000000e+00> : vector<16xf32>
    %188 = vector.multi_reduction <add>, %187, %cst_107 [1] : vector<16x384xf32> to vector<16xf32>
    %189 = vector.shape_cast %188 : vector<16xf32> to vector<16x1xf32>
    %cst_108 = arith.constant dense<0.000000e+00> : vector<1xf32>
    %190 = vector.multi_reduction <add>, %189, %cst_108 [0] : vector<16x1xf32> to vector<1xf32>
    %191 = vector.shape_cast %190 : vector<1xf32> to vector<1x1xf32>
    %cst_109 = arith.constant 2.44140625E-4 : f32
    %192 = vector.broadcast %cst_109 : f32 to vector<1x1xf32>
    %193 = arith.mulf %191, %192 : vector<1x1xf32>
    %194 = vector.broadcast %193 : vector<1x1xf32> to vector<16x384xf32>
    %195 = arith.subf %185, %194 : vector<16x384xf32>
    %196 = vector.broadcast %3 : vector<1x384xf32> to vector<16x384xf32>
    %197 = arith.mulf %195, %196 : vector<16x384xf32>
    %198 = arith.mulf %197, %197 : vector<16x384xf32>
    %cst_110 = arith.constant dense<0.000000e+00> : vector<16xf32>
    %199 = vector.multi_reduction <add>, %198, %cst_110 [1] : vector<16x384xf32> to vector<16xf32>
    %200 = vector.shape_cast %199 : vector<16xf32> to vector<16x1xf32>
    %cst_111 = arith.constant dense<0.000000e+00> : vector<1xf32>
    %201 = vector.multi_reduction <add>, %200, %cst_111 [0] : vector<16x1xf32> to vector<1xf32>
    %202 = vector.shape_cast %201 : vector<1xf32> to vector<1x1xf32>
    %cst_112 = arith.constant 2.44140625E-4 : f32
    %203 = vector.broadcast %cst_112 : f32 to vector<1x1xf32>
    %204 = arith.mulf %202, %203 : vector<1x1xf32>
    %cst_113 = arith.constant 9.99999974E-6 : f32
    %205 = vector.broadcast %cst_113 : f32 to vector<1x1xf32>
    %206 = arith.addf %204, %205 : vector<1x1xf32>
    %207 = math.rsqrt %206 : vector<1x1xf32>
    %208 = vector.broadcast %207 : vector<1x1xf32> to vector<16x384xf32>
    %209 = arith.mulf %197, %208 : vector<16x384xf32>
    %c0_114 = arith.constant 0 : index
    %c0_115 = arith.constant 0 : index
    %210 = vector.load %arg10[%c0_114, %c0_115] : memref<64x1xf32, #tpu.memory_space<vmem>>, vector<16x1xf32>
    %211 = vector.broadcast %210 : vector<16x1xf32> to vector<16x384xf32>
    %212 = arith.mulf %209, %211 : vector<16x384xf32>
    %c0_116 = arith.constant 0 : index
    %c0_117 = arith.constant 0 : index
    %213 = vector.load %arg11[%c0_116, %c0_117] : memref<64x1xf32, #tpu.memory_space<vmem>>, vector<16x1xf32>
    %214 = vector.broadcast %213 : vector<16x1xf32> to vector<16x384xf32>
    %215 = arith.addf %212, %214 : vector<16x384xf32>
    %cst_118 = arith.constant 0.000000e+00 : f32
    %216 = vector.broadcast %cst_118 : f32 to vector<16x384xf32>
    %217 = arith.maximumf %215, %216 : vector<16x384xf32>
    %218 = vector.broadcast %3 : vector<1x384xf32> to vector<16x384xf32>
    %219 = arith.mulf %217, %218 : vector<16x384xf32>
    %220 = arith.truncf %219 : vector<16x384xf32> to vector<16x384xbf16>
    %c0_119 = arith.constant 0 : index
    %c128_120 = arith.constant 128 : index
    %221 = vector.load %arg15[%c0_119, %c128_120] : memref<64x640xbf16, #tpu.memory_space<vmem>>, vector<16x384xbf16>
    tpu.vector_store %arg15[%c0_119, %c128_120], %220 {strides = array<i32>} : memref<64x640xbf16, #tpu.memory_space<vmem>>, vector<16x384xbf16>,
    %c16_121 = arith.constant 16 : index
    %c0_122 = arith.constant 0 : index
    %222 = vector.load %arg16[%c16_121, %c0_122] : memref<64x384xf32, #tpu.memory_space<vmem>>, vector<16x384xf32>
    %223 = vector.broadcast %3 : vector<1x384xf32> to vector<16x384xf32>
    %224 = arith.mulf %222, %223 : vector<16x384xf32>
    %cst_123 = arith.constant dense<0.000000e+00> : vector<16xf32>
    %225 = vector.multi_reduction <add>, %224, %cst_123 [1] : vector<16x384xf32> to vector<16xf32>
    %226 = vector.shape_cast %225 : vector<16xf32> to vector<16x1xf32>
    %cst_124 = arith.constant dense<0.000000e+00> : vector<1xf32>
    %227 = vector.multi_reduction <add>, %226, %cst_124 [0] : vector<16x1xf32> to vector<1xf32>
    %228 = vector.shape_cast %227 : vector<1xf32> to vector<1x1xf32>
    %cst_125 = arith.constant 2.44140625E-4 : f32
    %229 = vector.broadcast %cst_125 : f32 to vector<1x1xf32>
    %230 = arith.mulf %228, %229 : vector<1x1xf32>
    %231 = vector.broadcast %230 : vector<1x1xf32> to vector<16x384xf32>
    %232 = arith.subf %222, %231 : vector<16x384xf32>
    %233 = vector.broadcast %3 : vector<1x384xf32> to vector<16x384xf32>
    %234 = arith.mulf %232, %233 : vector<16x384xf32>
    %235 = arith.mulf %234, %234 : vector<16x384xf32>
    %cst_126 = arith.constant dense<0.000000e+00> : vector<16xf32>
    %236 = vector.multi_reduction <add>, %235, %cst_126 [1] : vector<16x384xf32> to vector<16xf32>
    %237 = vector.shape_cast %236 : vector<16xf32> to vector<16x1xf32>
    %cst_127 = arith.constant dense<0.000000e+00> : vector<1xf32>
    %238 = vector.multi_reduction <add>, %237, %cst_127 [0] : vector<16x1xf32> to vector<1xf32>
    %239 = vector.shape_cast %238 : vector<1xf32> to vector<1x1xf32>
    %cst_128 = arith.constant 2.44140625E-4 : f32
    %240 = vector.broadcast %cst_128 : f32 to vector<1x1xf32>
    %241 = arith.mulf %239, %240 : vector<1x1xf32>
    %cst_129 = arith.constant 9.99999974E-6 : f32
    %242 = vector.broadcast %cst_129 : f32 to vector<1x1xf32>
    %243 = arith.addf %241, %242 : vector<1x1xf32>
    %244 = math.rsqrt %243 : vector<1x1xf32>
    %245 = vector.broadcast %244 : vector<1x1xf32> to vector<16x384xf32>
    %246 = arith.mulf %234, %245 : vector<16x384xf32>
    %c16_130 = arith.constant 16 : index
    %c0_131 = arith.constant 0 : index
    %247 = vector.load %arg10[%c16_130, %c0_131] : memref<64x1xf32, #tpu.memory_space<vmem>>, vector<16x1xf32>
    %248 = vector.broadcast %247 : vector<16x1xf32> to vector<16x384xf32>
    %249 = arith.mulf %246, %248 : vector<16x384xf32>
    %c16_132 = arith.constant 16 : index
    %c0_133 = arith.constant 0 : index
    %250 = vector.load %arg11[%c16_132, %c0_133] : memref<64x1xf32, #tpu.memory_space<vmem>>, vector<16x1xf32>
    %251 = vector.broadcast %250 : vector<16x1xf32> to vector<16x384xf32>
    %252 = arith.addf %249, %251 : vector<16x384xf32>
    %cst_134 = arith.constant 0.000000e+00 : f32
    %253 = vector.broadcast %cst_134 : f32 to vector<16x384xf32>
    %254 = arith.maximumf %252, %253 : vector<16x384xf32>
    %255 = vector.broadcast %3 : vector<1x384xf32> to vector<16x384xf32>
    %256 = arith.mulf %254, %255 : vector<16x384xf32>
    %257 = arith.truncf %256 : vector<16x384xf32> to vector<16x384xbf16>
    %c16_135 = arith.constant 16 : index
    %c128_136 = arith.constant 128 : index
    %258 = vector.load %arg15[%c16_135, %c128_136] : memref<64x640xbf16, #tpu.memory_space<vmem>>, vector<16x384xbf16>
    tpu.vector_store %arg15[%c16_135, %c128_136], %257 {strides = array<i32>} : memref<64x640xbf16, #tpu.memory_space<vmem>>, vector<16x384xbf16>,
    %c32_137 = arith.constant 32 : index
    %c0_138 = arith.constant 0 : index
    %259 = vector.load %arg16[%c32_137, %c0_138] : memref<64x384xf32, #tpu.memory_space<vmem>>, vector<16x384xf32>
    %260 = vector.broadcast %3 : vector<1x384xf32> to vector<16x384xf32>
    %261 = arith.mulf %259, %260 : vector<16x384xf32>
    %cst_139 = arith.constant dense<0.000000e+00> : vector<16xf32>
    %262 = vector.multi_reduction <add>, %261, %cst_139 [1] : vector<16x384xf32> to vector<16xf32>
    %263 = vector.shape_cast %262 : vector<16xf32> to vector<16x1xf32>
    %cst_140 = arith.constant dense<0.000000e+00> : vector<1xf32>
    %264 = vector.multi_reduction <add>, %263, %cst_140 [0] : vector<16x1xf32> to vector<1xf32>
    %265 = vector.shape_cast %264 : vector<1xf32> to vector<1x1xf32>
    %cst_141 = arith.constant 2.44140625E-4 : f32
    %266 = vector.broadcast %cst_141 : f32 to vector<1x1xf32>
    %267 = arith.mulf %265, %266 : vector<1x1xf32>
    %268 = vector.broadcast %267 : vector<1x1xf32> to vector<16x384xf32>
    %269 = arith.subf %259, %268 : vector<16x384xf32>
    %270 = vector.broadcast %3 : vector<1x384xf32> to vector<16x384xf32>
    %271 = arith.mulf %269, %270 : vector<16x384xf32>
    %272 = arith.mulf %271, %271 : vector<16x384xf32>
    %cst_142 = arith.constant dense<0.000000e+00> : vector<16xf32>
    %273 = vector.multi_reduction <add>, %272, %cst_142 [1] : vector<16x384xf32> to vector<16xf32>
    %274 = vector.shape_cast %273 : vector<16xf32> to vector<16x1xf32>
    %cst_143 = arith.constant dense<0.000000e+00> : vector<1xf32>
    %275 = vector.multi_reduction <add>, %274, %cst_143 [0] : vector<16x1xf32> to vector<1xf32>
    %276 = vector.shape_cast %275 : vector<1xf32> to vector<1x1xf32>
    %cst_144 = arith.constant 2.44140625E-4 : f32
    %277 = vector.broadcast %cst_144 : f32 to vector<1x1xf32>
    %278 = arith.mulf %276, %277 : vector<1x1xf32>
    %cst_145 = arith.constant 9.99999974E-6 : f32
    %279 = vector.broadcast %cst_145 : f32 to vector<1x1xf32>
    %280 = arith.addf %278, %279 : vector<1x1xf32>
    %281 = math.rsqrt %280 : vector<1x1xf32>
    %282 = vector.broadcast %281 : vector<1x1xf32> to vector<16x384xf32>
    %283 = arith.mulf %271, %282 : vector<16x384xf32>
    %c32_146 = arith.constant 32 : index
    %c0_147 = arith.constant 0 : index
    %284 = vector.load %arg10[%c32_146, %c0_147] : memref<64x1xf32, #tpu.memory_space<vmem>>, vector<16x1xf32>
    %285 = vector.broadcast %284 : vector<16x1xf32> to vector<16x384xf32>
    %286 = arith.mulf %283, %285 : vector<16x384xf32>
    %c32_148 = arith.constant 32 : index
    %c0_149 = arith.constant 0 : index
    %287 = vector.load %arg11[%c32_148, %c0_149] : memref<64x1xf32, #tpu.memory_space<vmem>>, vector<16x1xf32>
    %288 = vector.broadcast %287 : vector<16x1xf32> to vector<16x384xf32>
    %289 = arith.addf %286, %288 : vector<16x384xf32>
    %cst_150 = arith.constant 0.000000e+00 : f32
    %290 = vector.broadcast %cst_150 : f32 to vector<16x384xf32>
    %291 = arith.maximumf %289, %290 : vector<16x384xf32>
    %292 = vector.broadcast %3 : vector<1x384xf32> to vector<16x384xf32>
    %293 = arith.mulf %291, %292 : vector<16x384xf32>
    %294 = arith.truncf %293 : vector<16x384xf32> to vector<16x384xbf16>
    %c32_151 = arith.constant 32 : index
    %c128_152 = arith.constant 128 : index
    %295 = vector.load %arg15[%c32_151, %c128_152] : memref<64x640xbf16, #tpu.memory_space<vmem>>, vector<16x384xbf16>
    tpu.vector_store %arg15[%c32_151, %c128_152], %294 {strides = array<i32>} : memref<64x640xbf16, #tpu.memory_space<vmem>>, vector<16x384xbf16>,
    %c48_153 = arith.constant 48 : index
    %c0_154 = arith.constant 0 : index
    %296 = vector.load %arg16[%c48_153, %c0_154] : memref<64x384xf32, #tpu.memory_space<vmem>>, vector<16x384xf32>
    %297 = vector.broadcast %3 : vector<1x384xf32> to vector<16x384xf32>
    %298 = arith.mulf %296, %297 : vector<16x384xf32>
    %cst_155 = arith.constant dense<0.000000e+00> : vector<16xf32>
    %299 = vector.multi_reduction <add>, %298, %cst_155 [1] : vector<16x384xf32> to vector<16xf32>
    %300 = vector.shape_cast %299 : vector<16xf32> to vector<16x1xf32>
    %cst_156 = arith.constant dense<0.000000e+00> : vector<1xf32>
    %301 = vector.multi_reduction <add>, %300, %cst_156 [0] : vector<16x1xf32> to vector<1xf32>
    %302 = vector.shape_cast %301 : vector<1xf32> to vector<1x1xf32>
    %cst_157 = arith.constant 2.44140625E-4 : f32
    %303 = vector.broadcast %cst_157 : f32 to vector<1x1xf32>
    %304 = arith.mulf %302, %303 : vector<1x1xf32>
    %305 = vector.broadcast %304 : vector<1x1xf32> to vector<16x384xf32>
    %306 = arith.subf %296, %305 : vector<16x384xf32>
    %307 = vector.broadcast %3 : vector<1x384xf32> to vector<16x384xf32>
    %308 = arith.mulf %306, %307 : vector<16x384xf32>
    %309 = arith.mulf %308, %308 : vector<16x384xf32>
    %cst_158 = arith.constant dense<0.000000e+00> : vector<16xf32>
    %310 = vector.multi_reduction <add>, %309, %cst_158 [1] : vector<16x384xf32> to vector<16xf32>
    %311 = vector.shape_cast %310 : vector<16xf32> to vector<16x1xf32>
    %cst_159 = arith.constant dense<0.000000e+00> : vector<1xf32>
    %312 = vector.multi_reduction <add>, %311, %cst_159 [0] : vector<16x1xf32> to vector<1xf32>
    %313 = vector.shape_cast %312 : vector<1xf32> to vector<1x1xf32>
    %cst_160 = arith.constant 2.44140625E-4 : f32
    %314 = vector.broadcast %cst_160 : f32 to vector<1x1xf32>
    %315 = arith.mulf %313, %314 : vector<1x1xf32>
    %cst_161 = arith.constant 9.99999974E-6 : f32
    %316 = vector.broadcast %cst_161 : f32 to vector<1x1xf32>
    %317 = arith.addf %315, %316 : vector<1x1xf32>
    %318 = math.rsqrt %317 : vector<1x1xf32>
    %319 = vector.broadcast %318 : vector<1x1xf32> to vector<16x384xf32>
    %320 = arith.mulf %308, %319 : vector<16x384xf32>
    %c48_162 = arith.constant 48 : index
    %c0_163 = arith.constant 0 : index
    %321 = vector.load %arg10[%c48_162, %c0_163] : memref<64x1xf32, #tpu.memory_space<vmem>>, vector<16x1xf32>
    %322 = vector.broadcast %321 : vector<16x1xf32> to vector<16x384xf32>
    %323 = arith.mulf %320, %322 : vector<16x384xf32>
    %c48_164 = arith.constant 48 : index
    %c0_165 = arith.constant 0 : index
    %324 = vector.load %arg11[%c48_164, %c0_165] : memref<64x1xf32, #tpu.memory_space<vmem>>, vector<16x1xf32>
    %325 = vector.broadcast %324 : vector<16x1xf32> to vector<16x384xf32>
    %326 = arith.addf %323, %325 : vector<16x384xf32>
    %cst_166 = arith.constant 0.000000e+00 : f32
    %327 = vector.broadcast %cst_166 : f32 to vector<16x384xf32>
    %328 = arith.maximumf %326, %327 : vector<16x384xf32>
    %329 = vector.broadcast %3 : vector<1x384xf32> to vector<16x384xf32>
    %330 = arith.mulf %328, %329 : vector<16x384xf32>
    %331 = arith.truncf %330 : vector<16x384xf32> to vector<16x384xbf16>
    %c48_167 = arith.constant 48 : index
    %c128_168 = arith.constant 128 : index
    %332 = vector.load %arg15[%c48_167, %c128_168] : memref<64x640xbf16, #tpu.memory_space<vmem>>, vector<16x384xbf16>
    tpu.vector_store %arg15[%c48_167, %c128_168], %331 {strides = array<i32>} : memref<64x640xbf16, #tpu.memory_space<vmem>>, vector<16x384xbf16>,
    %c0_169 = arith.constant 0 : index
    %c109_170 = arith.constant 109 : index
    %333 = vector.load %arg15[%c0_169, %c109_170] : memref<64x640xbf16, #tpu.memory_space<vmem>>, vector<64x384xbf16>
    %c0_171 = arith.constant 0 : index
    %c0_172 = arith.constant 0 : index
    %334 = vector.load %arg17[%c0_171, %c0_172] : memref<576x384xbf16, #tpu.memory_space<vmem>>, vector<64x384xbf16>
    tpu.vector_store %arg17[%c0_171, %c0_172], %333 {strides = array<i32>} : memref<576x384xbf16, #tpu.memory_space<vmem>>, vector<64x384xbf16>,
    %c0_173 = arith.constant 0 : index
    %c110_174 = arith.constant 110 : index
    %335 = vector.load %arg15[%c0_173, %c110_174] : memref<64x640xbf16, #tpu.memory_space<vmem>>, vector<64x384xbf16>
    %c64_175 = arith.constant 64 : index
    %c0_176 = arith.constant 0 : index
    %336 = vector.load %arg17[%c64_175, %c0_176] : memref<576x384xbf16, #tpu.memory_space<vmem>>, vector<64x384xbf16>
    tpu.vector_store %arg17[%c64_175, %c0_176], %335 {strides = array<i32>} : memref<576x384xbf16, #tpu.memory_space<vmem>>, vector<64x384xbf16>,
    %c0_177 = arith.constant 0 : index
    %c111_178 = arith.constant 111 : index
    %337 = vector.load %arg15[%c0_177, %c111_178] : memref<64x640xbf16, #tpu.memory_space<vmem>>, vector<64x384xbf16>
    %c128_179 = arith.constant 128 : index
    %c0_180 = arith.constant 0 : index
    %338 = vector.load %arg17[%c128_179, %c0_180] : memref<576x384xbf16, #tpu.memory_space<vmem>>, vector<64x384xbf16>
    tpu.vector_store %arg17[%c128_179, %c0_180], %337 {strides = array<i32>} : memref<576x384xbf16, #tpu.memory_space<vmem>>, vector<64x384xbf16>,
    %c0_181 = arith.constant 0 : index
    %c127_182 = arith.constant 127 : index
    %339 = vector.load %arg15[%c0_181, %c127_182] : memref<64x640xbf16, #tpu.memory_space<vmem>>, vector<64x384xbf16>
    %c192_183 = arith.constant 192 : index
    %c0_184 = arith.constant 0 : index
    %340 = vector.load %arg17[%c192_183, %c0_184] : memref<576x384xbf16, #tpu.memory_space<vmem>>, vector<64x384xbf16>
    tpu.vector_store %arg17[%c192_183, %c0_184], %339 {strides = array<i32>} : memref<576x384xbf16, #tpu.memory_space<vmem>>, vector<64x384xbf16>,
    %c0_185 = arith.constant 0 : index
    %c128_186 = arith.constant 128 : index
    %341 = vector.load %arg15[%c0_185, %c128_186] : memref<64x640xbf16, #tpu.memory_space<vmem>>, vector<64x384xbf16>
    %c256_187 = arith.constant 256 : index
    %c0_188 = arith.constant 0 : index
    %342 = vector.load %arg17[%c256_187, %c0_188] : memref<576x384xbf16, #tpu.memory_space<vmem>>, vector<64x384xbf16>
    tpu.vector_store %arg17[%c256_187, %c0_188], %341 {strides = array<i32>} : memref<576x384xbf16, #tpu.memory_space<vmem>>, vector<64x384xbf16>,
    %c0_189 = arith.constant 0 : index
    %c129_190 = arith.constant 129 : index
    %343 = vector.load %arg15[%c0_189, %c129_190] : memref<64x640xbf16, #tpu.memory_space<vmem>>, vector<64x384xbf16>
    %c320_191 = arith.constant 320 : index
    %c0_192 = arith.constant 0 : index
    %344 = vector.load %arg17[%c320_191, %c0_192] : memref<576x384xbf16, #tpu.memory_space<vmem>>, vector<64x384xbf16>
    tpu.vector_store %arg17[%c320_191, %c0_192], %343 {strides = array<i32>} : memref<576x384xbf16, #tpu.memory_space<vmem>>, vector<64x384xbf16>,
    %c0_193 = arith.constant 0 : index
    %c145_194 = arith.constant 145 : index
    %345 = vector.load %arg15[%c0_193, %c145_194] : memref<64x640xbf16, #tpu.memory_space<vmem>>, vector<64x384xbf16>
    %c384_195 = arith.constant 384 : index
    %c0_196 = arith.constant 0 : index
    %346 = vector.load %arg17[%c384_195, %c0_196] : memref<576x384xbf16, #tpu.memory_space<vmem>>, vector<64x384xbf16>
    tpu.vector_store %arg17[%c384_195, %c0_196], %345 {strides = array<i32>} : memref<576x384xbf16, #tpu.memory_space<vmem>>, vector<64x384xbf16>,
    %c0_197 = arith.constant 0 : index
    %c146_198 = arith.constant 146 : index
    %347 = vector.load %arg15[%c0_197, %c146_198] : memref<64x640xbf16, #tpu.memory_space<vmem>>, vector<64x384xbf16>
    %c448_199 = arith.constant 448 : index
    %c0_200 = arith.constant 0 : index
    %348 = vector.load %arg17[%c448_199, %c0_200] : memref<576x384xbf16, #tpu.memory_space<vmem>>, vector<64x384xbf16>
    tpu.vector_store %arg17[%c448_199, %c0_200], %347 {strides = array<i32>} : memref<576x384xbf16, #tpu.memory_space<vmem>>, vector<64x384xbf16>,
    %c0_201 = arith.constant 0 : index
    %c147_202 = arith.constant 147 : index
    %349 = vector.load %arg15[%c0_201, %c147_202] : memref<64x640xbf16, #tpu.memory_space<vmem>>, vector<64x384xbf16>
    %c512_203 = arith.constant 512 : index
    %c0_204 = arith.constant 0 : index
    %350 = vector.load %arg17[%c512_203, %c0_204] : memref<576x384xbf16, #tpu.memory_space<vmem>>, vector<64x384xbf16>
    tpu.vector_store %arg17[%c512_203, %c0_204], %349 {strides = array<i32>} : memref<576x384xbf16, #tpu.memory_space<vmem>>, vector<64x384xbf16>,
    %c0_205 = arith.constant 0 : index
    %c0_206 = arith.constant 0 : index
    %351 = vector.load %arg12[%c0_205, %c0_206] : memref<4x576xbf16, #tpu.memory_space<vmem>>, vector<4x576xbf16>
    %c0_207 = arith.constant 0 : index
    %c0_208 = arith.constant 0 : index
    %352 = vector.load %arg17[%c0_207, %c0_208] : memref<576x384xbf16, #tpu.memory_space<vmem>>, vector<576x384xbf16>
    %cst_209 = arith.constant dense<0.000000e+00> : vector<4x384xf32>
    %353 = tpu.matmul %351, %352, %cst_209 {dimension_numbers = #tpu.dot_dimension_numbers<[1], [0], [0], [1], [0, 0, 1, 1], [], []>} : vector<4x576xbf16>, vector<576x384xbf16>, vector<4x384xf32> -> vector<4x384xf32>
    %c0_210 = arith.constant 0 : index
    %c0_211 = arith.constant 0 : index
    %354 = vector.load %arg13[%c0_210, %c0_211] : memref<4x1xf32, #tpu.memory_space<vmem>>, vector<4x1xf32>
    %355 = vector.broadcast %354 : vector<4x1xf32> to vector<4x384xf32>
    %356 = arith.addf %353, %355 : vector<4x384xf32>
    %cst_212 = arith.constant dense<0xFF800000> : vector<384xf32>
    %357 = vector.multi_reduction <maximumf>, %356, %cst_212 [0] : vector<4x384xf32> to vector<384xf32>
    %358 = vector.shape_cast %357 : vector<384xf32> to vector<1x384xf32>
    %359 = vector.broadcast %358 : vector<1x384xf32> to vector<4x384xf32>
    %360 = arith.subf %356, %359 : vector<4x384xf32>
    %361 = math.exp %360 : vector<4x384xf32>
    %cst_213 = arith.constant dense<0.000000e+00> : vector<384xf32>
    %362 = vector.multi_reduction <add>, %361, %cst_213 [0] : vector<4x384xf32> to vector<384xf32>
    %363 = vector.shape_cast %362 : vector<384xf32> to vector<1x384xf32>
    %364 = tpu.reciprocal %363 {approx = true} : vector<1x384xf32> -> vector<1x384xf32>
    %365 = vector.broadcast %364 : vector<1x384xf32> to vector<4x384xf32>
    %366 = arith.mulf %361, %365 : vector<4x384xf32>
    %c0_214 = arith.constant 0 : index
    %c0_215 = arith.constant 0 : index
    %c0_216 = arith.constant 0 : index
    %367 = vector.load %arg2[%c0_214, %c0_215, %c0_216] : memref<1x4x384xf32, #tpu.memory_space<vmem>>, vector<1x4x384xf32>
    %368 = vector.shape_cast %367 : vector<1x4x384xf32> to vector<4x384xf32>
    %369 = arith.mulf %368, %366 : vector<4x384xf32>
    %cst_217 = arith.constant dense<0.000000e+00> : vector<384xf32>
    %370 = vector.multi_reduction <add>, %369, %cst_217 [0] : vector<4x384xf32> to vector<384xf32>
    %371 = vector.shape_cast %370 : vector<384xf32> to vector<1x384xf32>
    %c0_218 = arith.constant 0 : index
    %c0_219 = arith.constant 0 : index
    %c0_220 = arith.constant 0 : index
    %372 = vector.load %arg14[%c0_218, %c0_219, %c0_220] : memref<1x1x384xf32, #tpu.memory_space<vmem>>, vector<1x1x384xf32>
    %373 = vector.shape_cast %372 : vector<1x1x384xf32> to vector<1x384xf32>
    %374 = vector.shape_cast %371 : vector<1x384xf32> to vector<1x1x384xf32>
    tpu.vector_store %arg14[%c0_218, %c0_219, %c0_220], %374 {strides = array<i32>} : memref<1x1x384xf32, #tpu.memory_space<vmem>>, vector<1x1x384xf32>,
    return
  }
  func.func @transform_0(%arg0: i32) -> (i32, i32, i32) {
    %c0_i32 = arith.constant 0 : i32
    %c0_i32_0 = arith.constant 0 : i32
    %c0_i32_1 = arith.constant 0 : i32
    return %arg0, %c0_i32, %c0_i32_0 : i32, i32, i32
  }
  func.func @transform_1(%arg0: i32) -> (i32, i32, i32) {
    %c0_i32 = arith.constant 0 : i32
    %c0_i32_0 = arith.constant 0 : i32
    %c0_i32_1 = arith.constant 0 : i32
    return %arg0, %c0_i32, %c0_i32_0 : i32, i32, i32
  }
  func.func @transform_2(%arg0: i32) -> (i32, i32) {
    %c0_i32 = arith.constant 0 : i32
    %c0_i32_0 = arith.constant 0 : i32
    %c0_i32_1 = arith.constant 0 : i32
    return %c0_i32, %c0_i32_0 : i32, i32
  }
  func.func @transform_3(%arg0: i32) -> (i32, i32) {
    %c0_i32 = arith.constant 0 : i32
    %c0_i32_0 = arith.constant 0 : i32
    %c0_i32_1 = arith.constant 0 : i32
    return %c0_i32, %c0_i32_0 : i32, i32
  }
  func.func @transform_4(%arg0: i32) -> (i32, i32) {
    %c0_i32 = arith.constant 0 : i32
    %c0_i32_0 = arith.constant 0 : i32
    %c0_i32_1 = arith.constant 0 : i32
    return %c0_i32, %c0_i32_0 : i32, i32
  }
  func.func @transform_5(%arg0: i32) -> (i32, i32) {
    %c0_i32 = arith.constant 0 : i32
    %c0_i32_0 = arith.constant 0 : i32
    %c0_i32_1 = arith.constant 0 : i32
    return %c0_i32, %c0_i32_0 : i32, i32
  }
  func.func @transform_6(%arg0: i32) -> (i32, i32) {
    %c0_i32 = arith.constant 0 : i32
    %c0_i32_0 = arith.constant 0 : i32
    %c0_i32_1 = arith.constant 0 : i32
    return %c0_i32, %c0_i32_0 : i32, i32
  }
  func.func @transform_7(%arg0: i32) -> (i32, i32) {
    %c0_i32 = arith.constant 0 : i32
    %c0_i32_0 = arith.constant 0 : i32
    %c0_i32_1 = arith.constant 0 : i32
    return %c0_i32, %c0_i32_0 : i32, i32
  }
  func.func @transform_8(%arg0: i32) -> (i32, i32) {
    %c0_i32 = arith.constant 0 : i32
    %c0_i32_0 = arith.constant 0 : i32
    %c0_i32_1 = arith.constant 0 : i32
    return %c0_i32, %c0_i32_0 : i32, i32
  }
  func.func @transform_9(%arg0: i32) -> (i32, i32) {
    %c0_i32 = arith.constant 0 : i32
    %c0_i32_0 = arith.constant 0 : i32
    %c0_i32_1 = arith.constant 0 : i32
    return %c0_i32, %c0_i32_0 : i32, i32
  }
  func.func @transform_10(%arg0: i32) -> (i32, i32) {
    %c0_i32 = arith.constant 0 : i32
    %c0_i32_0 = arith.constant 0 : i32
    %c0_i32_1 = arith.constant 0 : i32
    return %c0_i32, %c0_i32_0 : i32, i32
  }
  func.func @transform_11(%arg0: i32) -> (i32, i32) {
    %c0_i32 = arith.constant 0 : i32
    %c0_i32_0 = arith.constant 0 : i32
    %c0_i32_1 = arith.constant 0 : i32
    return %c0_i32, %c0_i32_0 : i32, i32
  }
  func.func @transform_12(%arg0: i32) -> (i32, i32) {
    %c0_i32 = arith.constant 0 : i32
    %c0_i32_0 = arith.constant 0 : i32
    %c0_i32_1 = arith.constant 0 : i32
    return %c0_i32, %c0_i32_0 : i32, i32
  }
  func.func @transform_13(%arg0: i32) -> (i32, i32, i32) {
    %c0_i32 = arith.constant 0 : i32
    %c0_i32_0 = arith.constant 0 : i32
    %c0_i32_1 = arith.constant 0 : i32
    return %arg0, %c0_i32, %c0_i32_0 : i32, i32, i32
  }
}

</mosaic_0001>

<bundles_post_ra>
// kernel: squeeze.1
= control target key start
LH: loop header
LB: loop body
LE: loop exit
PB: predicated region body
PF: predicated region fallthrough
CT: control target
= control target key end

     0   :  { %vm15_vm0 = vcmask 146432   ;;  %s126_s12 = smov 3  ;;  %s192_s13 = smov 110   ;;  %vm131_vm1 = vcmask 1014784   ;;  %vm144_vm2 = vcmask 1031168   ;;  %vm135_vm3 = vcmask 31744   ;;  %s304_s0 = inlined_call_operand.vmem [shape: f32[2,324], index: 0, kind: input, shape index: {}]   ;;  %s305_s1 = inlined_call_operand.vmem [shape: f32[2,18,18], index: 1, kind: output, shape index: {}]  }
   0x1   :  { %v12_v0 = vld [vmem:[%s304_s0] sm:$0x3]  ;;  %v154_v1 = vld [vmem:[%s304_s0 + $0x4] sm:$0x3]  ;;  %v155_v2 = vld [vmem:[%s304_s0 + $0x2] sm:$0x3] }
   0x2   :  { %13 = vst [vmem:[#allocation0] sm:$0x3] %v12_v0  ;;  %s18_s0 = smov 3  ;;  %s129_s16 = smov 3  ;;  %vm138_vm4 = vcmask 146464   ;;  %vm148_vm5 = vcmask 15360  }
   0x3   :  { %7 = vst [vmem:[#allocation0 + $0x10] sm:$0x3] %v154_v1  ;;  %s193_s17 = smov 114   ;;  %s40_s18 = smov 3  ;;  %vm151_vm6 = vcmask 146448  }
   0x4   :  { %11 = vst [vmem:[#allocation0 + $0x8] sm:$0x3] %v155_v2  ;;  %s26_s19 = smov 3  ;;  %s194_s20 = smov 4  }
   0x5   :  { %s195_s21 = smov 96   ;;  %s196_s22 = smov 112  }
   0x6   :  { %s48_s23 = smov 3  ;;  %s197_s24 = smov 2  }
   0x7   :  { %s62_s25 = smov 3  ;;  %s198_s26 = smov 92  }
   0x8   :  { %s199_s27 = smov 94   ;;  %s70_s28 = smov 3 }
   0x9   :  { %v33_v3 = vld [vmem:[#allocation0] sm:$0x3]   ;;  %s200_s29 = smov 78   ;;  %s84_s30 = smov 3 }
   0xa   :  { %v14_v4 = vld [vmem:[#allocation0] sm:$0x3]   ;;  %34 = vrot.lane.b32.xlu1 %v33_v3, %s192_s13  ;;  %v19_v5 = vld [vmem:[#allocation0 + $0x11] ss:$-1 sm:%s18_s0]   ;;  %s201_s2 = smov 74   ;;  %s202_s3 = smov 76  }
   0xb   :  { %16 = vst.msk [vmem:[%s305_s1] ss:$24 sm:$0x3] %vm15_vm0, %v14_v4   ;;  %20 = vrot.lane.b32.xlu0 %v19_v5, %s193_s17  ;;  %v127_v6 = vld [vmem:[#allocation0 + $0x9] ss:$-1 sm:%s126_s12]   ;;  %s98_s4 = smov 3 }
   0xc   :  { %v130_v7 = vld [vmem:[#allocation0 + $0x11] ss:$-1 sm:%s129_s16]   ;;  %v27_v10 = vld [vmem:[#allocation0 + $0x9] ss:$-1 sm:%s26_s19]   ;;  %v141_v11 = vld [vmem:[#allocation0] sm:$0x3]  }
   0xd   :  { %v132_v8 = vsel %vm131_vm1, %v130_v7, %v127_v6  ;;  %v41_v9 = vld [vmem:[#allocation0 + $0x11] ss:$-1 sm:%s40_s18]   ;;  %v143_v12 = vld [vmem:[#allocation0 + $0x8] sm:$0x3]   ;;  %v55_v14 = vld [vmem:[#allocation0] sm:$0x3]  }
   0xe   :  { %133 = vrot.lane.b32.xlu2 %v132_v8, %s194_s20  ;;  %v145_v13 = vsel %vm144_vm2, %v143_v12, %v141_v11  ;;  %v49_v15 = vld [vmem:[#allocation0 + $0x9] ss:$-1 sm:%s48_s23]   ;;  %v63_v16 = vld [vmem:[#allocation0 + $0x11] ss:$-1 sm:%s62_s25]   ;;  %v77_v17 = vld [vmem:[#allocation0] sm:$0x3]  }
   0xf   :  { %v71_v18 = vld [vmem:[#allocation0 + $0x9] ss:$-1 sm:%s70_s28]   ;;  %s203_s5 = smov 58   ;;  %v91_v21 = vld [vmem:[#allocation0] sm:$0x3]   ;;  %s204_s6 = smov 40  }
  0x10   :  { %v85_v19 = vld [vmem:[#allocation0 + $0x9] ss:$-1 sm:%s84_s30]   ;;  %s205_s7 = smov 56   ;;  %v105_v22 = vld [vmem:[#allocation0] sm:$0x3]   ;;  %s112_s8 = smov 3 }
  0x11   :  { %v99_v20 = vld [vmem:[#allocation0 + $0x9] ss:$-1 sm:%s98_s4]   ;;  %v119_v23 = vld [vmem:[#allocation0] sm:$0x3]   ;;  %s206_s9 = smov 38   ;;  %s207_s10 = smov 20  }
  0x12   :  { %42 = vrot.lane.b32.xlu1 %v41_v9, %s195_s21  ;;  %v113_v24 = vld [vmem:[#allocation0 + $0x9] ss:$-1 sm:%s112_s8]   ;;  %s208_s11 = smov 22  }
  0x13   :  { %28 = vrot.lane.b32.xlu0 %v27_v10, %s196_s22 }
  0x16   :  { %146 = vrot.lane.b32.xlu2 %v145_v13, %s197_s24 }
  0x1a   :  { %56 = vrot.lane.b32.xlu1 %v55_v14, %s198_s26 }
  0x1b   :  { %50 = vrot.lane.b32.xlu0 %v49_v15, %s199_s27 }
  0x1e   :  { %64 = vrot.lane.b32.xlu2 %v63_v16, %s200_s29 }
  0x22   :  { %78 = vrot.lane.b32.xlu1 %v77_v17, %s201_s2 }
  0x23   :  { %72 = vrot.lane.b32.xlu0 %v71_v18, %s202_s3 }
  0x26   :  { %86 = vrot.lane.b32.xlu2 %v85_v19, %s203_s5 }
  0x2a   :  { %100 = vrot.lane.b32.xlu1 %v99_v20, %s204_s6 }
  0x2b   :  { %92 = vrot.lane.b32.xlu0 %v91_v21, %s205_s7 }
  0x2e   :  { %106 = vrot.lane.b32.xlu2 %v105_v22, %s206_s9 }
  0x32   :  { %120 = vrot.lane.b32.xlu1 %v119_v23, %s207_s10 }
  0x33   :  { %114 = vrot.lane.b32.xlu0 %v113_v24, %s208_s11 }
  0x68   :  { %v134_v25 = vpop.permute.xlu2 %133  }
  0x69   :  { %171 = vst.msk [vmem:[%s305_s1 + $0x26] ss:$-24 sm:$0x3] %vm135_vm3, %v134_v25  }
  0x6a   :  { %172 = vst.msk [vmem:[%s305_s1 + $0x26] ss:$-24 sm:$0x3] %vm138_vm4, %v134_v25  }
  0x70   :  { %v147_v26 = vpop.permute.xlu2 %146  }
  0x71   :  { %173 = vst.msk [vmem:[%s305_s1 + $0x7] ss:$24 sm:$0x3] %vm148_vm5, %v147_v26  }
  0x72   :  { %174 = vst.msk [vmem:[%s305_s1 + $0x7] ss:$24 sm:$0x3] %vm151_vm6, %v147_v26  }
  0x78   :  { %v65_v27 = vpop.permute.xlu2 %64  }
  0x79   :  { %162 = vst.msk [vmem:[%s305_s1 + $0x29] ss:$-24 sm:$0x3] %vm15_vm0, %v65_v27  }
  0x7c   :  { %v35_v28 = vpop.permute.xlu1 %34  }
  0x7d   :  { %158 = vst.msk [vmem:[%s305_s1 + $0x1] ss:$24 sm:$0x3] %vm15_vm0, %v35_v28   ;;  %v21_v29 = vpop.permute.xlu0 %20  }
  0x7e   :  { %156 = vst.msk [vmem:[%s305_s1 + $0x27] ss:$-24 sm:$0x3] %vm15_vm0, %v21_v29  }
  0x80   :  { %v87_v30 = vpop.permute.xlu2 %86  }
  0x81   :  { %165 = vst.msk [vmem:[%s305_s1 + $0x23] ss:$-24 sm:$0x3] %vm15_vm0, %v87_v30  }
  0x84   :  { %v43_v31 = vpop.permute.xlu1 %42  }
  0x85   :  { %159 = vst.msk [vmem:[%s305_s1 + $0x28] ss:$-24 sm:$0x3] %vm15_vm0, %v43_v31   ;;  %v29_v32 = vpop.permute.xlu0 %28  }
  0x86   :  { %157 = vst.msk [vmem:[%s305_s1 + $0x20] ss:$-24 sm:$0x3] %vm15_vm0, %v29_v32  }
  0x88   :  { %v107_v33 = vpop.permute.xlu2 %106  }
  0x89   :  { %168 = vst.msk [vmem:[%s305_s1 + $0x5] ss:$24 sm:$0x3] %vm15_vm0, %v107_v33  }
  0x8c   :  { %v57_v34 = vpop.permute.xlu1 %56  }
  0x8d   :  { %161 = vst.msk [vmem:[%s305_s1 + $0x2] ss:$24 sm:$0x3] %vm15_vm0, %v57_v34   ;;  %v51_v35 = vpop.permute.xlu0 %50  }
  0x8e   :  { %160 = vst.msk [vmem:[%s305_s1 + $0x21] ss:$-24 sm:$0x3] %vm15_vm0, %v51_v35  }
  0x94   :  { %v79_v36 = vpop.permute.xlu1 %78  }
  0x95   :  { %164 = vst.msk [vmem:[%s305_s1 + $0x3] ss:$24 sm:$0x3] %vm15_vm0, %v79_v36   ;;  %v73_v37 = vpop.permute.xlu0 %72  }
  0x96   :  { %163 = vst.msk [vmem:[%s305_s1 + $0x22] ss:$-24 sm:$0x3] %vm15_vm0, %v73_v37  }
  0x9c   :  { %v101_v38 = vpop.permute.xlu1 %100  }
  0x9d   :  { %167 = vst.msk [vmem:[%s305_s1 + $0x24] ss:$-24 sm:$0x3] %vm15_vm0, %v101_v38   ;;  %v93_v39 = vpop.permute.xlu0 %92  }
  0x9e   :  { %166 = vst.msk [vmem:[%s305_s1 + $0x4] ss:$24 sm:$0x3] %vm15_vm0, %v93_v39  }
  0xa4   :  { %v121_v40 = vpop.permute.xlu1 %120  }
  0xa5   :  { %170 = vst.msk [vmem:[%s305_s1 + $0x6] ss:$24 sm:$0x3] %vm15_vm0, %v121_v40   ;;  %v115_v41 = vpop.permute.xlu0 %114  }
  0xa6   :  { %169 = vst.msk [vmem:[%s305_s1 + $0x25] ss:$-24 sm:$0x3] %vm15_vm0, %v115_v41  }

// kernel: cofusion_forward.1
= control target key start
LH: loop header
LB: loop body
LE: loop exit
PB: predicated region body
PF: predicated region fallthrough
CT: control target
= control target key end

     0   :  { %s7964_s25 = smov 0   ;;  %s10741_s0 = inlined_call_operand.vmem [shape: bf16[2,36,384], index: 0, kind: input, shape index: {}]   ;;  %s10742_s1 = inlined_call_operand.vmem [shape: f32[2,4,384], index: 1, kind: input, shape index: {}]   ;;  %s10743_s2 = inlined_call_operand.vmem [shape: f32[1,384], index: 2, kind: input, shape index: {}]   ;;  %s10744_s3 = inlined_call_operand.vmem [shape: bf16[64,36], index: 3, kind: input, shape index: {}]   ;;  %s10745_s4 = inlined_call_operand.vmem [shape: f32[64,1], index: 4, kind: input, shape index: {}]   ;;  %s10746_s5 = inlined_call_operand.vmem [shape: f32[64,1], index: 5, kind: input, shape index: {}]   ;;  %s10747_s6 = inlined_call_operand.vmem [shape: f32[64,1], index: 6, kind: input, shape index: {}]   ;;  %s10748_s7 = inlined_call_operand.vmem [shape: bf16[64,576], index: 7, kind: input, shape index: {}]   ;;  %s10749_s8 = inlined_call_operand.vmem [shape: f32[64,1], index: 8, kind: input, shape index: {}]   ;;  %s10750_s9 = inlined_call_operand.vmem [shape: f32[64,1], index: 9, kind: input, shape index: {}]   ;;  %s10751_s10 = inlined_call_operand.vmem [shape: f32[64,1], index: 10, kind: input, shape index: {}]   ;;  %s10752_s11 = inlined_call_operand.vmem [shape: bf16[4,576], index: 11, kind: input, shape index: {}]   ;;  %s10753_s12 = inlined_call_operand.vmem [shape: f32[4,1], index: 12, kind: input, shape index: {}]   ;;  %s10754_s13 = inlined_call_operand.vmem [shape: f32[2,1,384], index: 13, kind: output, shape index: {}]  }
   0x1 LB: > { %s6554_s26 = sadd.s32 4294967295, %s7883_s25   ;;  %p6558_p0 = scmp.ge.s32.totalorder %s7883_s25, 1  ;;  %s7883_s25 = sphi %s7964_s25, %s23_s25  }
   0x2   : > { %p397_p1 = scmp.lt.s32.totalorder %s7883_s25, 3 }
   0x4   : > { %p398_p2 = pnand %p6558_p0, %p397_p1 }
   0x6   : > { %401 = sbr.rel (%p398_p2) target bundleno = 2314 (0x90a), region = 72 }
   0xb   : > { %v495_v0 = vld [vmem:[%s10745_s4] sm:$0xff]  ;;  %p445_p3 = scmp.lt.s32.totalorder %s6554_s26, 1  ;;  %v7885_v1 = vmov 0   ;;  %v497_v2 = vld [vmem:[%s10745_s4 + $0x10] sm:$0xff]  ;;  %v496_v3 = vld [vmem:[%s10745_s4 + $0x8] sm:$0xff]  ;;  %vm616_vm0 = vcmask 1041408  }
   0xc   : > { %7840 = vset.pattern.permute.xlu0 %v7885_v1  ;;  %460 = vst [vmem:[#allocation2] sm:$0xf] %v7885_v1  ;;  %7841 = vset.pattern.permute.xlu1 %v7885_v1  ;;  %v498_v4 = vld [vmem:[%s10745_s4 + $0x18] sm:$0xff]  ;;  %v501_v24 = vld [vmem:[%s10745_s4 + $0x30] sm:$0xff]  ;;  %v7574_v36 = vld [vmem:[%s10744_s3] sm:$0xff]  ;;  %vm603_vm1 = vcmask 293888  }
   0xd   : > { %461 = vst [vmem:[#allocation2 + $0x14] sm:$0xf] %v7885_v1  ;;  %505 = vperm.xlu0 %7840, %v495_v0   ;;  %s10762_s26 = smov (!%p445_p3, %s6554_s26), 1  ;;  %515 = vperm.xlu1 %7841, %v497_v2   ;;  %v502_v32 = vld [vmem:[%s10745_s4 + $0x38] sm:$0xff]  ;;  %v824_v37 = vld [vmem:[%s10746_s5 + $0x8] sm:$0xff]  ;;  %v841_v38 = vld [vmem:[%s10747_s6] sm:$0xff] }
   0xe   : > { %462 = vst [vmem:[#allocation2 + $0x28] sm:$0xf] %v7885_v1  ;;  %7842 = vset.pattern.permute.xlu2 %v7885_v1  ;;  %s7820_s14 = smul.u32 60, %s10762_s26  ;;  %v499_v39 = vld [vmem:[%s10745_s4 + $0x20] sm:$0xff]  ;;  %v842_v40 = vld [vmem:[%s10747_s6 + $0x8] sm:$0xff]  ;;  %v958_v41 = vld [vmem:[%s10746_s5 + $0x10] sm:$0xff] }
   0xf   : > { %463 = vst [vmem:[#allocation2 + $0x3c] sm:$0xf] %v7885_v1  ;;  %525 = vperm.xlu2 %7842, %v499_v39   ;;  %v7575_v42 = vld [vmem:[%s10744_s3 + $0x8] sm:$0xff]  ;;  %v959_v43 = vld [vmem:[%s10746_s5 + $0x18] sm:$0xff]  ;;  %v1093_v44 = vld [vmem:[%s10746_s5 + $0x20] sm:$0xff]  ;;  %s7886_s29 = smov 19  }
  0x10   : > { %464 = vst [vmem:[#allocation2 + $0x50] sm:$0xf] %v7885_v1  ;;  %s7987_s19 = scalar_lea.vmem %s10741_s0, %s7820_s14  ;;  %v500_v45 = vld [vmem:[%s10745_s4 + $0x28] sm:$0xff]  ;;  %v977_v46 = vld [vmem:[%s10747_s6 + $0x18] sm:$0xff]  ;;  %v823_v47 = vld [vmem:[%s10746_s5] sm:$0xff]  ;;  %s7887_s30 = smov 18  }
  0x11   : > { %465 = vst [vmem:[#allocation2 + $0x64] sm:$0xf] %v7885_v1  ;;  %v493_v5 = vld [vmem:[%s7987_s19 + $0x30] sm:$0x33]  ;;  %v494_v6 = vld [vmem:[%s7987_s19 + $0x38] sm:$0x3] }
  0x12   : > { %466 = vst [vmem:[#allocation2 + $0x78] sm:$0xf] %v7885_v1  ;;  %v585_v7 = vunpack.c.l.b16 %v493_v5  ;;  %v586_v8 = vunpack.c.h.b16 %v493_v5  ;;  %v587_v9 = vunpack.c.l.b16 %v494_v6  ;;  %v6591_v10 = vld [vmem:[%s7987_s19 + $0x18] sm:$0xf]  ;;  %v7582_v11 = vld [vmem:[%s7987_s19 + $0x20] sm:$0xf0] }
  0x13   : > { %467 = vst [vmem:[#allocation2 + $0x8c] sm:$0xf] %v7885_v1  ;;  %v7581_v15 = vld [vmem:[%s7987_s19 + $0x1c] sm:$0xf]  ;;  %v6593_v16 = vld [vmem:[%s7987_s19 + $0x24] sm:$0xf0]  ;;  %v6592_v22 = vor.u32 %v7582_v11, %v6591_v10 }
  0x14   : > { %468 = vst [vmem:[#allocation2 + $0x10] sm:$0xf] %v7885_v1  ;;  %v594_v12 = vpack.c.b16 %v585_v7, %v585_v7  ;;  %v595_v13 = vpack.c.b16 %v586_v8, %v586_v8  ;;  %v596_v14 = vpack.c.b16 %v587_v9, %v587_v9  ;;  %v6599_v17 = vld [vmem:[%s7987_s19 + $0x20] sm:$0xf]  ;;  %v7583_v18 = vld [vmem:[%s7987_s19 + $0x28] sm:$0xf0]  ;;  %v6596_v23 = vor.u32 %v7581_v15, %v6593_v16 }
  0x15   : > { %469 = vst [vmem:[#allocation2 + $0x24] sm:$0xf] %v7885_v1  ;;  %510 = vperm.xlu0 %7840, %v496_v3   ;;  %520 = vperm.xlu1 %7841, %v498_v4   ;;  %v6579_v25 = vld [vmem:[%s7987_s19] sm:$0xf]  ;;  %v7579_v26 = vld [vmem:[%s7987_s19 + $0x8] sm:$0xf0]  ;;  %v6600_v27 = vor.u32 %v7583_v18, %v6599_v17 }
  0x16   : > { %470 = vst [vmem:[#allocation2 + $0x38] sm:$0xf] %v7885_v1  ;;  %v618_v19 = vsel %vm616_vm0, %v594_v12, 0  ;;  %v621_v20 = vsel %vm616_vm0, %v595_v13, 0  ;;  %v624_v21 = vsel %vm616_vm0, %v596_v14, 0  ;;  %v6580_v33 = vor.u32 %v7579_v26, %v6579_v25  ;;  %v1112_v48 = vld [vmem:[%s10747_s6 + $0x28] sm:$0xff] }
  0x17   : > { %471 = vst [vmem:[#allocation2 + $0x4c] sm:$0xf] %v7885_v1  ;;  %631 = vmatpush.bf16.msra.mxu0 %v618_v19  ;;  %660 = vmatpush.bf16.msra.mxu1 %v621_v20  ;;  %v7578_v28 = vld [vmem:[%s7987_s19 + $0x4] sm:$0xf]  ;;  %v6581_v29 = vld [vmem:[%s7987_s19 + $0xc] sm:$0xf0] }
  0x18   : > { %472 = vst [vmem:[#allocation2 + $0x60] sm:$0xf] %v7885_v1  ;;  %689 = vmatpush.bf16.msra.mxu2 %v624_v21  ;;  %v6587_v30 = vld [vmem:[%s7987_s19 + $0x8] sm:$0xf]  ;;  %v7580_v31 = vld [vmem:[%s7987_s19 + $0x10] sm:$0xf0]  ;;  %v6584_v34 = vor.u32 %v7578_v28, %v6581_v29  ;;  %530 = vperm.xlu2 %7842, %v500_v45  }
  0x19   : > { %473 = vst [vmem:[#allocation2 + $0x74] sm:$0xf] %v7885_v1  ;;  %v6588_v35 = vor.u32 %v7580_v31, %v6587_v30  ;;  %v7576_v49 = vld [vmem:[%s10744_s3 + $0x10] sm:$0xff]  ;;  %v1111_v50 = vld [vmem:[%s10747_s6 + $0x20] sm:$0xff]  ;;  %v1094_v53 = vld [vmem:[%s10746_s5 + $0x28] sm:$0xff]  ;;  %s7888_s14 = smov 1  }
  0x1a   : > { %474 = vst [vmem:[#allocation2 + $0x88] sm:$0xf] %v7885_v1  ;;  %v976_v51 = vld [vmem:[%s10747_s6 + $0x10] sm:$0xff]  ;;  %v1229_v54 = vld [vmem:[%s10746_s5 + $0x38] sm:$0xff]  ;;  %v476_v56 = vld [vmem:[%s10743_s2] sm:$0x7] }
  0x1b   : > { %475 = vst [vmem:[#allocation2 + $0x9c] sm:$0xf] %v7885_v1  ;;  %632 = vmatpush.bf16.msra.mxu0 %v6592_v22  ;;  %661 = vmatpush.bf16.msra.mxu1 %v6596_v23  ;;  %v1228_v52 = vld [vmem:[%s10746_s5 + $0x30] sm:$0xff]  ;;  %v7577_v55 = vld [vmem:[%s10744_s3 + $0x18] sm:$0xff]  ;;  %v8090_v59 = vperm.slane %v476_v56, 0  ;;  %v8092_v61 = vperm.slane %v476_v56, 1 }
  0x1c   : > { %690 = vmatpush.bf16.msra.mxu2 %v6600_v27  ;;  %v8102_v2 = vperm.slane %v476_v56, 2  ;;  %s7889_s15 = smov 127   ;;  %s7890_s16 = smov 17   ;;  %vm1503_vm14 = vcmask 146432   ;;  %vm1366_vm15 = vcmask 154624  }
  0x1d   : > { %535 = vperm.xlu0 %7840, %v501_v24   ;;  %540 = vperm.xlu1 %7841, %v502_v32   ;;  %s7891_s17 = smov 110   ;;  %s10755_s18 = smov 111  }
  0x1e   : > { %s7893_s19 = smov 109   ;;  %s10760_s28 = smov 111  }
  0x1f   : > { %633 = vmatpush.bf16.msra.mxu0 %v6580_v33  ;;  %662 = vmatpush.bf16.msra.mxu1 %v6584_v34 }
  0x20   : > { %691 = vmatpush.bf16.msra.mxu2 %v6588_v35  ;;  %827 = vperm.xlu2 %7842, %v823_v47  }
  0x22   : > { %6601 = vmatmul.msk.bf16.vlgmr.msra.gmra.mxu0 %vm603_vm1, %v7574_v36  ;;  %6605 = vmatmul.msk.bf16.vlgmr.msra.gmra.mxu1 %vm603_vm1, %v7574_v36 }
  0x23   : > { %6609 = vmatmul.msk.bf16.vlgmr.msra.gmra.mxu2 %vm603_vm1, %v7574_v36 }
  0x25   : > { %832 = vperm.xlu0 %7840, %v824_v37   ;;  %845 = vperm.xlu1 %7841, %v841_v38  }
  0x28   : > { %980 = vperm.xlu2 %7842, %v976_v51  }
  0x2d   : > { %850 = vperm.xlu0 %7840, %v842_v40   ;;  %962 = vperm.xlu1 %7841, %v958_v41  }
  0x30   : > { %1102 = vperm.xlu2 %7842, %v1094_v53  }
  0x32   : > { %6602 = vmatmul.msk.bf16.gmra.mxu0 %vm603_vm1, %v7575_v42  ;;  %6606 = vmatmul.msk.bf16.gmra.mxu1 %vm603_vm1, %v7575_v42 }
  0x33   : > { %6610 = vmatmul.msk.bf16.gmra.mxu2 %vm603_vm1, %v7575_v42 }
  0x35   : > { %967 = vperm.xlu0 %7840, %v959_v43   ;;  %1097 = vperm.xlu1 %7841, %v1093_v44  }
  0x3d   : > { %985 = vperm.xlu0 %7840, %v977_v46   ;;  %1120 = vperm.xlu1 %7841, %v1112_v48  }
  0x42   : > { %6603 = vmatmul.msk.bf16.gmra.mxu0 %vm603_vm1, %v7576_v49  ;;  %6607 = vmatmul.msk.bf16.gmra.mxu1 %vm603_vm1, %v7576_v49 }
  0x43   : > { %6611 = vmatmul.msk.bf16.gmra.mxu2 %vm603_vm1, %v7576_v49 }
  0x45   : > { %1115 = vperm.xlu0 %7840, %v1111_v50   ;;  %1232 = vperm.xlu1 %7841, %v1228_v52  }
  0x4d   : > { %1237 = vperm.xlu1 %7841, %v1229_v54  }
  0x52   : > { %6604 = vmatmul.msk.bf16.gmra.mxu0 %vm603_vm1, %v7577_v55  ;;  %6608 = vmatmul.msk.bf16.gmra.mxu1 %vm603_vm1, %v7577_v55 }
  0x53   : > { %6612 = vmatmul.msk.bf16.gmra.mxu2 %vm603_vm1, %v7577_v55  ;;  %vm1364_vm1 = vcmask 1043456  }
  0x69   : > { %v526_v39 = vpop.permute.xlu2 %525 }
  0x72   : > { %v531_v56 = vpop.permute.xlu2 %530 }
  0x7f   : > { %v506_v57 = vpop.permute.xlu0 %505  ;;  %v516_v13 = vpop.permute.xlu1 %515 }
  0x87   : > { %v511_v8 = vpop.permute.xlu0 %510  ;;  %v521_v27 = vpop.permute.xlu1 %520 }
  0x9f   : > { %v635_v58 = vpop.f32.mrf.mxu0  ;;  %v664_v60 = vpop.f32.mrf.mxu1 }
  0xa0   : > { %v8094_v62 = vadd.f32 %v635_v58, %v506_v57  ;;  %v8096_v63 = vadd.f32 %v664_v60, %v506_v57 }
  0xa2   : > { %v750_v0 = vmul.f32 %v8090_v59, %v8094_v62  ;;  %v751_v1 = vmul.f32 %v8092_v61, %v8096_v63 }
  0xa4   : > { %v756_v7 = vadd.f32 %v751_v1, %v750_v0 }
  0xa6   : > { %v693_v3 = vpop.f32.mrf.mxu2 }
  0xa7   : > { %v8104_v4 = vadd.f32 %v693_v3, %v506_v57  ;;  %v637_v5 = vpop.f32.mrf.mxu0  ;;  %v666_v6 = vpop.f32.mrf.mxu1 }
  0xa8   : > { %v8108_v10 = vadd.f32 %v637_v5, %v511_v8  ;;  %v8110_v11 = vadd.f32 %v666_v6, %v511_v8 }
  0xa9   : > { %v752_v9 = vmul.f32 %v8102_v2, %v8104_v4 }
  0xaa   : > { %v753_v14 = vmul.f32 %v8090_v59, %v8108_v10  ;;  %v754_v15 = vmul.f32 %v8092_v61, %v8110_v11 }
  0xab   : > { %v757_v12 = vadd.f32 %v756_v7, %v752_v9  ;;  %v536_v9 = vpop.permute.xlu0 %535 }
  0xac   : > { %v760_v23 = vadd.f32 %v754_v15, %v753_v14 }
  0xad   : > { %758 = vadd.xlane.f32.xlu2 %v757_v12 }
  0xae   : > { %v695_v16 = vpop.f32.mrf.mxu2 }
  0xaf   : > { %v8116_v17 = vadd.f32 %v695_v16, %v511_v8  ;;  %v640_v18 = vpop.f32.mrf.mxu0  ;;  %v669_v19 = vpop.f32.mrf.mxu1 }
  0xb0   : > { %v8118_v20 = vadd.f32 %v640_v18, %v516_v13  ;;  %v8120_v21 = vadd.f32 %v669_v19, %v516_v13 }
  0xb1   : > { %v755_v22 = vmul.f32 %v8102_v2, %v8116_v17 }
  0xb2   : > { %v885_v24 = vmul.f32 %v8090_v59, %v8118_v20  ;;  %v886_v25 = vmul.f32 %v8092_v61, %v8120_v21 }
  0xb3   : > { %v761_v26 = vadd.f32 %v760_v23, %v755_v22 }
  0xb4   : > { %v891_v32 = vadd.f32 %v886_v25, %v885_v24 }
  0xb5   : > { %762 = vadd.xlane.f32.xlu0 %v761_v26  ;;  %v541_v26 = vpop.permute.xlu1 %540 }
  0xb6   : > { %v698_v28 = vpop.f32.mrf.mxu2 }
  0xb7   : > { %v8128_v29 = vadd.f32 %v698_v28, %v516_v13  ;;  %v642_v30 = vpop.f32.mrf.mxu0  ;;  %v671_v31 = vpop.f32.mrf.mxu1 }
  0xb8   : > { %v8130_v33 = vadd.f32 %v642_v30, %v521_v27  ;;  %v8132_v34 = vadd.f32 %v671_v31, %v521_v27 }
  0xb9   : > { %v887_v35 = vmul.f32 %v8102_v2, %v8128_v29 }
  0xba   : > { %v888_v36 = vmul.f32 %v8090_v59, %v8130_v33  ;;  %v889_v37 = vmul.f32 %v8092_v61, %v8132_v34 }
  0xbb   : > { %v892_v38 = vadd.f32 %v891_v32, %v887_v35 }
  0xbc   : > { %v895_v44 = vadd.f32 %v889_v37, %v888_v36 }
  0xbd   : > { %893 = vadd.xlane.f32.xlu2 %v892_v38 }
  0xbe   : > { %v700_v40 = vpop.f32.mrf.mxu2 }
  0xbf   : > { %v8140_v41 = vadd.f32 %v700_v40, %v521_v27  ;;  %v645_v42 = vpop.f32.mrf.mxu0  ;;  %v674_v43 = vpop.f32.mrf.mxu1 }
  0xc0   : > { %v8142_v45 = vadd.f32 %v645_v42, %v526_v39  ;;  %v8144_v46 = vadd.f32 %v674_v43, %v526_v39  ;;  %v1246_v43 = vld [vmem:[%s10747_s6 + $0x30] sm:$0xff] }
  0xc1   : > { %v890_v47 = vmul.f32 %v8102_v2, %v8140_v41 }
  0xc2   : > { %v1020_v48 = vmul.f32 %v8090_v59, %v8142_v45  ;;  %v1021_v49 = vmul.f32 %v8092_v61, %v8144_v46 }
  0xc3   : > { %v896_v50 = vadd.f32 %v895_v44, %v890_v47  ;;  %v8195_v44 = vpop.permute.xlu0 %832  ;;  %v1247_v47 = vld [vmem:[%s10747_s6 + $0x38] sm:$0xff] }
  0xc4   : > { %v1026_v55 = vadd.f32 %v1021_v49, %v1020_v48  ;;  %v8200_v48 = vpop.permute.xlu1 %845 }
  0xc5   : > { %897 = vadd.xlane.f32.xlu1 %v896_v50 }
  0xc6   : > { %v703_v51 = vpop.f32.mrf.mxu2 }
  0xc7   : > { %v8152_v52 = vadd.f32 %v703_v51, %v526_v39  ;;  %v647_v53 = vpop.f32.mrf.mxu0  ;;  %v676_v54 = vpop.f32.mrf.mxu1 }
  0xc8   : > { %v8156_v58 = vadd.f32 %v647_v53, %v531_v56  ;;  %v8158_v60 = vadd.f32 %v676_v54, %v531_v56  ;;  %v8208_v53 = vpop.permute.xlu2 %827 }
  0xc9   : > { %v1022_v57 = vmul.f32 %v8102_v2, %v8152_v52 }
  0xca   : > { %v1023_v1 = vmul.f32 %v8090_v59, %v8156_v58  ;;  %v1024_v3 = vmul.f32 %v8092_v61, %v8158_v60 }
  0xcb   : > { %v1027_v0 = vadd.f32 %v1026_v55, %v1022_v57  ;;  %v8202_v49 = vpop.permute.xlu0 %850 }
  0xcc   : > { %v1030_v15 = vadd.f32 %v1024_v3, %v1023_v1  ;;  %v8204_v50 = vpop.permute.xlu1 %962 }
  0xcd   : > { %1028 = vadd.xlane.f32.xlu0 %v1027_v0 }
  0xce   : > { %v705_v5 = vpop.f32.mrf.mxu2 }
  0xcf   : > { %v8164_v6 = vadd.f32 %v705_v5, %v531_v56  ;;  %v650_v7 = vpop.f32.mrf.mxu0  ;;  %v679_v8 = vpop.f32.mrf.mxu1 }
  0xd0   : > { %v8166_v12 = vadd.f32 %v650_v7, %v536_v9  ;;  %v8168_v13 = vadd.f32 %v679_v8, %v536_v9  ;;  %v8214_v56 = vpop.permute.xlu2 %980 }
  0xd1   : > { %v1025_v14 = vmul.f32 %v8102_v2, %v8164_v6 }
  0xd2   : > { %v1155_v18 = vmul.f32 %v8090_v59, %v8166_v12  ;;  %v1156_v19 = vmul.f32 %v8092_v61, %v8168_v13 }
  0xd3   : > { %v1031_v16 = vadd.f32 %v1030_v15, %v1025_v14  ;;  %v8206_v51 = vpop.permute.xlu0 %967 }
  0xd4   : > { %v1161_v31 = vadd.f32 %v1156_v19, %v1155_v18  ;;  %v8210_v54 = vpop.permute.xlu1 %1097 }
  0xd5   : > { %1032 = vadd.xlane.f32.xlu1 %v1031_v16 }
  0xd6   : > { %v708_v22 = vpop.f32.mrf.mxu2 }
  0xd7   : > { %v8176_v23 = vadd.f32 %v708_v22, %v536_v9  ;;  %v652_v24 = vpop.f32.mrf.mxu0  ;;  %v681_v25 = vpop.f32.mrf.mxu1 }
  0xd8   : > { %v8180_v28 = vadd.f32 %v652_v24, %v541_v26  ;;  %v8182_v30 = vadd.f32 %v681_v25, %v541_v26  ;;  %v8220_v1 = vpop.permute.xlu2 %1102 }
  0xd9   : > { %v1157_v27 = vmul.f32 %v8102_v2, %v8176_v23 }
  0xda   : > { %v1158_v35 = vmul.f32 %v8090_v59, %v8180_v28  ;;  %v1159_v36 = vmul.f32 %v8092_v61, %v8182_v30 }
  0xdb   : > { %v1162_v32 = vadd.f32 %v1161_v31, %v1157_v27  ;;  %v8212_v55 = vpop.permute.xlu0 %985 }
  0xdc   : > { %v1165_v40 = vadd.f32 %v1159_v36, %v1158_v35  ;;  %v8216_v57 = vpop.permute.xlu1 %1120 }
  0xdd   : > { %1163 = vadd.xlane.f32.xlu1 %v1162_v32 }
  0xde   : > { %v710_v37 = vpop.f32.mrf.mxu2 }
  0xdf   : > { %v8188_v38 = vadd.f32 %v710_v37, %v541_v26 }
  0xe1   : > { %v1160_v39 = vmul.f32 %v8102_v2, %v8188_v38 }
  0xe3   : > { %v1166_v42 = vadd.f32 %v1165_v40, %v1160_v39  ;;  %v8218_v0 = vpop.permute.xlu0 %1115 }
  0xe4   : > { %v8222_v3 = vpop.permute.xlu1 %1232 }
  0xe5   : > { %1167 = vadd.xlane.f32.xlu2 %v1166_v42 }
  0xec   : > { %v8224_v16 = vpop.permute.xlu1 %1237 }
  0xf6   : > { %1250 = vperm.xlu1 %7841, %v1246_v43  }
  0xfe   : > { %1255 = vperm.xlu1 %7841, %v1247_v47  }
 0x120   : > { %v759_v5 = vpop.xlane.xlu2 %758 }
 0x128   : > { %v763_v7 = vpop.xlane.xlu0 %762 }
 0x129   : > { %v764_v8 = vadd.f32 %v763_v7, %v759_v5 }
 0x12b   : > { %v765_v9 = vrot.slane %v764_v8, 4 }
 0x12d   : > { %v766_v14 = vadd.f32 %v765_v9, %v764_v8 }
 0x12f   : > { %v767_v15 = vrot.slane %v766_v14, 2 }
 0x130   : > { %v894_v24 = vpop.xlane.xlu2 %893 }
 0x131   : > { %v768_v18 = vadd.f32 %v767_v15, %v766_v14 }
 0x133   : > { %v769_v19 = vrot.slane %v768_v18, 1 }
 0x135   : > { %v770_v22 = vadd.f32 %v769_v19, %v768_v18 }
 0x137   : > { %v771_v25 = vmul.f32 0.00024414063, %v770_v22 }
 0x138   : > { %v898_v26 = vpop.xlane.xlu1 %897 }
 0x139   : > { %v899_v27 = vadd.f32 %v898_v26, %v894_v24  ;;  %v775_v31 = vsub.f32 %v8108_v10, %v771_v25  ;;  %v776_v32 = vsub.f32 %v8110_v11, %v771_v25  ;;  %v777_v35 = vsub.f32 %v8116_v17, %v771_v25 }
 0x13a   : > { %v772_v36 = vsub.f32 %v8094_v62, %v771_v25  ;;  %v773_v37 = vsub.f32 %v8096_v63, %v771_v25  ;;  %v774_v39 = vsub.f32 %v8104_v4, %v771_v25 }
 0x13b   : > { %v900_v40 = vrot.slane %v899_v27, 4  ;;  %v8233_v42 = vmul.f32 %v775_v31, %v8090_v59  ;;  %v8236_v43 = vmul.f32 %v776_v32, %v8092_v61  ;;  %v8239_v47 = vmul.f32 %v777_v35, %v8102_v2 }
 0x13c   : > { %v8242_v10 = vmul.f32 %v772_v36, %v8090_v59  ;;  %v8245_v11 = vmul.f32 %v773_v37, %v8092_v61  ;;  %v8248_v62 = vmul.f32 %v774_v39, %v8102_v2 }
 0x13d   : > { %v901_v63 = vadd.f32 %v900_v40, %v899_v27  ;;  %v787_v4 = vmul.f32 %v8233_v42, %v8233_v42  ;;  %v788_v17 = vmul.f32 %v8236_v43, %v8236_v43  ;;  %v789_v9 = vmul.f32 %v8239_v47, %v8239_v47 }
 0x13e   : > { %v784_v5 = vmul.f32 %v8242_v10, %v8242_v10  ;;  %v785_v7 = vmul.f32 %v8245_v11, %v8245_v11  ;;  %v786_v15 = vmul.f32 %v8248_v62, %v8248_v62 }
 0x13f   : > { %v902_v8 = vrot.slane %v901_v63, 2  ;;  %v794_v14 = vadd.f32 %v788_v17, %v787_v4 }
 0x140   : > { %v790_v18 = vadd.f32 %v785_v7, %v784_v5  ;;  %v1029_v31 = vpop.xlane.xlu0 %1028 }
 0x141   : > { %v903_v19 = vadd.f32 %v902_v8, %v901_v63  ;;  %v795_v22 = vadd.f32 %v794_v14, %v789_v9 }
 0x142   : > { %v791_v24 = vadd.f32 %v790_v18, %v786_v15 }
 0x143   : > { %v904_v25 = vrot.slane %v903_v19, 1  ;;  %796 = vadd.xlane.f32.xlu2 %v795_v22 }
 0x144   : > { %792 = vadd.xlane.f32.xlu1 %v791_v24 }
 0x145   : > { %v905_v26 = vadd.f32 %v904_v25, %v903_v19 }
 0x147   : > { %v906_v27 = vmul.f32 0.00024414063, %v905_v26 }
 0x148   : > { %v1033_v32 = vpop.xlane.xlu1 %1032 }
 0x149   : > { %v1034_v35 = vadd.f32 %v1033_v32, %v1029_v31  ;;  %v910_v36 = vsub.f32 %v8130_v33, %v906_v27  ;;  %v911_v37 = vsub.f32 %v8132_v34, %v906_v27  ;;  %v912_v39 = vsub.f32 %v8140_v41, %v906_v27 }
 0x14a   : > { %v907_v40 = vsub.f32 %v8118_v20, %v906_v27  ;;  %v908_v63 = vsub.f32 %v8120_v21, %v906_v27  ;;  %v909_v4 = vsub.f32 %v8128_v29, %v906_v27 }
 0x14b   : > { %v1035_v17 = vrot.slane %v1034_v35, 4  ;;  %v8269_v5 = vmul.f32 %v910_v36, %v8090_v59  ;;  %v8272_v7 = vmul.f32 %v911_v37, %v8092_v61  ;;  %v8275_v8 = vmul.f32 %v912_v39, %v8102_v2 }
 0x14c   : > { %v8278_v33 = vmul.f32 %v907_v40, %v8090_v59  ;;  %v8281_v34 = vmul.f32 %v908_v63, %v8092_v61  ;;  %v8284_v20 = vmul.f32 %v909_v4, %v8102_v2 }
 0x14d   : > { %v1036_v21 = vadd.f32 %v1035_v17, %v1034_v35  ;;  %v922_v29 = vmul.f32 %v8269_v5, %v8269_v5  ;;  %v923_v41 = vmul.f32 %v8272_v7, %v8272_v7  ;;  %v924_v18 = vmul.f32 %v8275_v8, %v8275_v8 }
 0x14e   : > { %v919_v9 = vmul.f32 %v8278_v33, %v8278_v33  ;;  %v920_v14 = vmul.f32 %v8281_v34, %v8281_v34  ;;  %v921_v22 = vmul.f32 %v8284_v20, %v8284_v20 }
 0x14f   : > { %v1037_v15 = vrot.slane %v1036_v21, 2  ;;  %v929_v19 = vadd.f32 %v923_v41, %v922_v29 }
 0x150   : > { %v925_v24 = vadd.f32 %v920_v14, %v919_v9  ;;  %v1164_v36 = vpop.xlane.xlu1 %1163 }
 0x151   : > { %v1038_v25 = vadd.f32 %v1037_v15, %v1036_v21  ;;  %v930_v26 = vadd.f32 %v929_v19, %v924_v18 }
 0x152   : > { %v926_v27 = vadd.f32 %v925_v24, %v921_v22 }
 0x153   : > { %v1039_v31 = vrot.slane %v1038_v25, 1  ;;  %931 = vadd.xlane.f32.xlu2 %v930_v26 }
 0x154   : > { %927 = vadd.xlane.f32.xlu0 %v926_v27 }
 0x155   : > { %v1040_v32 = vadd.f32 %v1039_v31, %v1038_v25 }
 0x157   : > { %v1041_v35 = vmul.f32 0.00024414063, %v1040_v32 }
 0x158   : > { %v1168_v37 = vpop.xlane.xlu2 %1167 }
 0x159   : > { %v1169_v39 = vadd.f32 %v1168_v37, %v1164_v36  ;;  %v1042_v40 = vsub.f32 %v8142_v45, %v1041_v35  ;;  %v1043_v63 = vsub.f32 %v8144_v46, %v1041_v35  ;;  %v1044_v4 = vsub.f32 %v8152_v52, %v1041_v35 }
 0x15a   : > { %v1045_v17 = vsub.f32 %v8156_v58, %v1041_v35  ;;  %v1046_v21 = vsub.f32 %v8158_v60, %v1041_v35  ;;  %v1047_v29 = vsub.f32 %v8164_v6, %v1041_v35 }
 0x15b   : > { %v1170_v41 = vrot.slane %v1169_v39, 4  ;;  %v8305_v9 = vmul.f32 %v1042_v40, %v8090_v59  ;;  %v8308_v14 = vmul.f32 %v1043_v63, %v8092_v61  ;;  %v8311_v15 = vmul.f32 %v1044_v4, %v8102_v2 }
 0x15c   : > { %v8314_v45 = vmul.f32 %v1045_v17, %v8090_v59  ;;  %v8317_v46 = vmul.f32 %v1046_v21, %v8092_v61  ;;  %v8320_v52 = vmul.f32 %v1047_v29, %v8102_v2 }
 0x15d   : > { %v1171_v58 = vadd.f32 %v1170_v41, %v1169_v39  ;;  %v1054_v60 = vmul.f32 %v8305_v9, %v8305_v9  ;;  %v1055_v6 = vmul.f32 %v8308_v14, %v8308_v14  ;;  %v1056_v24 = vmul.f32 %v8311_v15, %v8311_v15 }
 0x15e   : > { %v1057_v18 = vmul.f32 %v8314_v45, %v8314_v45  ;;  %v1058_v19 = vmul.f32 %v8317_v46, %v8317_v46  ;;  %v1059_v26 = vmul.f32 %v8320_v52, %v8320_v52 }
 0x15f   : > { %v1172_v22 = vrot.slane %v1171_v58, 2  ;;  %v1060_v25 = vadd.f32 %v1055_v6, %v1054_v60 }
 0x160   : > { %v1064_v27 = vadd.f32 %v1058_v19, %v1057_v18 }
 0x161   : > { %v1173_v31 = vadd.f32 %v1172_v22, %v1171_v58  ;;  %v1061_v32 = vadd.f32 %v1060_v25, %v1056_v24 }
 0x162   : > { %v1065_v35 = vadd.f32 %v1064_v27, %v1059_v26 }
 0x163   : > { %v1174_v36 = vrot.slane %v1173_v31, 1  ;;  %1062 = vadd.xlane.f32.xlu2 %v1061_v32 }
 0x164   : > { %1066 = vadd.xlane.f32.xlu0 %v1065_v35 }
 0x165   : > { %v1175_v37 = vadd.f32 %v1174_v36, %v1173_v31 }
 0x167   : > { %v1176_v39 = vmul.f32 0.00024414063, %v1175_v37 }
 0x168   : > { %v8370_v27 = vpop.permute.xlu1 %1250 }
 0x169   : > { %v1180_v40 = vsub.f32 %v8180_v28, %v1176_v39  ;;  %v1181_v63 = vsub.f32 %v8182_v30, %v1176_v39  ;;  %v1182_v4 = vsub.f32 %v8188_v38, %v1176_v39  ;;  %v1177_v17 = vsub.f32 %v8166_v12, %v1176_v39 }
 0x16a   : > { %v1178_v21 = vsub.f32 %v8168_v13, %v1176_v39  ;;  %v1179_v29 = vsub.f32 %v8176_v23, %v1176_v39 }
 0x16b   : > { %v8341_v41 = vmul.f32 %v1180_v40, %v8090_v59  ;;  %v8344_v58 = vmul.f32 %v1181_v63, %v8092_v61  ;;  %v8347_v60 = vmul.f32 %v1182_v4, %v8102_v2  ;;  %v8350_v28 = vmul.f32 %v1177_v17, %v8090_v59 }
 0x16c   : > { %v8353_v30 = vmul.f32 %v1178_v21, %v8092_v61  ;;  %v8356_v12 = vmul.f32 %v1179_v29, %v8102_v2 }
 0x16d   : > { %v1192_v13 = vmul.f32 %v8341_v41, %v8341_v41  ;;  %v1193_v23 = vmul.f32 %v8344_v58, %v8344_v58  ;;  %v1189_v38 = vmul.f32 %v8350_v28, %v8350_v28  ;;  %v1194_v18 = vmul.f32 %v8347_v60, %v8347_v60 }
 0x16e   : > { %v1190_v6 = vmul.f32 %v8353_v30, %v8353_v30  ;;  %v1191_v22 = vmul.f32 %v8356_v12, %v8356_v12 }
 0x16f   : > { %v1199_v19 = vadd.f32 %v1193_v23, %v1192_v13 }
 0x170   : > { %v1195_v24 = vadd.f32 %v1190_v6, %v1189_v38  ;;  %v8372_v31 = vpop.permute.xlu1 %1255 }
 0x171   : > { %v1200_v25 = vadd.f32 %v1199_v19, %v1194_v18 }
 0x172   : > { %v1196_v26 = vadd.f32 %v1195_v24, %v1191_v22 }
 0x173   : > { %1201 = vadd.xlane.f32.xlu2 %v1200_v25 }
 0x174   : > { %1197 = vadd.xlane.f32.xlu0 %v1196_v26 }
 0x1b6   : > { %v797_v32 = vpop.xlane.xlu2 %796 }
 0x1b7   : > { %v793_v35 = vpop.xlane.xlu1 %792 }
 0x1b8   : > { %v798_v36 = vadd.f32 %v797_v32, %v793_v35 }
 0x1ba   : > { %v799_v37 = vrot.slane %v798_v36, 4 }
 0x1bc   : > { %v800_v39 = vadd.f32 %v799_v37, %v798_v36 }
 0x1be   : > { %v801_v40 = vrot.slane %v800_v39, 2 }
 0x1c0   : > { %v802_v63 = vadd.f32 %v801_v40, %v800_v39 }
 0x1c2   : > { %v803_v4 = vrot.slane %v802_v63, 1 }
 0x1c4   : > { %v804_v17 = vadd.f32 %v803_v4, %v802_v63 }
 0x1c6   : > { %v805_v21 = vmul.f32 0.00024414063, %v804_v17  ;;  %v932_v29 = vpop.xlane.xlu2 %931 }
 0x1c7   : > { %v928_v13 = vpop.xlane.xlu0 %927 }
 0x1c8   : > { %v806_v23 = vadd.f32 1e-05, %v805_v21  ;;  %v933_v38 = vadd.f32 %v932_v29, %v928_v13 }
 0x1ca   : > { %7843 = vrsqrt.f32 %v806_v23  ;;  %v934_v6 = vrot.slane %v933_v38, 4  ;;  %vm813_vm3 = vweird.f32 %v806_v23 }
 0x1cc   : > { %v935_v18 = vadd.f32 %v934_v6, %v933_v38 }
 0x1ce   : > { %v936_v19 = vrot.slane %v935_v18, 2 }
 0x1d0   : > { %v7844_v22 = vpop.eup %7843  ;;  %v937_v24 = vadd.f32 %v936_v19, %v935_v18 }
 0x1d1   : > { %v808_v25 = vmul.f32 %v7844_v22, %v806_v23  ;;  %vm814_vm2 = vweird.f32 %v7844_v22 }
 0x1d2   : > { %v938_v26 = vrot.slane %v937_v24, 1  ;;  %vm815_vm4 = vmor %vm813_vm3, %vm814_vm2  ;;  %vm1946_vm2 = vcmask 1039360   ;;  %vm1640_vm3 = vcmask 138240  }
 0x1d3   : > { %v809_v32 = vmul.f32 %v7844_v22, %v808_v25 }
 0x1d4   : > { %v939_v35 = vadd.f32 %v938_v26, %v937_v24 }
 0x1d5   : > { %v810_v36 = vmul.f32 0.5, %v809_v32 }
 0x1d6   : > { %v940_v37 = vmul.f32 0.00024414063, %v939_v35  ;;  %v1063_v39 = vpop.xlane.xlu2 %1062 }
 0x1d7   : > { %v811_v40 = vsub.f32 1.5, %v810_v36  ;;  %v1067_v63 = vpop.xlane.xlu0 %1066 }
 0x1d8   : > { %v941_v4 = vadd.f32 1e-05, %v940_v37  ;;  %v1068_v17 = vadd.f32 %v1067_v63, %v1063_v39 }
 0x1d9   : > { %v812_v21 = vmul.f32 %v7844_v22, %v811_v40 }
 0x1da   : > { %7845 = vrsqrt.f32 %v941_v4  ;;  %v1069_v29 = vrot.slane %v1068_v17, 4  ;;  %vm948_vm6 = vweird.f32 %v941_v4 }
 0x1db   : > { %v816_v13 = vsel %vm815_vm4, %v7844_v22, %v812_v21  ;;  %vm1777_vm4 = vcmask 7168  }
 0x1dc   : > { %v817_v38 = vmul.f32 %v816_v13, %v8242_v10  ;;  %v818_v6 = vmul.f32 %v816_v13, %v8245_v11  ;;  %v819_v18 = vmul.f32 %v816_v13, %v8248_v62  ;;  %v820_v19 = vmul.f32 %v816_v13, %v8233_v42 }
 0x1dd   : > { %v821_v24 = vmul.f32 %v816_v13, %v8236_v43  ;;  %v822_v25 = vmul.f32 %v816_v13, %v8239_v47  ;;  %v1070_v26 = vadd.f32 %v1069_v29, %v1068_v17 }
 0x1de   : > { %v835_v32 = vmul.f32 %v8208_v53, %v817_v38  ;;  %v836_v23 = vmul.f32 %v8208_v53, %v818_v6  ;;  %v837_v35 = vmul.f32 %v8208_v53, %v819_v18  ;;  %v838_v22 = vmul.f32 %v8195_v44, %v820_v19 }
 0x1df   : > { %v839_v10 = vmul.f32 %v8195_v44, %v821_v24  ;;  %v840_v11 = vmul.f32 %v8195_v44, %v822_v25  ;;  %v1071_v62 = vrot.slane %v1070_v26, 2 }
 0x1e0   : > { %v7846_v36 = vpop.eup %7845  ;;  %v853_v42 = vadd.f32 %v8200_v48, %v835_v32  ;;  %v854_v43 = vadd.f32 %v8200_v48, %v836_v23  ;;  %v855_v47 = vadd.f32 %v8200_v48, %v837_v35  ;;  %v856_v37 = vadd.f32 %v8202_v49, %v838_v22 }
 0x1e1   : > { %v857_v39 = vadd.f32 %v8202_v49, %v839_v10  ;;  %v858_v53 = vadd.f32 %v8202_v49, %v840_v11  ;;  %v943_v40 = vmul.f32 %v7846_v36, %v941_v4  ;;  %v1072_v6 = vadd.f32 %v1071_v62, %v1070_v26 }
 0x1e2   : > { %v859_v63 = vmax.f32 %v853_v42, 0.0  ;;  %v860_v17 = vmax.f32 %v854_v43, 0.0  ;;  %v861_v21 = vmax.f32 %v855_v47, 0.0  ;;  %v862_v29 = vmax.f32 %v856_v37, 0.0 }
 0x1e3   : > { %v863_v44 = vmax.f32 %v857_v39, 0.0  ;;  %v864_v13 = vmax.f32 %v858_v53, 0.0  ;;  %v944_v38 = vmul.f32 %v7846_v36, %v943_v40  ;;  %v1073_v23 = vrot.slane %v1072_v6, 1 }
 0x1e4   : > { %v865_v18 = vmul.f32 %v859_v63, %v8090_v59  ;;  %v866_v19 = vmul.f32 %v860_v17, %v8092_v61  ;;  %v867_v48 = vmul.f32 %v861_v21, %v8102_v2  ;;  %v868_v24 = vmul.f32 %v862_v29, %v8090_v59 }
 0x1e5   : > { %v869_v25 = vmul.f32 %v863_v44, %v8092_v61  ;;  %v870_v49 = vmul.f32 %v864_v13, %v8102_v2  ;;  %v945_v32 = vmul.f32 0.5, %v944_v38  ;;  %vm949_vm5 = vweird.f32 %v7846_v36 }
 0x1e6   : > { %v8398_v35 = vpack.c.bf16 %v866_v19, %v865_v18  ;;  %v872_v22 = vpack.c.bf16 %v867_v48, %v867_v48  ;;  %v1202_v10 = vpop.xlane.xlu2 %1201  ;;  %v1074_v42 = vadd.f32 %v1073_v23, %v1072_v6  ;;  %vm950_vm7 = vmor %vm948_vm6, %vm949_vm5  ;;  %vm2220_vm5 = vcmask 900096  }
 0x1e7   : > { %v8400_v26 = vpack.c.bf16 %v869_v25, %v868_v24  ;;  %v874_v11 = vpack.c.bf16 %v870_v49, %v870_v49  ;;  %v946_v62 = vsub.f32 1.5, %v945_v32  ;;  %v1198_v43 = vpop.xlane.xlu0 %1197  ;;  %vm2083_vm6 = vcmask 908288  }
 0x1e8   : > { %876 = vst [vmem:[#allocation2 + $0xc] sm:$0xf] %v872_v22  ;;  %v1203_v47 = vadd.f32 %v1202_v10, %v1198_v43  ;;  %v1075_v39 = vmul.f32 0.00024414063, %v1074_v42 }
 0x1e9   : > { %878 = vst [vmem:[#allocation2 + $0x20] sm:$0xf] %v874_v11  ;;  %v947_v37 = vmul.f32 %v7846_v36, %v946_v62 }
 0x1ea   : > { %875 = vst [vmem:[#allocation2 + $0x4] sm:$0xff] %v8398_v35  ;;  %v8404_v40 = vadd.f32 1e-05, %v1075_v39  ;;  %v1204_v63 = vrot.slane %v1203_v47, 4 }
 0x1eb   : > { %877 = vst [vmem:[#allocation2 + $0x18] sm:$0xff] %v8400_v26  ;;  %v951_v53 = vsel %vm950_vm7, %v7846_v36, %v947_v37  ;;  %vm2357_vm7 = vcmask 891904  }
 0x1ec   : > { %v952_v17 = vmul.f32 %v951_v53, %v8278_v33  ;;  %v953_v21 = vmul.f32 %v951_v53, %v8281_v34  ;;  %v954_v29 = vmul.f32 %v951_v53, %v8284_v20  ;;  %v955_v44 = vmul.f32 %v951_v53, %v8269_v5 }
 0x1ed   : > { %v956_v4 = vmul.f32 %v951_v53, %v8272_v7  ;;  %v957_v13 = vmul.f32 %v951_v53, %v8275_v8  ;;  %7847 = vrsqrt.f32 %v8404_v40  ;;  %v1205_v18 = vadd.f32 %v1204_v63, %v1203_v47 }
 0x1ee   : > { %v970_v38 = vmul.f32 %v8204_v50, %v952_v17  ;;  %v971_v36 = vmul.f32 %v8204_v50, %v953_v21  ;;  %v972_v6 = vmul.f32 %v8204_v50, %v954_v29  ;;  %v973_v33 = vmul.f32 %v8206_v51, %v955_v44 }
 0x1ef   : > { %v974_v34 = vmul.f32 %v8206_v51, %v956_v4  ;;  %v975_v20 = vmul.f32 %v8206_v51, %v957_v13  ;;  %v1834_v5 = vld [vmem:[#allocation2 + $0xc] sm:$0xf]  ;;  %v1206_v49 = vrot.slane %v1205_v18, 2  ;;  %vm1083_vm9 = vweird.f32 %v8404_v40 }
 0x1f0   : > { %v988_v7 = vadd.f32 %v8214_v56, %v970_v38  ;;  %v989_v8 = vadd.f32 %v8214_v56, %v971_v36  ;;  %v990_v19 = vadd.f32 %v8214_v56, %v972_v6  ;;  %v991_v48 = vadd.f32 %v8212_v55, %v973_v33  ;;  %v1836_v24 = vld [vmem:[#allocation2 + $0x20] sm:$0xf]  ;;  %1850 = vst [vmem:[#allocation4 + $0x188] sm:$0xf] %v1834_v5 }
 0x1f1   : > { %v992_v50 = vadd.f32 %v8212_v55, %v974_v34  ;;  %v993_v25 = vadd.f32 %v8212_v55, %v975_v20  ;;  %v8425_v32 = vld [vmem:[#allocation2 + $0x8] sm:$0xff]  ;;  %v8427_v51 = vld [vmem:[#allocation2] sm:$0xff]  ;;  %1852 = vst [vmem:[#allocation4 + $0x194] sm:$0xf] %v1836_v24  ;;  %v1207_v47 = vadd.f32 %v1206_v49, %v1205_v18 }
 0x1f2   : > { %v2276_v23 = vld [vmem:[#allocation2 + $0x4] sm:$0xff]  ;;  %v994_v22 = vmax.f32 %v988_v7, 0.0  ;;  %v995_v10 = vmax.f32 %v989_v8, 0.0  ;;  %v996_v11 = vmax.f32 %v990_v19, 0.0  ;;  %v997_v62 = vmax.f32 %v991_v48, 0.0  ;;  %v8429_v56 = vld [vmem:[#allocation2 + $0x14] sm:$0xff]  ;;  %1318 = vrot.lane.b32.xlu0 %v8425_v32, %s7886_s29  ;;  %1316 = vrot.lane.b32.xlu1 %v8427_v51, %s7886_s29 }
 0x1f3   : > { %v7848_v55 = vpop.eup %7847  ;;  %v998_v42 = vmax.f32 %v992_v50, 0.0  ;;  %v999_v43 = vmax.f32 %v993_v25, 0.0  ;;  %1320 = vrot.lane.b32.xlu2 %v8429_v56, %s7886_s29  ;;  %v2004_v37 = vld [vmem:[#allocation2 + $0x18] sm:$0xff]  ;;  %1849 = vst [vmem:[#allocation4 + $0x180] sm:$0xff] %v2276_v23  ;;  %v1208_v38 = vrot.slane %v1207_v47, 1 }
 0x1f4   : > { %v1000_v39 = vmul.f32 %v994_v22, %v8090_v59  ;;  %v1001_v53 = vmul.f32 %v995_v10, %v8092_v61  ;;  %v1002_v63 = vmul.f32 %v996_v11, %v8102_v2  ;;  %v1003_v17 = vmul.f32 %v997_v62, %v8090_v59  ;;  %1851 = vst [vmem:[#allocation4 + $0x18c] sm:$0xff] %v2004_v37  ;;  %v8448_v18 = vld [vmem:[#allocation2 + $0x1c] sm:$0xff] }
 0x1f5   : > { %v1004_v21 = vmul.f32 %v998_v42, %v8092_v61  ;;  %v1005_v29 = vmul.f32 %v999_v43, %v8102_v2  ;;  %v1078_v44 = vmul.f32 %v7848_v55, %v8404_v40  ;;  %v1209_v34 = vadd.f32 %v1208_v38, %v1207_v47 }
 0x1f6   : > { %v8444_v4 = vpack.c.bf16 %v1001_v53, %v1000_v39  ;;  %v1007_v13 = vpack.c.bf16 %v1002_v63, %v1002_v63  ;;  %vm1084_vm8 = vweird.f32 %v7848_v55 }
 0x1f7   : > { %v8446_v36 = vpack.c.bf16 %v1004_v21, %v1003_v17  ;;  %v1009_v6 = vpack.c.bf16 %v1005_v29, %v1005_v29  ;;  %v1079_v33 = vmul.f32 %v7848_v55, %v1078_v44  ;;  %v1210_v5 = vmul.f32 0.00024414063, %v1209_v34  ;;  %vm1085_vm10 = vmor %vm1083_vm9, %vm1084_vm8 }
 0x1f8   : > { %1011 = vst [vmem:[#allocation2 + $0x34] sm:$0xf] %v1007_v13  ;;  %vm3305_vm8 = vcmask 523264  }
 0x1f9   : > { %1013 = vst [vmem:[#allocation2 + $0x48] sm:$0xf] %v1009_v6  ;;  %v1080_v20 = vmul.f32 0.5, %v1079_v33  ;;  %v8458_v8 = vadd.f32 1e-05, %v1210_v5 }
 0x1fa   : > { %1010 = vst [vmem:[#allocation2 + $0x2c] sm:$0xff] %v8444_v4  ;;  %1458 = vrot.lane.b32.xlu0 %v8429_v56, %s7887_s30  ;;  %1322 = vrot.lane.b32.xlu1 %v8448_v18, %s7886_s29 }
 0x1fb   : > { %1012 = vst [vmem:[#allocation2 + $0x40] sm:$0xff] %v8446_v36  ;;  %v1081_v7 = vsub.f32 1.5, %v1080_v20  ;;  %1456 = vrot.lane.b32.xlu2 %v8425_v32, %s7887_s30  ;;  %7849 = vrsqrt.f32 %v8458_v8  ;;  %vm1218_vm12 = vweird.f32 %v8458_v8 }
 0x1fd   : > { %v1082_v19 = vmul.f32 %v7848_v55, %v1081_v7 }
 0x1ff   : > { %v1086_v48 = vsel %vm1085_vm10, %v7848_v55, %v1082_v19  ;;  %v1838_v24 = vld [vmem:[#allocation2 + $0x34] sm:$0xf]  ;;  %v8495_v19 = vld [vmem:[#allocation2 + $0xc] sm:$0xff] }
 0x200   : > { %v1087_v50 = vmul.f32 %v1086_v48, %v8305_v9  ;;  %v1088_v25 = vmul.f32 %v1086_v48, %v8308_v14  ;;  %v1089_v49 = vmul.f32 %v1086_v48, %v8311_v15  ;;  %v1090_v23 = vmul.f32 %v1086_v48, %v8314_v45  ;;  %v1840_v22 = vld [vmem:[#allocation2 + $0x48] sm:$0xf]  ;;  %1854 = vst [vmem:[#allocation4 + $0x1a0] sm:$0xf] %v1838_v24 }
 0x201   : > { %v1091_v10 = vmul.f32 %v1086_v48, %v8317_v46  ;;  %v1092_v11 = vmul.f32 %v1086_v48, %v8320_v52  ;;  %v2006_v40 = vld [vmem:[#allocation2 + $0x2c] sm:$0xff]  ;;  %1856 = vst [vmem:[#allocation4 + $0x1ac] sm:$0xf] %v1840_v22  ;;  %v7850_v52 = vpop.eup %7849 }
 0x202   : > { %v1105_v62 = vmul.f32 %v8210_v54, %v1087_v50  ;;  %v1106_v55 = vmul.f32 %v8210_v54, %v1088_v25  ;;  %v1107_v9 = vmul.f32 %v8210_v54, %v1089_v49  ;;  %v1108_v14 = vmul.f32 %v8220_v1, %v1090_v23  ;;  %1728 = vrot.lane.b32.xlu0 %v8427_v51, %s7888_s14  ;;  %v2282_v15 = vld [vmem:[#allocation2 + $0x40] sm:$0xff] }
 0x203   : > { %v1109_v45 = vmul.f32 %v8220_v1, %v1091_v10  ;;  %v1110_v46 = vmul.f32 %v8220_v1, %v1092_v11  ;;  %1732 = vrot.lane.b32.xlu2 %v8429_v56, %s7888_s14  ;;  %1454 = vrot.lane.b32.xlu1 %v8427_v51, %s7887_s30  ;;  %1853 = vst [vmem:[#allocation4 + $0x198] sm:$0xff] %v2006_v40  ;;  %vm1219_vm11 = vweird.f32 %v7850_v52 }
 0x204   : > { %v1123_v54 = vadd.f32 %v8218_v0, %v1105_v62  ;;  %v1124_v42 = vadd.f32 %v8218_v0, %v1106_v55  ;;  %v1125_v43 = vadd.f32 %v8218_v0, %v1107_v9  ;;  %v1126_v47 = vadd.f32 %v8216_v57, %v1108_v14  ;;  %1855 = vst [vmem:[#allocation4 + $0x1a4] sm:$0xff] %v2282_v15  ;;  %vm1220_vm13 = vmor %vm1218_vm12, %vm1219_vm11 }
 0x205   : > { %v1127_v37 = vadd.f32 %v8216_v57, %v1109_v45  ;;  %v1128_v1 = vadd.f32 %v8216_v57, %v1110_v46  ;;  %v1213_v39 = vmul.f32 %v7850_v52, %v8458_v8 }
 0x206   : > { %v1129_v53 = vmax.f32 %v1123_v54, 0.0  ;;  %v1130_v63 = vmax.f32 %v1124_v42, 0.0  ;;  %v1131_v17 = vmax.f32 %v1125_v43, 0.0  ;;  %v1132_v21 = vmax.f32 %v1126_v47, 0.0 }
 0x207   : > { %v1133_v29 = vmax.f32 %v1127_v37, 0.0  ;;  %v1134_v44 = vmax.f32 %v1128_v1, 0.0  ;;  %v1214_v13 = vmul.f32 %v7850_v52, %v1213_v39 }
 0x208   : > { %v1135_v38 = vmul.f32 %v1129_v53, %v8090_v59  ;;  %v1136_v0 = vmul.f32 %v1130_v63, %v8092_v61  ;;  %v1137_v6 = vmul.f32 %v1131_v17, %v8102_v2  ;;  %v1138_v33 = vmul.f32 %v1132_v21, %v8090_v59 }
 0x209   : > { %v1139_v34 = vmul.f32 %v1133_v29, %v8092_v61  ;;  %v1140_v57 = vmul.f32 %v1134_v44, %v8102_v2  ;;  %v1215_v20 = vmul.f32 0.5, %v1214_v13 }
 0x20a   : > { %v8493_v5 = vpack.c.bf16 %v1136_v0, %v1135_v38  ;;  %v1142_v7 = vpack.c.bf16 %v1137_v6, %v1137_v6  ;;  %1734 = vrot.lane.b32.xlu0 %v8448_v18, %s7888_s14  ;;  %v1289_v6 = vld [vmem:[#allocation2 + $0x30] sm:$0xff] }
 0x20b   : > { %v8499_v48 = vpack.c.bf16 %v1139_v34, %v1138_v33  ;;  %v1144_v24 = vpack.c.bf16 %v1140_v57, %v1140_v57  ;;  %v1216_v50 = vsub.f32 1.5, %v1215_v20  ;;  %1899 = vrot.lane.b32.xlu2 %v8495_v19, %s7889_s15  ;;  %1460 = vrot.lane.b32.xlu1 %v8448_v18, %s7887_s30  ;;  %v1288_v33 = vld [vmem:[#allocation2 + $0x28] sm:$0xff]  ;;  %v8581_v34 = vld [vmem:[#allocation2 + $0x34] sm:$0xff] }
 0x20c   : > { %1146 = vst [vmem:[#allocation2 + $0x5c] sm:$0xf] %v1142_v7 }
 0x20d   : > { %1148 = vst [vmem:[#allocation2 + $0x70] sm:$0xf] %v1144_v24  ;;  %v1217_v25 = vmul.f32 %v7850_v52, %v1216_v50 }
 0x20e   : > { %1145 = vst [vmem:[#allocation2 + $0x54] sm:$0xff] %v8493_v5 }
 0x20f   : > { %1147 = vst [vmem:[#allocation2 + $0x68] sm:$0xff] %v8499_v48  ;;  %v1221_v49 = vsel %vm1220_vm13, %v7850_v52, %v1217_v25 }
 0x210   : > { %v1222_v23 = vmul.f32 %v1221_v49, %v8350_v28  ;;  %v1223_v22 = vmul.f32 %v1221_v49, %v8353_v30  ;;  %v1224_v10 = vmul.f32 %v1221_v49, %v8356_v12  ;;  %v1225_v11 = vmul.f32 %v1221_v49, %v8341_v41 }
 0x211   : > { %v1226_v40 = vmul.f32 %v1221_v49, %v8344_v58  ;;  %v1227_v62 = vmul.f32 %v1221_v49, %v8347_v60 }
 0x212   : > { %v1240_v8 = vmul.f32 %v8222_v3, %v1222_v23  ;;  %v1241_v55 = vmul.f32 %v8222_v3, %v1223_v22  ;;  %v1242_v9 = vmul.f32 %v8222_v3, %v1224_v10  ;;  %v1243_v14 = vmul.f32 %v8224_v16, %v1225_v11  ;;  %1901 = vrot.lane.b32.xlu0 %v8400_v26, %s7889_s15 }
 0x213   : > { %v1244_v28 = vmul.f32 %v8224_v16, %v1226_v40  ;;  %v1245_v30 = vmul.f32 %v8224_v16, %v1227_v62  ;;  %1591 = vrot.lane.b32.xlu2 %v8427_v51, %s7890_s16  ;;  %1730 = vrot.lane.b32.xlu1 %v8425_v32, %s7888_s14  ;;  %v1842_v41 = vld [vmem:[#allocation2 + $0x5c] sm:$0xf] }
 0x214   : > { %v1258_v58 = vadd.f32 %v8370_v27, %v1240_v8  ;;  %v1259_v3 = vadd.f32 %v8370_v27, %v1241_v55  ;;  %v1260_v60 = vadd.f32 %v8370_v27, %v1242_v9  ;;  %v1261_v12 = vadd.f32 %v8372_v31, %v1243_v14  ;;  %v1844_v15 = vld [vmem:[#allocation2 + $0x70] sm:$0xf]  ;;  %1858 = vst [vmem:[#allocation4 + $0x1b8] sm:$0xf] %v1842_v41 }
 0x215   : > { %v1262_v16 = vadd.f32 %v8372_v31, %v1244_v28  ;;  %v1263_v45 = vadd.f32 %v8372_v31, %v1245_v30  ;;  %v8532_v46 = vld [vmem:[#allocation2 + $0x54] sm:$0xff]  ;;  %1860 = vst [vmem:[#allocation4 + $0x1c4] sm:$0xf] %v1844_v15 }
 0x216   : > { %v1264_v51 = vmax.f32 %v1258_v58, 0.0  ;;  %v1265_v52 = vmax.f32 %v1259_v3, 0.0  ;;  %v1266_v54 = vmax.f32 %v1260_v60, 0.0  ;;  %v1267_v42 = vmax.f32 %v1261_v12, 0.0  ;;  %v8534_v37 = vld [vmem:[#allocation2 + $0x68] sm:$0xff]  ;;  %1857 = vst [vmem:[#allocation4 + $0x1b0] sm:$0xff] %v8532_v46 }
 0x217   : > { %v1268_v43 = vmax.f32 %v1262_v16, 0.0  ;;  %v1269_v47 = vmax.f32 %v1263_v45, 0.0  ;;  %1859 = vst [vmem:[#allocation4 + $0x1bc] sm:$0xff] %v8534_v37  ;;  %v8600_v24 = vld [vmem:[#allocation2 + $0x50] sm:$0xff]  ;;  %v8627_v9 = vld [vmem:[#allocation2 + $0x64] sm:$0xff] }
 0x218   : > { %v1270_v27 = vmul.f32 %v1264_v51, %v8090_v59  ;;  %v1271_v1 = vmul.f32 %v1265_v52, %v8092_v61  ;;  %v1272_v39 = vmul.f32 %v1266_v54, %v8102_v2  ;;  %v1273_v31 = vmul.f32 %v1267_v42, %v8090_v59  ;;  %v8609_v25 = vld [vmem:[#allocation2 + $0x6c] sm:$0xff] }
 0x219   : > { %v1274_v53 = vmul.f32 %v1268_v43, %v8092_v61  ;;  %v1275_v63 = vmul.f32 %v1269_v47, %v8102_v2  ;;  %v8654_v47 = vld [vmem:[#allocation2 + $0x58] sm:$0xff] }
 0x21a   : > { %v8544_v17 = vpack.c.bf16 %v1271_v1, %v1270_v27  ;;  %v1277_v21 = vpack.c.bf16 %v1272_v39, %v1272_v39  ;;  %1593 = vrot.lane.b32.xlu0 %v8425_v32, %s7890_s16  ;;  %v8558_v32 = vld [vmem:[#allocation2 + $0x20] sm:$0xff] }
 0x21b   : > { %v8548_v29 = vpack.c.bf16 %v1274_v53, %v1273_v31  ;;  %v1279_v44 = vpack.c.bf16 %v1275_v63, %v1275_v63  ;;  %1597 = vrot.lane.b32.xlu2 %v8448_v18, %s7890_s16  ;;  %1897 = vrot.lane.b32.xlu1 %v8398_v35, %s7889_s15 }
 0x21c   : > { %1281 = vst [vmem:[#allocation2 + $0x84] sm:$0xf] %v1277_v21 }
 0x21d   : > { %1283 = vst [vmem:[#allocation2 + $0x98] sm:$0xf] %v1279_v44 }
 0x21e   : > { %1280 = vst [vmem:[#allocation2 + $0x7c] sm:$0xff] %v8544_v17 }
 0x21f   : > { %1282 = vst [vmem:[#allocation2 + $0x90] sm:$0xff] %v8548_v29 }
 0x222   : > { %2171 = vrot.lane.b32.xlu0 %v8398_v35, %s7891_s17  ;;  %v8567_v35 = vld [vmem:[#allocation2 + $0x44] sm:$0xff] }
 0x223   : > { %2175 = vrot.lane.b32.xlu2 %v8400_v26, %s7891_s17  ;;  %1903 = vrot.lane.b32.xlu1 %v8558_v32, %s7889_s15  ;;  %v1846_v18 = vld [vmem:[#allocation2 + $0x84] sm:$0xf]  ;;  %v1428_v26 = vld [vmem:[#allocation2 + $0x3c] sm:$0xff] }
 0x224   : > { %v1848_v13 = vld [vmem:[#allocation2 + $0x98] sm:$0xf]  ;;  %1862 = vst [vmem:[#allocation4 + $0x1d0] sm:$0xf] %v1846_v18 }
 0x225   : > { %v1845_v38 = vld [vmem:[#allocation2 + $0x7c] sm:$0xff]  ;;  %1864 = vst [vmem:[#allocation4 + $0x1dc] sm:$0xf] %v1848_v13 }
 0x226   : > { %v8564_v0 = vld [vmem:[#allocation2 + $0x90] sm:$0xff]  ;;  %1861 = vst [vmem:[#allocation4 + $0x1c8] sm:$0xff] %v1845_v38 }
 0x227   : > { %1863 = vst [vmem:[#allocation4 + $0x1d4] sm:$0xff] %v8564_v0 }
 0x22a   : > { %1326 = vrot.lane.b32.xlu0 %v1289_v6, %s7886_s29 }
 0x22b   : > { %1595 = vrot.lane.b32.xlu1 %v8429_v56, %s7890_s16  ;;  %1330 = vrot.lane.b32.xlu2 %v8567_v35, %s7886_s29  ;;  %v8588_v56 = vld [vmem:[#allocation2 + $0x48] sm:$0xff] }
 0x232   : > { %1466 = vrot.lane.b32.xlu0 %v1428_v26, %s7887_s30 }
 0x233   : > { %2173 = vrot.lane.b32.xlu1 %v8495_v19, %s7891_s17  ;;  %1464 = vrot.lane.b32.xlu2 %v1289_v6, %s7887_s30 }
 0x23a   : > { %1740 = vrot.lane.b32.xlu0 %v1428_v26, %s7888_s14 }
 0x23b   : > { %1738 = vrot.lane.b32.xlu2 %v1289_v6, %s7888_s14  ;;  %1324 = vrot.lane.b32.xlu1 %v1288_v33, %s7886_s29 }
 0x242   : > { %1907 = vrot.lane.b32.xlu0 %v8581_v34, %s7889_s15 }
 0x243   : > { %1905 = vrot.lane.b32.xlu2 %v8444_v4, %s7889_s15  ;;  %1328 = vrot.lane.b32.xlu1 %v1428_v26, %s7886_s29 }
 0x24a   : > { %1603 = vrot.lane.b32.xlu0 %v1428_v26, %s7890_s16 }
 0x24b   : > { %1911 = vrot.lane.b32.xlu2 %v8588_v56, %s7889_s15  ;;  %1462 = vrot.lane.b32.xlu1 %v1288_v33, %s7887_s30 }
 0x24d   : > { %v1321_v57 = vpop.permute.xlu2 %1320 }
 0x24e   : > { %v1350_v30 = vrot.slane %v1321_v57, 4 }
 0x252   : > { %2181 = vrot.lane.b32.xlu0 %v8581_v34, %s7891_s17 }
 0x253   : > { %1601 = vrot.lane.b32.xlu2 %v1289_v6, %s7890_s16  ;;  %1468 = vrot.lane.b32.xlu1 %v8567_v35, %s7887_s30 }
 0x255   : > { %v1457_v20 = vpop.permute.xlu2 %1456 }
 0x256   : > { %v1487_v7 = vrot.slane %v1457_v20, 4 }
 0x258   : > { %v1505_v19 = vsel %vm1503_vm14, %v1457_v20, %v1487_v7 }
 0x259   : > { %1544 = vst [vmem:[#allocation4 + $0x68] sm:$0xf] %v1505_v19 }
 0x25a   : > { %1332 = vrot.lane.b32.xlu0 %v8600_v24, %s7886_s29 }
 0x25b   : > { %2179 = vrot.lane.b32.xlu2 %v8444_v4, %s7891_s17  ;;  %1736 = vrot.lane.b32.xlu1 %v1288_v33, %s7888_s14 }
 0x25d   : > { %v8607_v50 = vpop.permute.xlu2 %1732 }
 0x25e   : > { %v1762_v1 = vrot.slane %v8607_v50, 4 }
 0x262   : > { %1338 = vrot.lane.b32.xlu0 %v8609_v25, %s7886_s29 }
 0x263   : > { %2185 = vrot.lane.b32.xlu2 %v8588_v56, %s7891_s17  ;;  %1742 = vrot.lane.b32.xlu1 %v8567_v35, %s7888_s14 }
 0x264   : > { %v1319_v49 = vpop.permute.xlu0 %1318  ;;  %v1317_v23 = vpop.permute.xlu1 %1316 }
 0x265   : > { %v1349_v4 = vrot.slane %v1319_v49, 4  ;;  %v1348_v22 = vrot.slane %v1317_v23, 4  ;;  %v8617_v10 = vpop.permute.xlu2 %1899 }
 0x266   : > { %v1930_v11 = vrot.slane %v8617_v10, 4 }
 0x267   : > { %v1368_v40 = vsel %vm1366_vm15, %v1319_v49, %v1349_v4  ;;  %v1365_v62 = vsel %vm1364_vm1, %v1348_v22, %v1349_v4  ;;  %v8688_v4 = vld [vmem:[#allocation2 + $0x70] sm:$0xff] }
 0x268   : > { %1407 = vst [vmem:[#allocation4 + $0x8] sm:$0xf] %v1368_v40  ;;  %v1367_v8 = vsel %vm1366_vm15, %v1317_v23, %v1365_v62  ;;  %v1948_v55 = vsel %vm1946_vm2, %v8617_v10, %v1930_v11 }
 0x269   : > { %1406 = vst [vmem:[#allocation4] sm:$0xff] %v1367_v8 }
 0x26a   : > { %1987 = vst [vmem:[#allocation4 + $0x1e8] sm:$0xf] %v1948_v55  ;;  %1470 = vrot.lane.b32.xlu0 %v8600_v24, %s7887_s30 }
 0x26b   : > { %1909 = vrot.lane.b32.xlu1 %v8446_v36, %s7889_s15  ;;  %1336 = vrot.lane.b32.xlu2 %v8627_v9, %s7886_s29 }
 0x26c   : > { %v1459_v14 = vpop.permute.xlu0 %1458  ;;  %v1323_v28 = vpop.permute.xlu1 %1322 }
 0x26d   : > { %v1351_v41 = vrot.slane %v1323_v28, 4  ;;  %v8635_v58 = vpop.permute.xlu2 %1591  ;;  %v1488_v63 = vrot.slane %v1459_v14, 4 }
 0x26e   : > { %v1623_v40 = vrot.slane %v8635_v58, 4 }
 0x26f   : > { %v1369_v3 = vsel %vm1364_vm1, %v1350_v30, %v1351_v41  ;;  %v1371_v60 = vsel %vm1366_vm15, %v1323_v28, %v1351_v41 }
 0x270   : > { %v1370_v12 = vsel %vm1366_vm15, %v1321_v57, %v1369_v3  ;;  %1409 = vst [vmem:[#allocation4 + $0x14] sm:$0xf] %v1371_v60 }
 0x271   : > { %1408 = vst [vmem:[#allocation4 + $0xc] sm:$0xff] %v1370_v12 }
 0x272   : > { %1476 = vrot.lane.b32.xlu0 %v8609_v25, %s7887_s30 }
 0x273   : > { %1599 = vrot.lane.b32.xlu1 %v1288_v33, %s7890_s16  ;;  %1474 = vrot.lane.b32.xlu2 %v8627_v9, %s7887_s30 }
 0x274   : > { %v1729_v15 = vpop.permute.xlu0 %1728 }
 0x275   : > { %v1455_v16 = vpop.permute.xlu1 %1454  ;;  %v8645_v45 = vpop.permute.xlu2 %1597  ;;  %v1760_v20 = vrot.slane %v1729_v15, 4 }
 0x276   : > { %v1486_v51 = vrot.slane %v1455_v16, 4  ;;  %v1626_v52 = vrot.slane %v8645_v45, 4 }
 0x278   : > { %v1502_v54 = vsel %vm1364_vm1, %v1486_v51, %v1487_v7  ;;  %v1645_v42 = vsel %vm1640_vm3, %v8645_v45, %v1626_v52 }
 0x279   : > { %v1504_v43 = vsel %vm1503_vm14, %v1455_v16, %v1502_v54  ;;  %1683 = vst [vmem:[#allocation4 + $0xd4] sm:$0xf] %v1645_v42 }
 0x27a   : > { %1543 = vst [vmem:[#allocation4 + $0x60] sm:$0xff] %v1504_v43  ;;  %1746 = vrot.lane.b32.xlu0 %v8654_v47, %s7888_s14 }
 0x27b   : > { %1605 = vrot.lane.b32.xlu1 %v8567_v35, %s7890_s16  ;;  %1744 = vrot.lane.b32.xlu2 %v8600_v24, %s7888_s14 }
 0x27c   : > { %v1735_v27 = vpop.permute.xlu0 %1734 }
 0x27d   : > { %v1763_v39 = vrot.slane %v1735_v27, 4  ;;  %v1461_v31 = vpop.permute.xlu1 %1460  ;;  %v8663_v53 = vpop.permute.xlu2 %2175 }
 0x27e   : > { %v1489_v21 = vrot.slane %v1461_v31, 4 }
 0x27f   : > { %v1780_v44 = vsel %vm1364_vm1, %v1762_v1, %v1763_v39  ;;  %v1782_v18 = vsel %vm1777_vm4, %v1735_v27, %v1763_v39  ;;  %v8728_v1 = vld [vmem:[#allocation2 + $0x5c] sm:$0xff] }
 0x280   : > { %v1781_v13 = vsel %vm1777_vm4, %v8607_v50, %v1780_v44  ;;  %1820 = vst [vmem:[#allocation4 + $0x134] sm:$0xf] %v1782_v18  ;;  %v1506_v38 = vsel %vm1364_vm1, %v1488_v63, %v1489_v21  ;;  %v1508_v6 = vsel %vm1503_vm14, %v1461_v31, %v1489_v21 }
 0x281   : > { %1819 = vst [vmem:[#allocation4 + $0x12c] sm:$0xff] %v1781_v13  ;;  %v1507_v35 = vsel %vm1503_vm14, %v1459_v14, %v1506_v38  ;;  %v8743_v38 = vld [vmem:[#allocation2 + $0x80] sm:$0xff] }
 0x282   : > { %1545 = vst [vmem:[#allocation4 + $0x6c] sm:$0xff] %v1507_v35  ;;  %1913 = vrot.lane.b32.xlu0 %v8493_v5, %s7889_s15 }
 0x283   : > { %1546 = vst [vmem:[#allocation4 + $0x74] sm:$0xf] %v1508_v6  ;;  %2183 = vrot.lane.b32.xlu1 %v8446_v36, %s7891_s17  ;;  %1750 = vrot.lane.b32.xlu2 %v8609_v25, %s7888_s14 }
 0x284   : > { %v1902_v26 = vpop.permute.xlu0 %1901 }
 0x285   : > { %v1731_v33 = vpop.permute.xlu1 %1730  ;;  %v8678_v57 = vpop.permute.xlu2 %1330  ;;  %v1931_v16 = vrot.slane %v1902_v26, 4 }
 0x286   : > { %v1761_v7 = vrot.slane %v1731_v33, 4  ;;  %v1355_v19 = vrot.slane %v8678_v57, 4 }
 0x288   : > { %v1776_v50 = vsel %vm1364_vm1, %v1760_v20, %v1761_v7  ;;  %v1779_v49 = vsel %vm1777_vm4, %v1731_v33, %v1761_v7  ;;  %v1377_v36 = vsel %vm1366_vm15, %v8678_v57, %v1355_v19 }
 0x289   : > { %v1778_v23 = vsel %vm1777_vm4, %v1729_v15, %v1776_v50  ;;  %1818 = vst [vmem:[#allocation4 + $0x128] sm:$0xf] %v1779_v49  ;;  %v8761_v50 = vld [vmem:[#allocation2 + $0x8c] sm:$0xff]  ;;  %v8765_v49 = vld [vmem:[#allocation2 + $0x78] sm:$0xff] }
 0x28a   : > { %1817 = vst [vmem:[#allocation4 + $0x120] sm:$0xff] %v1778_v23  ;;  %1919 = vrot.lane.b32.xlu0 %v8688_v4, %s7889_s15 }
 0x28b   : > { %1413 = vst [vmem:[#allocation4 + $0x2c] sm:$0xf] %v1377_v36  ;;  %1917 = vrot.lane.b32.xlu2 %v8499_v48, %s7889_s15  ;;  %1334 = vrot.lane.b32.xlu1 %v8654_v47, %s7886_s29 }
 0x28c   : > { %v1594_v22 = vpop.permute.xlu0 %1593 }
 0x28d   : > { %v1624_v62 = vrot.slane %v1594_v22, 4  ;;  %v1898_v8 = vpop.permute.xlu1 %1897  ;;  %v8697_v55 = vpop.permute.xlu2 %1464 }
 0x28e   : > { %v1929_v14 = vrot.slane %v1898_v8, 4  ;;  %v1491_v28 = vrot.slane %v8697_v55, 4 }
 0x28f   : > { %v1639_v30 = vsel %vm1364_vm1, %v1623_v40, %v1624_v62  ;;  %v1642_v41 = vsel %vm1640_vm3, %v1594_v22, %v1624_v62 }
 0x290   : > { %v1641_v3 = vsel %vm1640_vm3, %v8635_v58, %v1639_v30  ;;  %1681 = vst [vmem:[#allocation4 + $0xc8] sm:$0xf] %v1642_v41  ;;  %v1945_v60 = vsel %vm1364_vm1, %v1929_v14, %v1930_v11  ;;  %v1511_v12 = vsel %vm1503_vm14, %v8697_v55, %v1491_v28  ;;  %v8784_v30 = vld [vmem:[#allocation2 + $0x94] sm:$0xff] }
 0x291   : > { %1680 = vst [vmem:[#allocation4 + $0xc0] sm:$0xff] %v1641_v3  ;;  %v1947_v15 = vsel %vm1946_vm2, %v1898_v8, %v1945_v60 }
 0x292   : > { %1986 = vst [vmem:[#allocation4 + $0x1e0] sm:$0xff] %v1947_v15  ;;  %1607 = vrot.lane.b32.xlu0 %v8600_v24, %s7890_s16 }
 0x293   : > { %1548 = vst [vmem:[#allocation4 + $0x80] sm:$0xf] %v1511_v12  ;;  %1611 = vrot.lane.b32.xlu2 %v8627_v9, %s7890_s16  ;;  %1472 = vrot.lane.b32.xlu1 %v8654_v47, %s7887_s30 }
 0x294   : > { %v2172_v10 = vpop.permute.xlu0 %2171 }
 0x295   : > { %v1904_v11 = vpop.permute.xlu1 %1903  ;;  %v8718_v58 = vpop.permute.xlu2 %1738  ;;  %v2203_v6 = vrot.slane %v2172_v10, 4 }
 0x296   : > { %v1932_v51 = vrot.slane %v1904_v11, 4  ;;  %v1765_v54 = vrot.slane %v8718_v58, 4 }
 0x298   : > { %v1949_v42 = vsel %vm1364_vm1, %v1931_v16, %v1932_v51  ;;  %v1951_v43 = vsel %vm1946_vm2, %v1904_v11, %v1932_v51  ;;  %v1785_v24 = vsel %vm1777_vm4, %v8718_v58, %v1765_v54 }
 0x299   : > { %v1950_v27 = vsel %vm1946_vm2, %v1902_v26, %v1949_v42  ;;  %1989 = vst [vmem:[#allocation4 + $0x1f4] sm:$0xf] %v1951_v43 }
 0x29a   : > { %1988 = vst [vmem:[#allocation4 + $0x1ec] sm:$0xff] %v1950_v27  ;;  %1613 = vrot.lane.b32.xlu0 %v8609_v25, %s7890_s16 }
 0x29b   : > { %1822 = vst [vmem:[#allocation4 + $0x140] sm:$0xf] %v1785_v24  ;;  %2189 = vrot.lane.b32.xlu2 %v8728_v1, %s7891_s17  ;;  %1748 = vrot.lane.b32.xlu1 %v8627_v9, %s7888_s14 }
 0x29c   : > { %v1327_v39 = vpop.permute.xlu0 %1326 }
 0x29d   : > { %v1596_v31 = vpop.permute.xlu1 %1595  ;;  %v1353_v63 = vrot.slane %v1327_v39, 4  ;;  %v1906_v21 = vpop.permute.xlu2 %1905 }
 0x29e   : > { %v1625_v44 = vrot.slane %v1596_v31, 4  ;;  %v1933_v3 = vrot.slane %v1906_v21, 4 }
 0x29f   : > { %v1374_v18 = vsel %vm1366_vm15, %v1327_v39, %v1353_v63 }
 0x2a0   : > { %v1643_v13 = vsel %vm1364_vm1, %v1625_v44, %v1626_v52  ;;  %1411 = vst [vmem:[#allocation4 + $0x20] sm:$0xf] %v1374_v18 }
 0x2a1   : > { %v1644_v25 = vsel %vm1640_vm3, %v1596_v31, %v1643_v13 }
 0x2a2   : > { %1682 = vst [vmem:[#allocation4 + $0xcc] sm:$0xff] %v1644_v25  ;;  %2191 = vrot.lane.b32.xlu0 %v8499_v48, %s7891_s17 }
 0x2a3   : > { %1915 = vrot.lane.b32.xlu1 %v8728_v1, %s7889_s15  ;;  %1342 = vrot.lane.b32.xlu2 %v8743_v38, %s7886_s29 }
 0x2a4   : > { %v8749_v9 = vpop.permute.xlu0 %1466 }
 0x2a5   : > { %v2174_v45 = vpop.permute.xlu1 %2173  ;;  %v8751_v52 = vpop.permute.xlu2 %1911  ;;  %v1492_v13 = vrot.slane %v8749_v9, 4 }
 0x2a6   : > { %v2204_v35 = vrot.slane %v2174_v45, 4  ;;  %v1936_v26 = vrot.slane %v8751_v52, 4 }
 0x2a8   : > { %v2219_v48 = vsel %vm1364_vm1, %v2203_v6, %v2204_v35  ;;  %v2222_v33 = vsel %vm2220_vm5, %v2174_v45, %v2204_v35  ;;  %v1957_v20 = vsel %vm1946_vm2, %v8751_v52, %v1936_v26 }
 0x2a9   : > { %v2221_v7 = vsel %vm2220_vm5, %v2172_v10, %v2219_v48  ;;  %2261 = vst [vmem:[#allocation4 + $0x2a8] sm:$0xf] %v2222_v33 }
 0x2aa   : > { %2260 = vst [vmem:[#allocation4 + $0x2a0] sm:$0xff] %v2221_v7  ;;  %1344 = vrot.lane.b32.xlu0 %v8761_v50, %s7886_s29  ;;  %v8830_v7 = vld [vmem:[#allocation2 + $0x98] sm:$0xff] }
 0x2ab   : > { %1993 = vst [vmem:[#allocation4 + $0x20c] sm:$0xf] %v1957_v20  ;;  %1609 = vrot.lane.b32.xlu1 %v8654_v47, %s7890_s16  ;;  %1478 = vrot.lane.b32.xlu2 %v8765_v49, %s7887_s30 }
 0x2ac   : > { %v8771_v36 = vpop.permute.xlu0 %1740 }
 0x2ad   : > { %v1325_v23 = vpop.permute.xlu1 %1324  ;;  %v8773_v22 = vpop.permute.xlu2 %1601  ;;  %v1766_v58 = vrot.slane %v8771_v36, 4 }
 0x2ae   : > { %v1352_v40 = vrot.slane %v1325_v23, 4  ;;  %v1628_v62 = vrot.slane %v8773_v22, 4 }
 0x2b0   : > { %v1372_v8 = vsel %vm1364_vm1, %v1352_v40, %v1353_v63  ;;  %v1648_v14 = vsel %vm1640_vm3, %v8773_v22, %v1628_v62 }
 0x2b1   : > { %v1373_v47 = vsel %vm1366_vm15, %v1325_v23, %v1372_v8  ;;  %1685 = vst [vmem:[#allocation4 + $0xe0] sm:$0xf] %v1648_v14 }
 0x2b2   : > { %1410 = vst [vmem:[#allocation4 + $0x18] sm:$0xff] %v1373_v47  ;;  %1480 = vrot.lane.b32.xlu0 %v8743_v38, %s7887_s30 }
 0x2b3   : > { %2187 = vrot.lane.b32.xlu1 %v8493_v5, %s7891_s17  ;;  %1484 = vrot.lane.b32.xlu2 %v8784_v30, %s7887_s30 }
 0x2b4   : > { %v1908_v41 = vpop.permute.xlu0 %1907 }
 0x2b5   : > { %v1934_v60 = vrot.slane %v1908_v41, 4  ;;  %v1329_v12 = vpop.permute.xlu1 %1328  ;;  %v2180_v15 = vpop.permute.xlu2 %2179 }
 0x2b6   : > { %v1354_v10 = vrot.slane %v1329_v12, 4 }
 0x2b7   : > { %v1952_v11 = vsel %vm1364_vm1, %v1933_v3, %v1934_v60  ;;  %v1954_v16 = vsel %vm1946_vm2, %v1908_v41, %v1934_v60 }
 0x2b8   : > { %v1953_v51 = vsel %vm1946_vm2, %v1906_v21, %v1952_v11  ;;  %1991 = vst [vmem:[#allocation4 + $0x200] sm:$0xf] %v1954_v16  ;;  %v1375_v5 = vsel %vm1364_vm1, %v1354_v10, %v1355_v19 }
 0x2b9   : > { %1990 = vst [vmem:[#allocation4 + $0x1f8] sm:$0xff] %v1953_v51  ;;  %v1376_v42 = vsel %vm1366_vm15, %v1329_v12, %v1375_v5 }
 0x2ba   : > { %1412 = vst [vmem:[#allocation4 + $0x24] sm:$0xff] %v1376_v42  ;;  %1754 = vrot.lane.b32.xlu0 %v8743_v38, %s7888_s14 }
 0x2bb   : > { %2193 = vrot.lane.b32.xlu1 %v8688_v4, %s7891_s17  ;;  %1752 = vrot.lane.b32.xlu2 %v8765_v49, %s7888_s14 }
 0x2bc   : > { %v8803_v43 = vpop.permute.xlu0 %1603 }
 0x2bd   : > { %v1463_v24 = vpop.permute.xlu1 %1462  ;;  %v8805_v27 = vpop.permute.xlu2 %2185 }
 0x2be   : > { %v1490_v57 = vrot.slane %v1463_v24, 4  ;;  %v2210_v19 = vrot.slane %v8805_v27, 4 }
 0x2c0   : > { %v1509_v39 = vsel %vm1364_vm1, %v1490_v57, %v1491_v28  ;;  %v2231_v31 = vsel %vm2220_vm5, %v8805_v27, %v2210_v19  ;;  %v2207_v28 = vrot.slane %v2180_v15, 4 }
 0x2c1   : > { %v1510_v63 = vsel %vm1503_vm14, %v1463_v24, %v1509_v39  ;;  %2267 = vst [vmem:[#allocation4 + $0x2cc] sm:$0xf] %v2231_v31 }
 0x2c2   : > { %1547 = vst [vmem:[#allocation4 + $0x78] sm:$0xff] %v1510_v63  ;;  %1921 = vrot.lane.b32.xlu0 %v8544_v17, %s7889_s15  ;;  %v1878_v63 = vld [vmem:[#allocation2 + $0x84] sm:$0xff] }
 0x2c3   : > { %1758 = vrot.lane.b32.xlu2 %v8784_v30, %s7888_s14  ;;  %1340 = vrot.lane.b32.xlu1 %v8765_v49, %s7886_s29 }
 0x2c4   : > { %v2182_v55 = vpop.permute.xlu0 %2181 }
 0x2c5   : > { %v2208_v21 = vrot.slane %v2182_v55, 4  ;;  %v1469_v44 = vpop.permute.xlu1 %1468  ;;  %v1337_v18 = vpop.permute.xlu2 %1336 }
 0x2c6   : > { %v1493_v25 = vrot.slane %v1469_v44, 4  ;;  %v1358_v3 = vrot.slane %v1337_v18, 4 }
 0x2c7   : > { %v2226_v45 = vsel %vm1364_vm1, %v2207_v28, %v2208_v21  ;;  %v2228_v6 = vsel %vm2220_vm5, %v2182_v55, %v2208_v21 }
 0x2c8   : > { %v2227_v35 = vsel %vm2220_vm5, %v2180_v15, %v2226_v45  ;;  %2265 = vst [vmem:[#allocation4 + $0x2c0] sm:$0xf] %v2228_v6  ;;  %v1512_v48 = vsel %vm1364_vm1, %v1492_v13, %v1493_v25  ;;  %v1514_v33 = vsel %vm1503_vm14, %v1469_v44, %v1493_v25 }
 0x2c9   : > { %2264 = vst [vmem:[#allocation4 + $0x2b8] sm:$0xff] %v2227_v35  ;;  %v1513_v20 = vsel %vm1503_vm14, %v8749_v9, %v1512_v48 }
 0x2ca   : > { %1549 = vst [vmem:[#allocation4 + $0x84] sm:$0xff] %v1513_v20  ;;  %1927 = vrot.lane.b32.xlu0 %v8830_v7, %s7889_s15  ;;  %v1629_v20 = vrot.slane %v8803_v43, 4 }
 0x2cb   : > { %1550 = vst [vmem:[#allocation4 + $0x8c] sm:$0xf] %v1514_v33  ;;  %1925 = vrot.lane.b32.xlu2 %v8548_v29, %s7889_s15  ;;  %1346 = vrot.lane.b32.xlu1 %v8784_v30, %s7886_s29 }
 0x2cc   : > { %v8838_v23 = vpop.permute.xlu0 %1332 }
 0x2cd   : > { %v1737_v40 = vpop.permute.xlu1 %1736  ;;  %v1475_v8 = vpop.permute.xlu2 %1474 }
 0x2ce   : > { %v1764_v14 = vrot.slane %v1737_v40, 4 }
 0x2d0   : > { %v1783_v9 = vsel %vm1364_vm1, %v1764_v14, %v1765_v54 }
 0x2d1   : > { %v1784_v47 = vsel %vm1777_vm4, %v1737_v40, %v1783_v9 }
 0x2d2   : > { %1821 = vst [vmem:[#allocation4 + $0x138] sm:$0xff] %v1784_v47  ;;  %1617 = vrot.lane.b32.xlu0 %v8743_v38, %s7890_s16 }
 0x2d3   : > { %1615 = vrot.lane.b32.xlu2 %v8765_v49, %s7890_s16  ;;  %1482 = vrot.lane.b32.xlu1 %v8761_v50, %s7887_s30 }
 0x2d4   : > { %v1339_v41 = vpop.permute.xlu0 %1338 }
 0x2d5   : > { %v1743_v60 = vpop.permute.xlu1 %1742  ;;  %v1359_v12 = vrot.slane %v1339_v41, 4  ;;  %v1745_v15 = vpop.permute.xlu2 %1744 }
 0x2d6   : > { %v1767_v54 = vrot.slane %v1743_v60, 4  ;;  %v1768_v22 = vrot.slane %v1745_v15, 4 }
 0x2d7   : > { %v1381_v10 = vsel %vm1364_vm1, %v1358_v3, %v1359_v12  ;;  %v1383_v11 = vsel %vm1366_vm15, %v1339_v41, %v1359_v12 }
 0x2d8   : > { %v1786_v38 = vsel %vm1364_vm1, %v1766_v58, %v1767_v54  ;;  %v1788_v16 = vsel %vm1777_vm4, %v1743_v60, %v1767_v54  ;;  %v1382_v49 = vsel %vm1366_vm15, %v1337_v18, %v1381_v10  ;;  %1417 = vst [vmem:[#allocation4 + $0x44] sm:$0xf] %v1383_v11 }
 0x2d9   : > { %v1787_v51 = vsel %vm1777_vm4, %v8771_v36, %v1786_v38  ;;  %1824 = vst [vmem:[#allocation4 + $0x14c] sm:$0xf] %v1788_v16  ;;  %v1356_v38 = vrot.slane %v8838_v23, 4 }
 0x2da   : > { %1823 = vst [vmem:[#allocation4 + $0x144] sm:$0xff] %v1787_v51  ;;  %2195 = vrot.lane.b32.xlu0 %v8544_v17, %s7891_s17 }
 0x2db   : > { %1416 = vst [vmem:[#allocation4 + $0x3c] sm:$0xff] %v1382_v49  ;;  %1621 = vrot.lane.b32.xlu2 %v8784_v30, %s7890_s16  ;;  %1756 = vrot.lane.b32.xlu1 %v8761_v50, %s7888_s14 }
 0x2dc   : > { %v8864_v5 = vpop.permute.xlu0 %1470 }
 0x2dd   : > { %v1910_v42 = vpop.permute.xlu1 %1909  ;;  %v8866_v24 = vpop.permute.xlu2 %1750 }
 0x2de   : > { %v1935_v57 = vrot.slane %v1910_v42, 4  ;;  %v1771_v36 = vrot.slane %v8866_v24, 4 }
 0x2e0   : > { %v1955_v39 = vsel %vm1364_vm1, %v1935_v57, %v1936_v26  ;;  %v1794_v30 = vsel %vm1777_vm4, %v8866_v24, %v1771_v36  ;;  %v1496_v26 = vrot.slane %v1475_v8, 4  ;;  %v7871_v24 = vld [vmem:[#allocation4 + $0x198] sm:$0xff] }
 0x2e1   : > { %v1956_v31 = vsel %vm1946_vm2, %v1910_v42, %v1955_v39  ;;  %1828 = vst [vmem:[#allocation4 + $0x164] sm:$0xf] %v1794_v30 }
 0x2e2   : > { %1992 = vst [vmem:[#allocation4 + $0x204] sm:$0xff] %v1956_v31  ;;  %2201 = vrot.lane.b32.xlu0 %v8830_v7, %s7891_s17 }
 0x2e3   : > { %2199 = vrot.lane.b32.xlu2 %v8548_v29, %s7891_s17  ;;  %1923 = vrot.lane.b32.xlu1 %v1878_v63, %s7889_s15 }
 0x2e4   : > { %v1477_v52 = vpop.permute.xlu0 %1476 }
 0x2e5   : > { %v1600_v55 = vpop.permute.xlu1 %1599  ;;  %v1497_v28 = vrot.slane %v1477_v52, 4  ;;  %v1918_v21 = vpop.permute.xlu2 %1917 }
 0x2e6   : > { %v1627_v44 = vrot.slane %v1600_v55, 4  ;;  %v1939_v54 = vrot.slane %v1918_v21, 4 }
 0x2e7   : > { %v1518_v18 = vsel %vm1364_vm1, %v1496_v26, %v1497_v28  ;;  %v1520_v13 = vsel %vm1503_vm14, %v1477_v52, %v1497_v28  ;;  %v1494_v26 = vrot.slane %v8864_v5, 4 }
 0x2e8   : > { %v1646_v25 = vsel %vm1364_vm1, %v1627_v44, %v1628_v62  ;;  %v1519_v45 = vsel %vm1503_vm14, %v1475_v8, %v1518_v18  ;;  %1554 = vst [vmem:[#allocation4 + $0xa4] sm:$0xf] %v1520_v13 }
 0x2e9   : > { %v1647_v6 = vsel %vm1640_vm3, %v1600_v55, %v1646_v25  ;;  %1553 = vst [vmem:[#allocation4 + $0x9c] sm:$0xff] %v1519_v45 }
 0x2ea   : > { %1684 = vst [vmem:[#allocation4 + $0xd8] sm:$0xff] %v1647_v6  ;;  %2177 = vrot.lane.b32.xlu0 %v8558_v32, %s7891_s17 }
 0x2eb   : > { %2060 = vrot.lane.b32.xlu2 %v1878_v63, %s10755_s18  ;;  %1619 = vrot.lane.b32.xlu1 %v8761_v50, %s7890_s16 }
 0x2ec   : > { %v1747_v35 = vpop.permute.xlu0 %1746 }
 0x2ed   : > { %v1606_v48 = vpop.permute.xlu1 %1605  ;;  %v1769_v62 = vrot.slane %v1747_v35, 4  ;;  %v8894_v33 = vpop.permute.xlu2 %1611 }
 0x2ee   : > { %v1630_v40 = vrot.slane %v1606_v48, 4  ;;  %v1633_v18 = vrot.slane %v8894_v33, 4 }
 0x2ef   : > { %v1789_v8 = vsel %vm1364_vm1, %v1768_v22, %v1769_v62  ;;  %v1791_v14 = vsel %vm1777_vm4, %v1747_v35, %v1769_v62 }
 0x2f0   : > { %v1649_v32 = vsel %vm1364_vm1, %v1629_v20, %v1630_v40  ;;  %v1651_v9 = vsel %vm1640_vm3, %v1606_v48, %v1630_v40  ;;  %v1790_v47 = vsel %vm1777_vm4, %v1745_v15, %v1789_v8  ;;  %1826 = vst [vmem:[#allocation4 + $0x158] sm:$0xf] %v1791_v14 }
 0x2f1   : > { %v1650_v50 = vsel %vm1640_vm3, %v8803_v43, %v1649_v32  ;;  %1687 = vst [vmem:[#allocation4 + $0xec] sm:$0xf] %v1651_v9 }
 0x2f2   : > { %1686 = vst [vmem:[#allocation4 + $0xe4] sm:$0xff] %v1650_v50  ;;  %2062 = vrot.lane.b32.xlu0 %v8548_v29, %s10755_s18 }
 0x2f3   : > { %1825 = vst [vmem:[#allocation4 + $0x150] sm:$0xff] %v1790_v47  ;;  %2332 = vrot.lane.b32.xlu2 %v8544_v17, %s7893_s19  ;;  %2197 = vrot.lane.b32.xlu1 %v1878_v63, %s7891_s17 }
 0x2f4   : > { %v8909_v41 = vpop.permute.xlu0 %1913 }
 0x2f5   : > { %v2184_v3 = vpop.permute.xlu1 %2183  ;;  %v8911_v60 = vpop.permute.xlu2 %2189  ;;  %v1937_v8 = vrot.slane %v8909_v41, 4 }
 0x2f6   : > { %v2209_v12 = vrot.slane %v2184_v3, 4  ;;  %v2212_v43 = vrot.slane %v8911_v60, 4 }
 0x2f8   : > { %v2229_v15 = vsel %vm1364_vm1, %v2209_v12, %v2210_v19  ;;  %v2234_v29 = vsel %vm2220_vm5, %v8911_v60, %v2212_v43 }
 0x2f9   : > { %v2230_v58 = vsel %vm2220_vm5, %v2184_v3, %v2229_v15  ;;  %2269 = vst [vmem:[#allocation4 + $0x2d8] sm:$0xf] %v2234_v29 }
 0x2fa   : > { %2266 = vst [vmem:[#allocation4 + $0x2c4] sm:$0xff] %v2230_v58  ;;  %2334 = vrot.lane.b32.xlu0 %v1878_v63, %s7893_s19 }
 0x2fb   : > { %2338 = vrot.lane.b32.xlu2 %v8830_v7, %s7893_s19  ;;  %2058 = vrot.lane.b32.xlu1 %v8544_v17, %s10755_s18 }
 0x2fc   : > { %v1920_v27 = vpop.permute.xlu0 %1919 }
 0x2fd   : > { %v1335_v19 = vpop.permute.xlu1 %1334  ;;  %v1940_v10 = vrot.slane %v1920_v27, 4  ;;  %v8927_v11 = vpop.permute.xlu2 %1342 }
 0x2fe   : > { %v1357_v16 = vrot.slane %v1335_v19, 4  ;;  %v1361_v49 = vrot.slane %v8927_v11, 4 }
 0x2ff   : > { %v1961_v51 = vsel %vm1364_vm1, %v1939_v54, %v1940_v10  ;;  %v1963_v42 = vsel %vm1946_vm2, %v1920_v27, %v1940_v10 }
 0x300   : > { %v1378_v57 = vsel %vm1364_vm1, %v1356_v38, %v1357_v16  ;;  %v1380_v39 = vsel %vm1366_vm15, %v1335_v19, %v1357_v16  ;;  %v1962_v17 = vsel %vm1946_vm2, %v1918_v21, %v1961_v51  ;;  %1997 = vst [vmem:[#allocation4 + $0x224] sm:$0xf] %v1963_v42  ;;  %v1386_v31 = vsel %vm1366_vm15, %v8927_v11, %v1361_v49 }
 0x301   : > { %v1379_v30 = vsel %vm1366_vm15, %v8838_v23, %v1378_v57  ;;  %1415 = vst [vmem:[#allocation4 + $0x38] sm:$0xf] %v1380_v39  ;;  %v2283_v39 = vld [vmem:[#allocation2 + $0x48] sm:$0xff] }
 0x302   : > { %1414 = vst [vmem:[#allocation4 + $0x30] sm:$0xff] %v1379_v30  ;;  %2050 = vrot.lane.b32.xlu0 %v8532_v46, %s10755_s18 }
 0x303   : > { %1996 = vst [vmem:[#allocation4 + $0x21c] sm:$0xff] %v1962_v17  ;;  %2054 = vrot.lane.b32.xlu2 %v8534_v37, %s10755_s18  ;;  %2064 = vrot.lane.b32.xlu1 %v8830_v7, %s10755_s18  ;;  %v2003_v17 = vld [vmem:[#allocation2 + $0xc] sm:$0xff] }
 0x304   : > { %1419 = vst [vmem:[#allocation4 + $0x50] sm:$0xf] %v1386_v31  ;;  %v1608_v63 = vpop.permute.xlu0 %1607 }
 0x305   : > { %v1473_v23 = vpop.permute.xlu1 %1472  ;;  %v8948_v52 = vpop.permute.xlu2 %1478  ;;  %v1631_v3 = vrot.slane %v1608_v63, 4 }
 0x306   : > { %v1495_v55 = vrot.slane %v1473_v23, 4  ;;  %v1498_v27 = vrot.slane %v8948_v52, 4 }
 0x308   : > { %v1515_v28 = vsel %vm1364_vm1, %v1494_v26, %v1495_v55  ;;  %v1517_v21 = vsel %vm1503_vm14, %v1473_v23, %v1495_v55 }
 0x309   : > { %v1516_v44 = vsel %vm1503_vm14, %v8864_v5, %v1515_v28  ;;  %1552 = vst [vmem:[#allocation4 + $0x98] sm:$0xf] %v1517_v21 }
 0x30a   : > { %1551 = vst [vmem:[#allocation4 + $0x90] sm:$0xff] %v1516_v44  ;;  %2056 = vrot.lane.b32.xlu0 %v8688_v4, %s10755_s18 }
 0x30b   : > { %2326 = vrot.lane.b32.xlu2 %v8728_v1, %s7893_s19  ;;  %2336 = vrot.lane.b32.xlu1 %v8564_v0, %s7893_s19 }
 0x30c   : > { %v1614_v7 = vpop.permute.xlu0 %1613 }
 0x30d   : > { %v1749_v13 = vpop.permute.xlu1 %1748  ;;  %v1634_v25 = vrot.slane %v1614_v7, 4  ;;  %v8962_v45 = vpop.permute.xlu2 %1484 }
 0x30e   : > { %v1770_v6 = vrot.slane %v1749_v13, 4  ;;  %v1501_v5 = vrot.slane %v8962_v45, 4 }
 0x30f   : > { %v1655_v35 = vsel %vm1364_vm1, %v1633_v18, %v1634_v25  ;;  %v1657_v22 = vsel %vm1640_vm3, %v1614_v7, %v1634_v25  ;;  %v9035_v18 = vld [vmem:[#allocation4 + $0x18c] sm:$0xff]  ;;  %v7874_v25 = vld [vmem:[#allocation4 + $0x180] sm:$0xff] }
 0x310   : > { %v1792_v48 = vsel %vm1364_vm1, %v1770_v6, %v1771_v36  ;;  %v1656_v0 = vsel %vm1640_vm3, %v8894_v33, %v1655_v35  ;;  %1691 = vst [vmem:[#allocation4 + $0x104] sm:$0xf] %v1657_v22  ;;  %v1526_v62 = vsel %vm1503_vm14, %v8962_v45, %v1501_v5 }
 0x311   : > { %v1793_v20 = vsel %vm1777_vm4, %v1749_v13, %v1792_v48  ;;  %1690 = vst [vmem:[#allocation4 + $0xfc] sm:$0xff] %v1656_v0  ;;  %v2281_v13 = vld [vmem:[#allocation2 + $0x34] sm:$0xff] }
 0x312   : > { %1827 = vst [vmem:[#allocation4 + $0x15c] sm:$0xff] %v1793_v20  ;;  %2328 = vrot.lane.b32.xlu0 %v8534_v37, %s7893_s19 }
 0x313   : > { %1558 = vst [vmem:[#allocation4 + $0xbc] sm:$0xf] %v1526_v62  ;;  %2042 = vrot.lane.b32.xlu2 %v7871_v24, %s10755_s18  ;;  %2052 = vrot.lane.b32.xlu1 %v8728_v1, %s10755_s18 }
 0x314   : > { %v8982_v36 = vpop.permute.xlu0 %2191 }
 0x315   : > { %v1916_v33 = vpop.permute.xlu1 %1915  ;;  %v1753_v40 = vpop.permute.xlu2 %1752  ;;  %v2213_v23 = vrot.slane %v8982_v36, 4 }
 0x316   : > { %v1938_v14 = vrot.slane %v1916_v33, 4  ;;  %v1772_v60 = vrot.slane %v1753_v40, 4 }
 0x318   : > { %v1958_v32 = vsel %vm1364_vm1, %v1937_v8, %v1938_v14  ;;  %v1960_v9 = vsel %vm1946_vm2, %v1916_v33, %v1938_v14 }
 0x319   : > { %v1959_v37 = vsel %vm1946_vm2, %v8909_v41, %v1958_v32  ;;  %1995 = vst [vmem:[#allocation4 + $0x218] sm:$0xf] %v1960_v9 }
 0x31a   : > { %1994 = vst [vmem:[#allocation4 + $0x210] sm:$0xff] %v1959_v37  ;;  %2044 = vrot.lane.b32.xlu0 %v8581_v34, %s10755_s18 }
 0x31b   : > { %2048 = vrot.lane.b32.xlu2 %v8588_v56, %s10755_s18  ;;  %2324 = vrot.lane.b32.xlu1 %v8532_v46, %s7893_s19  ;;  %v7872_v56 = vld [vmem:[#allocation4 + $0x1a4] sm:$0xff] }
 0x31c   : > { %v8995_v1 = vpop.permute.xlu0 %1344 }
 0x31d   : > { %v1610_v47 = vpop.permute.xlu1 %1609  ;;  %v8997_v50 = vpop.permute.xlu2 %1758  ;;  %v1362_v14 = vrot.slane %v8995_v1, 4 }
 0x31e   : > { %v1632_v12 = vrot.slane %v1610_v47, 4  ;;  %v1775_v41 = vrot.slane %v8997_v50, 4 }
 0x320   : > { %v1652_v15 = vsel %vm1364_vm1, %v1631_v3, %v1632_v12  ;;  %v1654_v29 = vsel %vm1640_vm3, %v1610_v47, %v1632_v12  ;;  %v1800_v34 = vsel %vm1777_vm4, %v8997_v50, %v1775_v41  ;;  %v2581_v47 = vld [vmem:[%s10749_s8] sm:$0xff] }
 0x321   : > { %v1653_v46 = vsel %vm1640_vm3, %v1608_v63, %v1652_v15  ;;  %1689 = vst [vmem:[#allocation4 + $0xf8] sm:$0xf] %v1654_v29  ;;  %v2583_v29 = vld [vmem:[%s10749_s8 + $0x10] sm:$0xff] }
 0x322   : > { %1688 = vst [vmem:[#allocation4 + $0xf0] sm:$0xff] %v1653_v46  ;;  %2316 = vrot.lane.b32.xlu0 %v7871_v24, %s7893_s19 }
 0x323   : > { %1832 = vst [vmem:[#allocation4 + $0x17c] sm:$0xf] %v1800_v34  ;;  %2320 = vrot.lane.b32.xlu2 %v7872_v56, %s7893_s19  ;;  %2330 = vrot.lane.b32.xlu1 %v8688_v4, %s7893_s19 }
 0x324   : > { %v1481_v58 = vpop.permute.xlu0 %1480 }
 0x325   : > { %v2188_v54 = vpop.permute.xlu1 %2187  ;;  %v1499_v19 = vrot.slane %v1481_v58, 4  ;;  %v9012_v10 = vpop.permute.xlu2 %1925 }
 0x326   : > { %v2211_v38 = vrot.slane %v2188_v54, 4  ;;  %v1943_v11 = vrot.slane %v9012_v10, 4 }
 0x327   : > { %v1521_v16 = vsel %vm1364_vm1, %v1498_v27, %v1499_v19  ;;  %v1523_v51 = vsel %vm1503_vm14, %v1481_v58, %v1499_v19 }
 0x328   : > { %v2232_v42 = vsel %vm1364_vm1, %v2211_v38, %v2212_v43  ;;  %v1522_v57 = vsel %vm1503_vm14, %v8948_v52, %v1521_v16  ;;  %1556 = vst [vmem:[#allocation4 + $0xb0] sm:$0xf] %v1523_v51  ;;  %v2584_v16 = vld [vmem:[%s10749_s8 + $0x18] sm:$0xff] }
 0x329   : > { %v2233_v4 = vsel %vm2220_vm5, %v2188_v54, %v2232_v42  ;;  %1555 = vst [vmem:[#allocation4 + $0xa8] sm:$0xff] %v1522_v57 }
 0x32a   : > { %2268 = vst [vmem:[#allocation4 + $0x2d0] sm:$0xff] %v2233_v4  ;;  %2322 = vrot.lane.b32.xlu0 %v2283_v39, %s7893_s19  ;;  %v2586_v4 = vld [vmem:[%s10749_s8 + $0x28] sm:$0xff] }
 0x32b   : > { %2036 = vrot.lane.b32.xlu2 %v2003_v17, %s10755_s18  ;;  %2046 = vrot.lane.b32.xlu1 %v7872_v56, %s10755_s18 }
 0x32c   : > { %v1755_v30 = vpop.permute.xlu0 %1754 }
 0x32d   : > { %v2194_v31 = vpop.permute.xlu1 %2193  ;;  %v1773_v43 = vrot.slane %v1755_v30, 4  ;;  %v9025_v63 = vpop.permute.xlu2 %1615 }
 0x32e   : > { %v2214_v52 = vrot.slane %v2194_v31, 4  ;;  %v1635_v56 = vrot.slane %v9025_v63, 4 }
 0x32f   : > { %v1795_v26 = vsel %vm1364_vm1, %v1772_v60, %v1773_v43  ;;  %v1797_v55 = vsel %vm1777_vm4, %v1755_v30, %v1773_v43  ;;  %v2587_v60 = vld [vmem:[%s10749_s8 + $0x30] sm:$0xff]  ;;  %v3874_v43 = vld [vmem:[%s10751_s10] sm:$0xff] }
 0x330   : > { %v2235_v28 = vsel %vm1364_vm1, %v2213_v23, %v2214_v52  ;;  %v2237_v21 = vsel %vm2220_vm5, %v2194_v31, %v2214_v52  ;;  %v1796_v44 = vsel %vm1777_vm4, %v1753_v40, %v1795_v26  ;;  %1830 = vst [vmem:[#allocation4 + $0x170] sm:$0xf] %v1797_v55  ;;  %v6779_v52 = vld [vmem:[#allocation4 + $0xa8] sm:$0xf] }
 0x331   : > { %v2236_v7 = vsel %vm2220_vm5, %v8982_v36, %v2235_v28  ;;  %2271 = vst [vmem:[#allocation4 + $0x2e4] sm:$0xf] %v2237_v21  ;;  %v2279_v36 = vld [vmem:[#allocation2 + $0x20] sm:$0xff] }
 0x332   : > { %2270 = vst [vmem:[#allocation4 + $0x2dc] sm:$0xff] %v2236_v7  ;;  %2038 = vrot.lane.b32.xlu0 %v9035_v18, %s10755_s18 }
 0x333   : > { %1829 = vst [vmem:[#allocation4 + $0x168] sm:$0xff] %v1796_v44  ;;  %2308 = vrot.lane.b32.xlu2 %v7874_v25, %s7893_s19  ;;  %2318 = vrot.lane.b32.xlu1 %v2281_v13, %s7893_s19 }
 0x334   : > { %v9041_v6 = vpop.permute.xlu0 %1921 }
 0x335   : > { %v1341_v35 = vpop.permute.xlu1 %1340  ;;  %v9043_v22 = vpop.permute.xlu2 %1621 }
 0x336   : > { %v1360_v48 = vrot.slane %v1341_v35, 4  ;;  %v1638_v0 = vrot.slane %v9043_v22, 4 }
 0x338   : > { %v1384_v62 = vsel %vm1364_vm1, %v1360_v48, %v1361_v49  ;;  %v1663_v20 = vsel %vm1640_vm3, %v9043_v22, %v1638_v0 }
 0x339   : > { %v1385_v24 = vsel %vm1366_vm15, %v1341_v35, %v1384_v62  ;;  %1695 = vst [vmem:[#allocation4 + $0x11c] sm:$0xf] %v1663_v20  ;;  %v7623_v35 = vld [vmem:[#allocation4 + $0x98] sm:$0xf0] }
 0x33a   : > { %1418 = vst [vmem:[#allocation4 + $0x48] sm:$0xff] %v1385_v24  ;;  %2310 = vrot.lane.b32.xlu0 %v2003_v17, %s7893_s19  ;;  %v3856_v24 = vld [vmem:[%s10750_s9] sm:$0xff] }
 0x33b   : > { %2314 = vrot.lane.b32.xlu2 %v2279_v36, %s7893_s19  ;;  %2034 = vrot.lane.b32.xlu1 %v7874_v25, %s10755_s18 }
 0x33c   : > { %v1928_v33 = vpop.permute.xlu0 %1927 }
 0x33d   : > { %v1944_v49 = vrot.slane %v1928_v33, 4  ;;  %v1347_v40 = vpop.permute.xlu1 %1346  ;;  %v9058_v8 = vpop.permute.xlu2 %2199 }
 0x33e   : > { %v1363_v32 = vrot.slane %v1347_v40, 4  ;;  %v2217_v28 = vrot.slane %v9058_v8, 4 }
 0x33f   : > { %v1967_v9 = vsel %vm1364_vm1, %v1943_v11, %v1944_v49  ;;  %v1969_v37 = vsel %vm1946_vm2, %v1928_v33, %v1944_v49  ;;  %v3991_v49 = vld [vmem:[%s10750_s9 + $0x10] sm:$0xff] }
 0x340   : > { %v1968_v3 = vsel %vm1946_vm2, %v9012_v10, %v1967_v9  ;;  %2001 = vst [vmem:[#allocation4 + $0x23c] sm:$0xf] %v1969_v37  ;;  %v1387_v12 = vsel %vm1364_vm1, %v1362_v14, %v1363_v32  ;;  %v1389_v15 = vsel %vm1366_vm15, %v1347_v40, %v1363_v32  ;;  %v2585_v40 = vld [vmem:[%s10749_s8 + $0x20] sm:$0xff]  ;;  %v7620_v14 = vld [vmem:[#allocation4 + $0x80] sm:$0xf0] }
 0x341   : > { %2000 = vst [vmem:[#allocation4 + $0x234] sm:$0xff] %v1968_v3  ;;  %v1388_v34 = vsel %vm1366_vm15, %v8995_v1, %v1387_v12  ;;  %v6875_v9 = vld [vmem:[#allocation4 + $0x168] sm:$0xf] }
 0x342   : > { %1420 = vst [vmem:[#allocation4 + $0x54] sm:$0xff] %v1388_v34  ;;  %2591 = vperm.xlu0 %7840, %v2581_v47   ;;  %v6755_v47 = vld [vmem:[#allocation4 + $0x78] sm:$0xf]  ;;  %v2205_v34 = vrot.slane %v8663_v53, 4  ;;  %v6731_v22 = vld [vmem:[#allocation4 + $0x48] sm:$0xf] }
 0x343   : > { %1421 = vst [vmem:[#allocation4 + $0x5c] sm:$0xf] %v1389_v15  ;;  %2601 = vperm.xlu2 %7842, %v2583_v29   ;;  %2040 = vrot.lane.b32.xlu1 %v2279_v36, %s10755_s18  ;;  %v6756_v12 = vor.u32 %v7620_v14, %v6755_v47  ;;  %v7647_v15 = vld [vmem:[#allocation4 + $0x158] sm:$0xf0]  ;;  %v7617_v29 = vld [vmem:[#allocation4 + $0x68] sm:$0xf0] }
 0x344   : > { %v1618_v46 = vpop.permute.xlu0 %1617  ;;  %v7608_v47 = vld [vmem:[#allocation4 + $0x20] sm:$0xf0]  ;;  %s7822_s18 = smul.u32 3, %s10762_s26 }
 0x345   : > { %v1636_v58 = vrot.slane %v1618_v46, 4  ;;  %v1483_v27 = vpop.permute.xlu1 %1482  ;;  %v9077_v54 = vpop.permute.xlu2 %2060 }
 0x346   : > { %v1500_v19 = vrot.slane %v1483_v27, 4  ;;  %v2079_v10 = vrot.slane %v9077_v54, 4  ;;  %s458_s27 = scalar_lea.vmem %s10754_s13, %s7822_s18 }
 0x347   : > { %v1658_v38 = vsel %vm1364_vm1, %v1635_v56, %v1636_v58  ;;  %v1660_v1 = vsel %vm1640_vm3, %v1618_v46, %v1636_v58 }
 0x348   : > { %v1659_v51 = vsel %vm1640_vm3, %v9025_v63, %v1658_v38  ;;  %1693 = vst [vmem:[#allocation4 + $0x110] sm:$0xf] %v1660_v1  ;;  %v1524_v42 = vsel %vm1364_vm1, %v1500_v19, %v1501_v5  ;;  %v2103_v57 = vsel %vm2083_vm6, %v9077_v54, %v2079_v10  ;;  %v2582_v63 = vld [vmem:[%s10749_s8 + $0x8] sm:$0xff] }
 0x349   : > { %1692 = vst [vmem:[#allocation4 + $0x108] sm:$0xff] %v1659_v51  ;;  %v1525_v39 = vsel %vm1503_vm14, %v1483_v27, %v1524_v42  ;;  %v6863_v27 = vld [vmem:[#allocation4 + $0x150] sm:$0xf]  ;;  %v6743_v38 = vld [vmem:[#allocation4 + $0x60] sm:$0xf] }
 0x34a   : > { %1557 = vst [vmem:[#allocation4 + $0xb4] sm:$0xff] %v1525_v39  ;;  %2606 = vperm.xlu0 %7840, %v2584_v16   ;;  %v6864_v1 = vor.u32 %v7647_v15, %v6863_v27  ;;  %v6744_v42 = vor.u32 %v7617_v29, %v6743_v38  ;;  %v7644_v39 = vld [vmem:[#allocation4 + $0x140] sm:$0xf0]  ;;  %v7665_v27 = vld [vmem:[#allocation4 + $0x1e8] sm:$0xf0] }
 0x34b   : > { %2136 = vst [vmem:[#allocation4 + $0x290] sm:$0xf] %v2103_v57  ;;  %2616 = vperm.xlu2 %7842, %v2586_v4   ;;  %2312 = vrot.lane.b32.xlu1 %v9035_v18, %s7893_s19  ;;  %v1941_v18 = vrot.slane %v9041_v6, 4  ;;  %v3875_v57 = vld [vmem:[%s10751_s10 + $0x8] sm:$0xff]  ;;  %v6851_v4 = vld [vmem:[#allocation4 + $0x138] sm:$0xf] }
 0x34c   : > { %v9100_v45 = vpop.permute.xlu0 %2195  ;;  %v7605_v38 = vld [vmem:[#allocation4 + $0x8] sm:$0xf0] }
 0x34d   : > { %v1757_v5 = vpop.permute.xlu1 %1756  ;;  %v9102_v17 = vpop.permute.xlu2 %2332 }
 0x34e   : > { %v1774_v30 = vrot.slane %v1757_v5, 4 }
 0x350   : > { %v1798_v31 = vsel %vm1364_vm1, %v1774_v30, %v1775_v41  ;;  %v6767_v41 = vld [vmem:[#allocation4 + $0x90] sm:$0xf] }
 0x351   : > { %v1799_v23 = vsel %vm1777_vm4, %v1757_v5, %v1798_v31  ;;  %v7626_v26 = vld [vmem:[#allocation4 + $0xb0] sm:$0xf0]  ;;  %v6768_v20 = vor.u32 %v7623_v35, %v6767_v41  ;;  %v7671_v35 = vld [vmem:[#allocation4 + $0x218] sm:$0xf0] }
 0x352   : > { %1831 = vst [vmem:[#allocation4 + $0x174] sm:$0xff] %v1799_v23  ;;  %2621 = vperm.xlu0 %7840, %v2587_v60   ;;  %v6780_v55 = vor.u32 %v7626_v26, %v6779_v52  ;;  %v4010_v60 = vld [vmem:[%s10751_s10 + $0x18] sm:$0xff]  ;;  %v6839_v26 = vld [vmem:[#allocation4 + $0x120] sm:$0xf] }
 0x353   : > { %3878 = vperm.xlu2 %7842, %v3874_v43   ;;  %2596 = vperm.xlu1 %7841, %v2582_v63   ;;  %v2588_v31 = vld [vmem:[%s10749_s8 + $0x38] sm:$0xff] }
 0x354   : > { %3318 = vmatpush.bf16.msra.mxu3 %v6780_v55  ;;  %v2202_v50 = vpop.permute.xlu0 %2201  ;;  %v7614_v43 = vld [vmem:[#allocation4 + $0x50] sm:$0xf0] }
 0x355   : > { %v2218_v21 = vrot.slane %v2202_v50, 4  ;;  %v1924_v44 = vpop.permute.xlu1 %1923  ;;  %v9118_v7 = vpop.permute.xlu2 %2338  ;;  %v7674_v23 = vld [vmem:[#allocation4 + $0x230] sm:$0xf0]  ;;  %v6732_v55 = vor.u32 %v7614_v43, %v6731_v22  ;;  %v6923_v43 = vld [vmem:[#allocation4 + $0x1c8] sm:$0xf]  ;;  %v4126_v22 = vld [vmem:[%s10750_s9 + $0x20] sm:$0xff] }
 0x356   : > { %v1942_v13 = vrot.slane %v1924_v44, 4  ;;  %v2355_v25 = vrot.slane %v9118_v7, 4 }
 0x357   : > { %v2241_v48 = vsel %vm1364_vm1, %v2217_v28, %v2218_v21  ;;  %v2243_v62 = vsel %vm2220_vm5, %v2202_v50, %v2218_v21  ;;  %v6959_v50 = vld [vmem:[#allocation4 + $0x210] sm:$0xf]  ;;  %v7641_v21 = vld [vmem:[#allocation4 + $0x128] sm:$0xf0] }
 0x358   : > { %v2242_v36 = vsel %vm2220_vm5, %v9058_v8, %v2241_v48  ;;  %2275 = vst [vmem:[#allocation4 + $0x2fc] sm:$0xf] %v2243_v62  ;;  %v1964_v33 = vsel %vm1364_vm1, %v1941_v18, %v1942_v13  ;;  %v1966_v11 = vsel %vm1946_vm2, %v1924_v44, %v1942_v13  ;;  %v2380_v8 = vsel %vm2357_vm7, %v9118_v7, %v2355_v25  ;;  %v6719_v28 = vld [vmem:[#allocation4 + $0x30] sm:$0xf] }
 0x359   : > { %2274 = vst [vmem:[#allocation4 + $0x2f4] sm:$0xff] %v2242_v36  ;;  %v1965_v32 = vsel %vm1946_vm2, %v9041_v6, %v1964_v33  ;;  %3319 = vmatpush.bf16.msra.mxu3 %v6768_v20  ;;  %v7650_v37 = vld [vmem:[#allocation4 + $0x170] sm:$0xf0]  ;;  %v6840_v13 = vor.u32 %v7641_v21, %v6839_v26  ;;  %v2215_v48 = vrot.slane %v9100_v45, 4  ;;  %v6960_v36 = vor.u32 %v7671_v35, %v6959_v50  ;;  %v4261_v50 = vld [vmem:[%s10750_s9 + $0x30] sm:$0xff] }
 0x35a   : > { %1998 = vst [vmem:[#allocation4 + $0x228] sm:$0xff] %v1965_v32  ;;  %3860 = vperm.xlu0 %7840, %v3856_v24   ;;  %v6876_v3 = vor.u32 %v7650_v37, %v6875_v9  ;;  %v7611_v24 = vld [vmem:[#allocation4 + $0x38] sm:$0xf0]  ;;  %v4127_v9 = vld [vmem:[%s10750_s9 + $0x28] sm:$0xff] }
 0x35b   : > { %1999 = vst [vmem:[#allocation4 + $0x230] sm:$0xf] %v1966_v11  ;;  %3995 = vperm.xlu2 %7842, %v3991_v49   ;;  %2611 = vperm.xlu1 %7841, %v2585_v40   ;;  %v6720_v33 = vor.u32 %v7611_v24, %v6719_v28  ;;  %v3992_v11 = vld [vmem:[%s10750_s9 + $0x18] sm:$0xff]  ;;  %v6947_v49 = vld [vmem:[#allocation4 + $0x1f8] sm:$0xf]  ;;  %v3857_v37 = vld [vmem:[%s10750_s9 + $0x8] sm:$0xff] }
 0x35c   : > { %2412 = vst [vmem:[#allocation4 + $0x35c] sm:$0xf] %v2380_v8  ;;  %3347 = vmatpush.bf16.msrb.mxu0 %v6876_v3  ;;  %v2178_v6 = vpop.permute.xlu0 %2177  ;;  %v7668_v40 = vld [vmem:[#allocation4 + $0x200] sm:$0xf0]  ;;  %v4009_v28 = vld [vmem:[%s10751_s10 + $0x10] sm:$0xff] }
 0x35d   : > { %3320 = vmatpush.bf16.msra.mxu3 %v6756_v12  ;;  %v2206_v46 = vrot.slane %v2178_v6, 4  ;;  %v1620_v56 = vpop.permute.xlu1 %1619  ;;  %v9144_v58 = vpop.permute.xlu2 %2054  ;;  %v6827_v12 = vld [vmem:[#allocation4 + $0x108] sm:$0xf]  ;;  %v6911_v24 = vld [vmem:[#allocation4 + $0x1b0] sm:$0xf] }
 0x35e   : > { %v1637_v19 = vrot.slane %v1620_v56, 4 }
 0x35f   : > { %v2223_v16 = vsel %vm1364_vm1, %v2205_v34, %v2206_v46  ;;  %v2225_v51 = vsel %vm2220_vm5, %v2178_v6, %v2206_v46  ;;  %v6707_v6 = vld [vmem:[#allocation4 + $0x18] sm:$0xf]  ;;  %v6948_v34 = vor.u32 %v7668_v40, %v6947_v49  ;;  %v7695_v49 = vld [vmem:[#allocation4 + $0x2d8] sm:$0xf0] }
 0x360   : > { %v2224_v5 = vsel %vm2220_vm5, %v8663_v53, %v2223_v16  ;;  %2263 = vst [vmem:[#allocation4 + $0x2b4] sm:$0xf] %v2225_v51  ;;  %v1661_v30 = vsel %vm1364_vm1, %v1637_v19, %v1638_v0  ;;  %3348 = vmatpush.bf16.msrb.mxu0 %v6864_v1  ;;  %v6852_v0 = vor.u32 %v7644_v39, %v6851_v4  ;;  %v6935_v1 = vld [vmem:[#allocation4 + $0x1e0] sm:$0xf]  ;;  %v2352_v16 = vrot.slane %v9102_v17, 4 }
 0x361   : > { %2262 = vst [vmem:[#allocation4 + $0x2ac] sm:$0xff] %v2224_v5  ;;  %v1662_v63 = vsel %vm1640_vm3, %v1620_v56, %v1661_v30  ;;  %3321 = vmatpush.bf16.msra.mxu3 %v6744_v42  ;;  %v6971_v53 = vld [vmem:[#allocation4 + $0x228] sm:$0xf]  ;;  %v6708_v46 = vor.u32 %v7608_v47, %v6707_v6  ;;  %v6815_v56 = vld [vmem:[#allocation4 + $0xf0] sm:$0xf] }
 0x362   : > { %1694 = vst [vmem:[#allocation4 + $0x114] sm:$0xff] %v1662_v63  ;;  %3883 = vperm.xlu0 %7840, %v3875_v57   ;;  %v6972_v52 = vor.u32 %v7674_v23, %v6971_v53  ;;  %v6615_v4 = vld [vmem:[%s10748_s7] sm:$0xf]  ;;  %v7586_v39 = vld [vmem:[%s10748_s7 + $0x10] sm:$0xf0] }
 0x363   : > { %4018 = vperm.xlu2 %7842, %v4010_v60   ;;  %2626 = vperm.xlu1 %7841, %v2588_v31   ;;  %v6695_v30 = vld [vmem:[#allocation4] sm:$0xf]  ;;  %v6936_v31 = vor.u32 %v7665_v27, %v6935_v1  ;;  %v9211_v21 = vor.u32 %v7586_v39, %v6615_v4  ;;  %v6781_v40 = vld [vmem:[#allocation4 + $0xb4] sm:$0xf0]  ;;  %v7055_v6 = vld [vmem:[#allocation4 + $0x2d0] sm:$0xf] }
 0x364   : > { %3349 = vmatpush.bf16.msrb.mxu0 %v6852_v0  ;;  %3376 = vmatpush.bf16.msrb.mxu1 %v6972_v52  ;;  %v9163_v41 = vpop.permute.xlu0 %2062  ;;  %v6696_v23 = vor.u32 %v7605_v38, %v6695_v30  ;;  %v7632_v0 = vld [vmem:[#allocation4 + $0xe0] sm:$0xf0]  ;;  %v7662_v52 = vld [vmem:[#allocation4 + $0x1d0] sm:$0xf0]  ;;  %v6899_v27 = vld [vmem:[#allocation4 + $0x198] sm:$0xf] }
 0x365   : > { %3322 = vmatpush.bf16.msra.mxu3 %v6732_v55  ;;  %v2198_v44 = vpop.permute.xlu1 %2197  ;;  %v9165_v18 = vpop.permute.xlu2 %2326  ;;  %v2080_v47 = vrot.slane %v9163_v41, 4  ;;  %v7692_v4 = vld [vmem:[#allocation4 + $0x2c0] sm:$0xf0]  ;;  %v6887_v30 = vld [vmem:[#allocation4 + $0x180] sm:$0xf] }
 0x366   : > { %v2216_v62 = vrot.slane %v2198_v44, 4  ;;  %v2349_v20 = vrot.slane %v9165_v18, 4 }
 0x368   : > { %v2238_v14 = vsel %vm1364_vm1, %v2215_v48, %v2216_v62  ;;  %v2240_v32 = vsel %vm2220_vm5, %v2198_v44, %v2216_v62  ;;  %v2371_v8 = vsel %vm2357_vm7, %v9165_v18, %v2349_v20  ;;  %3350 = vmatpush.bf16.msrb.mxu0 %v6840_v13  ;;  %3377 = vmatpush.bf16.msrb.mxu1 %v6960_v36  ;;  %v6803_v44 = vld [vmem:[#allocation4 + $0xd8] sm:$0xf]  ;;  %v7698_v13 = vld [vmem:[#allocation4 + $0x2f0] sm:$0xf0]  ;;  %v7629_v62 = vld [vmem:[#allocation4 + $0xc8] sm:$0xf0] }
 0x369   : > { %v2239_v3 = vsel %vm2220_vm5, %v9100_v45, %v2238_v14  ;;  %2273 = vst [vmem:[#allocation4 + $0x2f0] sm:$0xf] %v2240_v32  ;;  %3323 = vmatpush.bf16.msra.mxu3 %v6720_v33  ;;  %v7638_v15 = vld [vmem:[#allocation4 + $0x110] sm:$0xf0]  ;;  %v7635_v45 = vld [vmem:[#allocation4 + $0xf8] sm:$0xf0]  ;;  %v6924_v48 = vor.u32 %v7662_v52, %v6923_v43 }
 0x36a   : > { %2272 = vst [vmem:[#allocation4 + $0x2e8] sm:$0xff] %v2239_v3  ;;  %4000 = vperm.xlu0 %7840, %v3992_v11   ;;  %v6828_v29 = vor.u32 %v7638_v15, %v6827_v12  ;;  %v6816_v60 = vor.u32 %v7635_v45, %v6815_v56  ;;  %v7659_v36 = vld [vmem:[#allocation4 + $0x1b8] sm:$0xf0]  ;;  %v6791_v11 = vld [vmem:[#allocation4 + $0xc0] sm:$0xf] }
 0x36b   : > { %2406 = vst [vmem:[#allocation4 + $0x338] sm:$0xf] %v2371_v8  ;;  %4135 = vperm.xlu2 %7842, %v4127_v9   ;;  %3865 = vperm.xlu1 %7841, %v3857_v37   ;;  %v7625_v8 = vld [vmem:[#allocation4 + $0xac] sm:$0xf]  ;;  %v7584_v9 = vld [vmem:[%s10748_s7 + $0x4] sm:$0xf]  ;;  %v6792_v15 = vor.u32 %v7629_v62, %v6791_v11 }
 0x36c   : > { %3351 = vmatpush.bf16.msrb.mxu0 %v6828_v29  ;;  %3378 = vmatpush.bf16.msrb.mxu1 %v6948_v34  ;;  %v2335_v19 = vpop.permute.xlu0 %2334  ;;  %v6617_v37 = vld [vmem:[%s10748_s7 + $0x14] sm:$0xf0]  ;;  %v6912_v29 = vor.u32 %v7659_v36, %v6911_v24  ;;  %v7056_v34 = vor.u32 %v7695_v49, %v7055_v6  ;;  %v4145_v56 = vld [vmem:[%s10751_s10 + $0x28] sm:$0xff]  ;;  %v6757_v43 = vld [vmem:[#allocation4 + $0x84] sm:$0xf0] }
 0x36d   : > { %3324 = vmatpush.bf16.msra.mxu3 %v6708_v46  ;;  %v2353_v51 = vrot.slane %v2335_v19, 4  ;;  %v2059_v42 = vpop.permute.xlu1 %2058  ;;  %v9187_v57 = vpop.permute.xlu2 %2042  ;;  %v6784_v46 = vor.u32 %v7625_v8, %v6781_v40  ;;  %v7031_v62 = vld [vmem:[#allocation4 + $0x2a0] sm:$0xf]  ;;  %v7649_v36 = vld [vmem:[#allocation4 + $0x16c] sm:$0xf] }
 0x36e   : > { %v2078_v5 = vrot.slane %v2059_v42, 4  ;;  %v6745_v8 = vld [vmem:[#allocation4 + $0x6c] sm:$0xf0]  ;;  %v6865_v6 = vld [vmem:[#allocation4 + $0x15c] sm:$0xf0] }
 0x36f   : > { %v2375_v63 = vsel %vm1364_vm1, %v2352_v16, %v2353_v51  ;;  %v2377_v53 = vsel %vm2357_vm7, %v2335_v19, %v2353_v51  ;;  %v7656_v19 = vld [vmem:[#allocation4 + $0x1a0] sm:$0xf0]  ;;  %v4144_v16 = vld [vmem:[%s10751_s10 + $0x20] sm:$0xff]  ;;  %v4279_v51 = vld [vmem:[%s10751_s10 + $0x30] sm:$0xff] }
 0x370   : > { %v2376_v26 = vsel %vm2357_vm7, %v9102_v17, %v2375_v63  ;;  %2410 = vst [vmem:[#allocation4 + $0x350] sm:$0xf] %v2377_v53  ;;  %v2101_v55 = vsel %vm1364_vm1, %v2078_v5, %v2079_v10  ;;  %3352 = vmatpush.bf16.msrb.mxu0 %v6816_v60  ;;  %3379 = vmatpush.bf16.msrb.mxu1 %v6936_v31  ;;  %v7622_v5 = vld [vmem:[#allocation4 + $0x94] sm:$0xf]  ;;  %v7653_v60 = vld [vmem:[#allocation4 + $0x188] sm:$0xf0] }
 0x371   : > { %2409 = vst [vmem:[#allocation4 + $0x348] sm:$0xff] %v2376_v26  ;;  %v2102_v17 = vsel %vm2083_vm6, %v2059_v42, %v2101_v55  ;;  %3325 = vmatpush.bf16.msra.mxu3 %v6696_v23  ;;  %v7067_v54 = vld [vmem:[#allocation4 + $0x2e8] sm:$0xf]  ;;  %v6804_v10 = vor.u32 %v7632_v0, %v6803_v44  ;;  %v9242_v42 = vor.u32 %v7584_v9, %v6617_v37  ;;  %v7043_v31 = vld [vmem:[#allocation4 + $0x2b8] sm:$0xf] }
 0x372   : > { %2135 = vst [vmem:[#allocation4 + $0x288] sm:$0xff] %v2102_v17  ;;  %4130 = vperm.xlu0 %7840, %v4126_v22   ;;  %v7068_v35 = vor.u32 %v7698_v13, %v7067_v54  ;;  %v6900_v63 = vor.u32 %v7656_v19, %v6899_v27  ;;  %v7044_v53 = vor.u32 %v7692_v4, %v7043_v31  ;;  %v6769_v23 = vld [vmem:[#allocation4 + $0x9c] sm:$0xf0]  ;;  %v7619_v22 = vld [vmem:[#allocation4 + $0x7c] sm:$0xf] }
 0x373   : > { %4265 = vperm.xlu2 %7842, %v4261_v50   ;;  %4013 = vperm.xlu1 %7841, %v4009_v28   ;;  %v6877_v0 = vld [vmem:[#allocation4 + $0x174] sm:$0xf0]  ;;  %v6772_v52 = vor.u32 %v7622_v5, %v6769_v23  ;;  %v7689_v26 = vld [vmem:[#allocation4 + $0x2a8] sm:$0xf0]  ;;  %v6635_v55 = vld [vmem:[%s10748_s7 + $0x28] sm:$0xf]  ;;  %v6760_v24 = vor.u32 %v7619_v22, %v6757_v43 }
 0x374   : > { %3326 = vmatmul.bf16.vlgmr.msra.gmra.mxu3 %v9211_v21  ;;  %3353 = vmatpush.bf16.msrb.mxu0 %v6804_v10  ;;  %v9215_v33 = vpop.permute.xlu0 %2050  ;;  %v7591_v50 = vld [vmem:[%s10748_s7 + $0x38] sm:$0xf0]  ;;  %v2076_v28 = vrot.slane %v9144_v58, 4  ;;  %v6623_v13 = vld [vmem:[%s10748_s7 + $0x8] sm:$0xf]  ;;  %v7032_v40 = vor.u32 %v7689_v26, %v7031_v62 }
 0x375   : > { %3380 = vmatpush.bf16.msrb.mxu1 %v6924_v48  ;;  %3405 = vmatpush.bf16.msrb.mxu2 %v7068_v35  ;;  %v2065_v14 = vpop.permute.xlu1 %2064  ;;  %v9217_v32 = vpop.permute.xlu2 %2048  ;;  %v7587_v10 = vld [vmem:[%s10748_s7 + $0x18] sm:$0xf0]  ;;  %v6888_v48 = vor.u32 %v7653_v60, %v6887_v30  ;;  %v7589_v4 = vld [vmem:[%s10748_s7 + $0x2c] sm:$0xf]  ;;  %v2074_v5 = vrot.slane %v9215_v33, 4 }
 0x376   : > { %v2081_v3 = vrot.slane %v2065_v14, 4  ;;  %v2073_v12 = vrot.slane %v9217_v32, 4  ;;  %v7613_v31 = vld [vmem:[#allocation4 + $0x4c] sm:$0xf]  ;;  %v7640_v26 = vld [vmem:[#allocation4 + $0x124] sm:$0xf] }
 0x377   : > { %v6817_v18 = vld [vmem:[#allocation4 + $0xfc] sm:$0xf0] }
 0x378   : > { %v2104_v38 = vsel %vm1364_vm1, %v2080_v47, %v2081_v3  ;;  %v2106_v45 = vsel %vm2083_vm6, %v2065_v14, %v2081_v3  ;;  %v2094_v1 = vsel %vm2083_vm6, %v9217_v32, %v2073_v12  ;;  %3354 = vmatpush.bf16.msrb.mxu0 %v6792_v15  ;;  %v6880_v14 = vor.u32 %v7649_v36, %v6877_v0  ;;  %v4262_v47 = vld [vmem:[%s10750_s9 + $0x38] sm:$0xff]  ;;  %v7596_v36 = vld [vmem:[%s10748_s7 + $0x60] sm:$0xf0] }
 0x379   : > { %v2105_v39 = vsel %vm2083_vm6, %v9163_v41, %v2104_v38  ;;  %2138 = vst [vmem:[#allocation4 + $0x29c] sm:$0xf] %v2106_v45  ;;  %3381 = vmatpush.bf16.msrb.mxu1 %v6912_v29  ;;  %3406 = vmatpush.bf16.msrb.mxu2 %v7056_v34  ;;  %v9272_v3 = vor.u32 %v7591_v50, %v6635_v55  ;;  %v6733_v38 = vld [vmem:[#allocation4 + $0x54] sm:$0xf0]  ;;  %v6853_v45 = vld [vmem:[#allocation4 + $0x144] sm:$0xf0] }
 0x37a   : > { %2137 = vst [vmem:[#allocation4 + $0x294] sm:$0xff] %v2105_v39  ;;  %4153 = vperm.xlu0 %7840, %v4145_v56   ;;  %v9274_v15 = vor.u32 %v7587_v10, %v6623_v13  ;;  %v6637_v39 = vld [vmem:[%s10748_s7 + $0x3c] sm:$0xf0]  ;;  %v6736_v43 = vor.u32 %v7613_v31, %v6733_v38  ;;  %v4280_v0 = vld [vmem:[%s10751_s10 + $0x38] sm:$0xff]  ;;  %v7115_v50 = vld [vmem:[#allocation4 + $0x348] sm:$0xf] }
 0x37b   : > { %2130 = vst [vmem:[#allocation4 + $0x26c] sm:$0xf] %v2094_v1  ;;  %4148 = vperm.xlu1 %7841, %v4144_v16   ;;  %4283 = vperm.xlu2 %7842, %v4279_v51   ;;  %v7643_v51 = vld [vmem:[#allocation4 + $0x13c] sm:$0xf]  ;;  %v6721_v13 = vld [vmem:[#allocation4 + $0x3c] sm:$0xf0] }
 0x37c   : > { %3463 = vmatpush.bf16.msra.mxu0 %v6784_v46  ;;  %v2057_v41 = vpop.permute.xlu0 %2056  ;;  %v7646_v46 = vld [vmem:[#allocation4 + $0x154] sm:$0xf]  ;;  %v6709_v10 = vld [vmem:[#allocation4 + $0x24] sm:$0xf0]  ;;  %v6697_v38 = vld [vmem:[#allocation4 + $0xc] sm:$0xf0] }
 0x37d   : > { %3355 = vmatmul.bf16.vlgmr.msrb.gmra.mxu0 %v9242_v42  ;;  %3382 = vmatpush.bf16.msrb.mxu1 %v6900_v63  ;;  %v2077_v44 = vrot.slane %v2057_v41, 4  ;;  %v2337_v17 = vpop.permute.xlu1 %2336  ;;  %v9254_v54 = vpop.permute.xlu2 %2320  ;;  %v6868_v19 = vor.u32 %v7646_v46, %v6865_v6  ;;  %v6856_v63 = vor.u32 %v7643_v51, %v6853_v45  ;;  %v7637_v6 = vld [vmem:[#allocation4 + $0x10c] sm:$0xf]  ;;  %v7634_v45 = vld [vmem:[#allocation4 + $0xf4] sm:$0xf] }
 0x37e   : > { %3407 = vmatpush.bf16.msrb.mxu2 %v7044_v53  ;;  %v2354_v35 = vrot.slane %v2337_v17, 4  ;;  %v6820_v31 = vor.u32 %v7634_v45, %v6817_v18 }
 0x37f   : > { %v2098_v11 = vsel %vm1364_vm1, %v2076_v28, %v2077_v44  ;;  %v2100_v49 = vsel %vm2083_vm6, %v2057_v41, %v2077_v44  ;;  %v9300_v41 = vor.u32 %v7589_v4, %v6637_v39 }
 0x380   : > { %3464 = vmatpush.bf16.msra.mxu0 %v6772_v52  ;;  %v2099_v9 = vsel %vm2083_vm6, %v9144_v58, %v2098_v11  ;;  %2134 = vst [vmem:[#allocation4 + $0x284] sm:$0xf] %v2100_v49  ;;  %v2378_v37 = vsel %vm1364_vm1, %v2354_v35, %v2355_v25  ;;  %v7019_v58 = vld [vmem:[#allocation4 + $0x288] sm:$0xf]  ;;  %v7616_v25 = vld [vmem:[#allocation4 + $0x64] sm:$0xf] }
 0x381   : > { %2133 = vst [vmem:[#allocation4 + $0x27c] sm:$0xff] %v2099_v9  ;;  %v2379_v29 = vsel %vm2357_vm7, %v2337_v17, %v2378_v37  ;;  %3383 = vmatpush.bf16.msrb.mxu1 %v6888_v48  ;;  %v7686_v34 = vld [vmem:[#allocation4 + $0x290] sm:$0xf0]  ;;  %v6748_v27 = vor.u32 %v7616_v25, %v6745_v8  ;;  %v6841_v17 = vld [vmem:[#allocation4 + $0x12c] sm:$0xf0]  ;;  %v2070_v11 = vrot.slane %v9187_v57, 4 }
 0x382   : > { %3408 = vmatpush.bf16.msrb.mxu2 %v7032_v40  ;;  %2411 = vst [vmem:[#allocation4 + $0x354] sm:$0xff] %v2379_v29  ;;  %v7020_v7 = vor.u32 %v7686_v34, %v7019_v58  ;;  %4270 = vperm.xlu0 %7840, %v4262_v47   ;;  %v7610_v52 = vld [vmem:[#allocation4 + $0x34] sm:$0xf]  ;;  %v6844_v62 = vor.u32 %v7640_v26, %v6841_v17  ;;  %v6643_v8 = vld [vmem:[%s10748_s7 + $0x30] sm:$0xf] }
 0x383   : > { %v6724_v48 = vor.u32 %v7610_v52, %v6721_v13  ;;  %v7592_v9 = vld [vmem:[%s10748_s7 + $0x40] sm:$0xf0]  ;;  %v6657_v52 = vld [vmem:[%s10748_s7 + $0x64] sm:$0xf0] }
 0x384   : > { %3465 = vmatpush.bf16.msra.mxu0 %v6760_v24  ;;  %3331 = vmatmul.bf16.gmra.mxu3 %v9272_v3  ;;  %v9279_v56 = vpop.permute.xlu0 %2328  ;;  %v6829_v24 = vld [vmem:[#allocation4 + $0x114] sm:$0xf0]  ;;  %v7607_v47 = vld [vmem:[#allocation4 + $0x1c] sm:$0xf] }
 0x385   : > { %3492 = vmatpush.bf16.msra.mxu1 %v6880_v14  ;;  %v2053_v1 = vpop.permute.xlu1 %2052  ;;  %v9281_v16 = vpop.permute.xlu2 %2036  ;;  %v6712_v34 = vor.u32 %v7607_v47, %v6709_v10  ;;  %v2350_v26 = vrot.slane %v9279_v56, 4 }
 0x386   : > { %3384 = vmatmul.bf16.vlgmr.msrb.gmra.mxu1 %v9274_v15  ;;  %3409 = vmatpush.bf16.msrb.mxu2 %v7020_v7  ;;  %v2075_v30 = vrot.slane %v2053_v1, 4  ;;  %v2067_v60 = vrot.slane %v9281_v16, 4  ;;  %v6832_v7 = vor.u32 %v7637_v6, %v6829_v24  ;;  %v6787_v24 = vld [vmem:[#allocation4 + $0xb0] sm:$0xf] }
 0x387   : > { %v6663_v6 = vld [vmem:[%s10748_s7 + $0x58] sm:$0xf] }
 0x388   : > { %3466 = vmatpush.bf16.msra.mxu0 %v6748_v27  ;;  %v2095_v53 = vsel %vm1364_vm1, %v2074_v5, %v2075_v30  ;;  %v2097_v23 = vsel %vm2083_vm6, %v2053_v1, %v2075_v30  ;;  %v2085_v22 = vsel %vm2083_vm6, %v9281_v16, %v2067_v60  ;;  %v7683_v4 = vld [vmem:[#allocation4 + $0x278] sm:$0xf0]  ;;  %v7604_v5 = vld [vmem:[#allocation4 + $0x4] sm:$0xf]  ;;  %v7609_v16 = vld [vmem:[#allocation4 + $0x28] sm:$0xf0] }
 0x389   : > { %3493 = vmatpush.bf16.msra.mxu1 %v6868_v19  ;;  %v2096_v55 = vsel %vm2083_vm6, %v9215_v33, %v2095_v53  ;;  %2132 = vst [vmem:[#allocation4 + $0x278] sm:$0xf] %v2097_v23  ;;  %v7710_v28 = vld [vmem:[#allocation4 + $0x350] sm:$0xf0]  ;;  %v6655_v33 = vld [vmem:[%s10748_s7 + $0x50] sm:$0xf]  ;;  %v9329_v19 = vor.u32 %v7592_v9, %v6643_v8  ;;  %v6700_v30 = vor.u32 %v7604_v5, %v6697_v38 }
 0x38a   : > { %2131 = vst [vmem:[#allocation4 + $0x270] sm:$0xff] %v2096_v55  ;;  %v7116_v44 = vor.u32 %v7710_v28, %v7115_v50  ;;  %4288 = vperm.xlu0 %7840, %v4280_v0   ;;  %v9327_v27 = vor.u32 %v7596_v36, %v6655_v33  ;;  %v7117_v39 = vld [vmem:[#allocation4 + $0x354] sm:$0xf0]  ;;  %v7594_v0 = vld [vmem:[%s10748_s7 + $0x54] sm:$0xf]  ;;  %v2346_v8 = vrot.slane %v9254_v54, 4 }
 0x38b   : > { %2124 = vst [vmem:[#allocation4 + $0x248] sm:$0xf] %v2085_v22  ;;  %v7631_v28 = vld [vmem:[#allocation4 + $0xdc] sm:$0xf]  ;;  %v7628_v33 = vld [vmem:[#allocation4 + $0xc4] sm:$0xf] }
 0x38c   : > { %3467 = vmatpush.bf16.msra.mxu0 %v6736_v43  ;;  %3438 = vmatpush.bf16.msrb.mxu3 %v7116_v44  ;;  %v2045_v35 = vpop.permute.xlu0 %2044  ;;  %v7709_v43 = vld [vmem:[#allocation4 + $0x34c] sm:$0xf] }
 0x38d   : > { %3494 = vmatpush.bf16.msra.mxu1 %v6856_v63  ;;  %3360 = vmatmul.bf16.gmra.mxu0 %v9300_v41  ;;  %v2071_v49 = vrot.slane %v2045_v35, 4  ;;  %v2325_v40 = vpop.permute.xlu1 %2324  ;;  %v9312_v14 = vpop.permute.xlu2 %2308  ;;  %v6805_v63 = vld [vmem:[#allocation4 + $0xe4] sm:$0xf0]  ;;  %v7120_v22 = vor.u32 %v7709_v43, %v7117_v39  ;;  %v7621_v43 = vld [vmem:[#allocation4 + $0x88] sm:$0xf0] }
 0x38e   : > { %v2348_v37 = vrot.slane %v2325_v40, 4  ;;  %v6808_v44 = vor.u32 %v7631_v28, %v6805_v63 }
 0x38f   : > { %v2089_v29 = vsel %vm1364_vm1, %v2070_v11, %v2071_v49  ;;  %v2091_v58 = vsel %vm2083_vm6, %v2045_v35, %v2071_v49  ;;  %v9352_v35 = vor.u32 %v7594_v0, %v6657_v52  ;;  %v7627_v49 = vld [vmem:[#allocation4 + $0xb8] sm:$0xf0]  ;;  %v6677_v0 = vld [vmem:[%s10748_s7 + $0x8c] sm:$0xf0] }
 0x390   : > { %3468 = vmatpush.bf16.msra.mxu0 %v6724_v48  ;;  %v2090_v25 = vsel %vm2083_vm6, %v9187_v57, %v2089_v29  ;;  %2128 = vst [vmem:[#allocation4 + $0x260] sm:$0xf] %v2091_v58  ;;  %v2369_v46 = vsel %vm1364_vm1, %v2348_v37, %v2349_v20  ;;  %v6788_v47 = vor.u32 %v7627_v49, %v6787_v24  ;;  %v7597_v29 = vld [vmem:[%s10748_s7 + $0x68] sm:$0xf0]  ;;  %v6739_v49 = vld [vmem:[#allocation4 + $0x50] sm:$0xf] }
 0x391   : > { %3495 = vmatpush.bf16.msra.mxu1 %v6844_v62  ;;  %2127 = vst [vmem:[#allocation4 + $0x258] sm:$0xff] %v2090_v25  ;;  %v2370_v1 = vsel %vm2357_vm7, %v2325_v40, %v2369_v46  ;;  %v7007_v51 = vld [vmem:[#allocation4 + $0x270] sm:$0xf]  ;;  %v7624_v46 = vld [vmem:[#allocation4 + $0xa0] sm:$0xf0] }
 0x392   : > { %2405 = vst [vmem:[#allocation4 + $0x330] sm:$0xff] %v2370_v1  ;;  %v7008_v57 = vor.u32 %v7683_v4, %v7007_v51  ;;  %v6793_v62 = vld [vmem:[#allocation4 + $0xcc] sm:$0xf0]  ;;  %v9379_v51 = vor.u32 %v7597_v29, %v6663_v6  ;;  %v6727_v6 = vld [vmem:[#allocation4 + $0x38] sm:$0xf] }
 0x393   : > { %v6796_v11 = vor.u32 %v7628_v33, %v6793_v62  ;;  %v6675_v40 = vld [vmem:[%s10748_s7 + $0x78] sm:$0xf] }
 0x394   : > { %3469 = vmatpush.bf16.msra.mxu0 %v6712_v34  ;;  %3336 = vmatmul.bf16.gmra.mxu3 %v9327_v27  ;;  %v9334_v20 = vpop.permute.xlu0 %2316  ;;  %v6775_v34 = vld [vmem:[#allocation4 + $0x98] sm:$0xf] }
 0x395   : > { %3496 = vmatpush.bf16.msra.mxu1 %v6832_v7  ;;  %3410 = vmatpush.bf16.msrb.mxu2 %v7008_v57  ;;  %v2331_v53 = vpop.permute.xlu1 %2330  ;;  %v9336_v23 = vpop.permute.xlu2 %2314  ;;  %v6776_v5 = vor.u32 %v7624_v46, %v6775_v34  ;;  %v2344_v52 = vrot.slane %v9334_v20, 4  ;;  %v7612_v34 = vld [vmem:[#allocation4 + $0x40] sm:$0xf0] }
 0x396   : > { %3389 = vmatmul.bf16.gmra.mxu1 %v9329_v19  ;;  %v2351_v55 = vrot.slane %v2331_v53, 4  ;;  %v2343_v50 = vrot.slane %v9336_v23, 4 }
 0x398   : > { %3470 = vmatpush.bf16.msra.mxu0 %v6700_v30  ;;  %v2372_v17 = vsel %vm1364_vm1, %v2350_v26, %v2351_v55  ;;  %v2374_v13 = vsel %vm2357_vm7, %v2331_v53, %v2351_v55  ;;  %v2362_v10 = vsel %vm2357_vm7, %v9336_v23, %v2343_v50  ;;  %v7618_v55 = vld [vmem:[#allocation4 + $0x70] sm:$0xf0]  ;;  %v6995_v62 = vld [vmem:[#allocation4 + $0x258] sm:$0xf] }
 0x399   : > { %3497 = vmatpush.bf16.msra.mxu1 %v6820_v31  ;;  %v2373_v48 = vsel %vm2357_vm7, %v9279_v56, %v2372_v17  ;;  %2408 = vst [vmem:[#allocation4 + $0x344] sm:$0xf] %v2374_v13  ;;  %v7601_v56 = vld [vmem:[%s10748_s7 + $0x88] sm:$0xf0]  ;;  %v7103_v4 = vld [vmem:[#allocation4 + $0x330] sm:$0xf] }
 0x39a   : > { %2407 = vst [vmem:[#allocation4 + $0x33c] sm:$0xff] %v2373_v48  ;;  %v9377_v1 = vor.u32 %v7601_v56, %v6675_v40  ;;  %v7706_v57 = vld [vmem:[#allocation4 + $0x334] sm:$0xf]  ;;  %v6751_v17 = vld [vmem:[#allocation4 + $0x68] sm:$0xf]  ;;  %v2340_v40 = vrot.slane %v9312_v14, 4 }
 0x39b   : > { %2400 = vst [vmem:[#allocation4 + $0x314] sm:$0xf] %v2362_v10  ;;  %v6752_v48 = vor.u32 %v7618_v55, %v6751_v17  ;;  %v7123_v17 = vld [vmem:[#allocation4 + $0x350] sm:$0xf] }
 0x39c   : > { %3583 = vmatpush.bf16.msrb.mxu0 %v7120_v22  ;;  %v2323_v36 = vpop.permute.xlu0 %2322  ;;  %v7599_v22 = vld [vmem:[%s10748_s7 + $0x7c] sm:$0xf] }
 0x39d   : > { %3498 = vmatpush.bf16.msra.mxu1 %v6808_v44  ;;  %3365 = vmatmul.bf16.gmra.mxu0 %v9352_v35  ;;  %v2347_v9 = vrot.slane %v2323_v36, 4  ;;  %v2047_v37 = vpop.permute.xlu1 %2046  ;;  %v9395_v13 = vor.u32 %v7599_v22, %v6677_v0  ;;  %v6703_v22 = vld [vmem:[#allocation4 + $0x8] sm:$0xf] }
 0x39e   : > { %v2072_v58 = vrot.slane %v2047_v37, 4 }
 0x39f   : > { %v2366_v7 = vsel %vm1364_vm1, %v2346_v8, %v2347_v9  ;;  %v2368_v25 = vsel %vm2357_vm7, %v2323_v36, %v2347_v9  ;;  %v7615_v36 = vld [vmem:[#allocation4 + $0x58] sm:$0xf0] }
 0x3a0   : > { %v2367_v38 = vsel %vm2357_vm7, %v9254_v54, %v2366_v7  ;;  %2404 = vst [vmem:[#allocation4 + $0x32c] sm:$0xf] %v2368_v25  ;;  %v2092_v45 = vsel %vm1364_vm1, %v2072_v58, %v2073_v12  ;;  %v6763_v12 = vld [vmem:[#allocation4 + $0x80] sm:$0xf]  ;;  %v6740_v9 = vor.u32 %v7615_v36, %v6739_v49 }
 0x3a1   : > { %3499 = vmatpush.bf16.msra.mxu1 %v6796_v11  ;;  %2403 = vst [vmem:[#allocation4 + $0x324] sm:$0xff] %v2367_v38  ;;  %v2093_v39 = vsel %vm2083_vm6, %v2047_v37, %v2092_v45  ;;  %v7707_v18 = vld [vmem:[#allocation4 + $0x338] sm:$0xf0]  ;;  %v7105_v30 = vld [vmem:[#allocation4 + $0x33c] sm:$0xf0]  ;;  %v6764_v53 = vor.u32 %v7621_v43, %v6763_v12 }
 0x3a2   : > { %2129 = vst [vmem:[#allocation4 + $0x264] sm:$0xff] %v2093_v39  ;;  %v7104_v31 = vor.u32 %v7707_v18, %v7103_v4  ;;  %v7108_v54 = vor.u32 %v7706_v57, %v7105_v30  ;;  %v7602_v37 = vld [vmem:[%s10748_s7 + $0x90] sm:$0xf0]  ;;  %v6728_v57 = vor.u32 %v7612_v34, %v6727_v6  ;;  %v7606_v12 = vld [vmem:[#allocation4 + $0x10] sm:$0xf0] }
 0x3a3   : > { %v7697_v6 = vld [vmem:[#allocation4 + $0x2ec] sm:$0xf] }
 0x3a4   : > { %3341 = vmatmul.bf16.gmra.mxu3 %v9377_v1  ;;  %v9384_v32 = vpop.permute.xlu0 %2038  ;;  %3584 = vmatpush.bf16.msrb.mxu0 %v7108_v54 }
 0x3a5   : > { %3608 = vmatpush.bf16.msrb.mxu1 %v6788_v47  ;;  %3439 = vmatpush.bf16.msrb.mxu3 %v7104_v31  ;;  %v2319_v63 = vpop.permute.xlu1 %2318  ;;  %v6715_v31 = vld [vmem:[#allocation4 + $0x20] sm:$0xf]  ;;  %v2068_v54 = vrot.slane %v9384_v32, 4 }
 0x3a6   : > { %3394 = vmatmul.bf16.gmra.mxu1 %v9379_v51  ;;  %v2345_v26 = vrot.slane %v2319_v63, 4 }
 0x3a8   : > { %v2363_v28 = vsel %vm1364_vm1, %v2344_v52, %v2345_v26  ;;  %v2365_v44 = vsel %vm2357_vm7, %v2319_v63, %v2345_v26  ;;  %v7704_v38 = vld [vmem:[#allocation4 + $0x320] sm:$0xf0]  ;;  %v7093_v45 = vld [vmem:[#allocation4 + $0x324] sm:$0xf0]  ;;  %v6704_v52 = vor.u32 %v7606_v12, %v6703_v22  ;;  %v7702_v22 = vld [vmem:[#allocation4 + $0x310] sm:$0xf0] }
 0x3a9   : > { %3609 = vmatpush.bf16.msrb.mxu1 %v6776_v5  ;;  %v2364_v10 = vsel %vm2357_vm7, %v9334_v20, %v2363_v28  ;;  %2402 = vst [vmem:[#allocation4 + $0x320] sm:$0xf] %v2365_v44  ;;  %v7680_v24 = vld [vmem:[#allocation4 + $0x260] sm:$0xf0]  ;;  %v6683_v20 = vld [vmem:[%s10748_s7 + $0x80] sm:$0xf] }
 0x3aa   : > { %2401 = vst [vmem:[#allocation4 + $0x318] sm:$0xff] %v2364_v10  ;;  %v6996_v33 = vor.u32 %v7680_v24, %v6995_v62  ;;  %v9414_v46 = vor.u32 %v7602_v37, %v6683_v20  ;;  %v7673_v28 = vld [vmem:[#allocation4 + $0x22c] sm:$0xf]  ;;  %v7585_v10 = vld [vmem:[%s10748_s7 + $0xc] sm:$0xf] }
 0x3ac   : > { %3411 = vmatpush.bf16.msrb.mxu2 %v6996_v33  ;;  %v2311_v11 = vpop.permute.xlu0 %2310  ;;  %v7711_v33 = vld [vmem:[#allocation4 + $0x358] sm:$0xf0] }
 0x3ad   : > { %3610 = vmatpush.bf16.msrb.mxu1 %v6764_v53  ;;  %3370 = vmatmul.bf16.gmra.mxu0 %v9395_v13  ;;  %v2341_v56 = vrot.slane %v2311_v11, 4  ;;  %v2035_v8 = vpop.permute.xlu1 %2034  ;;  %v7124_v23 = vor.u32 %v7711_v33, %v7123_v17  ;;  %v7063_v17 = vld [vmem:[#allocation4 + $0x2d8] sm:$0xf]  ;;  %v7045_v33 = vld [vmem:[#allocation4 + $0x2c4] sm:$0xf0] }
 0x3ae   : > { %v2066_v47 = vrot.slane %v2035_v8, 4 }
 0x3af   : > { %v2356_v29 = vsel %vm1364_vm1, %v2340_v40, %v2341_v56  ;;  %v2359_v58 = vsel %vm2357_vm7, %v2311_v11, %v2341_v56  ;;  %v6973_v11 = vld [vmem:[#allocation4 + $0x234] sm:$0xf0]  ;;  %v7708_v40 = vld [vmem:[#allocation4 + $0x340] sm:$0xf0]  ;;  %v7670_v56 = vld [vmem:[#allocation4 + $0x214] sm:$0xf] }
 0x3b0   : > { %v2358_v7 = vsel %vm2357_vm7, %v9312_v14, %v2356_v29  ;;  %2398 = vst [vmem:[#allocation4 + $0x308] sm:$0xf] %v2359_v58  ;;  %v2082_v25 = vsel %vm1364_vm1, %v2066_v47, %v2067_v60  ;;  %v6716_v14 = vor.u32 %v7609_v16, %v6715_v31  ;;  %v6976_v49 = vor.u32 %v7673_v28, %v6973_v11  ;;  %v6949_v47 = vld [vmem:[#allocation4 + $0x204] sm:$0xf0]  ;;  %v7099_v58 = vld [vmem:[#allocation4 + $0x320] sm:$0xf] }
 0x3b1   : > { %3611 = vmatpush.bf16.msrb.mxu1 %v6752_v48  ;;  %2397 = vst [vmem:[#allocation4 + $0x300] sm:$0xff] %v2358_v7  ;;  %v2084_v4 = vsel %vm2083_vm6, %v2035_v8, %v2082_v25  ;;  %v7091_v39 = vld [vmem:[#allocation4 + $0x318] sm:$0xf]  ;;  %v7703_v5 = vld [vmem:[#allocation4 + $0x31c] sm:$0xf] }
 0x3b2   : > { %2123 = vst [vmem:[#allocation4 + $0x240] sm:$0xff] %v2084_v4  ;;  %v7092_v18 = vor.u32 %v7704_v38, %v7091_v39  ;;  %v7096_v30 = vor.u32 %v7703_v5, %v7093_v45  ;;  %v7111_v8 = vld [vmem:[#allocation4 + $0x338] sm:$0xf]  ;;  %v6631_v29 = vld [vmem:[%s10748_s7 + $0x10] sm:$0xf] }
 0x3b3   : > { %v7112_v20 = vor.u32 %v7708_v40, %v7111_v8  ;;  %v7588_v7 = vld [vmem:[%s10748_s7 + $0x20] sm:$0xf0]  ;;  %v7705_v4 = vld [vmem:[#allocation4 + $0x328] sm:$0xf0]  ;;  %v7075_v5 = vld [vmem:[#allocation4 + $0x2f0] sm:$0xf] }
 0x3b4   : > { %3440 = vmatpush.bf16.msrb.mxu3 %v7092_v18  ;;  %3585 = vmatpush.bf16.msrb.mxu0 %v7096_v30  ;;  %v7100_v18 = vor.u32 %v7705_v4, %v7099_v58  ;;  %v7667_v30 = vld [vmem:[#allocation4 + $0x1fc] sm:$0xf]  ;;  %v7069_v31 = vld [vmem:[#allocation4 + $0x2f4] sm:$0xf0]  ;;  %v9444_v16 = vor.u32 %v7588_v7, %v6631_v29  ;;  %v6651_v7 = vld [vmem:[%s10748_s7 + $0x38] sm:$0xf] }
 0x3b5   : > { %3612 = vmatpush.bf16.msrb.mxu1 %v6740_v9  ;;  %v2041_v60 = vpop.permute.xlu1 %2040  ;;  %v6961_v9 = vld [vmem:[#allocation4 + $0x21c] sm:$0xf0]  ;;  %v7691_v11 = vld [vmem:[#allocation4 + $0x2bc] sm:$0xf]  ;;  %v6901_v4 = vld [vmem:[#allocation4 + $0x1a4] sm:$0xf0] }
 0x3b6   : > { %3399 = vmatmul.bf16.gmra.mxu1 %v9414_v46  ;;  %v2069_v43 = vrot.slane %v2041_v60, 4  ;;  %v6964_v37 = vor.u32 %v7670_v56, %v6961_v9  ;;  %v7048_v40 = vor.u32 %v7691_v11, %v7045_v33  ;;  %v7693_v56 = vld [vmem:[#allocation4 + $0x2c8] sm:$0xf0]  ;;  %v7658_v9 = vld [vmem:[#allocation4 + $0x1b4] sm:$0xf] }
 0x3b7   : > { %v7648_v11 = vld [vmem:[#allocation4 + $0x160] sm:$0xf0] }
 0x3b8   : > { %v2086_v63 = vsel %vm1364_vm1, %v2068_v54, %v2069_v43  ;;  %v2088_v53 = vsel %vm2083_vm6, %v2041_v60, %v2069_v43  ;;  %v7079_v34 = vld [vmem:[#allocation4 + $0x300] sm:$0xf]  ;;  %v7700_v38 = vld [vmem:[#allocation4 + $0x304] sm:$0xf]  ;;  %v6952_v60 = vor.u32 %v7667_v30, %v6949_v47  ;;  %v7699_v54 = vld [vmem:[#allocation4 + $0x2f8] sm:$0xf0] }
 0x3b9   : > { %3613 = vmatpush.bf16.msrb.mxu1 %v6728_v57  ;;  %v2087_v0 = vsel %vm2083_vm6, %v9384_v32, %v2086_v63  ;;  %2126 = vst [vmem:[#allocation4 + $0x254] sm:$0xf] %v2088_v53  ;;  %v6625_v32 = vld [vmem:[%s10748_s7 + $0x1c] sm:$0xf0]  ;;  %v6983_v62 = vld [vmem:[#allocation4 + $0x240] sm:$0xf]  ;;  %v7076_v12 = vor.u32 %v7699_v54, %v7075_v5 }
 0x3ba   : > { %2125 = vst [vmem:[#allocation4 + $0x24c] sm:$0xff] %v2087_v0  ;;  %v7087_v43 = vld [vmem:[#allocation4 + $0x308] sm:$0xf]  ;;  %v6937_v63 = vld [vmem:[#allocation4 + $0x1ec] sm:$0xf0] }
 0x3bb   : > { %v7057_v53 = vld [vmem:[#allocation4 + $0x2dc] sm:$0xf0]  ;;  %v7696_v0 = vld [vmem:[#allocation4 + $0x2e0] sm:$0xf0]  ;;  %v7690_v47 = vld [vmem:[#allocation4 + $0x2b0] sm:$0xf0] }
 0x3bc   : > { %v7685_v5 = vld [vmem:[#allocation4 + $0x28c] sm:$0xf]  ;;  %v7652_v54 = vld [vmem:[#allocation4 + $0x184] sm:$0xf] }
 0x3bd   : > { %3614 = vmatpush.bf16.msrb.mxu1 %v6716_v14  ;;  %3471 = vmatmul.bf16.vlgmr.msra.gmra.mxu0 %v9211_v21  ;;  %v2313_v26 = vpop.permute.xlu1 %2312  ;;  %v7072_v14 = vor.u32 %v7697_v6, %v7069_v31  ;;  %v7688_v6 = vld [vmem:[#allocation4 + $0x2a4] sm:$0xf] }
 0x3be   : > { %v2342_v55 = vrot.slane %v2313_v26, 4 }
 0x3c0   : > { %v2360_v44 = vsel %vm1364_vm1, %v2342_v55, %v2343_v50  ;;  %v9434_v50 = vor.u32 %v7585_v10, %v6625_v32  ;;  %v7694_v55 = vld [vmem:[#allocation4 + $0x2d4] sm:$0xf]  ;;  %v7590_v10 = vld [vmem:[%s10748_s7 + $0x34] sm:$0xf]  ;;  %v6645_v32 = vld [vmem:[%s10748_s7 + $0x44] sm:$0xf0] }
 0x3c1   : > { %3615 = vmatpush.bf16.msrb.mxu1 %v6704_v52  ;;  %v2361_v48 = vsel %vm2357_vm7, %v2313_v26, %v2360_v44  ;;  %v7677_v24 = vld [vmem:[#allocation4 + $0x248] sm:$0xf0]  ;;  %v7088_v52 = vor.u32 %v7702_v22, %v7087_v43  ;;  %v7664_v26 = vld [vmem:[#allocation4 + $0x1e4] sm:$0xf]  ;;  %v7060_v44 = vor.u32 %v7694_v55, %v7057_v53  ;;  %v6889_v43 = vld [vmem:[#allocation4 + $0x18c] sm:$0xf0] }
 0x3c2   : > { %2399 = vst [vmem:[#allocation4 + $0x30c] sm:$0xff] %v2361_v48  ;;  %v6984_v36 = vor.u32 %v7677_v24, %v6983_v62  ;;  %v6940_v28 = vor.u32 %v7664_v26, %v6937_v63  ;;  %v7064_v48 = vor.u32 %v7696_v0, %v7063_v17  ;;  %v7661_v62 = vld [vmem:[#allocation4 + $0x1cc] sm:$0xf]  ;;  %v6925_v24 = vld [vmem:[#allocation4 + $0x1d4] sm:$0xf0]  ;;  %v6892_v0 = vor.u32 %v7652_v54, %v6889_v43 }
 0x3c3   : > { %v7015_v63 = vld [vmem:[#allocation4 + $0x278] sm:$0xf]  ;;  %v6883_v53 = vld [vmem:[#allocation4 + $0x170] sm:$0xf]  ;;  %v7009_v22 = vld [vmem:[#allocation4 + $0x27c] sm:$0xf0] }
 0x3c4   : > { %3412 = vmatpush.bf16.msrb.mxu2 %v6984_v36  ;;  %v7051_v36 = vld [vmem:[#allocation4 + $0x2c0] sm:$0xf]  ;;  %v7684_v26 = vld [vmem:[#allocation4 + $0x280] sm:$0xf0]  ;;  %v7651_v55 = vld [vmem:[#allocation4 + $0x178] sm:$0xf0] }
 0x3c5   : > { %v7052_v8 = vor.u32 %v7693_v56, %v7051_v36  ;;  %v6997_v17 = vld [vmem:[#allocation4 + $0x264] sm:$0xf0]  ;;  %v7681_v36 = vld [vmem:[#allocation4 + $0x268] sm:$0xf0]  ;;  %v6835_v54 = vld [vmem:[#allocation4 + $0x110] sm:$0xf] }
 0x3c6   : > { %3500 = vmatmul.bf16.vlgmr.msra.gmra.mxu1 %v9242_v42  ;;  %v6955_v43 = vld [vmem:[#allocation4 + $0x200] sm:$0xf] }
 0x3c7   : > { %3728 = vmatpush.bf16.msra.mxu1 %v7124_v23  ;;  %3413 = vmatmul.bf16.vlgmr.msrb.gmra.mxu2 %v9434_v50  ;;  %v9455_v23 = vor.u32 %v7590_v10, %v6645_v32  ;;  %v7595_v10 = vld [vmem:[%s10748_s7 + $0x5c] sm:$0xf]  ;;  %v6665_v32 = vld [vmem:[%s10748_s7 + $0x6c] sm:$0xf0] }
 0x3c8   : > { %3521 = vmatpush.bf16.msra.mxu2 %v6976_v49  ;;  %v6928_v49 = vor.u32 %v7661_v62, %v6925_v24  ;;  %v6871_v62 = vld [vmem:[#allocation4 + $0x158] sm:$0xf]  ;;  %v7679_v24 = vld [vmem:[#allocation4 + $0x25c] sm:$0xf] }
 0x3c9   : > { %v7701_v25 = vld [vmem:[#allocation4 + $0x308] sm:$0xf0]  ;;  %v7081_v45 = vld [vmem:[#allocation4 + $0x30c] sm:$0xf0]  ;;  %v7000_v33 = vor.u32 %v7679_v24, %v6997_v17  ;;  %v6872_v56 = vor.u32 %v7648_v11, %v6871_v62  ;;  %v9500_v62 = vpop.permute.xlu0 %2591 }
 0x3ca   : > { %v7080_v57 = vor.u32 %v7701_v25, %v7079_v34  ;;  %v7084_v39 = vor.u32 %v7700_v38, %v7081_v45  ;;  %v7039_v34 = vld [vmem:[#allocation4 + $0x2a8] sm:$0xf]  ;;  %v7593_v25 = vld [vmem:[%s10748_s7 + $0x48] sm:$0xf0]  ;;  %v7655_v45 = vld [vmem:[#allocation4 + $0x19c] sm:$0xf] }
 0x3cb   : > { %3729 = vmatpush.bf16.msra.mxu1 %v7112_v20  ;;  %v6913_v20 = vld [vmem:[#allocation4 + $0x1bc] sm:$0xf0]  ;;  %v7040_v38 = vor.u32 %v7690_v47, %v7039_v34  ;;  %v6904_v30 = vor.u32 %v7655_v45, %v6901_v4  ;;  %v6671_v34 = vld [vmem:[%s10748_s7 + $0x60] sm:$0xf]  ;;  %v7675_v45 = vld [vmem:[#allocation4 + $0x238] sm:$0xf0] }
 0x3cc   : > { %3522 = vmatpush.bf16.msra.mxu2 %v6964_v37  ;;  %3441 = vmatpush.bf16.msrb.mxu3 %v7080_v57  ;;  %v7033_v37 = vld [vmem:[#allocation4 + $0x2ac] sm:$0xf0]  ;;  %v6916_v29 = vor.u32 %v7658_v9, %v6913_v20  ;;  %v7021_v57 = vld [vmem:[#allocation4 + $0x294] sm:$0xf0]  ;;  %v7678_v9 = vld [vmem:[#allocation4 + $0x250] sm:$0xf0] }
 0x3cd   : > { %3476 = vmatmul.bf16.gmra.mxu0 %v9272_v3  ;;  %v7036_v58 = vor.u32 %v7688_v6, %v7033_v37  ;;  %v7024_v31 = vor.u32 %v7685_v5, %v7021_v57  ;;  %v7645_v20 = vld [vmem:[#allocation4 + $0x148] sm:$0xf0]  ;;  %v7676_v37 = vld [vmem:[#allocation4 + $0x244] sm:$0xf]  ;;  %v6859_v47 = vld [vmem:[#allocation4 + $0x140] sm:$0xf] }
 0x3ce   : > { %3586 = vmatpush.bf16.msrb.mxu0 %v7084_v39  ;;  %v7687_v39 = vld [vmem:[#allocation4 + $0x298] sm:$0xf0]  ;;  %v6979_v6 = vld [vmem:[#allocation4 + $0x230] sm:$0xf]  ;;  %v6847_v57 = vld [vmem:[#allocation4 + $0x128] sm:$0xf] }
 0x3cf   : > { %3730 = vmatpush.bf16.msra.mxu1 %v7100_v18  ;;  %7125 = vmatmul.msk.bf16.vlgmr.msrb.gmra.mxu3 %vm3305_vm8, %v9444_v16  ;;  %v9465_v18 = vor.u32 %v7593_v25, %v6651_v7  ;;  %v7598_v7 = vld [vmem:[%s10748_s7 + $0x70] sm:$0xf0]  ;;  %v6980_v4 = vor.u32 %v7675_v45, %v6979_v6  ;;  %v6799_v6 = vld [vmem:[#allocation4 + $0xc8] sm:$0xf] }
 0x3d0   : > { %3523 = vmatpush.bf16.msra.mxu2 %v6952_v60  ;;  %3550 = vmatpush.bf16.msra.mxu3 %v7072_v14  ;;  %v7027_v60 = vld [vmem:[#allocation4 + $0x290] sm:$0xf]  ;;  %v9486_v5 = vor.u32 %v7598_v7, %v6671_v34  ;;  %v7630_v7 = vld [vmem:[#allocation4 + $0xd0] sm:$0xf0] }
 0x3d1   : > { %v7028_v14 = vor.u32 %v7687_v39, %v7027_v60  ;;  %v6967_v39 = vld [vmem:[#allocation4 + $0x218] sm:$0xf]  ;;  %v7672_v60 = vld [vmem:[#allocation4 + $0x220] sm:$0xf0] }
 0x3d2   : > { %3695 = vmatpush.bf16.msra.mxu0 %v7076_v12  ;;  %v7682_v12 = vld [vmem:[#allocation4 + $0x274] sm:$0xf] }
 0x3d3   : > { %3731 = vmatpush.bf16.msra.mxu1 %v7088_v52  ;;  %v7012_v52 = vor.u32 %v7682_v12, %v7009_v22  ;;  %v7639_v12 = vld [vmem:[#allocation4 + $0x118] sm:$0xf0] }
 0x3d4   : > { %3524 = vmatpush.bf16.msra.mxu2 %v6940_v28  ;;  %3551 = vmatpush.bf16.msra.mxu3 %v7060_v44  ;;  %v7016_v28 = vor.u32 %v7684_v26, %v7015_v63  ;;  %v6884_v44 = vor.u32 %v7651_v55, %v6883_v53  ;;  %v6836_v63 = vor.u32 %v7639_v12, %v6835_v54  ;;  %v7669_v53 = vld [vmem:[#allocation4 + $0x208] sm:$0xf0]  ;;  %v7600_v22 = vld [vmem:[%s10748_s7 + $0x84] sm:$0xf]  ;;  %v6823_v26 = vld [vmem:[#allocation4 + $0xf8] sm:$0xf] }
 0x3d5   : > { %v7666_v55 = vld [vmem:[#allocation4 + $0x1f0] sm:$0xf0]  ;;  %v6895_v54 = vld [vmem:[#allocation4 + $0x188] sm:$0xf] }
 0x3d6   : > { %3696 = vmatpush.bf16.msra.mxu0 %v7064_v48  ;;  %3505 = vmatmul.bf16.gmra.mxu1 %v9300_v41  ;;  %v7003_v48 = vld [vmem:[#allocation4 + $0x260] sm:$0xf] }
 0x3d7   : > { %3418 = vmatmul.bf16.gmra.mxu2 %v9455_v23 }
 0x3d8   : > { %3525 = vmatpush.bf16.msra.mxu2 %v6928_v49  ;;  %3552 = vmatpush.bf16.msra.mxu3 %v7048_v40  ;;  %v9477_v49 = vor.u32 %v7595_v10, %v6665_v32  ;;  %v7004_v40 = vor.u32 %v7681_v36, %v7003_v48  ;;  %v6943_v10 = vld [vmem:[#allocation4 + $0x1e8] sm:$0xf]  ;;  %v7633_v48 = vld [vmem:[#allocation4 + $0xe8] sm:$0xf0]  ;;  %v7663_v36 = vld [vmem:[#allocation4 + $0x1d8] sm:$0xf0] }
 0x3d9   : > { %v6944_v32 = vor.u32 %v7666_v55, %v6943_v10 }
 0x3da   : > { %3697 = vmatpush.bf16.msra.mxu0 %v7052_v8  ;;  %v6985_v8 = vld [vmem:[#allocation4 + $0x24c] sm:$0xf0] }
 0x3dc   : > { %3526 = vmatpush.bf16.msra.mxu2 %v6916_v29  ;;  %3553 = vmatpush.bf16.msra.mxu3 %v7036_v58  ;;  %v6988_v29 = vor.u32 %v7676_v37, %v6985_v8  ;;  %v6991_v58 = vld [vmem:[#allocation4 + $0x248] sm:$0xf]  ;;  %v7603_v8 = vld [vmem:[%s10748_s7 + $0x98] sm:$0xf0] }
 0x3dd   : > { %3481 = vmatmul.bf16.gmra.mxu0 %v9327_v27  ;;  %v6992_v25 = vor.u32 %v7678_v9, %v6991_v58  ;;  %v7660_v58 = vld [vmem:[#allocation4 + $0x1c0] sm:$0xf0] }
 0x3de   : > { %3698 = vmatpush.bf16.msra.mxu0 %v7040_v38  ;;  %v6860_v38 = vor.u32 %v7645_v20, %v6859_v47 }
 0x3df   : > { %7126 = vmatmul.msk.bf16.gmra.mxu3 %vm3305_vm8, %v9465_v18 }
 0x3e0   : > { %3527 = vmatpush.bf16.msra.mxu2 %v6904_v30  ;;  %3554 = vmatpush.bf16.msra.mxu3 %v7024_v31  ;;  %v7642_v30 = vld [vmem:[#allocation4 + $0x130] sm:$0xf0] }
 0x3e1   : > { %v6848_v31 = vor.u32 %v7642_v30, %v6847_v57  ;;  %v7657_v57 = vld [vmem:[#allocation4 + $0x1a8] sm:$0xf0] }
 0x3e2   : > { %3699 = vmatpush.bf16.msra.mxu0 %v7028_v14  ;;  %v6968_v14 = vor.u32 %v7672_v60, %v6967_v39 }
 0x3e4   : > { %3528 = vmatpush.bf16.msra.mxu2 %v6892_v0  ;;  %3555 = vmatpush.bf16.msra.mxu3 %v7012_v52  ;;  %v6685_v0 = vld [vmem:[%s10748_s7 + $0x94] sm:$0xf0]  ;;  %v6956_v52 = vor.u32 %v7669_v53, %v6955_v43  ;;  %v7654_v43 = vld [vmem:[#allocation4 + $0x190] sm:$0xf0]  ;;  %v9522_v53 = vpop.permute.xlu2 %2601 }
 0x3e6   : > { %3700 = vmatpush.bf16.msra.mxu0 %v7016_v28  ;;  %3510 = vmatmul.bf16.gmra.mxu1 %v9352_v35  ;;  %v7636_v28 = vld [vmem:[#allocation4 + $0x100] sm:$0xf0] }
 0x3e7   : > { %3423 = vmatmul.bf16.gmra.mxu2 %v9477_v49  ;;  %v6824_v17 = vor.u32 %v7636_v28, %v6823_v26 }
 0x3e8   : > { %3637 = vmatpush.bf16.msrb.mxu2 %v6884_v44  ;;  %3556 = vmatpush.bf16.msra.mxu3 %v7000_v33  ;;  %v9498_v44 = vor.u32 %v7600_v22, %v6685_v0  ;;  %v6931_v33 = vld [vmem:[#allocation4 + $0x1d0] sm:$0xf] }
 0x3e9   : > { %v6932_v47 = vor.u32 %v7663_v36, %v6931_v33 }
 0x3ea   : > { %3701 = vmatpush.bf16.msra.mxu0 %v7004_v40  ;;  %v6811_v40 = vld [vmem:[#allocation4 + $0xe0] sm:$0xf] }
 0x3eb   : > { %v6812_v20 = vor.u32 %v7633_v48, %v6811_v40 }
 0x3ec   : > { %3638 = vmatpush.bf16.msrb.mxu2 %v6872_v56  ;;  %3557 = vmatpush.bf16.msra.mxu3 %v6988_v29  ;;  %v6691_v56 = vld [vmem:[%s10748_s7 + $0x88] sm:$0xf]  ;;  %v6919_v29 = vld [vmem:[#allocation4 + $0x1b8] sm:$0xf] }
 0x3ed   : > { %3486 = vmatmul.bf16.gmra.mxu0 %v9377_v1  ;;  %v9510_v34 = vor.u32 %v7603_v8, %v6691_v56 }
 0x3ee   : > { %3702 = vmatpush.bf16.msra.mxu0 %v6992_v25  ;;  %v6800_v25 = vor.u32 %v7630_v7, %v6799_v6 }
 0x3ef   : > { %7127 = vmatmul.msk.bf16.gmra.mxu3 %vm3305_vm8, %v9486_v5 }
 0x3f0   : > { %3639 = vmatpush.bf16.msrb.mxu2 %v6860_v38  ;;  %3666 = vmatpush.bf16.msrb.mxu3 %v6980_v4  ;;  %v6920_v38 = vor.u32 %v7660_v58, %v6919_v29  ;;  %v6907_v4 = vld [vmem:[#allocation4 + $0x1a0] sm:$0xf]  ;;  %v9548_v58 = vpop.permute.xlu2 %2616 }
 0x3f1   : > { %v6908_v60 = vor.u32 %v7657_v57, %v6907_v4 }
 0x3f4   : > { %3640 = vmatpush.bf16.msrb.mxu2 %v6848_v31  ;;  %3667 = vmatpush.bf16.msrb.mxu3 %v6968_v14  ;;  %v9518_v14 = vpop.permute.xlu1 %2596 }
 0x3f6   : > { %3515 = vmatmul.bf16.gmra.mxu1 %v9395_v13 }
 0x3f7   : > { %v3327_v24 = vpop.f32.mrf.mxu3  ;;  %3428 = vmatmul.bf16.gmra.mxu2 %v9498_v44 }
 0x3f8   : > { %3641 = vmatpush.bf16.msrb.mxu2 %v6836_v63  ;;  %3668 = vmatpush.bf16.msrb.mxu3 %v6956_v52  ;;  %v3328_v11 = vadd.f32 %v3327_v24, %v9500_v62  ;;  %v6896_v63 = vor.u32 %v7654_v43, %v6895_v54  ;;  %v9533_v24 = vpop.permute.xlu0 %2606 }
 0x3fa   : > { %v3356_v9 = vpop.f32.mrf.mxu0 }
 0x3fb   : > { %v3357_v37 = vadd.f32 %v3356_v9, %v3328_v11 }
 0x3fc   : > { %3642 = vmatpush.bf16.msrb.mxu2 %v6824_v17  ;;  %3669 = vmatpush.bf16.msrb.mxu3 %v6944_v32  ;;  %v9537_v36 = vpop.permute.xlu1 %2611 }
 0x3fd   : > { %7129 = vmatmul.msk.bf16.vlgmr.msrb.gmra.mxu0 %vm3305_vm8, %v9444_v16 }
 0x3ff   : > { %v3329_v45 = vpop.f32.mrf.mxu3  ;;  %7128 = vmatmul.msk.bf16.gmra.mxu3 %vm3305_vm8, %v9510_v34 }
 0x400   : > { %3643 = vmatpush.bf16.msrb.mxu2 %v6812_v20  ;;  %3670 = vmatpush.bf16.msrb.mxu3 %v6932_v47  ;;  %v3330_v12 = vadd.f32 %v3329_v45, %v9518_v14 }
 0x402   : > { %v3358_v39 = vpop.f32.mrf.mxu0 }
 0x403   : > { %v3385_v30 = vpop.f32.mrf.mxu1  ;;  %v3359_v0 = vadd.f32 %v3358_v39, %v3330_v12 }
 0x404   : > { %3644 = vmatpush.bf16.msrb.mxu2 %v6800_v25  ;;  %3671 = vmatpush.bf16.msrb.mxu3 %v6920_v38  ;;  %v9516_v31 = vadd.f32 %v3385_v30, %v3357_v37  ;;  %v9552_v25 = vpop.permute.xlu0 %2621 }
 0x406   : > { %3616 = vmatmul.bf16.vlgmr.msrb.gmra.mxu1 %v9211_v21 }
 0x407   : > { %v3332_v22 = vpop.f32.mrf.mxu3  ;;  %3529 = vmatmul.bf16.vlgmr.msra.gmra.mxu2 %v9274_v15 }
 0x408   : > { %3672 = vmatpush.bf16.msrb.mxu3 %v6908_v60  ;;  %v3333_v52 = vadd.f32 %v3332_v22, %v9522_v53 }
 0x40a   : > { %v3361_v26 = vpop.f32.mrf.mxu0 }
 0x40b   : > { %v3387_v55 = vpop.f32.mrf.mxu1  ;;  %v3362_v28 = vadd.f32 %v3361_v26, %v3333_v52 }
 0x40c   : > { %3673 = vmatpush.bf16.msrb.mxu3 %v6896_v63  ;;  %v9526_v17 = vadd.f32 %v3387_v55, %v3359_v0  ;;  %v9563_v63 = vpop.permute.xlu1 %2626 }
 0x40d   : > { %7130 = vmatmul.msk.bf16.gmra.mxu0 %vm3305_vm8, %v9465_v18 }
 0x40f   : > { %v3334_v10 = vpop.f32.mrf.mxu3  ;;  %3558 = vmatmul.bf16.vlgmr.msra.gmra.mxu3 %v9434_v50 }
 0x410   : > { %v3335_v33 = vadd.f32 %v3334_v10, %v9533_v24 }
 0x412   : > { %v3363_v21 = vpop.f32.mrf.mxu0 }
 0x413   : > { %v3390_v32 = vpop.f32.mrf.mxu1  ;;  %v3364_v40 = vadd.f32 %v3363_v21, %v3335_v33 }
 0x414   : > { %v9531_v48 = vadd.f32 %v3390_v32, %v3362_v28 }
 0x416   : > { %3621 = vmatmul.bf16.gmra.mxu1 %v9272_v3 }
 0x417   : > { %v3337_v11 = vpop.f32.mrf.mxu3  ;;  %3534 = vmatmul.bf16.gmra.mxu2 %v9329_v19 }
 0x418   : > { %v3338_v56 = vadd.f32 %v3337_v11, %v9537_v36 }
 0x41a   : > { %v3366_v8 = vpop.f32.mrf.mxu0 }
 0x41b   : > { %v3392_v9 = vpop.f32.mrf.mxu1  ;;  %v3367_v20 = vadd.f32 %v3366_v8, %v3338_v56 }
 0x41c   : > { %v9541_v37 = vadd.f32 %v3392_v9, %v3364_v40 }
 0x41d   : > { %7131 = vmatmul.msk.bf16.gmra.mxu0 %vm3305_vm8, %v9486_v5 }
 0x41f   : > { %v3339_v47 = vpop.f32.mrf.mxu3  ;;  %3563 = vmatmul.bf16.gmra.mxu3 %v9455_v23 }
 0x420   : > { %v3340_v7 = vadd.f32 %v3339_v47, %v9548_v58 }
 0x422   : > { %v3368_v3 = vpop.f32.mrf.mxu0 }
 0x423   : > { %v3395_v6 = vpop.f32.mrf.mxu1  ;;  %v3369_v45 = vadd.f32 %v3368_v3, %v3340_v7 }
 0x424   : > { %v9546_v29 = vadd.f32 %v3395_v6, %v3367_v20 }
 0x426   : > { %3626 = vmatmul.bf16.gmra.mxu1 %v9327_v27 }
 0x427   : > { %v3342_v38 = vpop.f32.mrf.mxu3  ;;  %3539 = vmatmul.bf16.gmra.mxu2 %v9379_v51 }
 0x428   : > { %v3343_v4 = vadd.f32 %v3342_v38, %v9552_v25 }
 0x42a   : > { %v3371_v57 = vpop.f32.mrf.mxu0 }
 0x42b   : > { %v3397_v39 = vpop.f32.mrf.mxu1  ;;  %v3372_v30 = vadd.f32 %v3371_v57, %v3343_v4 }
 0x42c   : > { %v9556_v60 = vadd.f32 %v3397_v39, %v3369_v45 }
 0x42d   : > { %7132 = vmatmul.msk.bf16.gmra.mxu0 %vm3305_vm8, %v9510_v34 }
 0x42f   : > { %3568 = vmatmul.bf16.gmra.mxu3 %v9477_v49  ;;  %v3344_v54 = vpop.f32.mrf.mxu3 }
 0x430   : > { %v3345_v22 = vadd.f32 %v3344_v54, %v9563_v63 }
 0x432   : > { %v3373_v27 = vpop.f32.mrf.mxu0 }
 0x433   : > { %v3400_v43 = vpop.f32.mrf.mxu1  ;;  %v3374_v0 = vadd.f32 %v3373_v27, %v3345_v22 }
 0x434   : > { %v9561_v12 = vadd.f32 %v3400_v43, %v3372_v30 }
 0x436   : > { %3631 = vmatmul.bf16.gmra.mxu1 %v9377_v1 }
 0x437   : > { %3544 = vmatmul.bf16.gmra.mxu2 %v9414_v46 }
 0x43a   : > { %v3472_v26 = vpop.f32.mrf.mxu0 }
 0x43b   : > { %v3402_v52 = vpop.f32.mrf.mxu1  ;;  %v3473_v28 = vadd.f32 %v3472_v26, %v9500_v62 }
 0x43c   : > { %v9568_v55 = vadd.f32 %v3402_v52, %v3374_v0 }
 0x43d   : > { %3703 = vmatmul.bf16.vlgmr.msra.gmra.mxu0 %v9434_v50 }
 0x43f   : > { %3573 = vmatmul.bf16.gmra.mxu3 %v9498_v44 }
 0x442   : > { %v9573_v10 = vpop.f32.mrf.mxu0 }
 0x443   : > { %v3501_v21 = vpop.f32.mrf.mxu1 }
 0x444   : > { %v9575_v32 = vadd.f32 %v3501_v21, %v3473_v28 }
 0x446   : > { %7133 = vmatmul.msk.bf16.vlgmr.msra.gmra.mxu1 %vm3305_vm8, %v9444_v16 }
 0x447   : > { %3645 = vmatmul.bf16.vlgmr.msrb.gmra.mxu2 %v9242_v42 }
 0x44a   : > { %v3477_v1 = vpop.f32.mrf.mxu0  ;;  %v3414_v11 = vpop.f32.mrf.mxu2 }
 0x44b   : > { %v9580_v33 = vpop.f32.mrf.mxu1  ;;  %v3415_v50 = vadd.f32 %v3414_v11, %v9516_v31  ;;  %v3478_v40 = vadd.f32 %v3477_v1, %v9522_v53 }
 0x44d   : > { %3708 = vmatmul.bf16.gmra.mxu0 %v9455_v23 }
 0x44f   : > { %3674 = vmatmul.bf16.vlgmr.msrb.gmra.mxu3 %v9274_v15 }
 0x452   : > { %v9586_v56 = vpop.f32.mrf.mxu0  ;;  %v9590_v16 = vpop.f32.mrf.mxu2 }
 0x453   : > { %v3506_v8 = vpop.f32.mrf.mxu1  ;;  %v3443_v42 = vpop.f32.mrf.mxu3 }
 0x454   : > { %v9588_v9 = vadd.f32 %v3506_v8, %v3478_v40  ;;  %v9592_v20 = vadd.f32 %v3443_v42, %v3415_v50 }
 0x456   : > { %7134 = vmatmul.msk.bf16.gmra.mxu1 %vm3305_vm8, %v9465_v18 }
 0x457   : > { %3650 = vmatmul.bf16.gmra.mxu2 %v9300_v41 }
 0x45a   : > { %v3482_v23 = vpop.f32.mrf.mxu0  ;;  %v3419_v15 = vpop.f32.mrf.mxu2 }
 0x45b   : > { %v9597_v31 = vpop.f32.mrf.mxu1  ;;  %v9599_v47 = vpop.f32.mrf.mxu3  ;;  %v3420_v3 = vadd.f32 %v3419_v15, %v9531_v48  ;;  %v3483_v6 = vadd.f32 %v3482_v23, %v9537_v36 }
 0x45d   : > { %3713 = vmatmul.bf16.gmra.mxu0 %v9477_v49 }
 0x45f   : > { %3679 = vmatmul.bf16.gmra.mxu3 %v9329_v19 }
 0x462   : > { %v9605_v7 = vpop.f32.mrf.mxu0  ;;  %v9609_v41 = vpop.f32.mrf.mxu2 }
 0x463   : > { %v3511_v38 = vpop.f32.mrf.mxu1  ;;  %v3448_v45 = vpop.f32.mrf.mxu3 }
 0x464   : > { %v9607_v18 = vadd.f32 %v3511_v38, %v3483_v6  ;;  %v9611_v4 = vadd.f32 %v3448_v45, %v3420_v3  ;;  %v3475_v38 = vadd.f32 %v9573_v10, %v9518_v14 }
 0x466   : > { %7135 = vmatmul.msk.bf16.gmra.mxu1 %vm3305_vm8, %v9486_v5 }
 0x467   : > { %3655 = vmatmul.bf16.gmra.mxu2 %v9352_v35 }
 0x46a   : > { %v3487_v49 = vpop.f32.mrf.mxu0  ;;  %v3424_v57 = vpop.f32.mrf.mxu2 }
 0x46b   : > { %v9616_v48 = vpop.f32.mrf.mxu1  ;;  %v9618_v19 = vpop.f32.mrf.mxu3  ;;  %v3425_v39 = vadd.f32 %v3424_v57, %v9546_v29  ;;  %v3488_v30 = vadd.f32 %v3487_v49, %v9552_v25  ;;  %v3504_v49 = vadd.f32 %v9580_v33, %v3475_v38 }
 0x46d   : > { %3718 = vmatmul.bf16.gmra.mxu0 %v9498_v44 }
 0x46f   : > { %3684 = vmatmul.bf16.gmra.mxu3 %v9379_v51 }
 0x472   : > { %v3489_v54 = vpop.f32.mrf.mxu0  ;;  %v9626_v35 = vpop.f32.mrf.mxu2 }
 0x473   : > { %v3516_v27 = vpop.f32.mrf.mxu1  ;;  %v3453_v5 = vpop.f32.mrf.mxu3  ;;  %v3490_v29 = vadd.f32 %v3489_v54, %v9563_v63 }
 0x474   : > { %v9624_v43 = vadd.f32 %v3516_v27, %v3488_v30  ;;  %v9628_v22 = vadd.f32 %v3453_v5, %v3425_v39 }
 0x476   : > { %7136 = vmatmul.msk.bf16.gmra.mxu1 %vm3305_vm8, %v9510_v34 }
 0x477   : > { %3660 = vmatmul.bf16.gmra.mxu2 %v9395_v13 }
 0x47a   : > { %v3588_v51 = vpop.f32.mrf.mxu0  ;;  %v3429_v26 = vpop.f32.mrf.mxu2 }
 0x47b   : > { %v3518_v44 = vpop.f32.mrf.mxu1  ;;  %v9636_v52 = vpop.f32.mrf.mxu3  ;;  %v3430_v28 = vadd.f32 %v3429_v26, %v9561_v12 }
 0x47c   : > { %v9634_v0 = vadd.f32 %v3518_v44, %v3490_v29 }
 0x47f   : > { %3689 = vmatmul.bf16.gmra.mxu3 %v9414_v46 }
 0x482   : > { %v3590_v1 = vpop.f32.mrf.mxu0  ;;  %v9642_v34 = vpop.f32.mrf.mxu2 }
 0x483   : > { %v9640_v21 = vpop.f32.mrf.mxu1  ;;  %v3458_v11 = vpop.f32.mrf.mxu3 }
 0x484   : > { %v9644_v50 = vadd.f32 %v3458_v11, %v3430_v28 }
 0x48a   : > { %v3593_v8 = vpop.f32.mrf.mxu0  ;;  %v3530_v42 = vpop.f32.mrf.mxu2 }
 0x48b   : > { %v9646_v13 = vpop.f32.mrf.mxu1  ;;  %v9648_v40 = vpop.f32.mrf.mxu3  ;;  %v3531_v23 = vadd.f32 %v3530_v42, %v9575_v32 }
 0x492   : > { %v3532_v46 = vpop.f32.mrf.mxu2  ;;  %v3595_v6 = vpop.f32.mrf.mxu0 }
 0x493   : > { %v9651_v15 = vpop.f32.mrf.mxu1  ;;  %v3559_v12 = vpop.f32.mrf.mxu3  ;;  %v3533_v57 = vadd.f32 %v3532_v46, %v3504_v49 }
 0x494   : > { %v3560_v3 = vadd.f32 %v3559_v12, %v3531_v23 }
 0x496   : > { %v9655_v45 = vadd.f32 %v3588_v51, %v3560_v3  ;;  %v3480_v51 = vadd.f32 %v9586_v56, %v9533_v24  ;;  %v3485_v56 = vadd.f32 %v9605_v7, %v9548_v58 }
 0x498   : > { %v3509_v11 = vadd.f32 %v9597_v31, %v3480_v51 }
 0x49a   : > { %v3535_v54 = vpop.f32.mrf.mxu2  ;;  %v3598_v29 = vpop.f32.mrf.mxu0 }
 0x49b   : > { %v9658_v39 = vpop.f32.mrf.mxu1  ;;  %v3561_v30 = vpop.f32.mrf.mxu3  ;;  %v3536_v32 = vadd.f32 %v3535_v54, %v9588_v9 }
 0x49c   : > { %v3562_v27 = vadd.f32 %v3561_v30, %v3533_v57 }
 0x49e   : > { %v9661_v5 = vadd.f32 %v3590_v1, %v3562_v27  ;;  %v3514_v27 = vadd.f32 %v9616_v48, %v3485_v56 }
 0x4a2   : > { %v3537_v28 = vpop.f32.mrf.mxu2  ;;  %v3600_v42 = vpop.f32.mrf.mxu0 }
 0x4a3   : > { %v9663_v44 = vpop.f32.mrf.mxu1  ;;  %v3564_v26 = vpop.f32.mrf.mxu3  ;;  %v3538_v23 = vadd.f32 %v3537_v28, %v3509_v11 }
 0x4a4   : > { %v3565_v10 = vadd.f32 %v3564_v26, %v3536_v32 }
 0x4a6   : > { %v9667_v33 = vadd.f32 %v3593_v8, %v3565_v10 }
 0x4aa   : > { %v3540_v46 = vpop.f32.mrf.mxu2  ;;  %v3603_v57 = vpop.f32.mrf.mxu0 }
 0x4ab   : > { %v3566_v12 = vpop.f32.mrf.mxu3  ;;  %v9670_v1 = vpop.f32.mrf.mxu1  ;;  %v3541_v3 = vadd.f32 %v3540_v46, %v9607_v18 }
 0x4ac   : > { %v3567_v9 = vadd.f32 %v3566_v12, %v3538_v23 }
 0x4ae   : > { %v9673_v38 = vadd.f32 %v3595_v6, %v3567_v9 }
 0x4b2   : > { %v3542_v30 = vpop.f32.mrf.mxu2  ;;  %v3605_v6 = vpop.f32.mrf.mxu0 }
 0x4b3   : > { %v3569_v49 = vpop.f32.mrf.mxu3  ;;  %v9679_v31 = vpop.f32.mrf.mxu1  ;;  %v3543_v32 = vadd.f32 %v3542_v30, %v3514_v27 }
 0x4b4   : > { %v3570_v54 = vadd.f32 %v3569_v49, %v3541_v3 }
 0x4b6   : > { %v9677_v8 = vadd.f32 %v3598_v29, %v3570_v54 }
 0x4ba   : > { %v3545_v28 = vpop.f32.mrf.mxu2  ;;  %v3704_v9 = vpop.f32.mrf.mxu0 }
 0x4bb   : > { %v3571_v26 = vpop.f32.mrf.mxu3  ;;  %v3546_v18 = vadd.f32 %v3545_v28, %v9624_v43  ;;  %v9685_v11 = vpop.f32.mrf.mxu1  ;;  %v3618_v43 = vadd.f32 %v9640_v21, %v9500_v62  ;;  %v3417_v62 = vadd.f32 %v9590_v16, %v9526_v17  ;;  %v3623_v16 = vadd.f32 %v9651_v15, %v9522_v53 }
 0x4bc   : > { %v3572_v10 = vadd.f32 %v3571_v26, %v3543_v32  ;;  %v3918_v53 = vmul.f32 %v9611_v4, %v8090_v59  ;;  %v3625_v15 = vadd.f32 %v9658_v39, %v9533_v24  ;;  %v3922_v24 = vmul.f32 %v9673_v38, %v8092_v61 }
 0x4be   : > { %v9683_v51 = vadd.f32 %v3600_v42, %v3572_v10  ;;  %v3783_v10 = vmul.f32 %v9592_v20, %v8090_v59 }
 0x4c2   : > { %v3547_v12 = vpop.f32.mrf.mxu2  ;;  %v3706_v42 = vpop.f32.mrf.mxu0 }
 0x4c3   : > { %v3574_v23 = vpop.f32.mrf.mxu3  ;;  %v3548_v29 = vadd.f32 %v3547_v12, %v9634_v0  ;;  %v3733_v48 = vpop.f32.mrf.mxu1  ;;  %v3784_v0 = vmul.f32 %v9655_v45, %v8092_v61 }
 0x4c4   : > { %v3575_v7 = vadd.f32 %v3574_v23, %v3546_v18  ;;  %v3620_v18 = vadd.f32 %v9646_v13, %v9518_v14  ;;  %v3787_v14 = vmul.f32 %v9661_v5, %v8092_v61 }
 0x4c6   : > { %v9688_v46 = vadd.f32 %v3603_v57, %v3575_v7  ;;  %v3789_v7 = vadd.f32 %v3784_v0, %v3783_v10 }
 0x4ca   : > { %v3646_v30 = vpop.f32.mrf.mxu2  ;;  %v3709_v23 = vpop.f32.mrf.mxu0 }
 0x4cb   : > { %v3576_v3 = vpop.f32.mrf.mxu3  ;;  %v3647_v56 = vadd.f32 %v3646_v30, %v3618_v43  ;;  %v3735_v32 = vpop.f32.mrf.mxu1 }
 0x4cc   : > { %v3577_v49 = vadd.f32 %v3576_v3, %v3548_v29 }
 0x4ce   : > { %v9690_v54 = vadd.f32 %v3605_v6, %v3577_v49 }
 0x4d2   : > { %v3648_v26 = vpop.f32.mrf.mxu2 }
 0x4d3   : > { %v3675_v27 = vpop.f32.mrf.mxu3  ;;  %v3649_v21 = vadd.f32 %v3648_v26, %v3620_v18  ;;  %v3738_v3 = vpop.f32.mrf.mxu1  ;;  %v3919_v18 = vmul.f32 %v9667_v33, %v8092_v61 }
 0x4d4   : > { %v3676_v28 = vadd.f32 %v3675_v27, %v3647_v56 }
 0x4d6   : > { %v3705_v57 = vadd.f32 %v3704_v9, %v3676_v28  ;;  %v9707_v9 = vadd.f32 %v9599_v47, %v3417_v62  ;;  %v3711_v28 = vpop.f32.mrf.mxu0 }
 0x4d8   : > { %v9700_v6 = vadd.f32 %v3733_v48, %v3705_v57  ;;  %v3786_v17 = vmul.f32 %v9707_v9, %v8090_v59 }
 0x4da   : > { %v3785_v12 = vmul.f32 %v9700_v6, %v8102_v2  ;;  %v3651_v49 = vpop.f32.mrf.mxu2  ;;  %v3793_v27 = vadd.f32 %v3787_v14, %v3786_v17 }
 0x4db   : > { %v3677_v29 = vpop.f32.mrf.mxu3  ;;  %v3652_v56 = vadd.f32 %v3651_v49, %v3623_v16 }
 0x4dc   : > { %v3678_v30 = vadd.f32 %v3677_v29, %v3649_v21  ;;  %v3790_v43 = vadd.f32 %v3789_v7, %v3785_v12  ;;  %v3422_v21 = vadd.f32 %v9609_v41, %v9541_v37  ;;  %v3924_v29 = vadd.f32 %v3919_v18, %v3918_v53 }
 0x4dd   : > { %v3628_v41 = vadd.f32 %v9663_v44, %v9537_v36  ;;  %v4053_v36 = vmul.f32 %v9628_v22, %v8090_v59  ;;  %v3630_v44 = vadd.f32 %v9670_v1, %v9548_v58  ;;  %v4057_v58 = vmul.f32 %v9683_v51, %v8092_v61 }
 0x4de   : > { %v3707_v13 = vadd.f32 %v3706_v42, %v3678_v30  ;;  %3791 = vadd.xlane.f32.xlu2 %v3790_v43  ;;  %v3740_v42 = vpop.f32.mrf.mxu1 }
 0x4e0   : > { %v9715_v48 = vadd.f32 %v3735_v32, %v3707_v13  ;;  %v3714_v13 = vpop.f32.mrf.mxu0 }
 0x4e2   : > { %v3788_v47 = vmul.f32 %v9715_v48, %v8102_v2  ;;  %v3653_v0 = vpop.f32.mrf.mxu2 }
 0x4e3   : > { %v3680_v26 = vpop.f32.mrf.mxu3  ;;  %v3654_v12 = vadd.f32 %v3653_v0, %v3625_v15 }
 0x4e4   : > { %v3681_v57 = vadd.f32 %v3680_v26, %v3652_v56  ;;  %v3794_v10 = vadd.f32 %v3793_v27, %v3788_v47 }
 0x4e6   : > { %v3710_v62 = vadd.f32 %v3709_v23, %v3681_v57  ;;  %3795 = vadd.xlane.f32.xlu0 %v3794_v10  ;;  %v9732_v23 = vadd.f32 %v9618_v19, %v3422_v21 }
 0x4e8   : > { %v9725_v32 = vadd.f32 %v3738_v3, %v3710_v62  ;;  %v3743_v3 = vpop.f32.mrf.mxu1  ;;  %v3921_v37 = vmul.f32 %v9732_v23, %v8090_v59  ;;  %v3716_v10 = vpop.f32.mrf.mxu0  ;;  %v3427_v62 = vadd.f32 %v9626_v35, %v9556_v60  ;;  %v3633_v35 = vadd.f32 %v9679_v31, %v9552_v25 }
 0x4e9   : > { %v4188_v25 = vmul.f32 %v9644_v50, %v8090_v59  ;;  %v3635_v31 = vadd.f32 %v9685_v11, %v9563_v63  ;;  %v4192_v63 = vmul.f32 %v9690_v54, %v8092_v61 }
 0x4ea   : > { %v3920_v7 = vmul.f32 %v9725_v32, %v8102_v2  ;;  %v3656_v30 = vpop.f32.mrf.mxu2  ;;  %v3928_v56 = vadd.f32 %v3922_v24, %v3921_v37 }
 0x4eb   : > { %v3682_v49 = vpop.f32.mrf.mxu3  ;;  %v3657_v19 = vadd.f32 %v3656_v30, %v3628_v41 }
 0x4ec   : > { %v3683_v43 = vadd.f32 %v3682_v49, %v3654_v12  ;;  %v3925_v14 = vadd.f32 %v3924_v29, %v3920_v7  ;;  %v9757_v7 = vadd.f32 %v9636_v52, %v3427_v62 }
 0x4ee   : > { %v3712_v39 = vadd.f32 %v3711_v28, %v3683_v43  ;;  %3926 = vadd.xlane.f32.xlu1 %v3925_v14  ;;  %v4054_v28 = vmul.f32 %v9677_v8, %v8092_v61  ;;  %v4056_v60 = vmul.f32 %v9757_v7, %v8090_v59 }
 0x4f0   : > { %v9740_v17 = vadd.f32 %v3740_v42, %v3712_v39  ;;  %v3745_v18 = vpop.f32.mrf.mxu1  ;;  %v4059_v21 = vadd.f32 %v4054_v28, %v4053_v36  ;;  %v3719_v14 = vpop.f32.mrf.mxu0  ;;  %v4063_v24 = vadd.f32 %v4057_v58, %v4056_v60 }
 0x4f2   : > { %v3923_v16 = vmul.f32 %v9740_v17, %v8102_v2  ;;  %v3658_v27 = vpop.f32.mrf.mxu2 }
 0x4f3   : > { %v3685_v47 = vpop.f32.mrf.mxu3  ;;  %v3659_v53 = vadd.f32 %v3658_v27, %v3630_v44  ;;  %v3432_v27 = vadd.f32 %v9642_v34, %v9568_v55 }
 0x4f4   : > { %v3686_v26 = vadd.f32 %v3685_v47, %v3657_v19  ;;  %v3929_v0 = vadd.f32 %v3928_v56, %v3923_v16  ;;  %v4189_v19 = vmul.f32 %v9688_v46, %v8092_v61 }
 0x4f5   : > { %v9782_v36 = vadd.f32 %v9648_v40, %v3432_v27  ;;  %v9792_v40 = vpop.permute.xlu0 %3860 }
 0x4f6   : > { %v3715_v57 = vadd.f32 %v3714_v13, %v3686_v26  ;;  %3930 = vadd.xlane.f32.xlu2 %v3929_v0  ;;  %v4194_v28 = vadd.f32 %v4189_v19, %v4188_v25 }
 0x4f7   : > { %v4191_v55 = vmul.f32 %v9782_v36, %v8090_v59 }
 0x4f8   : > { %v9750_v42 = vadd.f32 %v3743_v3, %v3715_v57  ;;  %v3748_v3 = vpop.f32.mrf.mxu1 }
 0x4fa   : > { %v4055_v15 = vmul.f32 %v9750_v42, %v8102_v2  ;;  %v3661_v30 = vpop.f32.mrf.mxu2 }
 0x4fb   : > { %v3687_v12 = vpop.f32.mrf.mxu3  ;;  %v3662_v13 = vadd.f32 %v3661_v30, %v3633_v35 }
 0x4fc   : > { %v3688_v29 = vadd.f32 %v3687_v12, %v3659_v53  ;;  %v4060_v49 = vadd.f32 %v4059_v21, %v4055_v15  ;;  %v4198_v15 = vadd.f32 %v4192_v63, %v4191_v55  ;;  %v9794_v12 = vpop.permute.xlu2 %3878 }
 0x4fe   : > { %v3717_v1 = vadd.f32 %v3716_v10, %v3688_v29  ;;  %4061 = vadd.xlane.f32.xlu0 %v4060_v49  ;;  %v3721_v10 = vpop.f32.mrf.mxu0  ;;  %v9796_v29 = vpop.permute.xlu0 %3883 }
 0x500   : > { %v9765_v43 = vadd.f32 %v3745_v18, %v3717_v1  ;;  %v3750_v62 = vpop.f32.mrf.mxu1 }
 0x502   : > { %v4058_v52 = vmul.f32 %v9765_v43, %v8102_v2  ;;  %v3663_v56 = vpop.f32.mrf.mxu2 }
 0x503   : > { %v3690_v39 = vpop.f32.mrf.mxu3  ;;  %v3664_v26 = vadd.f32 %v3663_v56, %v3635_v31 }
 0x504   : > { %v3691_v37 = vadd.f32 %v3690_v39, %v3662_v13  ;;  %v4064_v41 = vadd.f32 %v4063_v24, %v4058_v52  ;;  %v9798_v49 = vpop.permute.xlu2 %3995  ;;  %v9814_v52 = vpop.permute.xlu1 %3865 }
 0x506   : > { %v3720_v16 = vadd.f32 %v3719_v14, %v3691_v37  ;;  %4065 = vadd.xlane.f32.xlu1 %v4064_v41  ;;  %v9800_v30 = vpop.permute.xlu0 %4000 }
 0x508   : > { %v9775_v47 = vadd.f32 %v3748_v3, %v3720_v16 }
 0x50a   : > { %v4190_v0 = vmul.f32 %v9775_v47, %v8102_v2 }
 0x50b   : > { %v3692_v57 = vpop.f32.mrf.mxu3 }
 0x50c   : > { %v3693_v44 = vadd.f32 %v3692_v57, %v3664_v26  ;;  %v4195_v18 = vadd.f32 %v4194_v28, %v4190_v0  ;;  %v9802_v58 = vpop.permute.xlu2 %4018  ;;  %v9820_v3 = vpop.permute.xlu1 %4013 }
 0x50e   : > { %v3722_v11 = vadd.f32 %v3721_v10, %v3693_v44  ;;  %4196 = vadd.xlane.f32.xlu0 %v4195_v18  ;;  %v9804_v1 = vpop.permute.xlu0 %4130 }
 0x510   : > { %v9788_v34 = vadd.f32 %v3750_v62, %v3722_v11 }
 0x512   : > { %v4193_v53 = vmul.f32 %v9788_v34, %v8102_v2 }
 0x514   : > { %v4199_v21 = vadd.f32 %v4198_v15, %v4193_v53  ;;  %v9806_v60 = vpop.permute.xlu2 %4135  ;;  %v9822_v31 = vpop.permute.xlu1 %4148 }
 0x516   : > { %4200 = vadd.xlane.f32.xlu1 %v4199_v21  ;;  %v9808_v35 = vpop.permute.xlu0 %4153 }
 0x51c   : > { %v9810_v14 = vpop.permute.xlu2 %4265 }
 0x51e   : > { %v9812_v13 = vpop.permute.xlu0 %4270 }
 0x524   : > { %v9816_v24 = vpop.permute.xlu2 %4283 }
 0x526   : > { %v9818_v39 = vpop.permute.xlu0 %4288 }
 0x527   : > { %10758 = vst [vmem:[#allocation5_spill] sm:$0xff] %v9818_v39 }
 0x551   : > { %v3792_v37 = vpop.xlane.xlu2 %3791 }
 0x559   : > { %v3796_v41 = vpop.xlane.xlu0 %3795 }
 0x55a   : > { %v3797_v19 = vadd.f32 %v3796_v41, %v3792_v37 }
 0x55c   : > { %v3798_v16 = vrot.slane %v3797_v19, 4 }
 0x55e   : > { %v3799_v56 = vadd.f32 %v3798_v16, %v3797_v19 }
 0x560   : > { %v3800_v25 = vrot.slane %v3799_v56, 2 }
 0x561   : > { %v3927_v57 = vpop.xlane.xlu1 %3926 }
 0x562   : > { %v3801_v27 = vadd.f32 %v3800_v25, %v3799_v56 }
 0x564   : > { %v3802_v26 = vrot.slane %v3801_v27, 1 }
 0x566   : > { %v3803_v0 = vadd.f32 %v3802_v26, %v3801_v27 }
 0x568   : > { %v3804_v28 = vmul.f32 0.00024414063, %v3803_v0 }
 0x569   : > { %v3931_v10 = vpop.xlane.xlu2 %3930 }
 0x56a   : > { %v3932_v44 = vadd.f32 %v3931_v10, %v3927_v57  ;;  %v3808_v18 = vsub.f32 %v9707_v9, %v3804_v28  ;;  %v3809_v62 = vsub.f32 %v9661_v5, %v3804_v28  ;;  %v3810_v63 = vsub.f32 %v9715_v48, %v3804_v28 }
 0x56b   : > { %v3805_v11 = vsub.f32 %v9592_v20, %v3804_v28  ;;  %v3806_v55 = vsub.f32 %v9655_v45, %v3804_v28  ;;  %v3807_v53 = vsub.f32 %v9700_v6, %v3804_v28 }
 0x56c   : > { %v3933_v15 = vrot.slane %v3932_v44, 4  ;;  %v9831_v21 = vmul.f32 %v3808_v18, %v8090_v59  ;;  %v9834_v37 = vmul.f32 %v3809_v62, %v8092_v61  ;;  %v9837_v41 = vmul.f32 %v3810_v63, %v8102_v2 }
 0x56d   : > { %v9840_v5 = vmul.f32 %v3805_v11, %v8090_v59  ;;  %v9843_v9 = vmul.f32 %v3806_v55, %v8092_v61  ;;  %v9846_v20 = vmul.f32 %v3807_v53, %v8102_v2 }
 0x56e   : > { %v3934_v45 = vadd.f32 %v3933_v15, %v3932_v44  ;;  %v3820_v6 = vmul.f32 %v9831_v21, %v9831_v21  ;;  %v3821_v48 = vmul.f32 %v9834_v37, %v9834_v37  ;;  %v3822_v25 = vmul.f32 %v9837_v41, %v9837_v41 }
 0x56f   : > { %v3817_v19 = vmul.f32 %v9840_v5, %v9840_v5  ;;  %v3818_v16 = vmul.f32 %v9843_v9, %v9843_v9  ;;  %v3819_v26 = vmul.f32 %v9846_v20, %v9846_v20 }
 0x570   : > { %v3935_v56 = vrot.slane %v3934_v45, 2  ;;  %v3827_v27 = vadd.f32 %v3821_v48, %v3820_v6 }
 0x571   : > { %v3823_v0 = vadd.f32 %v3818_v16, %v3817_v19  ;;  %v4062_v63 = vpop.xlane.xlu0 %4061 }
 0x572   : > { %v3936_v28 = vadd.f32 %v3935_v56, %v3934_v45  ;;  %v3828_v57 = vadd.f32 %v3827_v27, %v3822_v25 }
 0x573   : > { %v3824_v10 = vadd.f32 %v3823_v0, %v3819_v26 }
 0x574   : > { %v3937_v44 = vrot.slane %v3936_v28, 1  ;;  %3829 = vadd.xlane.f32.xlu2 %v3828_v57 }
 0x575   : > { %3825 = vadd.xlane.f32.xlu1 %v3824_v10 }
 0x576   : > { %v3938_v18 = vadd.f32 %v3937_v44, %v3936_v28 }
 0x578   : > { %v3939_v62 = vmul.f32 0.00024414063, %v3938_v18 }
 0x579   : > { %v4066_v11 = vpop.xlane.xlu1 %4065 }
 0x57a   : > { %v4067_v55 = vadd.f32 %v4066_v11, %v4062_v63  ;;  %v3943_v53 = vsub.f32 %v9732_v23, %v3939_v62  ;;  %v3944_v15 = vsub.f32 %v9673_v38, %v3939_v62  ;;  %v3945_v6 = vsub.f32 %v9740_v17, %v3939_v62 }
 0x57b   : > { %v3940_v48 = vsub.f32 %v9611_v4, %v3939_v62  ;;  %v3941_v45 = vsub.f32 %v9667_v33, %v3939_v62  ;;  %v3942_v19 = vsub.f32 %v9725_v32, %v3939_v62 }
 0x57c   : > { %v4068_v16 = vrot.slane %v4067_v55, 4  ;;  %v9867_v56 = vmul.f32 %v3943_v53, %v8090_v59  ;;  %v9870_v25 = vmul.f32 %v3944_v15, %v8092_v61  ;;  %v9873_v27 = vmul.f32 %v3945_v6, %v8102_v2 }
 0x57d   : > { %v9876_v38 = vmul.f32 %v3940_v48, %v8090_v59  ;;  %v9879_v23 = vmul.f32 %v3941_v45, %v8092_v61  ;;  %v9882_v4 = vmul.f32 %v3942_v19, %v8102_v2 }
 0x57e   : > { %v4069_v33 = vadd.f32 %v4068_v16, %v4067_v55  ;;  %v3955_v32 = vmul.f32 %v9867_v56, %v9867_v56  ;;  %v3956_v17 = vmul.f32 %v9870_v25, %v9870_v25  ;;  %v3957_v57 = vmul.f32 %v9873_v27, %v9873_v27 }
 0x57f   : > { %v3952_v26 = vmul.f32 %v9876_v38, %v9876_v38  ;;  %v3953_v0 = vmul.f32 %v9879_v23, %v9879_v23  ;;  %v3954_v44 = vmul.f32 %v9882_v4, %v9882_v4 }
 0x580   : > { %v4070_v28 = vrot.slane %v4069_v33, 2  ;;  %v3962_v10 = vadd.f32 %v3956_v17, %v3955_v32 }
 0x581   : > { %v3958_v18 = vadd.f32 %v3953_v0, %v3952_v26  ;;  %v4197_v6 = vpop.xlane.xlu0 %4196 }
 0x582   : > { %v4071_v62 = vadd.f32 %v4070_v28, %v4069_v33  ;;  %v3963_v63 = vadd.f32 %v3962_v10, %v3957_v57 }
 0x583   : > { %v3959_v11 = vadd.f32 %v3958_v18, %v3954_v44 }
 0x584   : > { %v4072_v55 = vrot.slane %v4071_v62, 1  ;;  %3964 = vadd.xlane.f32.xlu1 %v3963_v63 }
 0x585   : > { %3960 = vadd.xlane.f32.xlu0 %v3959_v11 }
 0x586   : > { %v4073_v53 = vadd.f32 %v4072_v55, %v4071_v62 }
 0x588   : > { %v4074_v15 = vmul.f32 0.00024414063, %v4073_v53 }
 0x589   : > { %v4201_v48 = vpop.xlane.xlu1 %4200 }
 0x58a   : > { %v4202_v45 = vadd.f32 %v4201_v48, %v4197_v6  ;;  %v4075_v19 = vsub.f32 %v9628_v22, %v4074_v15  ;;  %v4076_v16 = vsub.f32 %v9677_v8, %v4074_v15  ;;  %v4077_v32 = vsub.f32 %v9750_v42, %v4074_v15 }
 0x58b   : > { %v4078_v17 = vsub.f32 %v9757_v7, %v4074_v15  ;;  %v4079_v33 = vsub.f32 %v9683_v51, %v4074_v15  ;;  %v4080_v26 = vsub.f32 %v9765_v43, %v4074_v15 }
 0x58c   : > { %v4203_v0 = vrot.slane %v4202_v45, 4  ;;  %v9903_v28 = vmul.f32 %v4075_v19, %v8090_v59  ;;  %v9906_v57 = vmul.f32 %v4076_v16, %v8092_v61  ;;  %v9909_v10 = vmul.f32 %v4077_v32, %v8102_v2 }
 0x58d   : > { %v9912_v22 = vmul.f32 %v4078_v17, %v8090_v59  ;;  %v9915_v8 = vmul.f32 %v4079_v33, %v8092_v61  ;;  %v9918_v51 = vmul.f32 %v4080_v26, %v8102_v2 }
 0x58e   : > { %v4204_v42 = vadd.f32 %v4203_v0, %v4202_v45  ;;  %v4087_v7 = vmul.f32 %v9903_v28, %v9903_v28  ;;  %v4088_v43 = vmul.f32 %v9906_v57, %v9906_v57  ;;  %v4089_v63 = vmul.f32 %v9909_v10, %v9909_v10 }
 0x58f   : > { %v4090_v44 = vmul.f32 %v9912_v22, %v9912_v22  ;;  %v4091_v18 = vmul.f32 %v9915_v8, %v9915_v8  ;;  %v4092_v55 = vmul.f32 %v9918_v51, %v9918_v51 }
 0x590   : > { %v4205_v62 = vrot.slane %v4204_v42, 2  ;;  %v4093_v11 = vadd.f32 %v4088_v43, %v4087_v7 }
 0x591   : > { %v4097_v53 = vadd.f32 %v4091_v18, %v4090_v44 }
 0x592   : > { %v4206_v15 = vadd.f32 %v4205_v62, %v4204_v42  ;;  %v4094_v6 = vadd.f32 %v4093_v11, %v4089_v63 }
 0x593   : > { %v4098_v48 = vadd.f32 %v4097_v53, %v4092_v55 }
 0x594   : > { %v4207_v45 = vrot.slane %v4206_v15, 1  ;;  %4095 = vadd.xlane.f32.xlu2 %v4094_v6 }
 0x595   : > { %4099 = vadd.xlane.f32.xlu0 %v4098_v48 }
 0x596   : > { %v4208_v19 = vadd.f32 %v4207_v45, %v4206_v15 }
 0x598   : > { %v4209_v16 = vmul.f32 0.00024414063, %v4208_v19 }
 0x59a   : > { %v4213_v32 = vsub.f32 %v9782_v36, %v4209_v16  ;;  %v4214_v17 = vsub.f32 %v9690_v54, %v4209_v16  ;;  %v4215_v33 = vsub.f32 %v9788_v34, %v4209_v16  ;;  %v4210_v26 = vsub.f32 %v9644_v50, %v4209_v16 }
 0x59b   : > { %v4211_v0 = vsub.f32 %v9688_v46, %v4209_v16  ;;  %v4212_v7 = vsub.f32 %v9775_v47, %v4209_v16 }
 0x59c   : > { %v9939_v42 = vmul.f32 %v4213_v32, %v8090_v59  ;;  %v9942_v43 = vmul.f32 %v4214_v17, %v8092_v61  ;;  %v9945_v44 = vmul.f32 %v4215_v33, %v8102_v2  ;;  %v9948_v36 = vmul.f32 %v4210_v26, %v8090_v59 }
 0x59d   : > { %v9951_v54 = vmul.f32 %v4211_v0, %v8092_v61  ;;  %v9954_v50 = vmul.f32 %v4212_v7, %v8102_v2 }
 0x59e   : > { %v4225_v46 = vmul.f32 %v9939_v42, %v9939_v42  ;;  %v4226_v47 = vmul.f32 %v9942_v43, %v9942_v43  ;;  %v4222_v34 = vmul.f32 %v9948_v36, %v9948_v36  ;;  %v4227_v62 = vmul.f32 %v9945_v44, %v9945_v44 }
 0x59f   : > { %v4223_v18 = vmul.f32 %v9951_v54, %v9951_v54  ;;  %v4224_v11 = vmul.f32 %v9954_v50, %v9954_v50 }
 0x5a0   : > { %v4232_v63 = vadd.f32 %v4226_v47, %v4225_v46 }
 0x5a1   : > { %v4228_v55 = vadd.f32 %v4223_v18, %v4222_v34 }
 0x5a2   : > { %v4233_v53 = vadd.f32 %v4232_v63, %v4227_v62 }
 0x5a3   : > { %v4229_v15 = vadd.f32 %v4228_v55, %v4224_v11 }
 0x5a4   : > { %4234 = vadd.xlane.f32.xlu2 %v4233_v53 }
 0x5a5   : > { %4230 = vadd.xlane.f32.xlu1 %v4229_v15 }
 0x5e7   : > { %v3830_v6 = vpop.xlane.xlu2 %3829 }
 0x5e8   : > { %v3826_v48 = vpop.xlane.xlu1 %3825 }
 0x5e9   : > { %v3831_v45 = vadd.f32 %v3830_v6, %v3826_v48 }
 0x5eb   : > { %v3832_v19 = vrot.slane %v3831_v45, 4 }
 0x5ed   : > { %v3833_v16 = vadd.f32 %v3832_v19, %v3831_v45 }
 0x5ef   : > { %v3834_v32 = vrot.slane %v3833_v16, 2 }
 0x5f1   : > { %v3835_v17 = vadd.f32 %v3834_v32, %v3833_v16 }
 0x5f3   : > { %v3836_v33 = vrot.slane %v3835_v17, 1 }
 0x5f5   : > { %v3837_v26 = vadd.f32 %v3836_v33, %v3835_v17 }
 0x5f7   : > { %v3838_v0 = vmul.f32 0.00024414063, %v3837_v26  ;;  %v3965_v7 = vpop.xlane.xlu1 %3964 }
 0x5f8   : > { %v3961_v46 = vpop.xlane.xlu0 %3960 }
 0x5f9   : > { %v3839_v47 = vadd.f32 1e-05, %v3838_v0  ;;  %v3966_v39 = vadd.f32 %v3965_v7, %v3961_v46 }
 0x5fb   : > { %7851 = vrsqrt.f32 %v3839_v47  ;;  %v3967_v34 = vrot.slane %v3966_v39, 4  ;;  %vm3846_vm10 = vweird.f32 %v3839_v47 }
 0x5fd   : > { %v3968_v18 = vadd.f32 %v3967_v34, %v3966_v39 }
 0x5ff   : > { %v3969_v62 = vrot.slane %v3968_v18, 2 }
 0x601   : > { %v7852_v63 = vpop.eup %7851  ;;  %v3970_v11 = vadd.f32 %v3969_v62, %v3968_v18 }
 0x602   : > { %v3841_v55 = vmul.f32 %v7852_v63, %v3839_v47  ;;  %vm3847_vm9 = vweird.f32 %v7852_v63 }
 0x603   : > { %v3971_v53 = vrot.slane %v3970_v11, 1  ;;  %vm3848_vm11 = vmor %vm3846_vm10, %vm3847_vm9 }
 0x604   : > { %v3842_v15 = vmul.f32 %v7852_v63, %v3841_v55 }
 0x605   : > { %v3972_v6 = vadd.f32 %v3971_v53, %v3970_v11 }
 0x606   : > { %v3843_v48 = vmul.f32 0.5, %v3842_v15 }
 0x607   : > { %v3973_v45 = vmul.f32 0.00024414063, %v3972_v6  ;;  %v4096_v19 = vpop.xlane.xlu2 %4095 }
 0x608   : > { %v3844_v16 = vsub.f32 1.5, %v3843_v48  ;;  %v4100_v32 = vpop.xlane.xlu0 %4099 }
 0x609   : > { %v3974_v17 = vadd.f32 1e-05, %v3973_v45  ;;  %v4101_v33 = vadd.f32 %v4100_v32, %v4096_v19 }
 0x60a   : > { %v3845_v26 = vmul.f32 %v7852_v63, %v3844_v16 }
 0x60b   : > { %7853 = vrsqrt.f32 %v3974_v17  ;;  %v4102_v39 = vrot.slane %v4101_v33, 4  ;;  %vm3981_vm13 = vweird.f32 %v3974_v17 }
 0x60c   : > { %v3849_v0 = vsel %vm3848_vm11, %v7852_v63, %v3845_v26 }
 0x60d   : > { %v3850_v7 = vmul.f32 %v3849_v0, %v9840_v5  ;;  %v3851_v46 = vmul.f32 %v3849_v0, %v9843_v9  ;;  %v3852_v34 = vmul.f32 %v3849_v0, %v9846_v20  ;;  %v3853_v18 = vmul.f32 %v3849_v0, %v9831_v21 }
 0x60e   : > { %v3854_v62 = vmul.f32 %v3849_v0, %v9834_v37  ;;  %v3855_v11 = vmul.f32 %v3849_v0, %v9837_v41  ;;  %v4103_v55 = vadd.f32 %v4102_v39, %v4101_v33 }
 0x60f   : > { %v3868_v53 = vmul.f32 %v9792_v40, %v3850_v7  ;;  %v3869_v47 = vmul.f32 %v9792_v40, %v3851_v46  ;;  %v3870_v15 = vmul.f32 %v9792_v40, %v3852_v34  ;;  %v3871_v63 = vmul.f32 %v9814_v52, %v3853_v18 }
 0x610   : > { %v3872_v5 = vmul.f32 %v9814_v52, %v3854_v62  ;;  %v3873_v9 = vmul.f32 %v9814_v52, %v3855_v11  ;;  %v4104_v20 = vrot.slane %v4103_v55, 2 }
 0x611   : > { %v7854_v6 = vpop.eup %7853  ;;  %v3886_v21 = vadd.f32 %v9794_v12, %v3868_v53  ;;  %v3887_v37 = vadd.f32 %v9794_v12, %v3869_v47  ;;  %v3888_v41 = vadd.f32 %v9794_v12, %v3870_v15  ;;  %v3889_v48 = vadd.f32 %v9796_v29, %v3871_v63 }
 0x612   : > { %v3890_v45 = vadd.f32 %v9796_v29, %v3872_v5  ;;  %v3891_v40 = vadd.f32 %v9796_v29, %v3873_v9  ;;  %v3976_v19 = vmul.f32 %v7854_v6, %v3974_v17  ;;  %v4105_v7 = vadd.f32 %v4104_v20, %v4103_v55 }
 0x613   : > { %v3892_v16 = vmax.f32 %v3886_v21, 0.0  ;;  %v3893_v32 = vmax.f32 %v3887_v37, 0.0  ;;  %v3894_v33 = vmax.f32 %v3888_v41, 0.0  ;;  %v3895_v26 = vmax.f32 %v3889_v48, 0.0 }
 0x614   : > { %v3896_v52 = vmax.f32 %v3890_v45, 0.0  ;;  %v3897_v39 = vmax.f32 %v3891_v40, 0.0  ;;  %v3977_v0 = vmul.f32 %v7854_v6, %v3976_v19  ;;  %v4106_v53 = vrot.slane %v4105_v7, 1 }
 0x615   : > { %v3898_v46 = vmul.f32 %v3892_v16, %v8090_v59  ;;  %v3899_v34 = vmul.f32 %v3893_v32, %v8092_v61  ;;  %v3900_v12 = vmul.f32 %v3894_v33, %v8102_v2  ;;  %v3901_v18 = vmul.f32 %v3895_v26, %v8090_v59 }
 0x616   : > { %v3902_v62 = vmul.f32 %v3896_v52, %v8092_v61  ;;  %v3903_v29 = vmul.f32 %v3897_v39, %v8102_v2  ;;  %v3978_v11 = vmul.f32 0.5, %v3977_v0  ;;  %vm3982_vm12 = vweird.f32 %v7854_v6 }
 0x617   : > { %v9992_v47 = vpack.c.bf16 %v3899_v34, %v3898_v46  ;;  %v3905_v15 = vpack.c.bf16 %v3900_v12, %v3900_v12  ;;  %v4235_v63 = vpop.xlane.xlu2 %4234  ;;  %v4107_v20 = vadd.f32 %v4106_v53, %v4105_v7  ;;  %vm3983_vm9 = vmor %vm3981_vm13, %vm3982_vm12 }
 0x618   : > { %v9994_v55 = vpack.c.bf16 %v3902_v62, %v3901_v18  ;;  %v3907_v5 = vpack.c.bf16 %v3903_v29, %v3903_v29  ;;  %v3979_v9 = vsub.f32 1.5, %v3978_v11  ;;  %v4231_v21 = vpop.xlane.xlu1 %4230 }
 0x619   : > { %3908 = vst [vmem:[#allocation2 + $0x4] sm:$0xff] %v9992_v47  ;;  %v4236_v37 = vadd.f32 %v4235_v63, %v4231_v21  ;;  %v4108_v48 = vmul.f32 0.00024414063, %v4107_v20 }
 0x61a   : > { %3909 = vst [vmem:[#allocation2 + $0xc] sm:$0xf] %v3905_v15  ;;  %v3980_v41 = vmul.f32 %v7854_v6, %v3979_v9 }
 0x61b   : > { %3910 = vst [vmem:[#allocation2 + $0x18] sm:$0xff] %v9994_v55  ;;  %v9998_v40 = vadd.f32 1e-05, %v4108_v48  ;;  %v4237_v19 = vrot.slane %v4236_v37, 4 }
 0x61c   : > { %3911 = vst [vmem:[#allocation2 + $0x20] sm:$0xf] %v3907_v5  ;;  %v3984_v45 = vsel %vm3983_vm9, %v7854_v6, %v3980_v41 }
 0x61d   : > { %v3985_v16 = vmul.f32 %v3984_v45, %v9876_v38  ;;  %v3986_v32 = vmul.f32 %v3984_v45, %v9879_v23  ;;  %v3987_v33 = vmul.f32 %v3984_v45, %v9882_v4  ;;  %v3988_v26 = vmul.f32 %v3984_v45, %v9867_v56 }
 0x61e   : > { %v3989_v52 = vmul.f32 %v3984_v45, %v9870_v25  ;;  %v3990_v17 = vmul.f32 %v3984_v45, %v9873_v27  ;;  %7855 = vrsqrt.f32 %v9998_v40  ;;  %v4238_v7 = vadd.f32 %v4237_v19, %v4236_v37 }
 0x61f   : > { %v4003_v39 = vmul.f32 %v9798_v49, %v3985_v16  ;;  %v4004_v6 = vmul.f32 %v9798_v49, %v3986_v32  ;;  %v4005_v0 = vmul.f32 %v9798_v49, %v3987_v33  ;;  %v4006_v38 = vmul.f32 %v9800_v30, %v3988_v26 }
 0x620   : > { %v4007_v23 = vmul.f32 %v9800_v30, %v3989_v52  ;;  %v4008_v4 = vmul.f32 %v9800_v30, %v3990_v17  ;;  %v10013_v56 = vld [vmem:[#allocation2] sm:$0xff]  ;;  %v4239_v62 = vrot.slane %v4238_v7, 2  ;;  %vm4116_vm11 = vweird.f32 %v9998_v40 }
 0x621   : > { %v5029_v25 = vld [vmem:[#allocation2 + $0x4] sm:$0xff]  ;;  %v4021_v27 = vadd.f32 %v9820_v3, %v4003_v39  ;;  %v4022_v46 = vadd.f32 %v9820_v3, %v4004_v6  ;;  %v4023_v34 = vadd.f32 %v9820_v3, %v4005_v0  ;;  %v4024_v12 = vadd.f32 %v9802_v58, %v4006_v38  ;;  %4349 = vrot.lane.b32.xlu1 %v10013_v56, %s7886_s29  ;;  %v4862_v3 = vld [vmem:[#allocation2 + $0xc] sm:$0xf] }
 0x622   : > { %v10019_v18 = vld [vmem:[#allocation2 + $0x8] sm:$0xff]  ;;  %v4025_v49 = vadd.f32 %v9802_v58, %v4007_v23  ;;  %v4026_v30 = vadd.f32 %v9802_v58, %v4008_v4  ;;  %v10025_v29 = vld [vmem:[#allocation2 + $0x14] sm:$0xff]  ;;  %4877 = vst [vmem:[#allocation4 + $0x180] sm:$0xff] %v5029_v25  ;;  %v4240_v58 = vadd.f32 %v4239_v62, %v4238_v7 }
 0x623   : > { %4351 = vrot.lane.b32.xlu2 %v10019_v18, %s7886_s29  ;;  %v5303_v11 = vld [vmem:[#allocation2 + $0x18] sm:$0xff]  ;;  %v4027_v53 = vmax.f32 %v4021_v27, 0.0  ;;  %v4028_v15 = vmax.f32 %v4022_v46, 0.0  ;;  %v4029_v63 = vmax.f32 %v4023_v34, 0.0  ;;  %v4030_v5 = vmax.f32 %v4024_v12, 0.0  ;;  %4353 = vrot.lane.b32.xlu0 %v10025_v29, %s7886_s29 }
 0x624   : > { %v7856_v9 = vpop.eup %7855  ;;  %v4031_v20 = vmax.f32 %v4025_v49, 0.0  ;;  %v4032_v21 = vmax.f32 %v4026_v30, 0.0  ;;  %4879 = vst [vmem:[#allocation4 + $0x18c] sm:$0xff] %v5303_v11  ;;  %v4864_v37 = vld [vmem:[#allocation2 + $0x20] sm:$0xf]  ;;  %v4241_v17 = vrot.slane %v4240_v58, 1 }
 0x625   : > { %v4033_v41 = vmul.f32 %v4027_v53, %v8090_v59  ;;  %v4034_v48 = vmul.f32 %v4028_v15, %v8092_v61  ;;  %v4035_v45 = vmul.f32 %v4029_v63, %v8102_v2  ;;  %v4036_v19 = vmul.f32 %v4030_v5, %v8090_v59  ;;  %4878 = vst [vmem:[#allocation4 + $0x188] sm:$0xf] %v4862_v3  ;;  %v10042_v38 = vld [vmem:[#allocation2 + $0x1c] sm:$0xff] }
 0x626   : > { %v4037_v16 = vmul.f32 %v4031_v20, %v8092_v61  ;;  %v4038_v32 = vmul.f32 %v4032_v21, %v8102_v2  ;;  %v4111_v33 = vmul.f32 %v7856_v9, %v9998_v40  ;;  %4880 = vst [vmem:[#allocation4 + $0x194] sm:$0xf] %v4864_v37  ;;  %v4242_v23 = vadd.f32 %v4241_v17, %v4240_v58 }
 0x627   : > { %v10038_v26 = vpack.c.bf16 %v4034_v48, %v4033_v41  ;;  %v4040_v52 = vpack.c.bf16 %v4035_v45, %v4035_v45  ;;  %vm4117_vm10 = vweird.f32 %v7856_v9 }
 0x628   : > { %v10040_v39 = vpack.c.bf16 %v4037_v16, %v4036_v19  ;;  %v4042_v6 = vpack.c.bf16 %v4038_v32, %v4038_v32  ;;  %v4112_v0 = vmul.f32 %v7856_v9, %v4111_v33  ;;  %v4243_v7 = vmul.f32 0.00024414063, %v4242_v23  ;;  %vm4118_vm12 = vmor %vm4116_vm11, %vm4117_vm10 }
 0x629   : > { %4043 = vst [vmem:[#allocation2 + $0x2c] sm:$0xff] %v10038_v26  ;;  %4355 = vrot.lane.b32.xlu1 %v10042_v38, %s7886_s29 }
 0x62a   : > { %4044 = vst [vmem:[#allocation2 + $0x34] sm:$0xf] %v4040_v52  ;;  %v4113_v4 = vmul.f32 0.5, %v4112_v0  ;;  %v10052_v27 = vadd.f32 1e-05, %v4243_v7  ;;  %v10081_v52 = vld [vmem:[#allocation2 + $0xc] sm:$0xff] }
 0x62b   : > { %4489 = vrot.lane.b32.xlu2 %v10025_v29, %s7887_s30  ;;  %4045 = vst [vmem:[#allocation2 + $0x40] sm:$0xff] %v10040_v39  ;;  %4485 = vrot.lane.b32.xlu0 %v10013_v56, %s7887_s30 }
 0x62c   : > { %4046 = vst [vmem:[#allocation2 + $0x48] sm:$0xf] %v4042_v6  ;;  %v4114_v25 = vsub.f32 1.5, %v4113_v4  ;;  %7857 = vrsqrt.f32 %v10052_v27  ;;  %vm4251_vm9 = vweird.f32 %v10052_v27 }
 0x62e   : > { %v4115_v46 = vmul.f32 %v7856_v9, %v4114_v25 }
 0x630   : > { %v4119_v34 = vsel %vm4118_vm12, %v7856_v9, %v4115_v46  ;;  %v4865_v12 = vld [vmem:[#allocation2 + $0x2c] sm:$0xff] }
 0x631   : > { %v4120_v49 = vmul.f32 %v4119_v34, %v9903_v28  ;;  %v4121_v30 = vmul.f32 %v4119_v34, %v9906_v57  ;;  %v4122_v62 = vmul.f32 %v4119_v34, %v9909_v10  ;;  %v4123_v11 = vmul.f32 %v4119_v34, %v9912_v22  ;;  %4487 = vrot.lane.b32.xlu1 %v10019_v18, %s7887_s30  ;;  %v4866_v15 = vld [vmem:[#allocation2 + $0x34] sm:$0xf] }
 0x632   : > { %v4124_v3 = vmul.f32 %v4119_v34, %v9915_v8  ;;  %v4125_v40 = vmul.f32 %v4119_v34, %v9918_v51  ;;  %v4867_v53 = vld [vmem:[#allocation2 + $0x40] sm:$0xff]  ;;  %4881 = vst [vmem:[#allocation4 + $0x198] sm:$0xff] %v4865_v12  ;;  %v7858_v5 = vpop.eup %7857 }
 0x633   : > { %4929 = vrot.lane.b32.xlu2 %v9994_v55, %s7889_s15  ;;  %v4138_v28 = vmul.f32 %v9804_v1, %v4120_v49  ;;  %v4139_v57 = vmul.f32 %v9804_v1, %v4121_v30  ;;  %v4140_v10 = vmul.f32 %v9804_v1, %v4122_v62  ;;  %v4141_v22 = vmul.f32 %v9806_v60, %v4123_v11  ;;  %v4868_v8 = vld [vmem:[#allocation2 + $0x48] sm:$0xf] }
 0x634   : > { %4491 = vrot.lane.b32.xlu0 %v10042_v38, %s7887_s30  ;;  %v4142_v51 = vmul.f32 %v9806_v60, %v4124_v3  ;;  %v4143_v63 = vmul.f32 %v9806_v60, %v4125_v40  ;;  %4883 = vst [vmem:[#allocation4 + $0x1a4] sm:$0xff] %v4867_v53  ;;  %v4246_v41 = vmul.f32 %v7858_v5, %v10052_v27  ;;  %vm4252_vm13 = vweird.f32 %v7858_v5 }
 0x635   : > { %v4156_v9 = vadd.f32 %v9822_v31, %v4138_v28  ;;  %v4157_v20 = vadd.f32 %v9822_v31, %v4139_v57  ;;  %v4158_v21 = vadd.f32 %v9822_v31, %v4140_v10  ;;  %v4159_v1 = vadd.f32 %v9808_v35, %v4141_v22  ;;  %4882 = vst [vmem:[#allocation4 + $0x1a0] sm:$0xf] %v4866_v15  ;;  %vm4253_vm10 = vmor %vm4251_vm9, %vm4252_vm13  ;;  %v4896_v15 = vld [vmem:[#allocation2 + $0x20] sm:$0xff] }
 0x636   : > { %v4160_v58 = vadd.f32 %v9808_v35, %v4142_v51  ;;  %v4161_v37 = vadd.f32 %v9808_v35, %v4143_v63  ;;  %4884 = vst [vmem:[#allocation4 + $0x1ac] sm:$0xf] %v4868_v8  ;;  %v4247_v33 = vmul.f32 %v7858_v5, %v4246_v41  ;;  %v10759_v22 = vld [vmem:[#allocation5_spill] sm:$0xff] }
 0x637   : > { %v4162_v48 = vmax.f32 %v4156_v9, 0.0  ;;  %v4163_v60 = vmax.f32 %v4157_v20, 0.0  ;;  %v4164_v45 = vmax.f32 %v4158_v21, 0.0  ;;  %v4165_v19 = vmax.f32 %v4159_v1, 0.0 }
 0x638   : > { %v4166_v16 = vmax.f32 %v4160_v58, 0.0  ;;  %v4167_v32 = vmax.f32 %v4161_v37, 0.0  ;;  %v4248_v4 = vmul.f32 0.5, %v4247_v33 }
 0x639   : > { %v4168_v31 = vmul.f32 %v4162_v48, %v8090_v59  ;;  %v4169_v17 = vmul.f32 %v4163_v60, %v8092_v61  ;;  %v4170_v6 = vmul.f32 %v4164_v45, %v8102_v2  ;;  %v4171_v35 = vmul.f32 %v4165_v19, %v8090_v59  ;;  %4927 = vrot.lane.b32.xlu1 %v10081_v52, %s7889_s15 }
 0x63a   : > { %v4172_v0 = vmul.f32 %v4166_v16, %v8092_v61  ;;  %v4173_v23 = vmul.f32 %v4167_v32, %v8102_v2  ;;  %v4249_v12 = vsub.f32 1.5, %v4248_v4 }
 0x63b   : > { %4759 = vrot.lane.b32.xlu2 %v10019_v18, %s7888_s14  ;;  %v10093_v7 = vpack.c.bf16 %v4169_v17, %v4168_v31  ;;  %v4175_v25 = vpack.c.bf16 %v4170_v6, %v4170_v6  ;;  %v4322_v17 = vld [vmem:[#allocation2 + $0x30] sm:$0xff] }
 0x63c   : > { %4925 = vrot.lane.b32.xlu0 %v9992_v47, %s7889_s15  ;;  %v10097_v46 = vpack.c.bf16 %v4172_v0, %v4171_v35  ;;  %v4177_v34 = vpack.c.bf16 %v4173_v23, %v4173_v23  ;;  %v4250_v49 = vmul.f32 %v7858_v5, %v4249_v12  ;;  %v10177_v35 = vld [vmem:[#allocation2 + $0x48] sm:$0xff]  ;;  %v10179_v0 = vld [vmem:[#allocation2 + $0x34] sm:$0xff] }
 0x63d   : > { %4178 = vst [vmem:[#allocation2 + $0x54] sm:$0xff] %v10093_v7 }
 0x63e   : > { %4179 = vst [vmem:[#allocation2 + $0x5c] sm:$0xf] %v4175_v25  ;;  %v4254_v30 = vsel %vm4253_vm10, %v7858_v5, %v4250_v49 }
 0x63f   : > { %4180 = vst [vmem:[#allocation2 + $0x68] sm:$0xff] %v10097_v46  ;;  %v4255_v62 = vmul.f32 %v4254_v30, %v9948_v36  ;;  %v4256_v11 = vmul.f32 %v4254_v30, %v9951_v54  ;;  %v4257_v3 = vmul.f32 %v4254_v30, %v9954_v50  ;;  %v4258_v40 = vmul.f32 %v4254_v30, %v9939_v42 }
 0x640   : > { %4181 = vst [vmem:[#allocation2 + $0x70] sm:$0xf] %v4177_v34  ;;  %v4259_v53 = vmul.f32 %v4254_v30, %v9942_v43  ;;  %v4260_v27 = vmul.f32 %v4254_v30, %v9945_v44 }
 0x641   : > { %4757 = vrot.lane.b32.xlu1 %v10013_v56, %s7888_s14  ;;  %v4273_v28 = vmul.f32 %v9810_v14, %v4255_v62  ;;  %v4274_v36 = vmul.f32 %v9810_v14, %v4256_v11  ;;  %v4275_v54 = vmul.f32 %v9810_v14, %v4257_v3  ;;  %v4276_v50 = vmul.f32 %v9812_v13, %v4258_v40 }
 0x642   : > { %v4277_v42 = vmul.f32 %v9812_v13, %v4259_v53  ;;  %v4278_v43 = vmul.f32 %v9812_v13, %v4260_v27 }
 0x643   : > { %4621 = vrot.lane.b32.xlu2 %v10013_v56, %s7890_s16  ;;  %v4291_v44 = vadd.f32 %v9816_v24, %v4273_v28  ;;  %v4292_v10 = vadd.f32 %v9816_v24, %v4274_v36  ;;  %v4293_v56 = vadd.f32 %v9816_v24, %v4275_v54  ;;  %v4294_v8 = vadd.f32 %v10759_v22, %v4276_v50 }
 0x644   : > { %4931 = vrot.lane.b32.xlu0 %v4896_v15, %s7889_s15  ;;  %v4869_v57 = vld [vmem:[#allocation2 + $0x54] sm:$0xff]  ;;  %v4295_v14 = vadd.f32 %v10759_v22, %v4277_v42  ;;  %v4296_v63 = vadd.f32 %v10759_v22, %v4278_v43 }
 0x645   : > { %4885 = vst [vmem:[#allocation4 + $0x1b0] sm:$0xff] %v4869_v57  ;;  %v4870_v51 = vld [vmem:[#allocation2 + $0x5c] sm:$0xf]  ;;  %v4297_v9 = vmax.f32 %v4291_v44, 0.0  ;;  %v4298_v20 = vmax.f32 %v4292_v10, 0.0  ;;  %v4299_v13 = vmax.f32 %v4293_v56, 0.0 }
 0x646   : > { %v4871_v5 = vld [vmem:[#allocation2 + $0x68] sm:$0xff]  ;;  %4886 = vst [vmem:[#allocation4 + $0x1b8] sm:$0xf] %v4870_v51  ;;  %v4300_v21 = vmax.f32 %v4294_v8, 0.0  ;;  %v4301_v1 = vmax.f32 %v4295_v14, 0.0  ;;  %v4302_v58 = vmax.f32 %v4296_v63, 0.0 }
 0x647   : > { %4887 = vst [vmem:[#allocation4 + $0x1bc] sm:$0xff] %v4871_v5  ;;  %v4872_v37 = vld [vmem:[#allocation2 + $0x70] sm:$0xf]  ;;  %v4303_v24 = vmul.f32 %v4297_v9, %v8090_v59  ;;  %v4304_v41 = vmul.f32 %v4298_v20, %v8092_v61  ;;  %v4305_v48 = vmul.f32 %v4299_v13, %v8102_v2 }
 0x648   : > { %v4306_v60 = vmul.f32 %v4300_v21, %v8090_v59  ;;  %v4307_v45 = vmul.f32 %v4301_v1, %v8092_v61  ;;  %v4308_v19 = vmul.f32 %v4302_v58, %v8102_v2  ;;  %4888 = vst [vmem:[#allocation4 + $0x1c4] sm:$0xf] %v4872_v37 }
 0x649   : > { %4763 = vrot.lane.b32.xlu1 %v10042_v38, %s7888_s14  ;;  %v10135_v16 = vpack.c.bf16 %v4304_v41, %v4303_v24  ;;  %v4310_v32 = vpack.c.bf16 %v4305_v48, %v4305_v48 }
 0x64a   : > { %v10139_v33 = vpack.c.bf16 %v4307_v45, %v4306_v60  ;;  %v4312_v59 = vpack.c.bf16 %v4308_v19, %v4308_v19 }
 0x64b   : > { %4627 = vrot.lane.b32.xlu2 %v10042_v38, %s7890_s16  ;;  %4313 = vst [vmem:[#allocation2 + $0x7c] sm:$0xff] %v10135_v16 }
 0x64c   : > { %4761 = vrot.lane.b32.xlu0 %v10025_v29, %s7888_s14  ;;  %4314 = vst [vmem:[#allocation2 + $0x84] sm:$0xf] %v4310_v32 }
 0x64d   : > { %4315 = vst [vmem:[#allocation2 + $0x90] sm:$0xff] %v10139_v33 }
 0x64e   : > { %4316 = vst [vmem:[#allocation2 + $0x98] sm:$0xf] %v4312_v59 }
 0x651   : > { %4625 = vrot.lane.b32.xlu1 %v10025_v29, %s7890_s16  ;;  %v4324_v29 = vld [vmem:[#allocation2 + $0x44] sm:$0xff] }
 0x652   : > { %v10149_v61 = vld [vmem:[#allocation2 + $0x7c] sm:$0xff] }
 0x653   : > { %5201 = vrot.lane.b32.xlu2 %v9994_v55, %s7891_s17  ;;  %4889 = vst [vmem:[#allocation4 + $0x1c8] sm:$0xff] %v10149_v61  ;;  %v4874_v2 = vld [vmem:[#allocation2 + $0x84] sm:$0xf]  ;;  %v4321_v55 = vld [vmem:[#allocation2 + $0x28] sm:$0xff] }
 0x654   : > { %4623 = vrot.lane.b32.xlu0 %v10019_v18, %s7890_s16  ;;  %v10152_v38 = vld [vmem:[#allocation2 + $0x90] sm:$0xff]  ;;  %4890 = vst [vmem:[#allocation4 + $0x1d0] sm:$0xf] %v4874_v2  ;;  %v4323_v18 = vld [vmem:[#allocation2 + $0x3c] sm:$0xff] }
 0x655   : > { %4891 = vst [vmem:[#allocation4 + $0x1d4] sm:$0xff] %v10152_v38  ;;  %v4876_v31 = vld [vmem:[#allocation2 + $0x98] sm:$0xf] }
 0x656   : > { %4892 = vst [vmem:[#allocation4 + $0x1dc] sm:$0xf] %v4876_v31 }
 0x659   : > { %5199 = vrot.lane.b32.xlu1 %v10081_v52, %s7891_s17 }
 0x65b   : > { %5335 = vrot.lane.b32.xlu2 %v10081_v52, %s7893_s19 }
 0x65c   : > { %5197 = vrot.lane.b32.xlu0 %v9992_v47, %s7891_s17 }
 0x661   : > { %5333 = vrot.lane.b32.xlu1 %v9992_v47, %s7893_s19 }
 0x663   : > { %4357 = vrot.lane.b32.xlu2 %v4321_v55, %s7886_s29 }
 0x664   : > { %5203 = vrot.lane.b32.xlu0 %v4896_v15, %s7891_s17 }
 0x669   : > { %4361 = vrot.lane.b32.xlu1 %v4323_v18, %s7886_s29 }
 0x66b   : > { %4363 = vrot.lane.b32.xlu2 %v4324_v29, %s7886_s29 }
 0x66c   : > { %4359 = vrot.lane.b32.xlu0 %v4322_v17, %s7886_s29 }
 0x671   : > { %4497 = vrot.lane.b32.xlu1 %v4323_v18, %s7887_s30 }
 0x673   : > { %4493 = vrot.lane.b32.xlu2 %v4321_v55, %s7887_s30 }
 0x674   : > { %4495 = vrot.lane.b32.xlu0 %v4322_v17, %s7887_s30 }
 0x679   : > { %4933 = vrot.lane.b32.xlu1 %v10038_v26, %s7889_s15 }
 0x67b   : > { %4499 = vrot.lane.b32.xlu2 %v4324_v29, %s7887_s30 }
 0x67c   : > { %4937 = vrot.lane.b32.xlu0 %v10040_v39, %s7889_s15 }
 0x67d   : > { %v4352_v47 = vpop.permute.xlu2 %4351 }
 0x67e   : > { %v4382_v52 = vrot.slane %v4352_v47, 4 }
 0x680   : > { %v4399_v6 = vsel %vm1366_vm15, %v4352_v47, %v4382_v52 }
 0x681   : > { %4438 = vst [vmem:[#allocation4 + $0x8] sm:$0xf] %v4399_v6  ;;  %4939 = vrot.lane.b32.xlu1 %v10177_v35, %s7889_s15 }
 0x683   : > { %4935 = vrot.lane.b32.xlu2 %v10179_v0, %s7889_s15 }
 0x684   : > { %4767 = vrot.lane.b32.xlu0 %v4322_v17, %s7888_s14 }
 0x685   : > { %v4490_v23 = vpop.permute.xlu2 %4489 }
 0x686   : > { %v4519_v22 = vrot.slane %v4490_v23, 4 }
 0x689   : > { %4769 = vrot.lane.b32.xlu1 %v4323_v18, %s7888_s14 }
 0x68b   : > { %4765 = vrot.lane.b32.xlu2 %v4321_v55, %s7888_s14 }
 0x68c   : > { %4629 = vrot.lane.b32.xlu0 %v4321_v55, %s7890_s16 }
 0x68d   : > { %v10189_v4 = vpop.permute.xlu2 %4929 }
 0x68e   : > { %v4959_v2 = vrot.slane %v10189_v4, 4 }
 0x691   : > { %4631 = vrot.lane.b32.xlu1 %v4322_v17, %s7890_s16 }
 0x693   : > { %4771 = vrot.lane.b32.xlu2 %v4324_v29, %s7888_s14  ;;  %v4350_v25 = vpop.permute.xlu1 %4349 }
 0x694   : > { %4635 = vrot.lane.b32.xlu0 %v4324_v29, %s7890_s16  ;;  %v4381_v34 = vrot.slane %v4350_v25, 4 }
 0x695   : > { %v10194_v12 = vpop.permute.xlu2 %4759  ;;  %v4354_v49 = vpop.permute.xlu0 %4353 }
 0x696   : > { %v4790_v30 = vrot.slane %v10194_v12, 4  ;;  %v4397_v62 = vsel %vm1364_vm1, %v4381_v34, %v4382_v52  ;;  %v4383_v53 = vrot.slane %v4354_v49, 4  ;;  %v10263_v52 = vld [vmem:[#allocation2 + $0x58] sm:$0xff] }
 0x697   : > { %v4398_v11 = vsel %vm1366_vm15, %v4350_v25, %v4397_v62 }
 0x698   : > { %v4807_v3 = vsel %vm1777_vm4, %v10194_v12, %v4790_v30  ;;  %4437 = vst [vmem:[#allocation4] sm:$0xff] %v4398_v11 }
 0x699   : > { %4846 = vst [vmem:[#allocation4 + $0x128] sm:$0xf] %v4807_v3  ;;  %5205 = vrot.lane.b32.xlu1 %v10038_v26, %s7891_s17 }
 0x69b   : > { %4633 = vrot.lane.b32.xlu2 %v4323_v18, %s7890_s16  ;;  %v4356_v40 = vpop.permute.xlu1 %4355 }
 0x69c   : > { %5209 = vrot.lane.b32.xlu0 %v10040_v39, %s7891_s17  ;;  %v4384_v27 = vrot.slane %v4356_v40, 4 }
 0x69d   : > { %v10208_v15 = vpop.permute.xlu2 %4621  ;;  %v4486_v28 = vpop.permute.xlu0 %4485 }
 0x69e   : > { %v4400_v36 = vsel %vm1364_vm1, %v4383_v53, %v4384_v27  ;;  %v4402_v54 = vsel %vm1366_vm15, %v4356_v40, %v4384_v27  ;;  %v4517_v43 = vrot.slane %v4486_v28, 4  ;;  %v4653_v27 = vrot.slane %v10208_v15, 4 }
 0x69f   : > { %v4401_v50 = vsel %vm1366_vm15, %v4354_v49, %v4400_v36  ;;  %4440 = vst [vmem:[#allocation4 + $0x14] sm:$0xf] %v4402_v54 }
 0x6a0   : > { %4439 = vst [vmem:[#allocation4 + $0xc] sm:$0xff] %v4401_v50 }
 0x6a1   : > { %5211 = vrot.lane.b32.xlu1 %v10177_v35, %s7891_s17 }
 0x6a3   : > { %5207 = vrot.lane.b32.xlu2 %v10179_v0, %s7891_s17  ;;  %v4488_v42 = vpop.permute.xlu1 %4487 }
 0x6a4   : > { %5343 = vrot.lane.b32.xlu0 %v10179_v0, %s7893_s19  ;;  %v4518_v57 = vrot.slane %v4488_v42, 4 }
 0x6a5   : > { %v10219_v44 = vpop.permute.xlu2 %4627 }
 0x6a6   : > { %v4492_v10 = vpop.permute.xlu0 %4491  ;;  %v4656_v56 = vrot.slane %v10219_v44, 4  ;;  %v4533_v51 = vsel %vm1364_vm1, %v4517_v43, %v4518_v57  ;;  %v4535_v14 = vsel %vm1503_vm14, %v4488_v42, %v4518_v57  ;;  %v10300_v57 = vld [vmem:[#allocation2 + $0x6c] sm:$0xff] }
 0x6a7   : > { %v4520_v8 = vrot.slane %v4492_v10, 4  ;;  %v4534_v63 = vsel %vm1503_vm14, %v4486_v28, %v4533_v51  ;;  %4574 = vst [vmem:[#allocation4 + $0x68] sm:$0xf] %v4535_v14 }
 0x6a8   : > { %4573 = vst [vmem:[#allocation4 + $0x60] sm:$0xff] %v4534_v63  ;;  %v4674_v20 = vsel %vm1640_vm3, %v10219_v44, %v4656_v56  ;;  %v10308_v44 = vld [vmem:[#allocation2 + $0x5c] sm:$0xff] }
 0x6a9   : > { %v4536_v5 = vsel %vm1364_vm1, %v4519_v22, %v4520_v8  ;;  %v4538_v9 = vsel %vm1503_vm14, %v4492_v10, %v4520_v8  ;;  %5345 = vrot.lane.b32.xlu1 %v10040_v39, %s7893_s19  ;;  %4712 = vst [vmem:[#allocation4 + $0xd4] sm:$0xf] %v4674_v20 }
 0x6aa   : > { %v4537_v13 = vsel %vm1503_vm14, %v4490_v23, %v4536_v5  ;;  %4576 = vst [vmem:[#allocation4 + $0x74] sm:$0xf] %v4538_v9 }
 0x6ab   : > { %4575 = vst [vmem:[#allocation4 + $0x6c] sm:$0xff] %v4537_v13  ;;  %5341 = vrot.lane.b32.xlu2 %v10038_v26, %s7893_s19  ;;  %v4928_v21 = vpop.permute.xlu1 %4927 }
 0x6ac   : > { %5069 = vrot.lane.b32.xlu0 %v10038_v26, %s10760_s28  ;;  %v4958_v1 = vrot.slane %v4928_v21, 4 }
 0x6ad   : > { %v10238_v58 = vpop.permute.xlu2 %5201 }
 0x6ae   : > { %v4926_v37 = vpop.permute.xlu0 %4925  ;;  %v4975_v41 = vsel %vm1946_vm2, %v4928_v21, %v4958_v1 }
 0x6af   : > { %v4957_v24 = vrot.slane %v4926_v37, 4  ;;  %5014 = vst [vmem:[#allocation4 + $0x1e8] sm:$0xf] %v4975_v41 }
 0x6b1   : > { %v4973_v48 = vsel %vm1364_vm1, %v4957_v24, %v4958_v1  ;;  %5071 = vrot.lane.b32.xlu1 %v10179_v0, %s10760_s28 }
 0x6b2   : > { %v4974_v60 = vsel %vm1946_vm2, %v4926_v37, %v4973_v48  ;;  %v5231_v37 = vrot.slane %v10238_v58, 4 }
 0x6b3   : > { %5013 = vst [vmem:[#allocation4 + $0x1e0] sm:$0xff] %v4974_v60  ;;  %5347 = vrot.lane.b32.xlu2 %v10177_v35, %s7893_s19  ;;  %v4758_v26 = vpop.permute.xlu1 %4757 }
 0x6b4   : > { %5075 = vrot.lane.b32.xlu0 %v10177_v35, %s10760_s28  ;;  %v4789_v45 = vrot.slane %v4758_v26, 4  ;;  %v10271_v35 = vld [vmem:[#allocation2 + $0x50] sm:$0xff] }
 0x6b5   : > { %v10249_v19 = vpop.permute.xlu2 %5335 }
 0x6b6   : > { %v4932_v32 = vpop.permute.xlu0 %4931  ;;  %v5366_v59 = vrot.slane %v10249_v19, 4  ;;  %v4805_v55 = vsel %vm1364_vm1, %v4789_v45, %v4790_v30 }
 0x6b7   : > { %v4960_v31 = vrot.slane %v4932_v32, 4  ;;  %v4806_v18 = vsel %vm1777_vm4, %v4758_v26, %v4805_v55 }
 0x6b8   : > { %4845 = vst [vmem:[#allocation4 + $0x120] sm:$0xff] %v4806_v18  ;;  %v5383_v47 = vsel %vm2357_vm7, %v10249_v19, %v5366_v59 }
 0x6b9   : > { %v4976_v29 = vsel %vm1364_vm1, %v4959_v2, %v4960_v31  ;;  %v4978_v17 = vsel %vm1946_vm2, %v4932_v32, %v4960_v31  ;;  %4367 = vrot.lane.b32.xlu1 %v10263_v52, %s7886_s29  ;;  %5422 = vst [vmem:[#allocation4 + $0x308] sm:$0xf] %v5383_v47  ;;  %v10333_v2 = vld [vmem:[#allocation2 + $0x70] sm:$0xff] }
 0x6ba   : > { %v4977_v6 = vsel %vm1946_vm2, %v10189_v4, %v4976_v29  ;;  %5016 = vst [vmem:[#allocation4 + $0x1f4] sm:$0xf] %v4978_v17 }
 0x6bb   : > { %5015 = vst [vmem:[#allocation4 + $0x1ec] sm:$0xff] %v4977_v6  ;;  %5073 = vrot.lane.b32.xlu2 %v10040_v39, %s10760_s28  ;;  %v4764_v0 = vpop.permute.xlu1 %4763  ;;  %v10280_v39 = vld [vmem:[#allocation2 + $0x64] sm:$0xff] }
 0x6bc   : > { %4365 = vrot.lane.b32.xlu0 %v10271_v35, %s7886_s29  ;;  %v4792_v23 = vrot.slane %v4764_v0, 4 }
 0x6bd   : > { %v10275_v25 = vpop.permute.xlu2 %4357 }
 0x6be   : > { %v4762_v34 = vpop.permute.xlu0 %4761  ;;  %v4810_v12 = vsel %vm1777_vm4, %v4764_v0, %v4792_v23 }
 0x6bf   : > { %v4791_v4 = vrot.slane %v4762_v34, 4  ;;  %4848 = vst [vmem:[#allocation4 + $0x134] sm:$0xf] %v4810_v12 }
 0x6c1   : > { %v4808_v49 = vsel %vm1364_vm1, %v4791_v4, %v4792_v23  ;;  %4501 = vrot.lane.b32.xlu1 %v10271_v35, %s7887_s30 }
 0x6c2   : > { %v4809_v30 = vsel %vm1777_vm4, %v4762_v34, %v4808_v49 }
 0x6c3   : > { %4847 = vst [vmem:[#allocation4 + $0x12c] sm:$0xff] %v4809_v30  ;;  %4369 = vrot.lane.b32.xlu2 %v10280_v39, %s7886_s29  ;;  %v4626_v62 = vpop.permute.xlu1 %4625 }
 0x6c4   : > { %4505 = vrot.lane.b32.xlu0 %v10280_v39, %s7887_s30  ;;  %v4655_v11 = vrot.slane %v4626_v62, 4 }
 0x6c5   : > { %v10288_v3 = vpop.permute.xlu2 %4363 }
 0x6c6   : > { %v4624_v40 = vpop.permute.xlu0 %4623  ;;  %v4388_v53 = vrot.slane %v10288_v3, 4  ;;  %v4672_v36 = vsel %vm1364_vm1, %v4655_v11, %v4656_v56 }
 0x6c7   : > { %v4654_v28 = vrot.slane %v4624_v40, 4  ;;  %v4673_v54 = vsel %vm1640_vm3, %v4626_v62, %v4672_v36 }
 0x6c8   : > { %4711 = vst [vmem:[#allocation4 + $0xcc] sm:$0xff] %v4673_v54  ;;  %v4408_v43 = vsel %vm1366_vm15, %v10288_v3, %v4388_v53 }
 0x6c9   : > { %v4669_v50 = vsel %vm1364_vm1, %v4653_v27, %v4654_v28  ;;  %v4671_v42 = vsel %vm1640_vm3, %v4624_v40, %v4654_v28  ;;  %4507 = vrot.lane.b32.xlu1 %v10300_v57, %s7887_s30  ;;  %4444 = vst [vmem:[#allocation4 + $0x2c] sm:$0xf] %v4408_v43 }
 0x6ca   : > { %v4670_v10 = vsel %vm1640_vm3, %v10208_v15, %v4669_v50  ;;  %4710 = vst [vmem:[#allocation4 + $0xc8] sm:$0xf] %v4671_v42 }
 0x6cb   : > { %4709 = vst [vmem:[#allocation4 + $0xc0] sm:$0xff] %v4670_v10  ;;  %4503 = vrot.lane.b32.xlu2 %v10263_v52, %s7887_s30  ;;  %v5200_v56 = vpop.permute.xlu1 %5199 }
 0x6cc   : > { %4943 = vrot.lane.b32.xlu0 %v10308_v44, %s7889_s15  ;;  %v5230_v22 = vrot.slane %v5200_v56, 4 }
 0x6cd   : > { %v10312_v8 = vpop.permute.xlu2 %4493 }
 0x6ce   : > { %v5198_v51 = vpop.permute.xlu0 %5197  ;;  %v5247_v14 = vsel %vm2220_vm5, %v5200_v56, %v5230_v22  ;;  %v4521_v62 = vrot.slane %v10312_v8, 4 }
 0x6cf   : > { %v5229_v15 = vrot.slane %v5198_v51, 4  ;;  %5286 = vst [vmem:[#allocation4 + $0x2a8] sm:$0xf] %v5247_v14 }
 0x6d1   : > { %v5245_v63 = vsel %vm1364_vm1, %v5229_v15, %v5230_v22  ;;  %4371 = vrot.lane.b32.xlu1 %v10300_v57, %s7886_s29 }
 0x6d2   : > { %v5246_v5 = vsel %vm2220_vm5, %v5198_v51, %v5245_v63 }
 0x6d3   : > { %5285 = vst [vmem:[#allocation4 + $0x2a0] sm:$0xff] %v5246_v5  ;;  %4941 = vrot.lane.b32.xlu2 %v10093_v7, %s7889_s15  ;;  %v5334_v9 = vpop.permute.xlu1 %5333 }
 0x6d4   : > { %4773 = vrot.lane.b32.xlu0 %v10271_v35, %s7888_s14  ;;  %v5365_v20 = vrot.slane %v5334_v9, 4 }
 0x6d5   : > { %v4500_v13 = vpop.permute.xlu2 %4499 }
 0x6d6   : > { %v5204_v21 = vpop.permute.xlu0 %5203  ;;  %v4524_v1 = vrot.slane %v4500_v13, 4  ;;  %v5381_v41 = vsel %vm1364_vm1, %v5365_v20, %v5366_v59 }
 0x6d7   : > { %v5232_v24 = vrot.slane %v5204_v21, 4  ;;  %v5382_v48 = vsel %vm2357_vm7, %v5334_v9, %v5381_v41 }
 0x6d8   : > { %5421 = vst [vmem:[#allocation4 + $0x300] sm:$0xff] %v5382_v48  ;;  %v4544_v45 = vsel %vm1503_vm14, %v4500_v13, %v4524_v1 }
 0x6d9   : > { %v5248_v60 = vsel %vm1364_vm1, %v5231_v37, %v5232_v24  ;;  %v5250_v26 = vsel %vm2220_vm5, %v5204_v21, %v5232_v24  ;;  %4945 = vrot.lane.b32.xlu1 %v10097_v46, %s7889_s15  ;;  %4580 = vst [vmem:[#allocation4 + $0x8c] sm:$0xf] %v4544_v45 }
 0x6da   : > { %v5249_v32 = vsel %vm2220_vm5, %v10238_v58, %v5248_v60  ;;  %5288 = vst [vmem:[#allocation4 + $0x2b4] sm:$0xf] %v5250_v26  ;;  %v4385_v58 = vrot.slane %v10275_v25, 4 }
 0x6db   : > { %5287 = vst [vmem:[#allocation4 + $0x2ac] sm:$0xff] %v5249_v32  ;;  %4947 = vrot.lane.b32.xlu2 %v10333_v2, %s7889_s15  ;;  %v4362_v19 = vpop.permute.xlu1 %4361 }
 0x6dc   : > { %4779 = vrot.lane.b32.xlu0 %v10300_v57, %s7888_s14  ;;  %v4387_v59 = vrot.slane %v4362_v19, 4 }
 0x6dd   : > { %v4936_v31 = vpop.permute.xlu2 %4935 }
 0x6de   : > { %v4360_v55 = vpop.permute.xlu0 %4359  ;;  %v4962_v18 = vrot.slane %v4936_v31, 4  ;;  %v4406_v17 = vsel %vm1364_vm1, %v4387_v59, %v4388_v53 }
 0x6df   : > { %v4386_v29 = vrot.slane %v4360_v55, 4  ;;  %v4407_v47 = vsel %vm1366_vm15, %v4362_v19, %v4406_v17 }
 0x6e0   : > { %4443 = vst [vmem:[#allocation4 + $0x24] sm:$0xff] %v4407_v47  ;;  %v4981_v23 = vsel %vm1946_vm2, %v4936_v31, %v4962_v18 }
 0x6e1   : > { %v4403_v6 = vsel %vm1364_vm1, %v4385_v58, %v4386_v29  ;;  %v4405_v0 = vsel %vm1366_vm15, %v4360_v55, %v4386_v29  ;;  %4775 = vrot.lane.b32.xlu1 %v10263_v52, %s7888_s14  ;;  %5018 = vst [vmem:[#allocation4 + $0x200] sm:$0xf] %v4981_v23 }
 0x6e2   : > { %v4404_v34 = vsel %vm1366_vm15, %v10275_v25, %v4403_v6  ;;  %4442 = vst [vmem:[#allocation4 + $0x20] sm:$0xf] %v4405_v0  ;;  %v10408_v6 = vld [vmem:[#allocation2 + $0x78] sm:$0xff] }
 0x6e3   : > { %4441 = vst [vmem:[#allocation4 + $0x18] sm:$0xff] %v4404_v34  ;;  %4777 = vrot.lane.b32.xlu2 %v10280_v39, %s7888_s14  ;;  %v4498_v4 = vpop.permute.xlu1 %4497 }
 0x6e4   : > { %4641 = vrot.lane.b32.xlu0 %v10280_v39, %s7890_s16  ;;  %v4523_v12 = vrot.slane %v4498_v4, 4 }
 0x6e5   : > { %v4766_v49 = vpop.permute.xlu2 %4765 }
 0x6e6   : > { %v4496_v30 = vpop.permute.xlu0 %4495  ;;  %v4542_v25 = vsel %vm1364_vm1, %v4523_v12, %v4524_v1  ;;  %v4793_v51 = vrot.slane %v4766_v49, 4 }
 0x6e7   : > { %v4522_v11 = vrot.slane %v4496_v30, 4  ;;  %v4543_v3 = vsel %vm1503_vm14, %v4498_v4, %v4542_v25 }
 0x6e8   : > { %4579 = vst [vmem:[#allocation4 + $0x84] sm:$0xff] %v4543_v3 }
 0x6e9   : > { %v4539_v40 = vsel %vm1364_vm1, %v4521_v62, %v4522_v11  ;;  %v4541_v53 = vsel %vm1503_vm14, %v4496_v30, %v4522_v11  ;;  %4637 = vrot.lane.b32.xlu1 %v10271_v35, %s7890_s16  ;;  %v10421_v62 = vld [vmem:[#allocation2 + $0x94] sm:$0xff] }
 0x6ea   : > { %v4540_v27 = vsel %vm1503_vm14, %v10312_v8, %v4539_v40  ;;  %4578 = vst [vmem:[#allocation4 + $0x80] sm:$0xf] %v4541_v53 }
 0x6eb   : > { %4577 = vst [vmem:[#allocation4 + $0x78] sm:$0xff] %v4540_v27  ;;  %4639 = vrot.lane.b32.xlu2 %v10263_v52, %s7890_s16  ;;  %v4934_v39 = vpop.permute.xlu1 %4933 }
 0x6ec   : > { %5215 = vrot.lane.b32.xlu0 %v10308_v44, %s7891_s17  ;;  %v4961_v28 = vrot.slane %v4934_v39, 4 }
 0x6ed   : > { %v4772_v36 = vpop.permute.xlu2 %4771 }
 0x6ee   : > { %v4938_v54 = vpop.permute.xlu0 %4937  ;;  %v4796_v50 = vrot.slane %v4772_v36, 4  ;;  %v4979_v42 = vsel %vm1364_vm1, %v4961_v28, %v4962_v18 }
 0x6ef   : > { %v4980_v43 = vsel %vm1946_vm2, %v4934_v39, %v4979_v42  ;;  %v4963_v35 = vrot.slane %v4938_v54, 4  ;;  %v10430_v42 = vld [vmem:[#allocation2 + $0x80] sm:$0xff] }
 0x6f0   : > { %v4816_v10 = vsel %vm1777_vm4, %v4772_v36, %v4796_v50  ;;  %5017 = vst [vmem:[#allocation4 + $0x1f8] sm:$0xff] %v4980_v43 }
 0x6f1   : > { %4852 = vst [vmem:[#allocation4 + $0x14c] sm:$0xf] %v4816_v10  ;;  %4643 = vrot.lane.b32.xlu1 %v10300_v57, %s7890_s16 }
 0x6f3   : > { %5213 = vrot.lane.b32.xlu2 %v10093_v7, %s7891_s17  ;;  %v4940_v52 = vpop.permute.xlu1 %4939 }
 0x6f4   : > { %5349 = vrot.lane.b32.xlu0 %v10093_v7, %s7893_s19  ;;  %v4964_v56 = vrot.slane %v4940_v52, 4 }
 0x6f5   : > { %v4634_v22 = vpop.permute.xlu2 %4633 }
 0x6f6   : > { %v4768_v8 = vpop.permute.xlu0 %4767  ;;  %v4982_v14 = vsel %vm1364_vm1, %v4963_v35, %v4964_v56  ;;  %v4984_v63 = vsel %vm1946_vm2, %v4940_v52, %v4964_v56  ;;  %v4659_v31 = vrot.slane %v4634_v22, 4 }
 0x6f7   : > { %v4794_v15 = vrot.slane %v4768_v8, 4  ;;  %v4983_v5 = vsel %vm1946_vm2, %v4938_v54, %v4982_v14  ;;  %5020 = vst [vmem:[#allocation4 + $0x20c] sm:$0xf] %v4984_v63 }
 0x6f8   : > { %5019 = vst [vmem:[#allocation4 + $0x204] sm:$0xff] %v4983_v5 }
 0x6f9   : > { %v4811_v57 = vsel %vm1364_vm1, %v4793_v51, %v4794_v15  ;;  %v4813_v9 = vsel %vm1777_vm4, %v4768_v8, %v4794_v15  ;;  %5217 = vrot.lane.b32.xlu1 %v10097_v46, %s7891_s17  ;;  %v10445_v51 = vld [vmem:[#allocation2 + $0x84] sm:$0xff] }
 0x6fa   : > { %v4812_v20 = vsel %vm1777_vm4, %v4766_v49, %v4811_v57  ;;  %4850 = vst [vmem:[#allocation4 + $0x140] sm:$0xf] %v4813_v9 }
 0x6fb   : > { %4849 = vst [vmem:[#allocation4 + $0x138] sm:$0xff] %v4812_v20  ;;  %5219 = vrot.lane.b32.xlu2 %v10333_v2, %s7891_s17  ;;  %v4770_v13 = vpop.permute.xlu1 %4769 }
 0x6fc   : > { %5355 = vrot.lane.b32.xlu0 %v10333_v2, %s7893_s19  ;;  %v4795_v21 = vrot.slane %v4770_v13, 4 }
 0x6fd   : > { %v5208_v1 = vpop.permute.xlu2 %5207 }
 0x6fe   : > { %v4630_v37 = vpop.permute.xlu0 %4629  ;;  %v5234_v24 = vrot.slane %v5208_v1, 4  ;;  %v4814_v41 = vsel %vm1364_vm1, %v4795_v21, %v4796_v50 }
 0x6ff   : > { %v4815_v48 = vsel %vm1777_vm4, %v4770_v13, %v4814_v41  ;;  %v4657_v45 = vrot.slane %v4630_v37, 4 }
 0x700   : > { %v5253_v60 = vsel %vm2220_vm5, %v5208_v1, %v5234_v24  ;;  %4851 = vst [vmem:[#allocation4 + $0x144] sm:$0xff] %v4815_v48 }
 0x701   : > { %5290 = vst [vmem:[#allocation4 + $0x2c0] sm:$0xf] %v5253_v60  ;;  %5351 = vrot.lane.b32.xlu1 %v10308_v44, %s7893_s19  ;;  %v10458_v60 = vld [vmem:[#allocation2 + $0x98] sm:$0xff] }
 0x703   : > { %5353 = vrot.lane.b32.xlu2 %v10097_v46, %s7893_s19  ;;  %v4632_v26 = vpop.permute.xlu1 %4631 }
 0x704   : > { %5081 = vrot.lane.b32.xlu0 %v10097_v46, %s10760_s28  ;;  %v4658_v32 = vrot.slane %v4632_v26, 4 }
 0x705   : > { %v5342_v19 = vpop.permute.xlu2 %5341 }
 0x706   : > { %v4636_v59 = vpop.permute.xlu0 %4635  ;;  %v4675_v18 = vsel %vm1364_vm1, %v4657_v45, %v4658_v32  ;;  %v4677_v58 = vsel %vm1640_vm3, %v4632_v26, %v4658_v32  ;;  %v5369_v27 = vrot.slane %v5342_v19, 4 }
 0x707   : > { %v4660_v55 = vrot.slane %v4636_v59, 4  ;;  %v4676_v29 = vsel %vm1640_vm3, %v4630_v37, %v4675_v18  ;;  %4714 = vst [vmem:[#allocation4 + $0xe0] sm:$0xf] %v4677_v58 }
 0x708   : > { %4713 = vst [vmem:[#allocation4 + $0xd8] sm:$0xff] %v4676_v29 }
 0x709   : > { %v4678_v17 = vsel %vm1364_vm1, %v4659_v31, %v4660_v55  ;;  %v4680_v47 = vsel %vm1640_vm3, %v4636_v59, %v4660_v55  ;;  %5077 = vrot.lane.b32.xlu1 %v10093_v7, %s10760_s28 }
 0x70a   : > { %v4679_v46 = vsel %vm1640_vm3, %v4634_v22, %v4678_v17  ;;  %4716 = vst [vmem:[#allocation4 + $0xec] sm:$0xf] %v4680_v47 }
 0x70b   : > { %4715 = vst [vmem:[#allocation4 + $0xe4] sm:$0xff] %v4679_v46  ;;  %5079 = vrot.lane.b32.xlu2 %v10308_v44, %s10760_s28  ;;  %v5206_v0 = vpop.permute.xlu1 %5205  ;;  %v10417_v44 = vld [vmem:[#allocation2 + $0x8c] sm:$0xff] }
 0x70c   : > { %4509 = vrot.lane.b32.xlu0 %v10408_v6, %s7887_s30  ;;  %v5233_v23 = vrot.slane %v5206_v0, 4 }
 0x70d   : > { %v5348_v34 = vpop.permute.xlu2 %5347 }
 0x70e   : > { %v5210_v4 = vpop.permute.xlu0 %5209  ;;  %v5372_v12 = vrot.slane %v5348_v34, 4  ;;  %v5251_v49 = vsel %vm1364_vm1, %v5233_v23, %v5234_v24 }
 0x70f   : > { %v5252_v30 = vsel %vm2220_vm5, %v5206_v0, %v5251_v49  ;;  %v5235_v25 = vrot.slane %v5210_v4, 4 }
 0x710   : > { %v5392_v7 = vsel %vm2357_vm7, %v5348_v34, %v5372_v12  ;;  %5289 = vst [vmem:[#allocation4 + $0x2b8] sm:$0xff] %v5252_v30 }
 0x711   : > { %5428 = vst [vmem:[#allocation4 + $0x32c] sm:$0xf] %v5392_v7  ;;  %5083 = vrot.lane.b32.xlu1 %v10333_v2, %s10760_s28 }
 0x713   : > { %4513 = vrot.lane.b32.xlu2 %v10417_v44, %s7887_s30  ;;  %v5212_v11 = vpop.permute.xlu1 %5211 }
 0x714   : > { %4515 = vrot.lane.b32.xlu0 %v10421_v62, %s7887_s30  ;;  %v5236_v3 = vrot.slane %v5212_v11, 4 }
 0x715   : > { %v5074_v40 = vpop.permute.xlu2 %5073 }
 0x716   : > { %v5344_v53 = vpop.permute.xlu0 %5343  ;;  %v5254_v28 = vsel %vm1364_vm1, %v5235_v25, %v5236_v3  ;;  %v5256_v2 = vsel %vm2220_vm5, %v5212_v11, %v5236_v3  ;;  %v5099_v20 = vrot.slane %v5074_v40, 4 }
 0x717   : > { %v5370_v39 = vrot.slane %v5344_v53, 4  ;;  %v5255_v36 = vsel %vm2220_vm5, %v5210_v4, %v5254_v28  ;;  %5292 = vst [vmem:[#allocation4 + $0x2cc] sm:$0xf] %v5256_v2 }
 0x718   : > { %5291 = vst [vmem:[#allocation4 + $0x2c4] sm:$0xff] %v5255_v36 }
 0x719   : > { %v5387_v54 = vsel %vm1364_vm1, %v5369_v27, %v5370_v39  ;;  %v5389_v50 = vsel %vm2357_vm7, %v5344_v53, %v5370_v39  ;;  %4511 = vrot.lane.b32.xlu1 %v10430_v42, %s7887_s30 }
 0x71a   : > { %v5388_v43 = vsel %vm2357_vm7, %v5342_v19, %v5387_v54  ;;  %5426 = vst [vmem:[#allocation4 + $0x320] sm:$0xf] %v5389_v50 }
 0x71b   : > { %5425 = vst [vmem:[#allocation4 + $0x318] sm:$0xff] %v5388_v43  ;;  %4375 = vrot.lane.b32.xlu2 %v10430_v42, %s7886_s29  ;;  %v5346_v10 = vpop.permute.xlu1 %5345 }
 0x71c   : > { %4377 = vrot.lane.b32.xlu0 %v10417_v44, %s7886_s29  ;;  %v5371_v52 = vrot.slane %v5346_v10, 4 }
 0x71d   : > { %v10439_v35 = vpop.permute.xlu2 %4369 }
 0x71e   : > { %v5070_v56 = vpop.permute.xlu0 %5069  ;;  %v5390_v22 = vsel %vm1364_vm1, %v5371_v52, %v5372_v12  ;;  %v4391_v28 = vrot.slane %v10439_v35, 4 }
 0x71f   : > { %v5391_v8 = vsel %vm2357_vm7, %v5346_v10, %v5390_v22  ;;  %v5097_v14 = vrot.slane %v5070_v56, 4 }
 0x720   : > { %5427 = vst [vmem:[#allocation4 + $0x324] sm:$0xff] %v5391_v8 }
 0x721   : > { %4373 = vrot.lane.b32.xlu1 %v10408_v6, %s7886_s29 }
 0x723   : > { %4949 = vrot.lane.b32.xlu2 %v10135_v16, %s7889_s15  ;;  %v5072_v15 = vpop.permute.xlu1 %5071 }
 0x724   : > { %4951 = vrot.lane.b32.xlu0 %v10445_v51, %s7889_s15  ;;  %v5098_v63 = vrot.slane %v5072_v15, 4 }
 0x725   : > { %v4504_v5 = vpop.permute.xlu2 %4503 }
 0x726   : > { %v5076_v57 = vpop.permute.xlu0 %5075  ;;  %v4526_v9 = vrot.slane %v4504_v5, 4  ;;  %v5115_v21 = vsel %vm1364_vm1, %v5097_v14, %v5098_v63  ;;  %v5117_v1 = vsel %vm2083_vm6, %v5072_v15, %v5098_v63 }
 0x727   : > { %v5100_v13 = vrot.slane %v5076_v57, 4  ;;  %v5116_v37 = vsel %vm2083_vm6, %v5070_v56, %v5115_v21  ;;  %5154 = vst [vmem:[#allocation4 + $0x260] sm:$0xf] %v5117_v1 }
 0x728   : > { %5153 = vst [vmem:[#allocation4 + $0x258] sm:$0xff] %v5116_v37  ;;  %v4547_v41 = vsel %vm1503_vm14, %v4504_v5, %v4526_v9 }
 0x729   : > { %v5118_v16 = vsel %vm1364_vm1, %v5099_v20, %v5100_v13  ;;  %v5120_v24 = vsel %vm2083_vm6, %v5076_v57, %v5100_v13  ;;  %4379 = vrot.lane.b32.xlu1 %v10421_v62, %s7886_s29  ;;  %4582 = vst [vmem:[#allocation4 + $0x98] sm:$0xf] %v4547_v41 }
 0x72a   : > { %v5119_v48 = vsel %vm2083_vm6, %v5074_v40, %v5118_v16  ;;  %5156 = vst [vmem:[#allocation4 + $0x26c] sm:$0xf] %v5120_v24 }
 0x72b   : > { %5155 = vst [vmem:[#allocation4 + $0x264] sm:$0xff] %v5119_v48  ;;  %4955 = vrot.lane.b32.xlu2 %v10458_v60, %s7889_s15  ;;  %v4368_v26 = vpop.permute.xlu1 %4367 }
 0x72c   : > { %4781 = vrot.lane.b32.xlu0 %v10408_v6, %s7888_s14  ;;  %v4390_v45 = vrot.slane %v4368_v26, 4 }
 0x72d   : > { %v4942_v32 = vpop.permute.xlu2 %4941 }
 0x72e   : > { %v4366_v19 = vpop.permute.xlu0 %4365  ;;  %v4411_v59 = vsel %vm1366_vm15, %v4368_v26, %v4390_v45  ;;  %v4965_v7 = vrot.slane %v4942_v32, 4 }
 0x72f   : > { %v4389_v31 = vrot.slane %v4366_v19, 4  ;;  %4446 = vst [vmem:[#allocation4 + $0x38] sm:$0xf] %v4411_v59 }
 0x731   : > { %v4409_v55 = vsel %vm1364_vm1, %v4389_v31, %v4390_v45  ;;  %4953 = vrot.lane.b32.xlu1 %v10139_v33, %s7889_s15 }
 0x732   : > { %v4410_v18 = vsel %vm1366_vm15, %v4366_v19, %v4409_v55 }
 0x733   : > { %4445 = vst [vmem:[#allocation4 + $0x30] sm:$0xff] %v4410_v18  ;;  %4785 = vrot.lane.b32.xlu2 %v10417_v44, %s7888_s14  ;;  %v4502_v58 = vpop.permute.xlu1 %4501 }
 0x734   : > { %4787 = vrot.lane.b32.xlu0 %v10421_v62, %s7888_s14  ;;  %v4525_v29 = vrot.slane %v4502_v58, 4 }
 0x735   : > { %v4948_v17 = vpop.permute.xlu2 %4947 }
 0x736   : > { %v4506_v47 = vpop.permute.xlu0 %4505  ;;  %v4968_v46 = vrot.slane %v4948_v17, 4  ;;  %v4545_v0 = vsel %vm1364_vm1, %v4525_v29, %v4526_v9 }
 0x737   : > { %v4546_v23 = vsel %vm1503_vm14, %v4502_v58, %v4545_v0  ;;  %v4527_v4 = vrot.slane %v4506_v47, 4 }
 0x738   : > { %v4990_v34 = vsel %vm1946_vm2, %v4948_v17, %v4968_v46  ;;  %4581 = vst [vmem:[#allocation4 + $0x90] sm:$0xff] %v4546_v23 }
 0x739   : > { %5024 = vst [vmem:[#allocation4 + $0x224] sm:$0xf] %v4990_v34  ;;  %4783 = vrot.lane.b32.xlu1 %v10430_v42, %s7888_s14 }
 0x73b   : > { %4645 = vrot.lane.b32.xlu2 %v10408_v6, %s7890_s16  ;;  %v4508_v33 = vpop.permute.xlu1 %4507 }
 0x73c   : > { %4647 = vrot.lane.b32.xlu0 %v10430_v42, %s7890_s16  ;;  %v4528_v12 = vrot.slane %v4508_v33, 4 }
 0x73d   : > { %v4778_v49 = vpop.permute.xlu2 %4777 }
 0x73e   : > { %v4944_v30 = vpop.permute.xlu0 %4943  ;;  %v4548_v11 = vsel %vm1364_vm1, %v4527_v4, %v4528_v12  ;;  %v4550_v25 = vsel %vm1503_vm14, %v4508_v33, %v4528_v12  ;;  %v4799_v8 = vrot.slane %v4778_v49, 4 }
 0x73f   : > { %v4966_v3 = vrot.slane %v4944_v30, 4  ;;  %v4549_v40 = vsel %vm1503_vm14, %v4506_v47, %v4548_v11  ;;  %4584 = vst [vmem:[#allocation4 + $0xa4] sm:$0xf] %v4550_v25 }
 0x740   : > { %4583 = vst [vmem:[#allocation4 + $0x9c] sm:$0xff] %v4549_v40 }
 0x741   : > { %v4985_v6 = vsel %vm1364_vm1, %v4965_v7, %v4966_v3  ;;  %v4987_v53 = vsel %vm1946_vm2, %v4944_v30, %v4966_v3  ;;  %4649 = vrot.lane.b32.xlu1 %v10417_v44, %s7890_s16  ;;  %v7876_v30 = vld [vmem:[#allocation4 + $0x180] sm:$0xff] }
 0x742   : > { %v4986_v27 = vsel %vm1946_vm2, %v4942_v32, %v4985_v6  ;;  %5022 = vst [vmem:[#allocation4 + $0x218] sm:$0xf] %v4987_v53 }
 0x743   : > { %5021 = vst [vmem:[#allocation4 + $0x210] sm:$0xff] %v4986_v27  ;;  %4651 = vrot.lane.b32.xlu2 %v10421_v62, %s7890_s16  ;;  %v4372_v39 = vpop.permute.xlu1 %4371 }
 0x744   : > { %5221 = vrot.lane.b32.xlu0 %v10149_v61, %s7891_s17  ;;  %v4392_v2 = vrot.slane %v4372_v39, 4 }
 0x745   : > { %v4640_v36 = vpop.permute.xlu2 %4639 }
 0x746   : > { %v4774_v54 = vpop.permute.xlu0 %4773  ;;  %v4662_v50 = vrot.slane %v4640_v36, 4  ;;  %v4412_v42 = vsel %vm1364_vm1, %v4391_v28, %v4392_v2  ;;  %v4414_v43 = vsel %vm1366_vm15, %v4372_v39, %v4392_v2  ;;  %v5583_v2 = vld [vmem:[%s10753_s12] sm:$0xf] }
 0x747   : > { %v4413_v44 = vsel %vm1366_vm15, %v10439_v35, %v4412_v42  ;;  %4448 = vst [vmem:[#allocation4 + $0x44] sm:$0xf] %v4414_v43  ;;  %v4797_v20 = vrot.slane %v4774_v54, 4 }
 0x748   : > { %v4683_v62 = vsel %vm1640_vm3, %v4640_v36, %v4662_v50  ;;  %4447 = vst [vmem:[#allocation4 + $0x3c] sm:$0xff] %v4413_v44 }
 0x749   : > { %4718 = vst [vmem:[#allocation4 + $0xf8] sm:$0xf] %v4683_v62  ;;  %5223 = vrot.lane.b32.xlu1 %v10445_v51, %s7891_s17 }
 0x74b   : > { %5225 = vrot.lane.b32.xlu2 %v10152_v38, %s7891_s17  ;;  %v4946_v10 = vpop.permute.xlu1 %4945 }
 0x74c   : > { %5227 = vrot.lane.b32.xlu0 %v10458_v60, %s7891_s17  ;;  %v4967_v52 = vrot.slane %v4946_v10, 4 }
 0x74d   : > { %v5214_v56 = vpop.permute.xlu2 %5213 }
 0x74e   : > { %v4780_v22 = vpop.permute.xlu0 %4779  ;;  %v4988_v35 = vsel %vm1364_vm1, %v4967_v52, %v4968_v46  ;;  %v5237_v59 = vrot.slane %v5214_v56, 4 }
 0x74f   : > { %v4800_v15 = vrot.slane %v4780_v22, 4  ;;  %v4989_v14 = vsel %vm1946_vm2, %v4946_v10, %v4988_v35 }
 0x750   : > { %5023 = vst [vmem:[#allocation4 + $0x21c] sm:$0xff] %v4989_v14 }
 0x751   : > { %v4820_v63 = vsel %vm1364_vm1, %v4799_v8, %v4800_v15  ;;  %v4822_v5 = vsel %vm1777_vm4, %v4780_v22, %v4800_v15  ;;  %5357 = vrot.lane.b32.xlu1 %v10149_v61, %s7893_s19 }
 0x752   : > { %v4821_v57 = vsel %vm1777_vm4, %v4778_v49, %v4820_v63  ;;  %4856 = vst [vmem:[#allocation4 + $0x164] sm:$0xf] %v4822_v5  ;;  %v5030_v49 = vld [vmem:[#allocation2 + $0xc] sm:$0xff] }
 0x753   : > { %4855 = vst [vmem:[#allocation4 + $0x15c] sm:$0xff] %v4821_v57  ;;  %5359 = vrot.lane.b32.xlu2 %v10445_v51, %s7893_s19  ;;  %v4776_v9 = vpop.permute.xlu1 %4775 }
 0x754   : > { %5361 = vrot.lane.b32.xlu0 %v10152_v38, %s7893_s19  ;;  %v4798_v13 = vrot.slane %v4776_v9, 4 }
 0x755   : > { %v5220_v21 = vpop.permute.xlu2 %5219 }
 0x756   : > { %v4642_v1 = vpop.permute.xlu0 %4641  ;;  %v5240_v37 = vrot.slane %v5220_v21, 4  ;;  %v4817_v16 = vsel %vm1364_vm1, %v4797_v20, %v4798_v13  ;;  %v4819_v24 = vsel %vm1777_vm4, %v4776_v9, %v4798_v13 }
 0x757   : > { %v4818_v41 = vsel %vm1777_vm4, %v4774_v54, %v4817_v16  ;;  %4854 = vst [vmem:[#allocation4 + $0x158] sm:$0xf] %v4819_v24  ;;  %v4663_v47 = vrot.slane %v4642_v1, 4 }
 0x758   : > { %v5262_v48 = vsel %vm2220_vm5, %v5220_v21, %v5240_v37  ;;  %4853 = vst [vmem:[#allocation4 + $0x150] sm:$0xff] %v4818_v41 }
 0x759   : > { %5296 = vst [vmem:[#allocation4 + $0x2e4] sm:$0xf] %v5262_v48  ;;  %5363 = vrot.lane.b32.xlu1 %v10458_v60, %s7893_s19 }
 0x75b   : > { %5085 = vrot.lane.b32.xlu2 %v10149_v61, %s10760_s28  ;;  %v4638_v26 = vpop.permute.xlu1 %4637 }
 0x75c   : > { %5087 = vrot.lane.b32.xlu0 %v10445_v51, %s10760_s28  ;;  %v4661_v45 = vrot.slane %v4638_v26, 4  ;;  %v7875_v51 = vld [vmem:[#allocation4 + $0x18c] sm:$0xff] }
 0x75d   : > { %v5354_v32 = vpop.permute.xlu2 %5353 }
 0x75e   : > { %v5216_v19 = vpop.permute.xlu0 %5215  ;;  %v4681_v31 = vsel %vm1364_vm1, %v4661_v45, %v4662_v50  ;;  %v5375_v40 = vrot.slane %v5354_v32, 4 }
 0x75f   : > { %v5238_v55 = vrot.slane %v5216_v19, 4  ;;  %v4682_v18 = vsel %vm1640_vm3, %v4638_v26, %v4681_v31 }
 0x760   : > { %4717 = vst [vmem:[#allocation4 + $0xf0] sm:$0xff] %v4682_v18 }
 0x761   : > { %v5257_v58 = vsel %vm1364_vm1, %v5237_v59, %v5238_v55  ;;  %v5259_v29 = vsel %vm2220_vm5, %v5216_v19, %v5238_v55  ;;  %5089 = vrot.lane.b32.xlu1 %v10152_v38, %s10760_s28 }
 0x762   : > { %v5258_v61 = vsel %vm2220_vm5, %v5214_v56, %v5257_v58  ;;  %5294 = vst [vmem:[#allocation4 + $0x2d8] sm:$0xf] %v5259_v29 }
 0x763   : > { %5293 = vst [vmem:[#allocation4 + $0x2d0] sm:$0xff] %v5258_v61  ;;  %5091 = vrot.lane.b32.xlu2 %v10458_v60, %s10760_s28  ;;  %v4644_v17 = vpop.permute.xlu1 %4643  ;;  %v5304_v60 = vld [vmem:[#allocation2 + $0x20] sm:$0xff] }
 0x764   : > { %5337 = vrot.lane.b32.xlu0 %v7875_v51, %s7893_s19  ;;  %v4664_v46 = vrot.slane %v4644_v17, 4 }
 0x765   : > { %v5080_v0 = vpop.permute.xlu2 %5079 }
 0x766   : > { %v5350_v23 = vpop.permute.xlu0 %5349  ;;  %v5102_v34 = vrot.slane %v5080_v0, 4  ;;  %v4684_v33 = vsel %vm1364_vm1, %v4663_v47, %v4664_v46  ;;  %v4686_v4 = vsel %vm1640_vm3, %v4644_v17, %v4664_v46 }
 0x767   : > { %v4685_v12 = vsel %vm1640_vm3, %v4642_v1, %v4684_v33  ;;  %4720 = vst [vmem:[#allocation4 + $0x104] sm:$0xf] %v4686_v4  ;;  %v5373_v50 = vrot.slane %v5350_v23, 4 }
 0x768   : > { %v5123_v38 = vsel %vm2083_vm6, %v5080_v0, %v5102_v34  ;;  %4719 = vst [vmem:[#allocation4 + $0xfc] sm:$0xff] %v4685_v12 }
 0x769   : > { %5158 = vst [vmem:[#allocation4 + $0x278] sm:$0xf] %v5123_v38  ;;  %5339 = vrot.lane.b32.xlu1 %v5304_v60, %s7893_s19  ;;  %s7821_s19 = smul.u32 12, %s10762_s26 }
 0x76b   : > { %5061 = vrot.lane.b32.xlu2 %v7876_v30, %s10760_s28  ;;  %v5218_v7 = vpop.permute.xlu1 %5217  ;;  %s454_s22 = scalar_lea.vmem %s10742_s1, %s7821_s19 }
 0x76c   : > { %5063 = vrot.lane.b32.xlu0 %v5030_v49, %s10760_s28  ;;  %v5239_v11 = vrot.slane %v5218_v7, 4 }
 0x76d   : > { %v4514_v25 = vpop.permute.xlu2 %4513 }
 0x76e   : > { %v5356_v3 = vpop.permute.xlu0 %5355  ;;  %v5260_v6 = vsel %vm1364_vm1, %v5239_v11, %v5240_v37  ;;  %v4531_v37 = vrot.slane %v4514_v25, 4 }
 0x76f   : > { %v5376_v53 = vrot.slane %v5356_v3, 4  ;;  %v5261_v27 = vsel %vm2220_vm5, %v5218_v7, %v5260_v6  ;;  %v7731_v6 = vld [vmem:[#allocation4 + $0x98] sm:$0xf0] }
 0x770   : > { %5295 = vst [vmem:[#allocation4 + $0x2dc] sm:$0xff] %v5261_v27 }
 0x771   : > { %v5396_v39 = vsel %vm1364_vm1, %v5375_v40, %v5376_v53  ;;  %v5398_v28 = vsel %vm2357_vm7, %v5356_v3, %v5376_v53  ;;  %5065 = vrot.lane.b32.xlu1 %v7875_v51, %s10760_s28  ;;  %v5437_v3 = vld [vmem:[%s10752_s11] sm:$0xff]  ;;  %v7213_v53 = vld [vmem:[#allocation4 + $0x9c] sm:$0xf0] }
 0x772   : > { %v5397_v36 = vsel %vm2357_vm7, %v5354_v32, %v5396_v39  ;;  %5432 = vst [vmem:[#allocation4 + $0x344] sm:$0xf] %v5398_v28  ;;  %v7211_v39 = vld [vmem:[#allocation4 + $0x90] sm:$0xf]  ;;  %v7730_v28 = vld [vmem:[#allocation4 + $0x94] sm:$0xf] }
 0x773   : > { %5431 = vst [vmem:[#allocation4 + $0x33c] sm:$0xff] %v5397_v36  ;;  %5067 = vrot.lane.b32.xlu2 %v5304_v60, %s10760_s28  ;;  %v5352_v54 = vpop.permute.xlu1 %5351 }
 0x774   : > { %5586 = vperm.xlu0 %7840, %v5583_v2   ;;  %v5374_v42 = vrot.slane %v5352_v54, 4  ;;  %5590 = vst [vmem:[#allocation1] ss:$4 sm:$0xff] %v5437_v3 }
 0x775   : > { %v4376_v43 = vpop.permute.xlu2 %4375 }
 0x776   : > { %v5082_v44 = vpop.permute.xlu0 %5081  ;;  %v4394_v62 = vrot.slane %v4376_v43, 4  ;;  %v5393_v10 = vsel %vm1364_vm1, %v5373_v50, %v5374_v42  ;;  %v5395_v52 = vsel %vm2357_vm7, %v5352_v54, %v5374_v42  ;;  %v7212_v50 = vor.u32 %v7731_v6, %v7211_v39 }
 0x777   : > { %v5394_v56 = vsel %vm2357_vm7, %v5350_v23, %v5393_v10  ;;  %5430 = vst [vmem:[#allocation4 + $0x338] sm:$0xf] %v5395_v52  ;;  %v5103_v9 = vrot.slane %v5082_v44, 4  ;;  %v7216_v42 = vor.u32 %v7730_v28, %v7213_v53  ;;  %v7199_v52 = vld [vmem:[#allocation4 + $0x78] sm:$0xf] }
 0x778   : > { %v4417_v22 = vsel %vm1366_vm15, %v4376_v43, %v4394_v62  ;;  %5429 = vst [vmem:[#allocation4 + $0x330] sm:$0xff] %v5394_v56  ;;  %v7728_v43 = vld [vmem:[#allocation4 + $0x80] sm:$0xf0]  ;;  %v7727_v56 = vld [vmem:[#allocation4 + $0x7c] sm:$0xf] }
 0x779   : > { %4450 = vst [vmem:[#allocation4 + $0x50] sm:$0xf] %v4417_v22 }
 0x77b   : > { %v5078_v8 = vpop.permute.xlu1 %5077 }
 0x77c   : > { %v5101_v35 = vrot.slane %v5078_v8, 4 }
 0x77d   : > { %v4950_v15 = vpop.permute.xlu2 %4949 }
 0x77e   : > { %v4510_v14 = vpop.permute.xlu0 %4509  ;;  %v5121_v63 = vsel %vm1364_vm1, %v5101_v35, %v5102_v34  ;;  %v4969_v23 = vrot.slane %v4950_v15, 4 }
 0x77f   : > { %v5122_v5 = vsel %vm2083_vm6, %v5078_v8, %v5121_v63  ;;  %v4529_v31 = vrot.slane %v4510_v14, 4 }
 0x780   : > { %5157 = vst [vmem:[#allocation4 + $0x270] sm:$0xff] %v5122_v5  ;;  %v7187_v5 = vld [vmem:[#allocation4 + $0x60] sm:$0xf] }
 0x783   : > { %v5084_v57 = vpop.permute.xlu1 %5083 }
 0x784   : > { %v5104_v20 = vrot.slane %v5084_v57, 4 }
 0x785   : > { %v10562_v13 = vpop.permute.xlu2 %4955 }
 0x786   : > { %v4516_v21 = vpop.permute.xlu0 %4515  ;;  %v4972_v1 = vrot.slane %v10562_v13, 4  ;;  %v5124_v16 = vsel %vm1364_vm1, %v5103_v9, %v5104_v20  ;;  %v5126_v24 = vsel %vm2083_vm6, %v5084_v57, %v5104_v20  ;;  %v7724_v57 = vld [vmem:[#allocation4 + $0x64] sm:$0xf]  ;;  %v7725_v9 = vld [vmem:[#allocation4 + $0x68] sm:$0xf0] }
 0x787   : > { %v4532_v41 = vrot.slane %v4516_v21, 4  ;;  %v5125_v48 = vsel %vm2083_vm6, %v5082_v44, %v5124_v16  ;;  %5160 = vst [vmem:[#allocation4 + $0x284] sm:$0xf] %v5126_v24  ;;  %v7201_v44 = vld [vmem:[#allocation4 + $0x84] sm:$0xf0]  ;;  %v7188_v24 = vor.u32 %v7725_v9, %v7187_v5 }
 0x788   : > { %5159 = vst [vmem:[#allocation4 + $0x27c] sm:$0xff] %v5125_v48  ;;  %v4996_v32 = vsel %vm1946_vm2, %v10562_v13, %v4972_v1  ;;  %v7204_v63 = vor.u32 %v7727_v56, %v7201_v44  ;;  %v7189_v20 = vld [vmem:[#allocation4 + $0x6c] sm:$0xf0]  ;;  %v7139_v56 = vld [vmem:[#allocation4] sm:$0xf] }
 0x789   : > { %v4554_v26 = vsel %vm1364_vm1, %v4531_v37, %v4532_v41  ;;  %v4556_v45 = vsel %vm1503_vm14, %v4516_v21, %v4532_v41  ;;  %5028 = vst [vmem:[#allocation4 + $0x23c] sm:$0xf] %v4996_v32  ;;  %v7192_v41 = vor.u32 %v7724_v57, %v7189_v20  ;;  %v7141_v44 = vld [vmem:[#allocation4 + $0xc] sm:$0xf0] }
 0x78a   : > { %v4555_v19 = vsel %vm1503_vm14, %v4514_v25, %v4554_v26  ;;  %4588 = vst [vmem:[#allocation4 + $0xbc] sm:$0xf] %v4556_v45  ;;  %v10635_v20 = vld.sshfl [vmem:[#allocation1] sm:$0xff pattern:$0x73625140] }
 0x78b   : > { %4587 = vst [vmem:[#allocation4 + $0xb4] sm:$0xff] %v4555_v19  ;;  %v4512_v59 = vpop.permute.xlu1 %4511 }
 0x78c   : > { %v4530_v55 = vrot.slane %v4512_v59, 4 }
 0x78d   : > { %v10575_v18 = vpop.permute.xlu2 %4785 }
 0x78e   : > { %v4378_v58 = vpop.permute.xlu0 %4377  ;;  %v4551_v29 = vsel %vm1364_vm1, %v4529_v31, %v4530_v55  ;;  %v4553_v61 = vsel %vm1503_vm14, %v4512_v59, %v4530_v55  ;;  %v4803_v26 = vrot.slane %v10575_v18, 4 }
 0x78f   : > { %v4552_v51 = vsel %vm1503_vm14, %v4510_v14, %v4551_v29  ;;  %4586 = vst [vmem:[#allocation4 + $0xb0] sm:$0xf] %v4553_v61  ;;  %v4395_v2 = vrot.slane %v4378_v58, 4  ;;  %v7200_v14 = vor.u32 %v7728_v43, %v7199_v52  ;;  %v7713_v43 = vld [vmem:[#allocation4 + $0x8] sm:$0xf0]  ;;  %vm6480_vm14 = vcmask 1040384  }
 0x790   : > { %4585 = vst [vmem:[#allocation4 + $0xa8] sm:$0xff] %v4552_v51 }
 0x792   : > { %v7734_v4 = vld [vmem:[#allocation4 + $0xb0] sm:$0xf0]  ;;  %v7225_v49 = vld [vmem:[#allocation4 + $0xb4] sm:$0xf0] }
 0x793   : > { %v4374_v17 = vpop.permute.xlu1 %4373 }
 0x794   : > { %v4393_v47 = vrot.slane %v4374_v17, 4 }
 0x795   : > { %v10580_v46 = vpop.permute.xlu2 %4645 }
 0x796   : > { %v4952_v0 = vpop.permute.xlu0 %4951  ;;  %v4415_v33 = vsel %vm1364_vm1, %v4393_v47, %v4394_v62  ;;  %v7165_v47 = vld [vmem:[#allocation4 + $0x3c] sm:$0xf0]  ;;  %v4665_v3 = vrot.slane %v10580_v46, 4 }
 0x797   : > { %v4970_v34 = vrot.slane %v4952_v0, 4  ;;  %v4416_v12 = vsel %vm1366_vm15, %v4374_v17, %v4415_v33  ;;  %v7223_v38 = vld [vmem:[#allocation4 + $0xa8] sm:$0xf]  ;;  %v7733_v60 = vld [vmem:[#allocation4 + $0xac] sm:$0xf] }
 0x798   : > { %4449 = vst [vmem:[#allocation4 + $0x48] sm:$0xff] %v4416_v12  ;;  %v7224_v11 = vor.u32 %v7734_v4, %v7223_v38  ;;  %v7228_v25 = vor.u32 %v7733_v60, %v7225_v49  ;;  %v7151_v49 = vld [vmem:[#allocation4 + $0x18] sm:$0xf] }
 0x799   : > { %v4991_v30 = vsel %vm1364_vm1, %v4969_v23, %v4970_v34  ;;  %v4993_v7 = vsel %vm1946_vm2, %v4952_v0, %v4970_v34  ;;  %v7163_v23 = vld [vmem:[#allocation4 + $0x30] sm:$0xf]  ;;  %v7718_v34 = vld [vmem:[#allocation4 + $0x34] sm:$0xf] }
 0x79a   : > { %v4992_v40 = vsel %vm1946_vm2, %v4950_v15, %v4991_v30  ;;  %5026 = vst [vmem:[#allocation4 + $0x230] sm:$0xf] %v4993_v7  ;;  %6181 = vmatpush.bf16.msra.mxu2 %v7224_v11  ;;  %6246 = vmatpush.bf16.msrb.mxu0 %v7228_v25  ;;  %v7168_v60 = vor.u32 %v7718_v34, %v7165_v47  ;;  %v7716_v30 = vld [vmem:[#allocation4 + $0x20] sm:$0xf0]  ;;  %v7715_v11 = vld [vmem:[#allocation4 + $0x1c] sm:$0xf] }
 0x79b   : > { %5025 = vst [vmem:[#allocation4 + $0x228] sm:$0xff] %v4992_v40  ;;  %v4380_v27 = vpop.permute.xlu1 %4379  ;;  %v7153_v25 = vld [vmem:[#allocation4 + $0x24] sm:$0xf0]  ;;  %v7152_v39 = vor.u32 %v7716_v30, %v7151_v49  ;;  %v7752_v47 = vld [vmem:[#allocation4 + $0x140] sm:$0xf0] }
 0x79c   : > { %v4396_v36 = vrot.slane %v4380_v27, 4  ;;  %v7295_v30 = vld [vmem:[#allocation4 + $0x138] sm:$0xf] }
 0x79d   : > { %v10590_v54 = vpop.permute.xlu2 %4651 }
 0x79e   : > { %v10592_v62 = vpop.permute.xlu0 %4781  ;;  %v4668_v10 = vrot.slane %v10590_v54, 4  ;;  %v4418_v22 = vsel %vm1364_vm1, %v4395_v2, %v4396_v36  ;;  %v4420_v8 = vsel %vm1366_vm15, %v4380_v27, %v4396_v36  ;;  %6182 = vmatpush.bf16.msra.mxu2 %v7212_v50  ;;  %6247 = vmatpush.bf16.msrb.mxu0 %v7216_v42  ;;  %v7156_v50 = vor.u32 %v7715_v11, %v7153_v25 }
 0x79f   : > { %v4419_v35 = vsel %vm1366_vm15, %v4378_v58, %v4418_v22  ;;  %4452 = vst [vmem:[#allocation4 + $0x5c] sm:$0xf] %v4420_v8  ;;  %v7175_v19 = vld [vmem:[#allocation4 + $0x48] sm:$0xf]  ;;  %v7721_v55 = vld [vmem:[#allocation4 + $0x4c] sm:$0xf]  ;;  %v7296_v25 = vor.u32 %v7752_v47, %v7295_v30 }
 0x7a0   : > { %v4692_v15 = vsel %vm1640_vm3, %v10590_v54, %v4668_v10  ;;  %4451 = vst [vmem:[#allocation4 + $0x54] sm:$0xff] %v4419_v35  ;;  %v4801_v33 = vrot.slane %v10592_v62, 4  ;;  %v7712_v22 = vld [vmem:[#allocation4 + $0x4] sm:$0xf]  ;;  %v7761_v30 = vld [vmem:[#allocation4 + $0x188] sm:$0xf0] }
 0x7a1   : > { %4724 = vst [vmem:[#allocation4 + $0x11c] sm:$0xf] %v4692_v15  ;;  %v7140_v15 = vor.u32 %v7713_v43, %v7139_v56  ;;  %v7770_v43 = vld [vmem:[#allocation4 + $0x1d0] sm:$0xf0] }
 0x7a2   : > { %6183 = vmatpush.bf16.msra.mxu2 %v7200_v14  ;;  %6248 = vmatpush.bf16.msrb.mxu0 %v7204_v63  ;;  %v7144_v14 = vor.u32 %v7712_v22, %v7141_v44  ;;  %v7415_v63 = vld [vmem:[#allocation4 + $0x228] sm:$0xf] }
 0x7a3   : > { %v4954_v21 = vpop.permute.xlu1 %4953 }
 0x7a4   : > { %v4971_v37 = vrot.slane %v4954_v21, 4 }
 0x7a5   : > { %v10602_v16 = vpop.permute.xlu2 %5225 }
 0x7a6   : > { %v4788_v48 = vpop.permute.xlu0 %4787  ;;  %v4994_v32 = vsel %vm1364_vm1, %v4971_v37, %v4972_v1  ;;  %6184 = vmatpush.bf16.msra.mxu2 %v7188_v24  ;;  %6249 = vmatpush.bf16.msrb.mxu0 %v7192_v41  ;;  %v7719_v1 = vld [vmem:[#allocation4 + $0x38] sm:$0xf0] }
 0x7a7   : > { %v4804_v45 = vrot.slane %v4788_v48, 4  ;;  %v4995_v59 = vsel %vm1946_vm2, %v4954_v21, %v4994_v32  ;;  %v7722_v31 = vld [vmem:[#allocation4 + $0x50] sm:$0xf0]  ;;  %v7177_v58 = vld [vmem:[#allocation4 + $0x54] sm:$0xf0]  ;;  %v7164_v38 = vor.u32 %v7719_v1, %v7163_v23 }
 0x7a8   : > { %5027 = vst [vmem:[#allocation4 + $0x234] sm:$0xff] %v4995_v59  ;;  %v7176_v51 = vor.u32 %v7722_v31, %v7175_v19  ;;  %v7180_v17 = vor.u32 %v7721_v55, %v7177_v58  ;;  %v7403_v32 = vld [vmem:[#allocation4 + $0x210] sm:$0xf]  ;;  %v7754_v19 = vld [vmem:[#allocation4 + $0x154] sm:$0xf] }
 0x7a9   : > { %v4826_v29 = vsel %vm1364_vm1, %v4803_v26, %v4804_v45  ;;  %v4828_v61 = vsel %vm1777_vm4, %v4788_v48, %v4804_v45  ;;  %v7776_v59 = vld [vmem:[#allocation4 + $0x200] sm:$0xf0]  ;;  %v7755_v55 = vld [vmem:[#allocation4 + $0x158] sm:$0xf0]  ;;  %v7309_v58 = vld [vmem:[#allocation4 + $0x15c] sm:$0xf0] }
 0x7aa   : > { %v4827_v13 = vsel %vm1777_vm4, %v10575_v18, %v4826_v29  ;;  %4860 = vst [vmem:[#allocation4 + $0x17c] sm:$0xf] %v4828_v61  ;;  %6185 = vmatpush.bf16.msra.mxu2 %v7176_v51  ;;  %6250 = vmatpush.bf16.msrb.mxu0 %v7180_v17  ;;  %v7391_v1 = vld [vmem:[#allocation4 + $0x1f8] sm:$0xf] }
 0x7ab   : > { %4859 = vst [vmem:[#allocation4 + $0x174] sm:$0xff] %v4827_v13  ;;  %v4784_v0 = vpop.permute.xlu1 %4783  ;;  %v7312_v13 = vor.u32 %v7754_v19, %v7309_v58  ;;  %v7392_v34 = vor.u32 %v7776_v59, %v7391_v1  ;;  %v7742_v19 = vld [vmem:[#allocation4 + $0xf4] sm:$0xf] }
 0x7ac   : > { %v4802_v4 = vrot.slane %v4784_v0, 4 }
 0x7ad   : > { %v10614_v12 = vpop.permute.xlu2 %5359 }
 0x7ae   : > { %v4648_v7 = vpop.permute.xlu0 %4647  ;;  %v5378_v18 = vrot.slane %v10614_v12, 4  ;;  %v4823_v6 = vsel %vm1364_vm1, %v4801_v33, %v4802_v4  ;;  %v4825_v53 = vsel %vm1777_vm4, %v4784_v0, %v4802_v4  ;;  %6186 = vmatpush.bf16.msra.mxu2 %v7164_v38  ;;  %6251 = vmatpush.bf16.msrb.mxu0 %v7168_v60  ;;  %v7297_v33 = vld [vmem:[#allocation4 + $0x144] sm:$0xf0]  ;;  %v5243_v4 = vrot.slane %v10602_v16, 4 }
 0x7af   : > { %v4666_v40 = vrot.slane %v4648_v7, 4  ;;  %v4824_v27 = vsel %vm1777_vm4, %v10592_v62, %v4823_v6  ;;  %4858 = vst [vmem:[#allocation4 + $0x170] sm:$0xf] %v4825_v53  ;;  %v7782_v62 = vld [vmem:[#allocation4 + $0x230] sm:$0xf0] }
 0x7b0   : > { %4857 = vst [vmem:[#allocation4 + $0x168] sm:$0xff] %v4824_v27  ;;  %v5401_v36 = vsel %vm2357_vm7, %v10614_v12, %v5378_v18  ;;  %v7416_v57 = vor.u32 %v7782_v62, %v7415_v63  ;;  %v7283_v62 = vld [vmem:[#allocation4 + $0x120] sm:$0xf]  ;;  %v7343_v12 = vld [vmem:[#allocation4 + $0x198] sm:$0xf] }
 0x7b1   : > { %v4687_v28 = vsel %vm1364_vm1, %v4665_v3, %v4666_v40  ;;  %v4689_v2 = vsel %vm1640_vm3, %v4648_v7, %v4666_v40  ;;  %5434 = vst [vmem:[#allocation4 + $0x350] sm:$0xf] %v5401_v36  ;;  %v7773_v7 = vld [vmem:[#allocation4 + $0x1e8] sm:$0xf0]  ;;  %v7751_v3 = vld [vmem:[#allocation4 + $0x13c] sm:$0xf] }
 0x7b2   : > { %v4688_v42 = vsel %vm1640_vm3, %v10580_v46, %v4687_v28  ;;  %4722 = vst [vmem:[#allocation4 + $0x110] sm:$0xf] %v4689_v2  ;;  %6187 = vmatpush.bf16.msra.mxu2 %v7152_v39  ;;  %6252 = vmatpush.bf16.msrb.mxu0 %v7156_v50  ;;  %v7779_v46 = vld [vmem:[#allocation4 + $0x218] sm:$0xf0]  ;;  %v7758_v21 = vld [vmem:[#allocation4 + $0x170] sm:$0xf0]  ;;  %v7300_v27 = vor.u32 %v7751_v3, %v7297_v33 }
 0x7b3   : > { %4721 = vst [vmem:[#allocation4 + $0x108] sm:$0xff] %v4688_v42  ;;  %v4650_v52 = vpop.permute.xlu1 %4649  ;;  %v7321_v48 = vld [vmem:[#allocation4 + $0x174] sm:$0xf0]  ;;  %v7404_v54 = vor.u32 %v7779_v46, %v7403_v32  ;;  %v7379_v39 = vld [vmem:[#allocation4 + $0x1e0] sm:$0xf] }
 0x7b4   : > { %v4667_v8 = vrot.slane %v4650_v52, 4  ;;  %v7380_v2 = vor.u32 %v7773_v7, %v7379_v39  ;;  %v7749_v36 = vld [vmem:[#allocation4 + $0x128] sm:$0xf0]  ;;  %v7285_v50 = vld [vmem:[#allocation4 + $0x12c] sm:$0xf0] }
 0x7b5   : > { %v10630_v35 = vpop.permute.xlu2 %5085  ;;  %v7367_v42 = vld [vmem:[#allocation4 + $0x1c8] sm:$0xf]  ;;  %v7355_v46 = vld [vmem:[#allocation4 + $0x1b0] sm:$0xf]  ;;  %v7261_v32 = vld [vmem:[#allocation4 + $0xfc] sm:$0xf0] }
 0x7b6   : > { %v5222_v5 = vpop.permute.xlu0 %5221  ;;  %v4690_v9 = vsel %vm1364_vm1, %v4667_v8, %v4668_v10  ;;  %6188 = vmatpush.bf16.msra.mxu2 %v7140_v15  ;;  %6253 = vmatpush.bf16.msrb.mxu0 %v7144_v14  ;;  %v7307_v10 = vld [vmem:[#allocation4 + $0x150] sm:$0xf]  ;;  %v7284_v8 = vor.u32 %v7749_v36, %v7283_v62  ;;  %v7368_v14 = vor.u32 %v7770_v43, %v7367_v42  ;;  %v5105_v33 = vrot.slane %v10630_v35, 4  ;;  %v7736_v36 = vld [vmem:[#allocation4 + $0xc4] sm:$0xf] }
 0x7b7   : > { %v4691_v37 = vsel %vm1640_vm3, %v4650_v52, %v4690_v9  ;;  %v7319_v24 = vld [vmem:[#allocation4 + $0x168] sm:$0xf]  ;;  %v7757_v41 = vld [vmem:[#allocation4 + $0x16c] sm:$0xf]  ;;  %v5241_v29 = vrot.slane %v5222_v5, 4  ;;  %v7308_v17 = vor.u32 %v7755_v55, %v7307_v10 }
 0x7b8   : > { %4723 = vst [vmem:[#allocation4 + $0x114] sm:$0xff] %v4691_v37  ;;  %v7320_v26 = vor.u32 %v7758_v21, %v7319_v24  ;;  %v7324_v45 = vor.u32 %v7757_v41, %v7321_v48  ;;  %v7748_v52 = vld [vmem:[#allocation4 + $0x124] sm:$0xf]  ;;  %v7767_v9 = vld [vmem:[#allocation4 + $0x1b8] sm:$0xf0] }
 0x7b9   : > { %6189 = vmatmul.bf16.vlgmr.msra.gmra.mxu2 %v10635_v20  ;;  %6254 = vmatmul.bf16.vlgmr.msrb.gmra.mxu0 %v10635_v20  ;;  %v7288_v15 = vor.u32 %v7748_v52, %v7285_v50  ;;  %v7259_v10 = vld [vmem:[#allocation4 + $0xf0] sm:$0xf] }
 0x7ba   : > { %6207 = vmatpush.bf16.msrb.mxu2 %v7416_v57  ;;  %6194 = vmatpush.bf16.msra.mxu3 %v7320_v26  ;;  %v7271_v37 = vld [vmem:[#allocation4 + $0x108] sm:$0xf]  ;;  %v7745_v24 = vld [vmem:[#allocation4 + $0x10c] sm:$0xf]  ;;  %v7356_v26 = vor.u32 %v7767_v9, %v7355_v46  ;;  %v7237_v39 = vld [vmem:[#allocation4 + $0xcc] sm:$0xf0] }
 0x7bb   : > { %6259 = vmatpush.bf16.msrb.mxu1 %v7324_v45  ;;  %v5224_v31 = vpop.permute.xlu1 %5223  ;;  %v7743_v45 = vld [vmem:[#allocation4 + $0xf8] sm:$0xf0]  ;;  %v7231_v50 = vld [vmem:[#allocation4 + $0xb0] sm:$0xf] }
 0x7bc   : > { %v5242_v61 = vrot.slane %v5224_v31, 4  ;;  %v7260_v58 = vor.u32 %v7743_v45, %v7259_v10  ;;  %v7219_v45 = vld [vmem:[#allocation4 + $0x98] sm:$0xf]  ;;  %v7800_v10 = vld [vmem:[#allocation4 + $0x2c0] sm:$0xf0] }
 0x7bd   : > { %v10640_v51 = vpop.permute.xlu2 %5091 }
 0x7be   : > { %6208 = vmatpush.bf16.msrb.mxu2 %v7404_v54  ;;  %v5228_v0 = vpop.permute.xlu0 %5227  ;;  %v5108_v23 = vrot.slane %v10640_v51, 4  ;;  %v5263_v60 = vsel %vm1364_vm1, %v5241_v29, %v5242_v61  ;;  %v5265_v49 = vsel %vm2220_vm5, %v5224_v31, %v5242_v61  ;;  %6195 = vmatpush.bf16.msra.mxu3 %v7308_v17  ;;  %v7764_v54 = vld [vmem:[#allocation4 + $0x1a0] sm:$0xf0]  ;;  %v7264_v29 = vor.u32 %v7742_v19, %v7261_v32  ;;  %v7247_v61 = vld [vmem:[#allocation4 + $0xd8] sm:$0xf] }
 0x7bf   : > { %v5244_v38 = vrot.slane %v5228_v0, 4  ;;  %6260 = vmatpush.bf16.msrb.mxu1 %v7312_v13  ;;  %v5264_v11 = vsel %vm2220_vm5, %v5222_v5, %v5263_v60  ;;  %5298 = vst [vmem:[#allocation4 + $0x2f0] sm:$0xf] %v5265_v49  ;;  %v7746_v63 = vld [vmem:[#allocation4 + $0x110] sm:$0xf0]  ;;  %v7344_v47 = vor.u32 %v7764_v54, %v7343_v12 }
 0x7c0   : > { %5297 = vst [vmem:[#allocation4 + $0x2e8] sm:$0xff] %v5264_v11  ;;  %v5132_v53 = vsel %vm2083_vm6, %v10640_v51, %v5108_v23  ;;  %v7273_v5 = vld [vmem:[#allocation4 + $0x114] sm:$0xf0]  ;;  %v7272_v41 = vor.u32 %v7746_v63, %v7271_v37  ;;  %v7740_v17 = vld [vmem:[#allocation4 + $0xe0] sm:$0xf0] }
 0x7c1   : > { %v5266_v40 = vsel %vm1364_vm1, %v5243_v4, %v5244_v38  ;;  %v5268_v6 = vsel %vm2220_vm5, %v5228_v0, %v5244_v38  ;;  %5164 = vst [vmem:[#allocation4 + $0x29c] sm:$0xf] %v5132_v53  ;;  %v7276_v48 = vor.u32 %v7745_v24, %v7273_v5  ;;  %v7739_v0 = vld [vmem:[#allocation4 + $0xdc] sm:$0xf]  ;;  %v7331_v49 = vld [vmem:[#allocation4 + $0x180] sm:$0xf]  ;;  %v7248_v11 = vor.u32 %v7740_v17, %v7247_v61 }
 0x7c2   : > { %6209 = vmatpush.bf16.msrb.mxu2 %v7392_v34  ;;  %v5267_v28 = vsel %vm2220_vm5, %v10602_v16, %v5266_v40  ;;  %5300 = vst [vmem:[#allocation4 + $0x2fc] sm:$0xf] %v5268_v6  ;;  %6196 = vmatpush.bf16.msra.mxu3 %v7296_v25  ;;  %v7249_v34 = vld [vmem:[#allocation4 + $0xe4] sm:$0xf0]  ;;  %v7737_v25 = vld [vmem:[#allocation4 + $0xc8] sm:$0xf0] }
 0x7c3   : > { %5299 = vst [vmem:[#allocation4 + $0x2f4] sm:$0xff] %v5267_v28  ;;  %6261 = vmatpush.bf16.msrb.mxu1 %v7300_v27  ;;  %v5358_v44 = vpop.permute.xlu1 %5357  ;;  %v7252_v53 = vor.u32 %v7739_v0, %v7249_v34  ;;  %v7235_v27 = vld [vmem:[#allocation4 + $0xc0] sm:$0xf]  ;;  %v7547_v54 = vld [vmem:[#allocation4 + $0x330] sm:$0xf] }
 0x7c4   : > { %v5377_v56 = vrot.slane %v5358_v44, 4  ;;  %v7236_v52 = vor.u32 %v7737_v25, %v7235_v27  ;;  %v10676_v5 = vld.sshfl [vmem:[#allocation1 + $0x8] sm:$0xff pattern:$0x73625140]  ;;  %v7729_v0 = vld [vmem:[#allocation4 + $0x88] sm:$0xf0] }
 0x7c5   : > { %v10655_v22 = vpop.permute.xlu2 %5061  ;;  %v5438_v37 = vld [vmem:[%s10752_s11 + $0x8] sm:$0x3]  ;;  %v7811_v27 = vld [vmem:[#allocation4 + $0x31c] sm:$0xf] }
 0x7c6   : > { %6210 = vmatpush.bf16.msrb.mxu2 %v7380_v2  ;;  %v5362_v16 = vpop.permute.xlu0 %5361  ;;  %v5399_v57 = vsel %vm1364_vm1, %v5377_v56, %v5378_v18  ;;  %6197 = vmatpush.bf16.msra.mxu3 %v7284_v8  ;;  %v7332_v2 = vor.u32 %v7761_v30, %v7331_v49  ;;  %v7240_v56 = vor.u32 %v7736_v36, %v7237_v39  ;;  %v7735_v8 = vld [vmem:[#allocation4 + $0xb8] sm:$0xf0]  ;;  %v7207_v19 = vld [vmem:[#allocation4 + $0x80] sm:$0xf]  ;;  %v7195_v49 = vld [vmem:[#allocation4 + $0x68] sm:$0xf] }
 0x7c7   : > { %6262 = vmatpush.bf16.msrb.mxu1 %v7288_v15  ;;  %v5400_v21 = vsel %vm2357_vm7, %v5358_v44, %v5399_v57  ;;  %v5379_v59 = vrot.slane %v5362_v16, 4  ;;  %v7511_v42 = vld [vmem:[#allocation4 + $0x2e8] sm:$0xf]  ;;  %v7803_v15 = vld [vmem:[#allocation4 + $0x2d8] sm:$0xf0]  ;;  %v7232_v63 = vor.u32 %v7735_v8, %v7231_v50  ;;  %v5093_v30 = vrot.slane %v10655_v22, 4 }
 0x7c8   : > { %5433 = vst [vmem:[#allocation4 + $0x348] sm:$0xff] %v5400_v21  ;;  %v10678_v57 = vld.sshfl [vmem:[#allocation1 + $0x10] sm:$0xff pattern:$0x73625140]  ;;  %v7475_v50 = vld [vmem:[#allocation4 + $0x2a0] sm:$0xf] }
 0x7c9   : > { %5593 = vst [vmem:[#allocation1 + $0x20] ss:$4 sm:$0xff] %v5438_v37  ;;  %v7720_v37 = vld [vmem:[#allocation4 + $0x40] sm:$0xf0] }
 0x7ca   : > { %6211 = vmatpush.bf16.msrb.mxu2 %v7368_v14  ;;  %6198 = vmatpush.bf16.msra.mxu3 %v7272_v41  ;;  %v7806_v43 = vld [vmem:[#allocation4 + $0x2f0] sm:$0xf0] }
 0x7cb   : > { %6263 = vmatpush.bf16.msrb.mxu1 %v7276_v48  ;;  %v5364_v18 = vpop.permute.xlu1 %5363 }
 0x7cc   : > { %v5380_v31 = vrot.slane %v5364_v18, 4 }
 0x7cd   : > { %v10661_v55 = vpop.permute.xlu2 %5067 }
 0x7ce   : > { %6212 = vmatpush.bf16.msrb.mxu2 %v7356_v26  ;;  %v5088_v13 = vpop.permute.xlu0 %5087  ;;  %v5096_v1 = vrot.slane %v10661_v55, 4  ;;  %v5402_v38 = vsel %vm1364_vm1, %v5379_v59, %v5380_v31  ;;  %v5404_v60 = vsel %vm2357_vm7, %v5364_v18, %v5380_v31  ;;  %6199 = vmatpush.bf16.msra.mxu3 %v7260_v58  ;;  %v7814_v18 = vld [vmem:[#allocation4 + $0x334] sm:$0xf]  ;;  %v7815_v31 = vld [vmem:[#allocation4 + $0x338] sm:$0xf0] }
 0x7cf   : > { %v5106_v4 = vrot.slane %v5088_v13, 4  ;;  %6264 = vmatpush.bf16.msrb.mxu1 %v7264_v29  ;;  %v5403_v7 = vsel %vm2357_vm7, %v5362_v16, %v5402_v38  ;;  %5436 = vst [vmem:[#allocation4 + $0x35c] sm:$0xf] %v5404_v60  ;;  %v7732_v16 = vld [vmem:[#allocation4 + $0xa0] sm:$0xf0]  ;;  %v7548_v17 = vor.u32 %v7815_v31, %v7547_v54 }
 0x7d0   : > { %5435 = vst [vmem:[#allocation4 + $0x354] sm:$0xff] %v5403_v7  ;;  %v5114_v6 = vsel %vm2083_vm6, %v10661_v55, %v5096_v1  ;;  %v7559_v9 = vld [vmem:[#allocation4 + $0x348] sm:$0xf]  ;;  %v7817_v21 = vld [vmem:[#allocation4 + $0x34c] sm:$0xf]  ;;  %v7220_v12 = vor.u32 %v7732_v16, %v7219_v45 }
 0x7d1   : > { %v5127_v3 = vsel %vm1364_vm1, %v5105_v33, %v5106_v4  ;;  %v5129_v40 = vsel %vm2083_vm6, %v5088_v13, %v5106_v4  ;;  %5152 = vst [vmem:[#allocation4 + $0x254] sm:$0xf] %v5114_v6  ;;  %v7549_v58 = vld [vmem:[#allocation4 + $0x33c] sm:$0xf0]  ;;  %v7208_v4 = vor.u32 %v7729_v0, %v7207_v19  ;;  %v7812_v38 = vld [vmem:[#allocation4 + $0x320] sm:$0xf0] }
 0x7d2   : > { %6213 = vmatpush.bf16.msrb.mxu2 %v7344_v47  ;;  %v5128_v28 = vsel %vm2083_vm6, %v10630_v35, %v5127_v3  ;;  %5162 = vst [vmem:[#allocation4 + $0x290] sm:$0xf] %v5129_v40  ;;  %6200 = vmatpush.bf16.msra.mxu3 %v7248_v11  ;;  %v7512_v35 = vor.u32 %v7806_v43, %v7511_v42  ;;  %v7487_v47 = vld [vmem:[#allocation4 + $0x2b8] sm:$0xf]  ;;  %v7537_v60 = vld [vmem:[#allocation4 + $0x324] sm:$0xf0] }
 0x7d3   : > { %5161 = vst [vmem:[#allocation4 + $0x288] sm:$0xff] %v5128_v28  ;;  %6265 = vmatpush.bf16.msrb.mxu1 %v7252_v53  ;;  %v5090_v44 = vpop.permute.xlu1 %5089  ;;  %v7552_v13 = vor.u32 %v7814_v18, %v7549_v58  ;;  %v7488_v33 = vor.u32 %v7800_v10, %v7487_v47  ;;  %v7797_v3 = vld [vmem:[#allocation4 + $0x2a8] sm:$0xf0]  ;;  %v7726_v40 = vld [vmem:[#allocation4 + $0x70] sm:$0xf0]  ;;  %v7540_v36 = vor.u32 %v7811_v27, %v7537_v60 }
 0x7d4   : > { %v5107_v62 = vrot.slane %v5090_v44, 4  ;;  %v7535_v53 = vld [vmem:[#allocation4 + $0x318] sm:$0xf]  ;;  %v7476_v43 = vor.u32 %v7797_v3, %v7475_v50  ;;  %v7183_v16 = vld [vmem:[#allocation4 + $0x50] sm:$0xf] }
 0x7d5   : > { %v7451_v45 = vld [vmem:[#allocation4 + $0x270] sm:$0xf]  ;;  %v7171_v18 = vld [vmem:[#allocation4 + $0x38] sm:$0xf]  ;;  %v7788_v10 = vld [vmem:[#allocation4 + $0x260] sm:$0xf0] }
 0x7d6   : > { %6214 = vmatpush.bf16.msrb.mxu2 %v7332_v2  ;;  %v5338_v14 = vpop.permute.xlu0 %5337  ;;  %v5130_v46 = vsel %vm1364_vm1, %v5107_v62, %v5108_v23  ;;  %6201 = vmatpush.bf16.msra.mxu3 %v7236_v52  ;;  %v7499_v23 = vld [vmem:[#allocation4 + $0x2d0] sm:$0xf]  ;;  %v7536_v2 = vor.u32 %v7812_v38, %v7535_v53  ;;  %v7723_v52 = vld [vmem:[#allocation4 + $0x58] sm:$0xf0]  ;;  %v7172_v19 = vor.u32 %v7720_v37, %v7171_v18  ;;  %v7405_v31 = vld [vmem:[#allocation4 + $0x21c] sm:$0xf0] }
 0x7d7   : > { %6266 = vmatpush.bf16.msrb.mxu1 %v7240_v56  ;;  %v5131_v24 = vsel %vm2083_vm6, %v5090_v44, %v5130_v46  ;;  %v7818_v41 = vld [vmem:[#allocation4 + $0x350] sm:$0xf0]  ;;  %v7561_v48 = vld [vmem:[#allocation4 + $0x354] sm:$0xf0]  ;;  %v7500_v32 = vor.u32 %v7803_v15, %v7499_v23  ;;  %v5367_v29 = vrot.slane %v5338_v14, 4  ;;  %v7196_v44 = vor.u32 %v7726_v40, %v7195_v49 }
 0x7d8   : > { %5163 = vst [vmem:[#allocation4 + $0x294] sm:$0xff] %v5131_v24  ;;  %v7560_v26 = vor.u32 %v7818_v41, %v7559_v9  ;;  %v7564_v51 = vor.u32 %v7817_v21, %v7561_v48  ;;  %v7808_v46 = vld [vmem:[#allocation4 + $0x304] sm:$0xf]  ;;  %v7791_v9 = vld [vmem:[#allocation4 + $0x278] sm:$0xf0] }
 0x7d9   : > { %6215 = vmatmul.bf16.vlgmr.msrb.gmra.mxu2 %v10678_v57  ;;  %6202 = vmatmul.bf16.vlgmr.msra.gmra.mxu3 %v10676_v5  ;;  %v7417_v21 = vld [vmem:[#allocation4 + $0x234] sm:$0xf0]  ;;  %v7452_v54 = vor.u32 %v7791_v9, %v7451_v45  ;;  %v7717_v0 = vld [vmem:[#allocation4 + $0x28] sm:$0xf0]  ;;  %v7775_v38 = vld [vmem:[#allocation4 + $0x1fc] sm:$0xf] }
 0x7da   : > { %6220 = vmatpush.bf16.msrb.mxu3 %v7512_v35  ;;  %6267 = vmatmul.bf16.vlgmr.msrb.gmra.mxu1 %v10676_v5  ;;  %v7463_v15 = vld [vmem:[#allocation4 + $0x288] sm:$0xf]  ;;  %v7184_v35 = vor.u32 %v7723_v52, %v7183_v16  ;;  %v10702_v58 = vld.sshfl [vmem:[#allocation1 + $0x20] sm:$0xff pattern:$0x73625140] }
 0x7db   : > { %6311 = vmatpush.bf16.msra.mxu1 %v7232_v63  ;;  %6237 = vmatpush.bf16.msra.mxu2 %v7560_v26  ;;  %v5340_v59 = vpop.permute.xlu1 %5339  ;;  %v7523_v63 = vld [vmem:[#allocation4 + $0x300] sm:$0xf]  ;;  %v7327_v26 = vld [vmem:[#allocation4 + $0x170] sm:$0xf]  ;;  %v7393_v60 = vld [vmem:[#allocation4 + $0x204] sm:$0xf0] }
 0x7dc   : > { %6302 = vmatpush.bf16.msra.mxu0 %v7564_v51  ;;  %v5368_v61 = vrot.slane %v5340_v59, 4  ;;  %v7714_v49 = vld [vmem:[#allocation4 + $0x10] sm:$0xf0]  ;;  %v7805_v3 = vld [vmem:[#allocation4 + $0x2ec] sm:$0xf]  ;;  %v7396_v53 = vor.u32 %v7775_v38, %v7393_v60 }
 0x7dd   : > { %v7513_v40 = vld [vmem:[#allocation4 + $0x2f4] sm:$0xf0]  ;;  %v7147_v27 = vld [vmem:[#allocation4 + $0x8] sm:$0xf]  ;;  %v7381_v50 = vld [vmem:[#allocation4 + $0x1ec] sm:$0xf0] }
 0x7de   : > { %6221 = vmatpush.bf16.msrb.mxu3 %v7500_v32  ;;  %v5064_v34 = vpop.permute.xlu0 %5063  ;;  %v5384_v11 = vsel %vm1364_vm1, %v5367_v29, %v5368_v61  ;;  %v5386_v25 = vsel %vm2357_vm7, %v5340_v59, %v5368_v61  ;;  %v7781_v32 = vld [vmem:[#allocation4 + $0x22c] sm:$0xf]  ;;  %v7159_v29 = vld [vmem:[#allocation4 + $0x20] sm:$0xf]  ;;  %v7315_v61 = vld [vmem:[#allocation4 + $0x158] sm:$0xf] }
 0x7df   : > { %6312 = vmatpush.bf16.msra.mxu1 %v7220_v12  ;;  %v5094_v7 = vrot.slane %v5064_v34, 4  ;;  %6238 = vmatpush.bf16.msra.mxu2 %v7548_v17  ;;  %v5385_v6 = vsel %vm2357_vm7, %v5338_v14, %v5384_v11  ;;  %5424 = vst [vmem:[#allocation4 + $0x314] sm:$0xf] %v5386_v25  ;;  %v7794_v62 = vld [vmem:[#allocation4 + $0x290] sm:$0xf0]  ;;  %v7420_v55 = vor.u32 %v7781_v32, %v7417_v21 }
 0x7e0   : > { %6303 = vmatpush.bf16.msra.mxu0 %v7552_v13  ;;  %5423 = vst [vmem:[#allocation4 + $0x30c] sm:$0xff] %v5385_v6  ;;  %v7464_v14 = vor.u32 %v7794_v62, %v7463_v15  ;;  %v7439_v12 = vld [vmem:[#allocation4 + $0x258] sm:$0xf]  ;;  %v7778_v17 = vld [vmem:[#allocation4 + $0x214] sm:$0xf] }
 0x7e1   : > { %v5109_v39 = vsel %vm1364_vm1, %v5093_v30, %v5094_v7  ;;  %v5111_v28 = vsel %vm2083_vm6, %v5064_v34, %v5094_v7  ;;  %v7440_v13 = vor.u32 %v7788_v10, %v7439_v12  ;;  %v7408_v47 = vor.u32 %v7778_v17, %v7405_v31  ;;  %v7756_v34 = vld [vmem:[#allocation4 + $0x160] sm:$0xf0]  ;;  %v7303_v11 = vld [vmem:[#allocation4 + $0x140] sm:$0xf]  ;;  %v7819_v6 = vld [vmem:[#allocation4 + $0x358] sm:$0xf0] }
 0x7e2   : > { %6222 = vmatpush.bf16.msrb.mxu3 %v7488_v33  ;;  %v5110_v42 = vsel %vm2083_vm6, %v10655_v22, %v5109_v39  ;;  %5150 = vst [vmem:[#allocation4 + $0x248] sm:$0xf] %v5111_v28  ;;  %v7160_v33 = vor.u32 %v7717_v0, %v7159_v29  ;;  %v7753_v39 = vld [vmem:[#allocation4 + $0x148] sm:$0xf0]  ;;  %v7148_v28 = vor.u32 %v7714_v49, %v7147_v27  ;;  %v7750_v62 = vld [vmem:[#allocation4 + $0x130] sm:$0xf0] }
 0x7e3   : > { %6313 = vmatpush.bf16.msra.mxu1 %v7208_v4  ;;  %5149 = vst [vmem:[#allocation4 + $0x240] sm:$0xff] %v5110_v42  ;;  %6239 = vmatpush.bf16.msra.mxu2 %v7536_v2  ;;  %v5066_v56 = vpop.permute.xlu1 %5065  ;;  %v7316_v4 = vor.u32 %v7756_v34, %v7315_v61  ;;  %v7304_v2 = vor.u32 %v7753_v39, %v7303_v11  ;;  %v7772_v52 = vld [vmem:[#allocation4 + $0x1e4] sm:$0xf]  ;;  %v7291_v16 = vld [vmem:[#allocation4 + $0x128] sm:$0xf] }
 0x7e4   : > { %6304 = vmatpush.bf16.msra.mxu0 %v7540_v36  ;;  %v5095_v8 = vrot.slane %v5066_v56, 4  ;;  %v7567_v36 = vld [vmem:[#allocation4 + $0x350] sm:$0xf]  ;;  %v7516_v42 = vor.u32 %v7805_v3, %v7513_v40  ;;  %v7384_v15 = vor.u32 %v7772_v52, %v7381_v50  ;;  %v7799_v45 = vld [vmem:[#allocation4 + $0x2bc] sm:$0xf] }
 0x7e5   : > { %v7279_v37 = vld [vmem:[#allocation4 + $0x110] sm:$0xf]  ;;  %v7813_v32 = vld [vmem:[#allocation4 + $0x328] sm:$0xf0]  ;;  %v7357_v12 = vld [vmem:[#allocation4 + $0x1bc] sm:$0xf0] }
 0x7e6   : > { %6223 = vmatpush.bf16.msrb.mxu3 %v7476_v43  ;;  %v5112_v22 = vsel %vm1364_vm1, %v5095_v8, %v5096_v1  ;;  %v7759_v1 = vld [vmem:[#allocation4 + $0x178] sm:$0xf0]  ;;  %v7568_v43 = vor.u32 %v7819_v6, %v7567_v36  ;;  %v7555_v8 = vld [vmem:[#allocation4 + $0x338] sm:$0xf]  ;;  %v7477_v18 = vld [vmem:[#allocation4 + $0x2ac] sm:$0xf0] }
 0x7e7   : > { %6314 = vmatpush.bf16.msra.mxu1 %v7196_v44  ;;  %v5113_v24 = vsel %vm2083_vm6, %v5066_v56, %v5112_v22  ;;  %v7809_v41 = vld [vmem:[#allocation4 + $0x308] sm:$0xf0]  ;;  %v7525_v48 = vld [vmem:[#allocation4 + $0x30c] sm:$0xf0]  ;;  %v7328_v59 = vor.u32 %v7759_v1, %v7327_v26  ;;  %v7501_v56 = vld [vmem:[#allocation4 + $0x2dc] sm:$0xf0] }
 0x7e8   : > { %5151 = vst [vmem:[#allocation4 + $0x24c] sm:$0xff] %v5113_v24  ;;  %v7524_v51 = vor.u32 %v7809_v41, %v7523_v63  ;;  %v7528_v23 = vor.u32 %v7808_v46, %v7525_v48  ;;  %v10708_v44 = vld.sshfl [vmem:[#allocation1 + $0x18] sm:$0xff pattern:$0x73625140]  ;;  %v7816_v46 = vld [vmem:[#allocation4 + $0x340] sm:$0xf0] }
 0x7e9   : > { %v7802_v63 = vld [vmem:[#allocation4 + $0x2d4] sm:$0xf]  ;;  %v7369_v22 = vld [vmem:[#allocation4 + $0x1d4] sm:$0xf0]  ;;  %v7556_v21 = vor.u32 %v7816_v46, %v7555_v8  ;;  %v7489_v24 = vld [vmem:[#allocation4 + $0x2c4] sm:$0xf0] }
 0x7ea   : > { %6224 = vmatpush.bf16.msrb.mxu3 %v7464_v14  ;;  %6240 = vmatpush.bf16.msra.mxu2 %v7524_v51  ;;  %v7427_v30 = vld [vmem:[#allocation4 + $0x240] sm:$0xf]  ;;  %v7769_v14 = vld [vmem:[#allocation4 + $0x1cc] sm:$0xf]  ;;  %v7504_v9 = vor.u32 %v7802_v63, %v7501_v56  ;;  %v7747_v26 = vld [vmem:[#allocation4 + $0x118] sm:$0xf0] }
 0x7eb   : > { %6315 = vmatpush.bf16.msra.mxu1 %v7184_v35  ;;  %6305 = vmatpush.bf16.msra.mxu0 %v7528_v23  ;;  %v7292_v35 = vor.u32 %v7750_v62, %v7291_v16  ;;  %v7543_v41 = vld [vmem:[#allocation4 + $0x320] sm:$0xf]  ;;  %v7372_v48 = vor.u32 %v7769_v14, %v7369_v22  ;;  %v7766_v51 = vld [vmem:[#allocation4 + $0x1b4] sm:$0xf]  ;;  %v7280_v23 = vor.u32 %v7747_v26, %v7279_v37  ;;  %v7796_v29 = vld [vmem:[#allocation4 + $0x2a4] sm:$0xf] }
 0x7ec   : > { %v7810_v1 = vld [vmem:[#allocation4 + $0x310] sm:$0xf0]  ;;  %v7360_v10 = vor.u32 %v7766_v51, %v7357_v12  ;;  %v7531_v61 = vld [vmem:[#allocation4 + $0x308] sm:$0xf]  ;;  %v7255_v0 = vld [vmem:[#allocation4 + $0xe0] sm:$0xf] }
 0x7ed   : > { %7569 = vmatmul.msk.bf16.vlgmr.msra.gmra.mxu2 %vm3305_vm8, %v10702_v58  ;;  %v7345_v17 = vld [vmem:[#allocation4 + $0x1a4] sm:$0xf0]  ;;  %v7741_v34 = vld [vmem:[#allocation4 + $0xe8] sm:$0xf0]  ;;  %v7760_v49 = vld [vmem:[#allocation4 + $0x184] sm:$0xf] }
 0x7ee   : > { %6225 = vmatpush.bf16.msrb.mxu3 %v7452_v54  ;;  %6272 = vmatpush.bf16.msrb.mxu2 %v7420_v55  ;;  %v7492_v54 = vor.u32 %v7799_v45, %v7489_v24  ;;  %v7544_v55 = vor.u32 %v7813_v32, %v7543_v41  ;;  %v7256_v38 = vor.u32 %v7741_v34, %v7255_v0  ;;  %v7793_v60 = vld [vmem:[#allocation4 + $0x28c] sm:$0xf]  ;;  %v7243_v11 = vld [vmem:[#allocation4 + $0xc8] sm:$0xf]  ;;  %v7453_v3 = vld [vmem:[#allocation4 + $0x27c] sm:$0xf0] }
 0x7ef   : > { %6316 = vmatpush.bf16.msra.mxu1 %v7172_v19  ;;  %6324 = vmatpush.bf16.msrb.mxu0 %v7328_v59  ;;  %v7785_v7 = vld [vmem:[#allocation4 + $0x248] sm:$0xf0]  ;;  %v7267_v19 = vld [vmem:[#allocation4 + $0xf8] sm:$0xf]  ;;  %v7763_v59 = vld [vmem:[#allocation4 + $0x19c] sm:$0xf] }
 0x7f0   : > { %7570 = vmatmul.msk.bf16.vlgmr.msra.gmra.mxu0 %vm3305_vm8, %v10702_v58  ;;  %v7428_v25 = vor.u32 %v7785_v7, %v7427_v30  ;;  %v7333_v30 = vld [vmem:[#allocation4 + $0x18c] sm:$0xf0]  ;;  %v7738_v6 = vld [vmem:[#allocation4 + $0xd0] sm:$0xf0]  ;;  %v7411_v36 = vld [vmem:[#allocation4 + $0x218] sm:$0xf] }
 0x7f1   : > { %v7336_v40 = vor.u32 %v7760_v49, %v7333_v30  ;;  %v7244_v27 = vor.u32 %v7738_v6, %v7243_v11  ;;  %v7790_v39 = vld [vmem:[#allocation4 + $0x274] sm:$0xf]  ;;  %v7787_v50 = vld [vmem:[#allocation4 + $0x25c] sm:$0xf]  ;;  %v7777_v56 = vld [vmem:[#allocation4 + $0x208] sm:$0xf0] }
 0x7f2   : > { %6226 = vmatpush.bf16.msrb.mxu3 %v7440_v13  ;;  %6273 = vmatpush.bf16.msrb.mxu2 %v7408_v47  ;;  %v7480_v13 = vor.u32 %v7796_v29, %v7477_v18  ;;  %v7532_v47 = vor.u32 %v7810_v1, %v7531_v61  ;;  %v7429_v8 = vld [vmem:[#allocation4 + $0x24c] sm:$0xf0]  ;;  %v7807_v14 = vld [vmem:[#allocation4 + $0x2f8] sm:$0xf0]  ;;  %v7774_v46 = vld [vmem:[#allocation4 + $0x1f0] sm:$0xf0] }
 0x7f3   : > { %6317 = vmatpush.bf16.msra.mxu1 %v7160_v33  ;;  %6325 = vmatpush.bf16.msrb.mxu0 %v7316_v4  ;;  %v7465_v33 = vld [vmem:[#allocation4 + $0x294] sm:$0xf0]  ;;  %v7348_v4 = vor.u32 %v7763_v59, %v7345_v17  ;;  %v7519_v16 = vld [vmem:[#allocation4 + $0x2f0] sm:$0xf]  ;;  %v7771_v41 = vld [vmem:[#allocation4 + $0x1d8] sm:$0xf0] }
 0x7f4   : > { %v7468_v7 = vor.u32 %v7793_v60, %v7465_v33  ;;  %v7520_v22 = vor.u32 %v7807_v14, %v7519_v16  ;;  %v7375_v24 = vld [vmem:[#allocation4 + $0x1d0] sm:$0xf]  ;;  %v7801_v26 = vld [vmem:[#allocation4 + $0x2c8] sm:$0xf0]  ;;  %v7363_v45 = vld [vmem:[#allocation4 + $0x1b8] sm:$0xf] }
 0x7f5   : > { %v7376_v51 = vor.u32 %v7771_v41, %v7375_v24  ;;  %v7768_v32 = vld [vmem:[#allocation4 + $0x1c0] sm:$0xf0]  ;;  %v7351_v18 = vld [vmem:[#allocation4 + $0x1a0] sm:$0xf]  ;;  %v7765_v1 = vld [vmem:[#allocation4 + $0x1a8] sm:$0xf0] }
 0x7f6   : > { %6227 = vmatpush.bf16.msrb.mxu3 %v7428_v25  ;;  %6274 = vmatpush.bf16.msrb.mxu2 %v7396_v53  ;;  %v7423_v25 = vld [vmem:[#allocation4 + $0x230] sm:$0xf]  ;;  %v7783_v53 = vld [vmem:[#allocation4 + $0x238] sm:$0xf0]  ;;  %v7352_v59 = vor.u32 %v7765_v1, %v7351_v18  ;;  %v7339_v29 = vld [vmem:[#allocation4 + $0x188] sm:$0xf] }
 0x7f7   : > { %6318 = vmatpush.bf16.msra.mxu1 %v7148_v28  ;;  %6326 = vmatpush.bf16.msrb.mxu0 %v7304_v2  ;;  %v7424_v28 = vor.u32 %v7783_v53, %v7423_v25  ;;  %v7456_v2 = vor.u32 %v7790_v39, %v7453_v3  ;;  %v7762_v61 = vld [vmem:[#allocation4 + $0x190] sm:$0xf0]  ;;  %v7459_v0 = vld [vmem:[#allocation4 + $0x278] sm:$0xf]  ;;  %v7447_v33 = vld [vmem:[#allocation4 + $0x260] sm:$0xf] }
 0x7f8   : > { %v7435_v60 = vld [vmem:[#allocation4 + $0x248] sm:$0xf]  ;;  %v7786_v49 = vld [vmem:[#allocation4 + $0x250] sm:$0xf0] }
 0x7f9   : > { %6228 = vmatmul.bf16.vlgmr.msrb.gmra.mxu3 %v10708_v44  ;;  %v7436_v30 = vor.u32 %v7786_v49, %v7435_v60 }
 0x7fa   : > { %6285 = vmatpush.bf16.msra.mxu3 %v7516_v42  ;;  %6319 = vmatmul.bf16.vlgmr.msra.gmra.mxu1 %v10635_v20  ;;  %v7744_v20 = vld [vmem:[#allocation4 + $0x100] sm:$0xf0]  ;;  %v7441_v42 = vld [vmem:[#allocation4 + $0x264] sm:$0xf0] }
 0x7fb   : > { %6367 = vmatpush.bf16.msrb.mxu1 %v7568_v43  ;;  %6275 = vmatpush.bf16.msrb.mxu2 %v7384_v15  ;;  %v7268_v31 = vor.u32 %v7744_v20, %v7267_v19  ;;  %v7780_v43 = vld [vmem:[#allocation4 + $0x220] sm:$0xf0]  ;;  %v7444_v52 = vor.u32 %v7787_v50, %v7441_v42  ;;  %v7399_v15 = vld [vmem:[#allocation4 + $0x200] sm:$0xf]  ;;  %v7483_v20 = vld [vmem:[#allocation4 + $0x2a8] sm:$0xf] }
 0x7fc   : > { %6327 = vmatpush.bf16.msrb.mxu0 %v7292_v35  ;;  %v7412_v62 = vor.u32 %v7780_v43, %v7411_v36  ;;  %v7400_v35 = vor.u32 %v7777_v56, %v7399_v15  ;;  %v7471_v19 = vld [vmem:[#allocation4 + $0x290] sm:$0xf]  ;;  %v5587_v36 = vpop.permute.xlu0 %5586 }
 0x7fe   : > { %6286 = vmatpush.bf16.msra.mxu3 %v7504_v9  ;;  %v7387_v9 = vld [vmem:[#allocation4 + $0x1e8] sm:$0xf] }
 0x7ff   : > { %6368 = vmatpush.bf16.msrb.mxu1 %v7556_v21  ;;  %6276 = vmatpush.bf16.msrb.mxu2 %v7372_v48  ;;  %v7507_v21 = vld [vmem:[#allocation4 + $0x2d8] sm:$0xf]  ;;  %v7388_v37 = vor.u32 %v7774_v46, %v7387_v9 }
 0x800   : > { %6328 = vmatpush.bf16.msrb.mxu0 %v7280_v23  ;;  %v7495_v23 = vld [vmem:[#allocation4 + $0x2c0] sm:$0xf] }
 0x801   : > { %v7496_v12 = vor.u32 %v7801_v26, %v7495_v23 }
 0x802   : > { %6287 = vmatpush.bf16.msra.mxu3 %v7492_v54  ;;  %v7798_v54 = vld [vmem:[#allocation4 + $0x2b0] sm:$0xf0] }
 0x803   : > { %6369 = vmatpush.bf16.msrb.mxu1 %v7544_v55  ;;  %6277 = vmatpush.bf16.msrb.mxu2 %v7360_v10  ;;  %v7364_v55 = vor.u32 %v7768_v32, %v7363_v45  ;;  %v7484_v10 = vor.u32 %v7798_v54, %v7483_v20 }
 0x804   : > { %6329 = vmatpush.bf16.msrb.mxu0 %v7268_v31  ;;  %v7795_v31 = vld [vmem:[#allocation4 + $0x298] sm:$0xf0] }
 0x805   : > { %v7472_v17 = vor.u32 %v7795_v31, %v7471_v19 }
 0x806   : > { %6288 = vmatpush.bf16.msra.mxu3 %v7480_v13  ;;  %v7792_v13 = vld [vmem:[#allocation4 + $0x280] sm:$0xf0] }
 0x807   : > { %6370 = vmatpush.bf16.msrb.mxu1 %v7532_v47  ;;  %6278 = vmatpush.bf16.msrb.mxu2 %v7348_v4  ;;  %v7340_v47 = vor.u32 %v7762_v61, %v7339_v29  ;;  %v7460_v34 = vor.u32 %v7792_v13, %v7459_v0  ;;  %v7789_v4 = vld [vmem:[#allocation4 + $0x268] sm:$0xf0] }
 0x808   : > { %6330 = vmatpush.bf16.msrb.mxu0 %v7256_v38  ;;  %v7448_v38 = vor.u32 %v7789_v4, %v7447_v33 }
 0x80a   : > { %6289 = vmatpush.bf16.msra.mxu3 %v7468_v7  ;;  %7571 = vmatmul.msk.bf16.vlgmr.msrb.gmra.mxu1 %vm3305_vm8, %v10702_v58  ;;  %v7784_v58 = vld [vmem:[#allocation4 + $0x244] sm:$0xf] }
 0x80b   : > { %6279 = vmatpush.bf16.msrb.mxu2 %v7336_v40  ;;  %v7432_v63 = vor.u32 %v7784_v58, %v7429_v8 }
 0x80c   : > { %6331 = vmatpush.bf16.msrb.mxu0 %v7244_v27 }
 0x80e   : > { %6290 = vmatpush.bf16.msra.mxu3 %v7456_v2  ;;  %6280 = vmatmul.bf16.vlgmr.msrb.gmra.mxu2 %v10678_v57 }
 0x80f   : > { %6337 = vmatpush.bf16.msra.mxu2 %v7424_v28  ;;  %6332 = vmatmul.bf16.vlgmr.msrb.gmra.mxu0 %v10676_v5  ;;  %v7804_v5 = vld [vmem:[#allocation4 + $0x2e0] sm:$0xf0] }
 0x810   : > { %v7508_v48 = vor.u32 %v7804_v5, %v7507_v21 }
 0x812   : > { %6291 = vmatpush.bf16.msra.mxu3 %v7444_v52 }
 0x813   : > { %6338 = vmatpush.bf16.msra.mxu2 %v7412_v62 }
 0x816   : > { %6292 = vmatpush.bf16.msra.mxu3 %v7432_v63 }
 0x817   : > { %6339 = vmatpush.bf16.msra.mxu2 %v7400_v35 }
 0x819   : > { %6293 = vmatmul.bf16.vlgmr.msra.gmra.mxu3 %v10708_v44 }
 0x81a   : > { %6350 = vmatpush.bf16.msrb.mxu3 %v7520_v22 }
 0x81b   : > { %6340 = vmatpush.bf16.msra.mxu2 %v7388_v37 }
 0x81e   : > { %6351 = vmatpush.bf16.msrb.mxu3 %v7508_v48 }
 0x81f   : > { %6341 = vmatpush.bf16.msra.mxu2 %v7376_v51 }
 0x822   : > { %6352 = vmatpush.bf16.msrb.mxu3 %v7496_v12 }
 0x823   : > { %6342 = vmatpush.bf16.msra.mxu2 %v7364_v55 }
 0x826   : > { %6353 = vmatpush.bf16.msrb.mxu3 %v7484_v10 }
 0x827   : > { %6343 = vmatpush.bf16.msra.mxu2 %v7352_v59 }
 0x82a   : > { %6354 = vmatpush.bf16.msrb.mxu3 %v7472_v17 }
 0x82b   : > { %6344 = vmatpush.bf16.msra.mxu2 %v7340_v47 }
 0x82e   : > { %6355 = vmatpush.bf16.msrb.mxu3 %v7460_v34  ;;  %6345 = vmatmul.bf16.vlgmr.msra.gmra.mxu2 %v10678_v57 }
 0x832   : > { %6356 = vmatpush.bf16.msrb.mxu3 %v7448_v38 }
 0x836   : > { %6357 = vmatpush.bf16.msrb.mxu3 %v7436_v30  ;;  %v6255_v7 = vpop.f32.mrf.mxu0 }
 0x837   : > { %v6256_v41 = vadd.f32 %v6255_v7, %v5587_v36 }
 0x839   : > { %6358 = vmatmul.bf16.vlgmr.msrb.gmra.mxu3 %v10708_v44 }
 0x83c   : > { %v6190_v11 = vpop.f32.mrf.mxu2 }
 0x83d   : > { %v6191_v50 = vadd.f32 %v6190_v11, %v5587_v36 }
 0x83e   : > { %v6257_v25 = vpop.f32.mrf.mxu0 }
 0x844   : > { %v6192_v3 = vpop.f32.mrf.mxu2 }
 0x857   : > { %v6268_v40 = vpop.f32.mrf.mxu1 }
 0x858   : > { %v6269_v48 = vadd.f32 %v6268_v40, %v6256_v41 }
 0x85c   : > { %v6216_v6 = vpop.f32.mrf.mxu2  ;;  %v6203_v53 = vpop.f32.mrf.mxu3 }
 0x85d   : > { %v6204_v43 = vadd.f32 %v6203_v53, %v6191_v50 }
 0x85f   : > { %v6270_v27 = vpop.f32.mrf.mxu1  ;;  %v6217_v52 = vadd.f32 %v6216_v6, %v6204_v43 }
 0x864   : > { %v6218_v39 = vpop.f32.mrf.mxu2  ;;  %v6205_v28 = vpop.f32.mrf.mxu3 }
 0x86d   : > { %v6307_v2 = vpop.f32.mrf.mxu0 }
 0x870   : > { %v6242_v57 = vpop.f32.mrf.mxu2 }
 0x875   : > { %v6309_v42 = vpop.f32.mrf.mxu0 }
 0x877   : > { %v6320_v62 = vpop.f32.mrf.mxu1 }
 0x878   : > { %v6244_v56 = vpop.f32.mrf.mxu2  ;;  %v6321_v38 = vadd.f32 %v6320_v62, %v5587_v36 }
 0x87c   : > { %v6229_v44 = vpop.f32.mrf.mxu3 }
 0x87d   : > { %v6230_v8 = vadd.f32 %v6229_v44, %v6217_v52 }
 0x87f   : > { %v6243_v15 = vadd.f32 %v6242_v57, %v6230_v8  ;;  %v6322_v16 = vpop.f32.mrf.mxu1 }
 0x881   : > { %v6377_v14 = vsel %vm1364_vm1, %v6243_v15, -inf }
 0x882   : > { %v6378_v58 = vrot.slane %v6377_v14, 4 }
 0x884   : > { %v6379_v35 = vmax.f32 %v6377_v14, %v6378_v58  ;;  %v6231_v63 = vpop.f32.mrf.mxu3 }
 0x886   : > { %v6380_v46 = vrot.slane %v6379_v35, 2 }
 0x887   : > { %v6372_v45 = vpop.f32.mrf.mxu1 }
 0x888   : > { %v6381_v22 = vmax.f32 %v6379_v35, %v6380_v46 }
 0x88a   : > { %v6382_v21 = vrot.slane %v6381_v22, 1 }
 0x88c   : > { %v6333_v9 = vpop.f32.mrf.mxu0  ;;  %v6383_v5 = vmax.f32 %v6381_v22, %v6382_v21  ;;  %v6434_v21 = vld [vmem:[%s454_s22] sm:$0xff] }
 0x88d   : > { %v6334_v49 = vadd.f32 %v6333_v9, %v6321_v38 }
 0x88e   : > { %v6398_v26 = vsub.f32 %v6243_v15, %v6383_v5 }
 0x88f   : > { %v6374_v1 = vpop.f32.mrf.mxu1 }
 0x890   : > { %v6401_v12 = vmul.f32 1.442695, %v6398_v26  ;;  %v6435_v1 = vld [vmem:[%s454_s22 + $0x8] sm:$0xf] }
 0x891   : > { %v6281_v37 = vpop.f32.mrf.mxu2 }
 0x892   : > { %v6282_v23 = vadd.f32 %v6281_v37, %v6269_v48  ;;  %7859 = vpow2.f32 %v6401_v12 }
 0x894   : > { %v6335_v24 = vpop.f32.mrf.mxu0 }
 0x898   : > { %v7860_v31 = vpop.eup %7859 }
 0x899   : > { %v6283_v51 = vpop.f32.mrf.mxu2  ;;  %v6407_v61 = vsel %vm1364_vm1, %v7860_v31, 0.0 }
 0x89a   : > { %v6408_v47 = vrot.slane %v6407_v61, 4 }
 0x89c   : > { %v6294_v32 = vpop.f32.mrf.mxu3  ;;  %v6409_v4 = vadd.f32 %v6408_v47, %v6407_v61 }
 0x89d   : > { %v6295_v54 = vadd.f32 %v6294_v32, %v6282_v23 }
 0x89e   : > { %v6410_v60 = vrot.slane %v6409_v4, 2 }
 0x89f   : > { %v6308_v55 = vadd.f32 %v6307_v2, %v6295_v54 }
 0x8a0   : > { %v6411_v25 = vadd.f32 %v6410_v60, %v6409_v4 }
 0x8a1   : > { %v6384_v20 = vsel %vm1364_vm1, %v6308_v55, -inf }
 0x8a2   : > { %v6385_v18 = vrot.slane %v6384_v20, 4  ;;  %v6412_v28 = vrot.slane %v6411_v25, 1 }
 0x8a4   : > { %v6386_v10 = vmax.f32 %v6384_v20, %v6385_v18  ;;  %v6296_v19 = vpop.f32.mrf.mxu3  ;;  %v6413_v42 = vadd.f32 %v6412_v28, %v6411_v25 }
 0x8a6   : > { %v6387_v59 = vrot.slane %v6386_v10, 2 }
 0x8a8   : > { %v6388_v29 = vmax.f32 %v6386_v10, %v6387_v59 }
 0x8aa   : > { %v6389_v17 = vrot.slane %v6388_v29, 1 }
 0x8ac   : > { %v6390_v13 = vmax.f32 %v6388_v29, %v6389_v17 }
 0x8ae   : > { %v6399_v0 = vsub.f32 %v6308_v55, %v6390_v13 }
 0x8b0   : > { %v6403_v33 = vmul.f32 1.442695, %v6399_v0 }
 0x8b1   : > { %v6346_v34 = vpop.f32.mrf.mxu2 }
 0x8b2   : > { %7861 = vpow2.f32 %v6403_v33  ;;  %v6347_v11 = vadd.f32 %v6346_v34, %v6334_v49 }
 0x8b3   : > { %7863 = vrcp.f32 %v6413_v42 }
 0x8b8   : > { %v7862_v7 = vpop.eup %7861 }
 0x8b9   : > { %v6348_v30 = vpop.f32.mrf.mxu2  ;;  %v6414_v3 = vsel %vm1364_vm1, %v7862_v7, 0.0  ;;  %v7864_v14 = vpop.eup %7863 }
 0x8ba   : > { %v6415_v6 = vrot.slane %v6414_v3, 4  ;;  %v6431_v22 = vmul.f32 %v7864_v14, %v7860_v31 }
 0x8bc   : > { %v6359_v40 = vpop.f32.mrf.mxu3  ;;  %v6416_v27 = vadd.f32 %v6415_v6, %v6414_v3  ;;  %v6484_v3 = vlaneseq }
 0x8bd   : > { %v6360_v53 = vadd.f32 %v6359_v40, %v6347_v11 }
 0x8be   : > { %v6417_v2 = vrot.slane %v6416_v27, 2  ;;  %vm6486_vm15 = vcmp.lt.s32.totalorder %v6484_v3, 384 }
 0x8bf   : > { %v6373_v39 = vadd.f32 %v6372_v45, %v6360_v53 }
 0x8c0   : > { %v6418_v36 = vadd.f32 %v6417_v2, %v6416_v27 }
 0x8c1   : > { %v6391_v57 = vsel %vm1364_vm1, %v6373_v39, -inf }
 0x8c2   : > { %v6392_v50 = vrot.slane %v6391_v57, 4  ;;  %v6419_v52 = vrot.slane %v6418_v36, 1 }
 0x8c4   : > { %v6393_v43 = vmax.f32 %v6391_v57, %v6392_v50  ;;  %v6361_v62 = vpop.f32.mrf.mxu3  ;;  %v6420_v44 = vadd.f32 %v6419_v52, %v6418_v36 }
 0x8c6   : > { %v6394_v56 = vrot.slane %v6393_v43, 2  ;;  %7865 = vrcp.f32 %v6420_v44 }
 0x8c8   : > { %v6395_v8 = vmax.f32 %v6393_v43, %v6394_v56 }
 0x8ca   : > { %v6396_v15 = vrot.slane %v6395_v8, 1 }
 0x8cc   : > { %v6397_v16 = vmax.f32 %v6395_v8, %v6396_v15  ;;  %v7866_v35 = vpop.eup %7865 }
 0x8cd   : > { %v6432_v63 = vmul.f32 %v7866_v35, %v7862_v7 }
 0x8ce   : > { %v6400_v58 = vsub.f32 %v6373_v39, %v6397_v16 }
 0x8cf   : > { %v6438_v9 = vrot.slane %v6432_v63, 4 }
 0x8d0   : > { %v6405_v46 = vmul.f32 1.442695, %v6400_v58 }
 0x8d1   : > { %v6439_v37 = vsel %vm1364_vm1, %v6431_v22, %v6438_v9 }
 0x8d2   : > { %7867 = vpow2.f32 %v6405_v46  ;;  %v6441_v5 = vmul.f32 %v6439_v37, %v6434_v21 }
 0x8d4   : > { %6445 = vst [vmem:[#allocation1] ss:$2 sm:$0xff] %v6441_v5 }
 0x8d8   : > { %v7868_v24 = vpop.eup %7867 }
 0x8d9   : > { %v6421_v41 = vsel %vm1364_vm1, %v7868_v24, 0.0 }
 0x8da   : > { %v6422_v48 = vrot.slane %v6421_v41, 4 }
 0x8db   : > { %v6449_v12 = vld.sshfl [vmem:[#allocation1 + $0x8] sm:$0xff pattern:$0x75316420]  ;;  %v6448_v55 = vld.sshfl [vmem:[#allocation1] sm:$0xff pattern:$0x75316420] }
 0x8dc   : > { %v6423_v26 = vadd.f32 %v6422_v48, %v6421_v41  ;;  %v6461_v54 = vsel %vm1364_vm1, %v6449_v12, 0.0  ;;  %v6454_v19 = vsel %vm1364_vm1, %v6448_v55, 0.0 }
 0x8dd   : > { %v6462_v20 = vrot.slane %v6461_v54, 4  ;;  %v6455_v29 = vrot.slane %v6454_v19, 4 }
 0x8de   : > { %v6424_v51 = vrot.slane %v6423_v26, 2 }
 0x8df   : > { %v6463_v31 = vadd.f32 %v6462_v20, %v6461_v54  ;;  %v6456_v17 = vadd.f32 %v6455_v29, %v6454_v19 }
 0x8e0   : > { %v6425_v23 = vadd.f32 %v6424_v51, %v6423_v26 }
 0x8e1   : > { %v6464_v61 = vrot.slane %v6463_v31, 2  ;;  %v6457_v0 = vrot.slane %v6456_v17, 2 }
 0x8e2   : > { %v6426_v45 = vrot.slane %v6425_v23, 1 }
 0x8e3   : > { %v6465_v13 = vadd.f32 %v6464_v61, %v6463_v31  ;;  %v6458_v60 = vadd.f32 %v6457_v0, %v6456_v17 }
 0x8e4   : > { %v6427_v32 = vadd.f32 %v6426_v45, %v6425_v23 }
 0x8e5   : > { %v6466_v4 = vrot.slane %v6465_v13, 1  ;;  %v6459_v11 = vrot.slane %v6458_v60, 1 }
 0x8e6   : > { %7869 = vrcp.f32 %v6427_v32 }
 0x8e7   : > { %v6467_v30 = vadd.f32 %v6466_v4, %v6465_v13  ;;  %v6460_v53 = vadd.f32 %v6459_v11, %v6458_v60 }
 0x8e9   : > { %v6478_v40 = vrot.slane %v6467_v30, 7 }
 0x8eb   : > { %v6481_v39 = vsel %vm6480_vm14, %v6460_v53, %v6478_v40 }
 0x8ec   : > { %v7870_v18 = vpop.eup %7869 }
 0x8ed   : > { %v6433_v10 = vmul.f32 %v7870_v18, %v7868_v24 }
 0x8ef   : > { %v6442_v59 = vmul.f32 %v6435_v1, %v6433_v10 }
 0x8f1   : > { %6447 = vst [vmem:[#allocation1 + $0x10] ss:$2 sm:$0xff] %v6442_v59 }
 0x8f8   : > { %v6450_v47 = vld.sshfl [vmem:[#allocation1 + $0x10] sm:$0xff pattern:$0x75316420] }
 0x8f9   : > { %v6468_v34 = vsel %vm1364_vm1, %v6450_v47, 0.0 }
 0x8fa   : > { %v6469_v33 = vrot.slane %v6468_v34, 4 }
 0x8fc   : > { %v6470_v38 = vadd.f32 %v6469_v33, %v6468_v34 }
 0x8fe   : > { %v6471_v49 = vrot.slane %v6470_v38, 2 }
 0x900   : > { %v6472_v7 = vadd.f32 %v6471_v49, %v6470_v38 }
 0x902   : > { %v6473_v25 = vrot.slane %v6472_v7, 1 }
 0x904   : > { %v6474_v6 = vadd.f32 %v6473_v25, %v6472_v7 }
 0x906   : > { %v6479_v27 = vrot.slane %v6474_v6, 6 }
 0x908   : > { %v6482_v28 = vsel %vm616_vm0, %v6481_v39, %v6479_v27 }
 0x909   : > { %6488 = vst.msk [vmem:[%s458_s27] sm:$0x7] %vm6486_vm15, %v6482_v28 }
 0x90a PF: > { %s23_s25 = sadd.s32 1, %s7883_s25  }
 0x90b   : > { %p20_p4 = scmp.ge.s32.totalorder %s23_s25, 4  }
 0x90d   :  { %22 = sbr.rel (!%p20_p4) target bundleno = 1 (0x1), region = 107 }

</bundles_post_ra>
